<compile_context>
chip_gen: v6e
topology: v6e:2x2x1
jax: 0.10.0
libtpu: 0.0.40
codegen_flags: <defaults>
</compile_context>

<pallas_src>
import functools

import jax
import jax.numpy as jnp
from jax.experimental import pallas as pl
from jax.experimental.pallas import tpu as pltpu


LANE = 128  # all channel dimensions are zero-padded to the 128-lane width


# ----------------------------------------------------------------------------
# Fused Pallas kernel: the whole conv stack for one batch element.
# ----------------------------------------------------------------------------
def _make_fused_kernel(layer_dims, K, pad):
    """layer_dims: tuple of (Hin, Win, Hout, Wout) per layer (static)."""
    L = len(layer_dims)

    def kernel_fn(x_ref, *refs):
        # refs = w_0..w_{L-1}, scale_0.., shift_0.., out_ref, act_scratch, patch_scratch
        w_refs = refs[0:L]                     # each (K*K*LANE, LANE) bf16
        sc_refs = refs[L:2 * L]                # each (1, LANE) f32
        sh_refs = refs[2 * L:3 * L]            # each (1, LANE) f32
        out_ref = refs[3 * L]                  # (M_last, LANE) f32
        act_ref = refs[3 * L + 1]              # (Hs, Ws, LANE) f32 padded activation
        patch_ref = refs[3 * L + 2]            # (M_max, K*K*LANE) bf16 im2col buffer

        for li in range(L):
            Hin, Win, Hout, Wout = layer_dims[li]
            M = Hout * Wout

            # Source of this layer's (already spatially padded) input.
            src = x_ref if li == 0 else act_ref

            # im2col: copy the K*K shifted windows into the lane-aligned patch
            # buffer (each window occupies a full 128-lane column block).
            for kh in range(K):
                for kw in range(K):
                    c0 = (kh * K + kw) * LANE
                    p = src[kh:kh + Hout, kw:kw + Wout, :]          # (Hout, Wout, LANE) f32
                    patch_ref[0:M, c0:c0 + LANE] = (
                        p.reshape(M, LANE).astype(jnp.bfloat16))

            # One MXU matmul per layer: (M, K*K*128) @ (K*K*128, 128) -> f32.
            acc = jnp.dot(patch_ref[0:M, :], w_refs[li][...],
                          preferred_element_type=jnp.float32)

            # Fused BatchNorm (+ conv bias) and ReLU, in f32.
            y = acc * sc_refs[li][...] + sh_refs[li][...]
            y = jnp.maximum(y, 0.0)                                  # (M, LANE) f32

            if li == L - 1:
                out_ref[...] = y                                     # lane-dense store
            else:
                # Stage the padded activation for the next layer in VMEM.
                act_ref[...] = jnp.zeros(act_ref.shape, act_ref.dtype)
                act_ref[pad:pad + Hout, pad:pad + Wout, :] = (
                    y.reshape(Hout, Wout, LANE))

    return kernel_fn


# ----------------------------------------------------------------------------
# Parameter construction (deterministic, synthetic).
# ----------------------------------------------------------------------------
def init_base_params(key, enc_sizes, kernel):
    params = []
    eps = 1e-5
    for cin, cout in zip(enc_sizes, enc_sizes[1:]):
        key, kw_, kb_ = jax.random.split(key, 3)
        fan_in = cin * kernel * kernel
        bound = 1.0 / jnp.sqrt(fan_in)
        # Conv2d weights in HWIO layout (PyTorch OIHW transposed).
        w = jax.random.uniform(
            kw_, (kernel, kernel, cin, cout), jnp.float32, -bound, bound)
        b = jax.random.uniform(kb_, (cout,), jnp.float32, -bound, bound)
        # BatchNorm2d (eval mode) stats / affine, deterministic defaults.
        gamma = jnp.ones((cout,), jnp.float32)
        beta = jnp.zeros((cout,), jnp.float32)
        running_mean = jnp.zeros((cout,), jnp.float32)
        running_var = jnp.ones((cout,), jnp.float32)
        scale = gamma / jnp.sqrt(running_var + eps)
        shift = beta + (b - running_mean) * scale
        params.append({"w": w, "scale": scale, "shift": shift})
    return params


# ----------------------------------------------------------------------------
# Forward wrapper: one fused pallas_call for the whole stack.
# ----------------------------------------------------------------------------
@functools.partial(jax.jit, static_argnames=("pad",))
def base_forward(x_nchw, params, pad):
    """Forward of Base.  x_nchw: (N, C, H, W) f32 -> (N, C_out, H', W') f32."""
    N, C0, H, W = x_nchw.shape
    L = len(params)
    K = params[0]["w"].shape[0]

    # Static per-layer spatial sizes (stride=1, dilation=1).
    layer_dims = []
    couts = []
    h, w = H, W
    for layer in params:
        ho = h + 2 * pad - K + 1
        wo = w + 2 * pad - K + 1
        layer_dims.append((h, w, ho, wo))
        couts.append(layer["w"].shape[3])
        h, w = ho, wo
    Hl, Wl = layer_dims[-1][2], layer_dims[-1][3]
    C_last = couts[-1]
    M_out = Hl * Wl
    M_max = max(d[2] * d[3] for d in layer_dims)

    # NCHW -> NHWC, spatial pad and channel pad to 128 lanes in one XLA pad op.
    x = jnp.transpose(x_nchw, (0, 2, 3, 1))
    x = jnp.pad(x, ((0, 0), (pad, pad), (pad, pad), (0, LANE - C0)))
    x = x.astype(jnp.float32)
    Hp0, Wp0 = x.shape[1], x.shape[2]

    # Pad/reshape per-layer weights to the im2col layout (K*K*128, 128) in bf16;
    # scale/shift zero-padded to 128 and kept in f32.
    w2ds, scs, shs = [], [], []
    for layer in params:
        _, _, cin, cout = layer["w"].shape
        wp = jnp.pad(layer["w"],
                     ((0, 0), (0, 0), (0, LANE - cin), (0, LANE - cout)))
        w2ds.append(wp.reshape(K * K * LANE, LANE).astype(jnp.bfloat16))
        scs.append(jnp.pad(layer["scale"], (0, LANE - cout))
                   .reshape(1, LANE).astype(jnp.float32))
        shs.append(jnp.pad(layer["shift"], (0, LANE - cout))
                   .reshape(1, LANE).astype(jnp.float32))

    # VMEM scratch for the largest padded intermediate activation.
    if L > 1:
        Hs = max(layer_dims[i][0] + 2 * pad for i in range(1, L))
        Ws = max(layer_dims[i][1] + 2 * pad for i in range(1, L))
    else:
        Hs, Ws = 8, 8

    kernel_fn = _make_fused_kernel(tuple(layer_dims), K, pad)

    in_specs = [pl.BlockSpec((None, Hp0, Wp0, LANE), lambda n: (n, 0, 0, 0))]
    in_specs += [pl.BlockSpec((K * K * LANE, LANE), lambda n: (0, 0))
                 for _ in range(L)]
    in_specs += [pl.BlockSpec((1, LANE), lambda n: (0, 0))
                 for _ in range(2 * L)]

    out = pl.pallas_call(
        kernel_fn,
        out_shape=jax.ShapeDtypeStruct((N, M_out, LANE), jnp.float32),
        grid=(N,),
        in_specs=in_specs,
        out_specs=pl.BlockSpec((None, M_out, LANE), lambda n: (n, 0, 0)),
        scratch_shapes=[
            pltpu.VMEM((Hs, Ws, LANE), jnp.float32),           # padded activation
            pltpu.VMEM((M_max, K * K * LANE), jnp.bfloat16),   # im2col patches
        ],
        compiler_params=pltpu.CompilerParams(
            dimension_semantics=("parallel",)),
    )(x, *w2ds, *scs, *shs)

    # Lane-dense slab -> NCHW (cheap wrapper-side reshape/slice).
    out = out[:, :, :C_last].reshape(N, Hl, Wl, C_last)
    return jnp.transpose(out, (0, 3, 1, 2))


# ----------------------------------------------------------------------------
# Pure-JAX reference with the same bf16-operand / f32-accumulate math.
# ----------------------------------------------------------------------------
def base_forward_ref(x_nchw, params, pad):
    x = x_nchw
    for layer in params:
        w_oihw = jnp.transpose(layer["w"], (3, 2, 0, 1))
        y = jax.lax.conv_general_dilated(
            x.astype(jnp.bfloat16), w_oihw.astype(jnp.bfloat16),
            window_strides=(1, 1),
            padding=[(pad, pad), (pad, pad)],
            dimension_numbers=("NCHW", "OIHW", "NCHW"),
            preferred_element_type=jnp.float32,
        )
        y = (y * layer["scale"][None, :, None, None]
             + layer["shift"][None, :, None, None])
        x = jnp.maximum(y, 0.0)
    return x


if __name__ == "__main__":
    enc_sizes = [4, 8, 16]   # two conv blocks: 4->8, 8->16
    kernel = 3
    pad = 1

    key = jax.random.PRNGKey(0)
    key, kx = jax.random.split(key)
    x = jax.random.normal(kx, (2, 4, 16, 16), jnp.float32)  # NCHW

    params = init_base_params(key, enc_sizes, kernel)

    out = jax.block_until_ready(base_forward(x, params, pad))
    ref = base_forward_ref(x, params, pad)

    assert out.shape == (2, 16, 16, 16), out.shape
    max_err = float(jnp.max(jnp.abs(out - ref)))
    assert jnp.allclose(out, ref, atol=2e-2, rtol=2e-2), max_err

    print("KERNEL_OK")
</pallas_src>

<mosaic_0001>
module attributes {stable_mosaic.version = 11 : i64} {
  func.func @kernel_fn(%arg0: i32, %arg1: memref<1x18x18x128xf32, #tpu.memory_space<vmem>>, %arg2: memref<1152x128xbf16, #tpu.memory_space<vmem>>, %arg3: memref<1152x128xbf16, #tpu.memory_space<vmem>>, %arg4: memref<1x128xf32, #tpu.memory_space<vmem>>, %arg5: memref<1x128xf32, #tpu.memory_space<vmem>>, %arg6: memref<1x128xf32, #tpu.memory_space<vmem>>, %arg7: memref<1x128xf32, #tpu.memory_space<vmem>>, %arg8: memref<1x256x128xf32, #tpu.memory_space<vmem>>, %arg9: memref<18x18x128xf32, #tpu.memory_space<vmem>>, %arg10: memref<256x1152xbf16, #tpu.memory_space<vmem>>) attributes {dimension_semantics = [#tpu.dimension_semantics<parallel>], iteration_bounds = array<i64: 2>, scalar_prefetch = 0 : i64, scratch_operands = 2 : i64, tpu.core_type = #tpu.core_type<tc>, window_params = [{transform_indices = @transform_0, window_bounds = array<i64: 1, 18, 18, 128>}, {pipeline_mode = #tpu.pipeline_mode<synchronous>, transform_indices = @transform_1, window_bounds = array<i64: 1152, 128>}, {pipeline_mode = #tpu.pipeline_mode<synchronous>, transform_indices = @transform_2, window_bounds = array<i64: 1152, 128>}, {pipeline_mode = #tpu.pipeline_mode<synchronous>, transform_indices = @transform_3, window_bounds = array<i64: 1, 128>}, {pipeline_mode = #tpu.pipeline_mode<synchronous>, transform_indices = @transform_4, window_bounds = array<i64: 1, 128>}, {pipeline_mode = #tpu.pipeline_mode<synchronous>, transform_indices = @transform_5, window_bounds = array<i64: 1, 128>}, {pipeline_mode = #tpu.pipeline_mode<synchronous>, transform_indices = @transform_6, window_bounds = array<i64: 1, 128>}, {transform_indices = @transform_7, window_bounds = array<i64: 1, 256, 128>}]} {
    %c0 = arith.constant 0 : index
    %c0_0 = arith.constant 0 : index
    %c0_1 = arith.constant 0 : index
    %c0_2 = arith.constant 0 : index
    %0 = vector.load %arg1[%c0, %c0_0, %c0_1, %c0_2] : memref<1x18x18x128xf32, #tpu.memory_space<vmem>>, vector<1x16x16x128xf32>
    %1 = vector.shape_cast %0 : vector<1x16x16x128xf32> to vector<16x16x128xf32>
    %2 = vector.shape_cast %1 : vector<16x16x128xf32> to vector<256x128xf32>
    %3 = arith.truncf %2 : vector<256x128xf32> to vector<256x128xbf16>
    %c0_3 = arith.constant 0 : index
    %c0_4 = arith.constant 0 : index
    %4 = vector.load %arg10[%c0_3, %c0_4] : memref<256x1152xbf16, #tpu.memory_space<vmem>>, vector<256x128xbf16>
    tpu.vector_store %arg10[%c0_3, %c0_4], %3 {strides = array<i32>} : memref<256x1152xbf16, #tpu.memory_space<vmem>>, vector<256x128xbf16>,
    %c0_5 = arith.constant 0 : index
    %c0_6 = arith.constant 0 : index
    %c1 = arith.constant 1 : index
    %c0_7 = arith.constant 0 : index
    %5 = vector.load %arg1[%c0_5, %c0_6, %c1, %c0_7] : memref<1x18x18x128xf32, #tpu.memory_space<vmem>>, vector<1x16x16x128xf32>
    %6 = vector.shape_cast %5 : vector<1x16x16x128xf32> to vector<16x16x128xf32>
    %7 = vector.shape_cast %6 : vector<16x16x128xf32> to vector<256x128xf32>
    %8 = arith.truncf %7 : vector<256x128xf32> to vector<256x128xbf16>
    %c0_8 = arith.constant 0 : index
    %c128 = arith.constant 128 : index
    %9 = vector.load %arg10[%c0_8, %c128] : memref<256x1152xbf16, #tpu.memory_space<vmem>>, vector<256x128xbf16>
    tpu.vector_store %arg10[%c0_8, %c128], %8 {strides = array<i32>} : memref<256x1152xbf16, #tpu.memory_space<vmem>>, vector<256x128xbf16>,
    %c0_9 = arith.constant 0 : index
    %c0_10 = arith.constant 0 : index
    %c2 = arith.constant 2 : index
    %c0_11 = arith.constant 0 : index
    %10 = vector.load %arg1[%c0_9, %c0_10, %c2, %c0_11] : memref<1x18x18x128xf32, #tpu.memory_space<vmem>>, vector<1x16x16x128xf32>
    %11 = vector.shape_cast %10 : vector<1x16x16x128xf32> to vector<16x16x128xf32>
    %12 = vector.shape_cast %11 : vector<16x16x128xf32> to vector<256x128xf32>
    %13 = arith.truncf %12 : vector<256x128xf32> to vector<256x128xbf16>
    %c0_12 = arith.constant 0 : index
    %c256 = arith.constant 256 : index
    %14 = vector.load %arg10[%c0_12, %c256] : memref<256x1152xbf16, #tpu.memory_space<vmem>>, vector<256x128xbf16>
    tpu.vector_store %arg10[%c0_12, %c256], %13 {strides = array<i32>} : memref<256x1152xbf16, #tpu.memory_space<vmem>>, vector<256x128xbf16>,
    %c0_13 = arith.constant 0 : index
    %c1_14 = arith.constant 1 : index
    %c0_15 = arith.constant 0 : index
    %c0_16 = arith.constant 0 : index
    %15 = vector.load %arg1[%c0_13, %c1_14, %c0_15, %c0_16] : memref<1x18x18x128xf32, #tpu.memory_space<vmem>>, vector<1x16x16x128xf32>
    %16 = vector.shape_cast %15 : vector<1x16x16x128xf32> to vector<16x16x128xf32>
    %17 = vector.shape_cast %16 : vector<16x16x128xf32> to vector<256x128xf32>
    %18 = arith.truncf %17 : vector<256x128xf32> to vector<256x128xbf16>
    %c0_17 = arith.constant 0 : index
    %c384 = arith.constant 384 : index
    %19 = vector.load %arg10[%c0_17, %c384] : memref<256x1152xbf16, #tpu.memory_space<vmem>>, vector<256x128xbf16>
    tpu.vector_store %arg10[%c0_17, %c384], %18 {strides = array<i32>} : memref<256x1152xbf16, #tpu.memory_space<vmem>>, vector<256x128xbf16>,
    %c0_18 = arith.constant 0 : index
    %c1_19 = arith.constant 1 : index
    %c1_20 = arith.constant 1 : index
    %c0_21 = arith.constant 0 : index
    %20 = vector.load %arg1[%c0_18, %c1_19, %c1_20, %c0_21] : memref<1x18x18x128xf32, #tpu.memory_space<vmem>>, vector<1x16x16x128xf32>
    %21 = vector.shape_cast %20 : vector<1x16x16x128xf32> to vector<16x16x128xf32>
    %22 = vector.shape_cast %21 : vector<16x16x128xf32> to vector<256x128xf32>
    %23 = arith.truncf %22 : vector<256x128xf32> to vector<256x128xbf16>
    %c0_22 = arith.constant 0 : index
    %c512 = arith.constant 512 : index
    %24 = vector.load %arg10[%c0_22, %c512] : memref<256x1152xbf16, #tpu.memory_space<vmem>>, vector<256x128xbf16>
    tpu.vector_store %arg10[%c0_22, %c512], %23 {strides = array<i32>} : memref<256x1152xbf16, #tpu.memory_space<vmem>>, vector<256x128xbf16>,
    %c0_23 = arith.constant 0 : index
    %c1_24 = arith.constant 1 : index
    %c2_25 = arith.constant 2 : index
    %c0_26 = arith.constant 0 : index
    %25 = vector.load %arg1[%c0_23, %c1_24, %c2_25, %c0_26] : memref<1x18x18x128xf32, #tpu.memory_space<vmem>>, vector<1x16x16x128xf32>
    %26 = vector.shape_cast %25 : vector<1x16x16x128xf32> to vector<16x16x128xf32>
    %27 = vector.shape_cast %26 : vector<16x16x128xf32> to vector<256x128xf32>
    %28 = arith.truncf %27 : vector<256x128xf32> to vector<256x128xbf16>
    %c0_27 = arith.constant 0 : index
    %c640 = arith.constant 640 : index
    %29 = vector.load %arg10[%c0_27, %c640] : memref<256x1152xbf16, #tpu.memory_space<vmem>>, vector<256x128xbf16>
    tpu.vector_store %arg10[%c0_27, %c640], %28 {strides = array<i32>} : memref<256x1152xbf16, #tpu.memory_space<vmem>>, vector<256x128xbf16>,
    %c0_28 = arith.constant 0 : index
    %c2_29 = arith.constant 2 : index
    %c0_30 = arith.constant 0 : index
    %c0_31 = arith.constant 0 : index
    %30 = vector.load %arg1[%c0_28, %c2_29, %c0_30, %c0_31] : memref<1x18x18x128xf32, #tpu.memory_space<vmem>>, vector<1x16x16x128xf32>
    %31 = vector.shape_cast %30 : vector<1x16x16x128xf32> to vector<16x16x128xf32>
    %32 = vector.shape_cast %31 : vector<16x16x128xf32> to vector<256x128xf32>
    %33 = arith.truncf %32 : vector<256x128xf32> to vector<256x128xbf16>
    %c0_32 = arith.constant 0 : index
    %c768 = arith.constant 768 : index
    %34 = vector.load %arg10[%c0_32, %c768] : memref<256x1152xbf16, #tpu.memory_space<vmem>>, vector<256x128xbf16>
    tpu.vector_store %arg10[%c0_32, %c768], %33 {strides = array<i32>} : memref<256x1152xbf16, #tpu.memory_space<vmem>>, vector<256x128xbf16>,
    %c0_33 = arith.constant 0 : index
    %c2_34 = arith.constant 2 : index
    %c1_35 = arith.constant 1 : index
    %c0_36 = arith.constant 0 : index
    %35 = vector.load %arg1[%c0_33, %c2_34, %c1_35, %c0_36] : memref<1x18x18x128xf32, #tpu.memory_space<vmem>>, vector<1x16x16x128xf32>
    %36 = vector.shape_cast %35 : vector<1x16x16x128xf32> to vector<16x16x128xf32>
    %37 = vector.shape_cast %36 : vector<16x16x128xf32> to vector<256x128xf32>
    %38 = arith.truncf %37 : vector<256x128xf32> to vector<256x128xbf16>
    %c0_37 = arith.constant 0 : index
    %c896 = arith.constant 896 : index
    %39 = vector.load %arg10[%c0_37, %c896] : memref<256x1152xbf16, #tpu.memory_space<vmem>>, vector<256x128xbf16>
    tpu.vector_store %arg10[%c0_37, %c896], %38 {strides = array<i32>} : memref<256x1152xbf16, #tpu.memory_space<vmem>>, vector<256x128xbf16>,
    %c0_38 = arith.constant 0 : index
    %c2_39 = arith.constant 2 : index
    %c2_40 = arith.constant 2 : index
    %c0_41 = arith.constant 0 : index
    %40 = vector.load %arg1[%c0_38, %c2_39, %c2_40, %c0_41] : memref<1x18x18x128xf32, #tpu.memory_space<vmem>>, vector<1x16x16x128xf32>
    %41 = vector.shape_cast %40 : vector<1x16x16x128xf32> to vector<16x16x128xf32>
    %42 = vector.shape_cast %41 : vector<16x16x128xf32> to vector<256x128xf32>
    %43 = arith.truncf %42 : vector<256x128xf32> to vector<256x128xbf16>
    %c0_42 = arith.constant 0 : index
    %c1024 = arith.constant 1024 : index
    %44 = vector.load %arg10[%c0_42, %c1024] : memref<256x1152xbf16, #tpu.memory_space<vmem>>, vector<256x128xbf16>
    tpu.vector_store %arg10[%c0_42, %c1024], %43 {strides = array<i32>} : memref<256x1152xbf16, #tpu.memory_space<vmem>>, vector<256x128xbf16>,
    %c0_43 = arith.constant 0 : index
    %c0_44 = arith.constant 0 : index
    %45 = vector.load %arg10[%c0_43, %c0_44] : memref<256x1152xbf16, #tpu.memory_space<vmem>>, vector<256x1152xbf16>
    %c0_45 = arith.constant 0 : index
    %c0_46 = arith.constant 0 : index
    %46 = vector.load %arg2[%c0_45, %c0_46] : memref<1152x128xbf16, #tpu.memory_space<vmem>>, vector<1152x128xbf16>
    %cst = arith.constant dense<0.000000e+00> : vector<256x128xf32>
    %47 = tpu.matmul %45, %46, %cst {dimension_numbers = #tpu.dot_dimension_numbers<[1], [0], [0], [1], [0, 0, 1, 1], [], []>} : vector<256x1152xbf16>, vector<1152x128xbf16>, vector<256x128xf32> -> vector<256x128xf32>
    %c0_47 = arith.constant 0 : index
    %c0_48 = arith.constant 0 : index
    %48 = vector.load %arg4[%c0_47, %c0_48] : memref<1x128xf32, #tpu.memory_space<vmem>>, vector<1x128xf32>
    %49 = vector.broadcast %48 : vector<1x128xf32> to vector<256x128xf32>
    %50 = arith.mulf %47, %49 : vector<256x128xf32>
    %c0_49 = arith.constant 0 : index
    %c0_50 = arith.constant 0 : index
    %51 = vector.load %arg6[%c0_49, %c0_50] : memref<1x128xf32, #tpu.memory_space<vmem>>, vector<1x128xf32>
    %52 = vector.broadcast %51 : vector<1x128xf32> to vector<256x128xf32>
    %53 = arith.addf %50, %52 : vector<256x128xf32>
    %cst_51 = arith.constant 0.000000e+00 : f32
    %54 = vector.broadcast %cst_51 : f32 to vector<256x128xf32>
    %55 = arith.maximumf %53, %54 : vector<256x128xf32>
    %cst_52 = arith.constant 0.000000e+00 : f32
    %56 = vector.broadcast %cst_52 : f32 to vector<18x18x128xf32>
    %c0_53 = arith.constant 0 : index
    %c0_54 = arith.constant 0 : index
    %c0_55 = arith.constant 0 : index
    %57 = vector.load %arg9[%c0_53, %c0_54, %c0_55] : memref<18x18x128xf32, #tpu.memory_space<vmem>>, vector<18x18x128xf32>
    tpu.vector_store %arg9[%c0_53, %c0_54, %c0_55], %56 {strides = array<i32>} : memref<18x18x128xf32, #tpu.memory_space<vmem>>, vector<18x18x128xf32>,
    %58 = vector.shape_cast %55 : vector<256x128xf32> to vector<16x16x128xf32>
    %c1_56 = arith.constant 1 : index
    %c1_57 = arith.constant 1 : index
    %c0_58 = arith.constant 0 : index
    %59 = vector.load %arg9[%c1_56, %c1_57, %c0_58] : memref<18x18x128xf32, #tpu.memory_space<vmem>>, vector<16x16x128xf32>
    tpu.vector_store %arg9[%c1_56, %c1_57, %c0_58], %58 {strides = array<i32>} : memref<18x18x128xf32, #tpu.memory_space<vmem>>, vector<16x16x128xf32>,
    %c0_59 = arith.constant 0 : index
    %c0_60 = arith.constant 0 : index
    %c0_61 = arith.constant 0 : index
    %60 = vector.load %arg9[%c0_59, %c0_60, %c0_61] : memref<18x18x128xf32, #tpu.memory_space<vmem>>, vector<16x16x128xf32>
    %61 = vector.shape_cast %60 : vector<16x16x128xf32> to vector<256x128xf32>
    %62 = arith.truncf %61 : vector<256x128xf32> to vector<256x128xbf16>
    %c0_62 = arith.constant 0 : index
    %c0_63 = arith.constant 0 : index
    %63 = vector.load %arg10[%c0_62, %c0_63] : memref<256x1152xbf16, #tpu.memory_space<vmem>>, vector<256x128xbf16>
    tpu.vector_store %arg10[%c0_62, %c0_63], %62 {strides = array<i32>} : memref<256x1152xbf16, #tpu.memory_space<vmem>>, vector<256x128xbf16>,
    %c0_64 = arith.constant 0 : index
    %c1_65 = arith.constant 1 : index
    %c0_66 = arith.constant 0 : index
    %64 = vector.load %arg9[%c0_64, %c1_65, %c0_66] : memref<18x18x128xf32, #tpu.memory_space<vmem>>, vector<16x16x128xf32>
    %65 = vector.shape_cast %64 : vector<16x16x128xf32> to vector<256x128xf32>
    %66 = arith.truncf %65 : vector<256x128xf32> to vector<256x128xbf16>
    %c0_67 = arith.constant 0 : index
    %c128_68 = arith.constant 128 : index
    %67 = vector.load %arg10[%c0_67, %c128_68] : memref<256x1152xbf16, #tpu.memory_space<vmem>>, vector<256x128xbf16>
    tpu.vector_store %arg10[%c0_67, %c128_68], %66 {strides = array<i32>} : memref<256x1152xbf16, #tpu.memory_space<vmem>>, vector<256x128xbf16>,
    %c0_69 = arith.constant 0 : index
    %c2_70 = arith.constant 2 : index
    %c0_71 = arith.constant 0 : index
    %68 = vector.load %arg9[%c0_69, %c2_70, %c0_71] : memref<18x18x128xf32, #tpu.memory_space<vmem>>, vector<16x16x128xf32>
    %69 = vector.shape_cast %68 : vector<16x16x128xf32> to vector<256x128xf32>
    %70 = arith.truncf %69 : vector<256x128xf32> to vector<256x128xbf16>
    %c0_72 = arith.constant 0 : index
    %c256_73 = arith.constant 256 : index
    %71 = vector.load %arg10[%c0_72, %c256_73] : memref<256x1152xbf16, #tpu.memory_space<vmem>>, vector<256x128xbf16>
    tpu.vector_store %arg10[%c0_72, %c256_73], %70 {strides = array<i32>} : memref<256x1152xbf16, #tpu.memory_space<vmem>>, vector<256x128xbf16>,
    %c1_74 = arith.constant 1 : index
    %c0_75 = arith.constant 0 : index
    %c0_76 = arith.constant 0 : index
    %72 = vector.load %arg9[%c1_74, %c0_75, %c0_76] : memref<18x18x128xf32, #tpu.memory_space<vmem>>, vector<16x16x128xf32>
    %73 = vector.shape_cast %72 : vector<16x16x128xf32> to vector<256x128xf32>
    %74 = arith.truncf %73 : vector<256x128xf32> to vector<256x128xbf16>
    %c0_77 = arith.constant 0 : index
    %c384_78 = arith.constant 384 : index
    %75 = vector.load %arg10[%c0_77, %c384_78] : memref<256x1152xbf16, #tpu.memory_space<vmem>>, vector<256x128xbf16>
    tpu.vector_store %arg10[%c0_77, %c384_78], %74 {strides = array<i32>} : memref<256x1152xbf16, #tpu.memory_space<vmem>>, vector<256x128xbf16>,
    %c1_79 = arith.constant 1 : index
    %c1_80 = arith.constant 1 : index
    %c0_81 = arith.constant 0 : index
    %76 = vector.load %arg9[%c1_79, %c1_80, %c0_81] : memref<18x18x128xf32, #tpu.memory_space<vmem>>, vector<16x16x128xf32>
    %77 = vector.shape_cast %76 : vector<16x16x128xf32> to vector<256x128xf32>
    %78 = arith.truncf %77 : vector<256x128xf32> to vector<256x128xbf16>
    %c0_82 = arith.constant 0 : index
    %c512_83 = arith.constant 512 : index
    %79 = vector.load %arg10[%c0_82, %c512_83] : memref<256x1152xbf16, #tpu.memory_space<vmem>>, vector<256x128xbf16>
    tpu.vector_store %arg10[%c0_82, %c512_83], %78 {strides = array<i32>} : memref<256x1152xbf16, #tpu.memory_space<vmem>>, vector<256x128xbf16>,
    %c1_84 = arith.constant 1 : index
    %c2_85 = arith.constant 2 : index
    %c0_86 = arith.constant 0 : index
    %80 = vector.load %arg9[%c1_84, %c2_85, %c0_86] : memref<18x18x128xf32, #tpu.memory_space<vmem>>, vector<16x16x128xf32>
    %81 = vector.shape_cast %80 : vector<16x16x128xf32> to vector<256x128xf32>
    %82 = arith.truncf %81 : vector<256x128xf32> to vector<256x128xbf16>
    %c0_87 = arith.constant 0 : index
    %c640_88 = arith.constant 640 : index
    %83 = vector.load %arg10[%c0_87, %c640_88] : memref<256x1152xbf16, #tpu.memory_space<vmem>>, vector<256x128xbf16>
    tpu.vector_store %arg10[%c0_87, %c640_88], %82 {strides = array<i32>} : memref<256x1152xbf16, #tpu.memory_space<vmem>>, vector<256x128xbf16>,
    %c2_89 = arith.constant 2 : index
    %c0_90 = arith.constant 0 : index
    %c0_91 = arith.constant 0 : index
    %84 = vector.load %arg9[%c2_89, %c0_90, %c0_91] : memref<18x18x128xf32, #tpu.memory_space<vmem>>, vector<16x16x128xf32>
    %85 = vector.shape_cast %84 : vector<16x16x128xf32> to vector<256x128xf32>
    %86 = arith.truncf %85 : vector<256x128xf32> to vector<256x128xbf16>
    %c0_92 = arith.constant 0 : index
    %c768_93 = arith.constant 768 : index
    %87 = vector.load %arg10[%c0_92, %c768_93] : memref<256x1152xbf16, #tpu.memory_space<vmem>>, vector<256x128xbf16>
    tpu.vector_store %arg10[%c0_92, %c768_93], %86 {strides = array<i32>} : memref<256x1152xbf16, #tpu.memory_space<vmem>>, vector<256x128xbf16>,
    %c2_94 = arith.constant 2 : index
    %c1_95 = arith.constant 1 : index
    %c0_96 = arith.constant 0 : index
    %88 = vector.load %arg9[%c2_94, %c1_95, %c0_96] : memref<18x18x128xf32, #tpu.memory_space<vmem>>, vector<16x16x128xf32>
    %89 = vector.shape_cast %88 : vector<16x16x128xf32> to vector<256x128xf32>
    %90 = arith.truncf %89 : vector<256x128xf32> to vector<256x128xbf16>
    %c0_97 = arith.constant 0 : index
    %c896_98 = arith.constant 896 : index
    %91 = vector.load %arg10[%c0_97, %c896_98] : memref<256x1152xbf16, #tpu.memory_space<vmem>>, vector<256x128xbf16>
    tpu.vector_store %arg10[%c0_97, %c896_98], %90 {strides = array<i32>} : memref<256x1152xbf16, #tpu.memory_space<vmem>>, vector<256x128xbf16>,
    %c2_99 = arith.constant 2 : index
    %c2_100 = arith.constant 2 : index
    %c0_101 = arith.constant 0 : index
    %92 = vector.load %arg9[%c2_99, %c2_100, %c0_101] : memref<18x18x128xf32, #tpu.memory_space<vmem>>, vector<16x16x128xf32>
    %93 = vector.shape_cast %92 : vector<16x16x128xf32> to vector<256x128xf32>
    %94 = arith.truncf %93 : vector<256x128xf32> to vector<256x128xbf16>
    %c0_102 = arith.constant 0 : index
    %c1024_103 = arith.constant 1024 : index
    %95 = vector.load %arg10[%c0_102, %c1024_103] : memref<256x1152xbf16, #tpu.memory_space<vmem>>, vector<256x128xbf16>
    tpu.vector_store %arg10[%c0_102, %c1024_103], %94 {strides = array<i32>} : memref<256x1152xbf16, #tpu.memory_space<vmem>>, vector<256x128xbf16>,
    %c0_104 = arith.constant 0 : index
    %c0_105 = arith.constant 0 : index
    %96 = vector.load %arg10[%c0_104, %c0_105] : memref<256x1152xbf16, #tpu.memory_space<vmem>>, vector<256x1152xbf16>
    %c0_106 = arith.constant 0 : index
    %c0_107 = arith.constant 0 : index
    %97 = vector.load %arg3[%c0_106, %c0_107] : memref<1152x128xbf16, #tpu.memory_space<vmem>>, vector<1152x128xbf16>
    %cst_108 = arith.constant dense<0.000000e+00> : vector<256x128xf32>
    %98 = tpu.matmul %96, %97, %cst_108 {dimension_numbers = #tpu.dot_dimension_numbers<[1], [0], [0], [1], [0, 0, 1, 1], [], []>} : vector<256x1152xbf16>, vector<1152x128xbf16>, vector<256x128xf32> -> vector<256x128xf32>
    %c0_109 = arith.constant 0 : index
    %c0_110 = arith.constant 0 : index
    %99 = vector.load %arg5[%c0_109, %c0_110] : memref<1x128xf32, #tpu.memory_space<vmem>>, vector<1x128xf32>
    %100 = vector.broadcast %99 : vector<1x128xf32> to vector<256x128xf32>
    %101 = arith.mulf %98, %100 : vector<256x128xf32>
    %c0_111 = arith.constant 0 : index
    %c0_112 = arith.constant 0 : index
    %102 = vector.load %arg7[%c0_111, %c0_112] : memref<1x128xf32, #tpu.memory_space<vmem>>, vector<1x128xf32>
    %103 = vector.broadcast %102 : vector<1x128xf32> to vector<256x128xf32>
    %104 = arith.addf %101, %103 : vector<256x128xf32>
    %cst_113 = arith.constant 0.000000e+00 : f32
    %105 = vector.broadcast %cst_113 : f32 to vector<256x128xf32>
    %106 = arith.maximumf %104, %105 : vector<256x128xf32>
    %c0_114 = arith.constant 0 : index
    %c0_115 = arith.constant 0 : index
    %c0_116 = arith.constant 0 : index
    %107 = vector.load %arg8[%c0_114, %c0_115, %c0_116] : memref<1x256x128xf32, #tpu.memory_space<vmem>>, vector<1x256x128xf32>
    %108 = vector.shape_cast %107 : vector<1x256x128xf32> to vector<256x128xf32>
    %109 = vector.shape_cast %106 : vector<256x128xf32> to vector<1x256x128xf32>
    tpu.vector_store %arg8[%c0_114, %c0_115, %c0_116], %109 {strides = array<i32>} : memref<1x256x128xf32, #tpu.memory_space<vmem>>, vector<1x256x128xf32>,
    return
  }
  func.func @transform_0(%arg0: i32) -> (i32, i32, i32, i32) {
    %c0_i32 = arith.constant 0 : i32
    %c0_i32_0 = arith.constant 0 : i32
    %c0_i32_1 = arith.constant 0 : i32
    %c0_i32_2 = arith.constant 0 : i32
    return %arg0, %c0_i32, %c0_i32_0, %c0_i32_1 : i32, i32, i32, i32
  }
  func.func @transform_1(%arg0: i32) -> (i32, i32) {
    %c0_i32 = arith.constant 0 : i32
    %c0_i32_0 = arith.constant 0 : i32
    %c0_i32_1 = arith.constant 0 : i32
    return %c0_i32, %c0_i32_0 : i32, i32
  }
  func.func @transform_2(%arg0: i32) -> (i32, i32) {
    %c0_i32 = arith.constant 0 : i32
    %c0_i32_0 = arith.constant 0 : i32
    %c0_i32_1 = arith.constant 0 : i32
    return %c0_i32, %c0_i32_0 : i32, i32
  }
  func.func @transform_3(%arg0: i32) -> (i32, i32) {
    %c0_i32 = arith.constant 0 : i32
    %c0_i32_0 = arith.constant 0 : i32
    %c0_i32_1 = arith.constant 0 : i32
    return %c0_i32, %c0_i32_0 : i32, i32
  }
  func.func @transform_4(%arg0: i32) -> (i32, i32) {
    %c0_i32 = arith.constant 0 : i32
    %c0_i32_0 = arith.constant 0 : i32
    %c0_i32_1 = arith.constant 0 : i32
    return %c0_i32, %c0_i32_0 : i32, i32
  }
  func.func @transform_5(%arg0: i32) -> (i32, i32) {
    %c0_i32 = arith.constant 0 : i32
    %c0_i32_0 = arith.constant 0 : i32
    %c0_i32_1 = arith.constant 0 : i32
    return %c0_i32, %c0_i32_0 : i32, i32
  }
  func.func @transform_6(%arg0: i32) -> (i32, i32) {
    %c0_i32 = arith.constant 0 : i32
    %c0_i32_0 = arith.constant 0 : i32
    %c0_i32_1 = arith.constant 0 : i32
    return %c0_i32, %c0_i32_0 : i32, i32
  }
  func.func @transform_7(%arg0: i32) -> (i32, i32, i32) {
    %c0_i32 = arith.constant 0 : i32
    %c0_i32_0 = arith.constant 0 : i32
    %c0_i32_1 = arith.constant 0 : i32
    return %arg0, %c0_i32, %c0_i32_0 : i32, i32, i32
  }
}

</mosaic_0001>

<bundles_post_ra>
// kernel: base_forward.1
= control target key start
LH: loop header
LB: loop body
LE: loop exit
PB: predicated region body
PF: predicated region fallthrough
CT: control target
= control target key end

     0   :  { %s12128_s24 = smov 0   ;;  %s14108_s0 = inlined_call_operand.vmem [shape: f32[2,18,18,128], index: 0, kind: input, shape index: {}]   ;;  %s14109_s1 = inlined_call_operand.vmem [shape: bf16[1152,128], index: 1, kind: input, shape index: {}]   ;;  %s14110_s2 = inlined_call_operand.vmem [shape: bf16[1152,128], index: 2, kind: input, shape index: {}]   ;;  %s14111_s3 = inlined_call_operand.vmem [shape: f32[1,128], index: 3, kind: input, shape index: {}]   ;;  %s14112_s4 = inlined_call_operand.vmem [shape: f32[1,128], index: 4, kind: input, shape index: {}]   ;;  %s14113_s5 = inlined_call_operand.vmem [shape: f32[1,128], index: 5, kind: input, shape index: {}]   ;;  %s14114_s6 = inlined_call_operand.vmem [shape: f32[1,128], index: 6, kind: input, shape index: {}]   ;;  %s14115_s7 = inlined_call_operand.vmem [shape: f32[2,256,128], index: 7, kind: output, shape index: {}]  }
   0x1 LB: > { %s8687_s25 = sadd.s32 4294967295, %s12084_s24   ;;  %p8691_p0 = scmp.ge.s32.totalorder %s12084_s24, 1  ;;  %s12084_s24 = sphi %s12128_s24, %s17_s24  }
   0x2   : > { %p237_p1 = scmp.lt.s32.totalorder %s12084_s24, 3 }
   0x4   : > { %p238_p2 = pnand %p8691_p0, %p237_p1 }
   0x6   : > { %241 = sbr.rel (%p238_p2) target bundleno = 1090 (0x442), region = 48 }
   0xb   : > { %v11528_v0 = vld [vmem:[%s14109_s1 + $0x78] sm:$0xff]   ;;  %v12086_v3 = vmov 0.0   ;;  %v11532_v5 = vld [vmem:[%s14109_s1 + $0x70] sm:$0xff]   ;;  %v11536_v9 = vld [vmem:[%s14109_s1 + $0x68] sm:$0xff]   ;;  %p269_p3 = scmp.lt.s32.totalorder %s8687_s25, 1 }
   0xc   : > { %v11529_v1 = vld [vmem:[%s14109_s1 + $0xf8] sm:$0xff]   ;;  %10478 = vmatprep.subr.bf16.mxu0 %v11528_v0  ;;  %4397 = vst [vmem:[#allocation2] sm:$0xff] %v12086_v3  ;;  %4398 = vst [vmem:[#allocation2 + $0x8] sm:$0xff] %v12086_v3  ;;  %v11533_v6 = vld [vmem:[%s14109_s1 + $0xf0] sm:$0xff]  }
   0xd   : > { %v11530_v2 = vld [vmem:[%s14109_s1 + $0x38] sm:$0xff]   ;;  %4399 = vst [vmem:[#allocation2 + $0x10] sm:$0x3] %v12086_v3  ;;  %4400 = vst [vmem:[#allocation2 + $0x18] sm:$0xff] %v12086_v3  ;;  %10590 = vmatprep.subr.bf16.mxu1 %v11529_v1  ;;  %v11534_v7 = vld [vmem:[%s14109_s1 + $0x30] sm:$0xff]   ;;  %s14243_s25 = smov (!%p269_p3, %s8687_s25), 1 }
   0xe   : > { %4401 = vst [vmem:[#allocation2 + $0x20] sm:$0xff] %v12086_v3  ;;  %4402 = vst [vmem:[#allocation2 + $0x28] sm:$0x3] %v12086_v3  ;;  %v11531_v4 = vld [vmem:[%s14109_s1 + $0xb8] sm:$0xff]   ;;  %10479 = vmatpush3.bf16.msra.mxu0 %v11530_v2  ;;  %v11535_v8 = vld [vmem:[%s14109_s1 + $0xb0] sm:$0xff]   ;;  %s11518_s13 = smul.u32 432, %s14243_s25 }
   0xf   : > { %4403 = vst [vmem:[#allocation2 + $0x30] sm:$0xff] %v12086_v3  ;;  %4404 = vst [vmem:[#allocation2 + $0x38] sm:$0xff] %v12086_v3  ;;  %10591 = vmatpush3.bf16.msra.mxu1 %v11531_v4  ;;  %10480 = vmatprep.subr.bf16.mxu0 %v11532_v5  ;;  %v11537_v10 = vld [vmem:[%s14109_s1 + $0xe8] sm:$0xff]   ;;  %v11540_v13 = vld [vmem:[%s14109_s1 + $0x60] sm:$0xff]   ;;  %s9901_s18 = sshll.u32 %s14243_s25, 8 }
  0x10   : > { %4405 = vst [vmem:[#allocation2 + $0x40] sm:$0x3] %v12086_v3  ;;  %4406 = vst [vmem:[#allocation2 + $0x48] sm:$0xff] %v12086_v3  ;;  %10592 = vmatprep.subr.bf16.mxu1 %v11533_v6  ;;  %v11538_v11 = vld [vmem:[%s14109_s1 + $0x28] sm:$0xff]   ;;  %v11541_v14 = vld [vmem:[%s14109_s1 + $0xe0] sm:$0xff]   ;;  %s12236_s26 = scalar_lea.vmem %s14108_s0, %s11518_s13  ;;  %s13915_s20 = scalar_lea.vmem %s14115_s7, %s9901_s18 }
  0x11   : > { %4407 = vst [vmem:[#allocation2 + $0x50] sm:$0xff] %v12086_v3  ;;  %4408 = vst [vmem:[#allocation2 + $0x58] sm:$0x3] %v12086_v3  ;;  %v11539_v12 = vld [vmem:[%s14109_s1 + $0xa8] sm:$0xff]   ;;  %v11542_v15 = vld [vmem:[%s14109_s1 + $0x20] sm:$0xff]  }
  0x12   : > { %4409 = vst [vmem:[#allocation2 + $0x60] sm:$0xff] %v12086_v3  ;;  %4410 = vst [vmem:[#allocation2 + $0x68] sm:$0xff] %v12086_v3  ;;  %10481 = vmatpush3.bf16.msra.mxu0 %v11534_v7  ;;  %v11543_v16 = vld [vmem:[%s14109_s1 + $0xa0] sm:$0xff]   ;;  %v11544_v17 = vld [vmem:[%s14109_s1 + $0x58] sm:$0xff]  }
  0x13   : > { %4411 = vst [vmem:[#allocation2 + $0x70] sm:$0x3] %v12086_v3  ;;  %4412 = vst [vmem:[#allocation2 + $0x78] sm:$0xff] %v12086_v3  ;;  %10593 = vmatpush3.bf16.msra.mxu1 %v11535_v8  ;;  %10482 = vmatprep.subr.bf16.mxu0 %v11536_v9  ;;  %v11545_v18 = vld [vmem:[%s14109_s1 + $0xd8] sm:$0xff]   ;;  %v11548_v21 = vld [vmem:[%s14109_s1 + $0x50] sm:$0xff]  }
  0x14   : > { %4413 = vst [vmem:[#allocation2 + $0x80] sm:$0xff] %v12086_v3  ;;  %4414 = vst [vmem:[#allocation2 + $0x88] sm:$0x3] %v12086_v3  ;;  %10594 = vmatprep.subr.bf16.mxu1 %v11537_v10  ;;  %v11546_v19 = vld [vmem:[%s14109_s1 + $0x18] sm:$0xff]   ;;  %v11549_v22 = vld [vmem:[%s14109_s1 + $0xd0] sm:$0xff]  }
  0x15   : > { %4415 = vst [vmem:[#allocation2 + $0x90] sm:$0xff] %v12086_v3  ;;  %4416 = vst [vmem:[#allocation2 + $0x98] sm:$0xff] %v12086_v3  ;;  %v11547_v20 = vld [vmem:[%s14109_s1 + $0x98] sm:$0xff]   ;;  %v11550_v23 = vld [vmem:[%s14109_s1 + $0x10] sm:$0xff]  }
  0x16   : > { %4417 = vst [vmem:[#allocation2 + $0xa0] sm:$0x3] %v12086_v3  ;;  %4418 = vst [vmem:[#allocation2 + $0xa8] sm:$0xff] %v12086_v3  ;;  %10483 = vmatpush3.bf16.msra.mxu0 %v11538_v11  ;;  %v11551_v24 = vld [vmem:[%s14109_s1 + $0x90] sm:$0xff]   ;;  %v11552_v25 = vld [vmem:[%s14109_s1 + $0x48] sm:$0xff]  }
  0x17   : > { %4419 = vst [vmem:[#allocation2 + $0xb0] sm:$0xff] %v12086_v3  ;;  %4420 = vst [vmem:[#allocation2 + $0xb8] sm:$0x3] %v12086_v3  ;;  %10595 = vmatpush3.bf16.msra.mxu1 %v11539_v12  ;;  %10484 = vmatprep.subr.bf16.mxu0 %v11540_v13  ;;  %v11553_v26 = vld [vmem:[%s14109_s1 + $0xc8] sm:$0xff]   ;;  %v11556_v29 = vld [vmem:[%s14109_s1 + $0x40] sm:$0xff]  }
  0x18   : > { %4421 = vst [vmem:[#allocation2 + $0xc0] sm:$0xff] %v12086_v3  ;;  %4422 = vst [vmem:[#allocation2 + $0xc8] sm:$0xff] %v12086_v3  ;;  %10596 = vmatprep.subr.bf16.mxu1 %v11541_v14  ;;  %v11554_v27 = vld [vmem:[%s14109_s1 + $0x8] sm:$0xff]   ;;  %v11557_v30 = vld [vmem:[%s14109_s1 + $0xc0] sm:$0xff]  }
  0x19   : > { %4423 = vst [vmem:[#allocation2 + $0xd0] sm:$0x3] %v12086_v3  ;;  %4424 = vst [vmem:[#allocation2 + $0xd8] sm:$0xff] %v12086_v3  ;;  %v11555_v28 = vld [vmem:[%s14109_s1 + $0x88] sm:$0xff]   ;;  %v11558_v31 = vld [vmem:[%s14109_s1] sm:$0xff]  }
  0x1a   : > { %4425 = vst [vmem:[#allocation2 + $0xe0] sm:$0xff] %v12086_v3  ;;  %4426 = vst [vmem:[#allocation2 + $0xe8] sm:$0x3] %v12086_v3  ;;  %10485 = vmatpush3.bf16.msra.mxu0 %v11542_v15  ;;  %v11559_v32 = vld [vmem:[%s14109_s1 + $0x80] sm:$0xff]   ;;  %v281_v34 = vld [vmem:[%s12236_s26 + $0x8] sm:$0xff] }
  0x1b   : > { %4427 = vst [vmem:[#allocation2 + $0xf0] sm:$0xff] %v12086_v3  ;;  %4428 = vst [vmem:[#allocation2 + $0xf8] sm:$0xff] %v12086_v3  ;;  %10597 = vmatpush3.bf16.msra.mxu1 %v11543_v16  ;;  %10486 = vmatprep.subr.bf16.mxu0 %v11544_v17  ;;  %v280_v33 = vld [vmem:[%s12236_s26] sm:$0xff]  ;;  %v9903_v37 = vpack.c.bf16 %v281_v34, %v281_v34  ;;  %v473_v38 = vld [vmem:[%s12236_s26 + $0x9] sm:$0xff] }
  0x1c   : > { %4429 = vst [vmem:[#allocation2 + $0x100] sm:$0x3] %v12086_v3  ;;  %4430 = vst [vmem:[#allocation2 + $0x108] sm:$0xff] %v12086_v3  ;;  %10598 = vmatprep.subr.bf16.mxu1 %v11545_v18  ;;  %v472_v35 = vld [vmem:[%s12236_s26 + $0x1] sm:$0xff]  ;;  %v9902_v36 = vpack.c.bf16 %v280_v33, %v280_v33  ;;  %v9935_v40 = vpack.c.bf16 %v473_v38, %v473_v38  ;;  %v665_v42 = vld [vmem:[%s12236_s26 + $0xa] sm:$0xff] }
  0x1d   : > { %4431 = vst [vmem:[#allocation2 + $0x110] sm:$0xff] %v12086_v3  ;;  %4432 = vst [vmem:[#allocation2 + $0x118] sm:$0x3] %v12086_v3  ;;  %v9934_v39 = vpack.c.bf16 %v472_v35, %v472_v35  ;;  %v664_v41 = vld [vmem:[%s12236_s26 + $0x2] sm:$0xff]  ;;  %v8791_v43 = vld [vmem:[%s12236_s26 + $0x18] sm:$0xff]  ;;  %v9967_v47 = vpack.c.bf16 %v665_v42, %v665_v42 }
  0x1e   : > { %4433 = vst [vmem:[#allocation2 + $0x120] sm:$0xff] %v12086_v3  ;;  %4434 = vst [vmem:[#allocation2 + $0x128] sm:$0xff] %v12086_v3  ;;  %10487 = vmatpush3.bf16.msra.mxu0 %v11546_v19  ;;  %v12251_v44 = vld [vmem:[#allocation2 + $0x1] sm:$0xff]  ;;  %v12253_v45 = vld [vmem:[#allocation2 + $0x9] sm:$0xff]  ;;  %v9966_v46 = vpack.c.bf16 %v664_v41, %v664_v41  ;;  %v9998_v49 = vpack.c.bf16 %v8791_v43, %v8791_v43 }
  0x1f   : > { %4435 = vst [vmem:[#allocation2 + $0x130] sm:$0x3] %v12086_v3  ;;  %4436 = vst [vmem:[#allocation2 + $0x138] sm:$0xff] %v12086_v3  ;;  %10599 = vmatpush3.bf16.msra.mxu1 %v11547_v20  ;;  %10488 = vmatprep.subr.bf16.mxu0 %v11548_v21  ;;  %v8792_v48 = vld [vmem:[%s12236_s26 + $0x20] sm:$0xff]  ;;  %v11564_v52 = vld [vmem:[%s14109_s1 + $0x178] sm:$0xff]   ;;  %v10222_v57 = vpack.c.bf16 %v12251_v44, %v12251_v44  ;;  %v10223_v0 = vpack.c.bf16 %v12253_v45, %v12253_v45 }
  0x20   : > { %4437 = vst [vmem:[#allocation2 + $0x140] sm:$0xff] %v12086_v3  ;;  %4438 = vst [vmem:[#allocation2 + $0x148] sm:$0x3] %v12086_v3  ;;  %10600 = vmatprep.subr.bf16.mxu1 %v11549_v22  ;;  %v9999_v50 = vpack.c.bf16 %v8792_v48, %v8792_v48  ;;  %v12256_v51 = vld [vmem:[#allocation2 + $0x2] sm:$0xff]  ;;  %v12261_v53 = vld [vmem:[#allocation2 + $0xa] sm:$0xff] }
  0x21   : > { %4439 = vst [vmem:[#allocation2 + $0x150] sm:$0xff] %v12086_v3  ;;  %4440 = vst [vmem:[#allocation2 + $0x158] sm:$0xff] %v12086_v3  ;;  %v474_v54 = vld [vmem:[%s12236_s26 + $0x19] sm:$0xff]  ;;  %v475_v55 = vld [vmem:[%s12236_s26 + $0x21] sm:$0xff]  ;;  %v10254_v7 = vpack.c.bf16 %v12256_v51, %v12256_v51  ;;  %v10255_v16 = vpack.c.bf16 %v12261_v53, %v12261_v53 }
  0x22   : > { %4441 = vst [vmem:[#allocation2 + $0x160] sm:$0x3] %v12086_v3  ;;  %4442 = vst [vmem:[#allocation2 + $0x168] sm:$0xff] %v12086_v3  ;;  %10489 = vmatpush3.bf16.msra.mxu0 %v11550_v23  ;;  %v666_v56 = vld [vmem:[%s12236_s26 + $0x1a] sm:$0xff]  ;;  %v9936_v58 = vpack.c.bf16 %v474_v54, %v474_v54  ;;  %v9937_v59 = vpack.c.bf16 %v475_v55, %v475_v55  ;;  %v667_v60 = vld [vmem:[%s12236_s26 + $0x22] sm:$0xff]  ;;  %v12087_v23 = vmov 0.0|0.0  }
  0x23   : > { %4443 = vst [vmem:[#allocation2 + $0x170] sm:$0xff] %v12086_v3  ;;  %4444 = vst [vmem:[#allocation2 + $0x178] sm:$0x3] %v12086_v3  ;;  %10601 = vmatpush3.bf16.msra.mxu1 %v11551_v24  ;;  %10490 = vmatprep.subr.bf16.mxu0 %v11552_v25  ;;  %v9968_v61 = vpack.c.bf16 %v666_v56, %v666_v56  ;;  %v8793_v62 = vld [vmem:[%s12236_s26 + $0x30] sm:$0xff]  ;;  %v8794_v63 = vld [vmem:[%s12236_s26 + $0x38] sm:$0xff]  ;;  %v9969_v1 = vpack.c.bf16 %v667_v60, %v667_v60 }
  0x24   : > { %4445 = vst [vmem:[#allocation2 + $0x180] sm:$0xff] %v12086_v3  ;;  %4446 = vst [vmem:[#allocation2 + $0x188] sm:$0xff] %v12086_v3  ;;  %10602 = vmatprep.subr.bf16.mxu1 %v11553_v26  ;;  %v10000_v2 = vpack.c.bf16 %v8793_v62, %v8793_v62  ;;  %v476_v4 = vld [vmem:[%s12236_s26 + $0x31] sm:$0xff]  ;;  %v477_v5 = vld [vmem:[%s12236_s26 + $0x39] sm:$0xff] }
  0x25   : > { %4447 = vst [vmem:[#allocation2 + $0x190] sm:$0x3] %v12086_v3  ;;  %4448 = vst [vmem:[#allocation2 + $0x198] sm:$0xff] %v12086_v3  ;;  %v668_v6 = vld [vmem:[%s12236_s26 + $0x32] sm:$0xff]  ;;  %v9938_v9 = vpack.c.bf16 %v476_v4, %v476_v4  ;;  %v9939_v10 = vpack.c.bf16 %v477_v5, %v477_v5  ;;  %v669_v11 = vld [vmem:[%s12236_s26 + $0x3a] sm:$0xff] }
  0x26   : > { %4449 = vst [vmem:[#allocation2 + $0x1a0] sm:$0xff] %v12086_v3  ;;  %4450 = vst [vmem:[#allocation2 + $0x1a8] sm:$0x3] %v12086_v3  ;;  %10491 = vmatpush3.bf16.msra.mxu0 %v11554_v27  ;;  %v10001_v3 = vpack.c.bf16 %v8794_v63, %v8794_v63  ;;  %v11565_v8 = vld [vmem:[%s14109_s1 + $0x138] sm:$0xff]   ;;  %v9970_v12 = vpack.c.bf16 %v668_v6, %v668_v6  ;;  %v8795_v13 = vld [vmem:[%s12236_s26 + $0x48] sm:$0xff]  ;;  %v9971_v17 = vpack.c.bf16 %v669_v11, %v669_v11 }
  0x27   : > { %10603 = vmatpush3.bf16.msra.mxu1 %v11555_v28  ;;  %10492 = vmatprep.subr.bf16.mxu0 %v11556_v29  ;;  %440 = vst [vmem:[#allocation3] sm:$0xf] %v9902_v36  ;;  %441 = vst [vmem:[#allocation3 + $0x24] sm:$0xf] %v9903_v37  ;;  %v8796_v14 = vld [vmem:[%s12236_s26 + $0x50] sm:$0xff]  ;;  %v10002_v18 = vpack.c.bf16 %v8795_v13, %v8795_v13  ;;  %v8797_v37 = vld [vmem:[%s12236_s26 + $0x60] sm:$0xff] }
  0x28   : > { %10604 = vmatprep.subr.bf16.mxu1 %v11557_v30  ;;  %632 = vst [vmem:[#allocation3 + $0x4] sm:$0xf] %v9934_v39  ;;  %633 = vst [vmem:[#allocation3 + $0x28] sm:$0xf] %v9935_v40  ;;  %v10003_v19 = vpack.c.bf16 %v8796_v14, %v8796_v14  ;;  %v11576_v22 = vld [vmem:[%s14109_s1 + $0x170] sm:$0xff]   ;;  %v8798_v38 = vld [vmem:[%s12236_s26 + $0x68] sm:$0xff]  ;;  %v10004_v43 = vpack.c.bf16 %v8797_v37, %v8797_v37 }
  0x29   : > { %824 = vst [vmem:[#allocation3 + $0x8] sm:$0xf] %v9966_v46  ;;  %825 = vst [vmem:[#allocation3 + $0x2c] sm:$0xf] %v9967_v47  ;;  %v11577_v28 = vld [vmem:[%s14109_s1 + $0x130] sm:$0xff]   ;;  %v10005_v44 = vpack.c.bf16 %v8798_v38, %v8798_v38  ;;  %v672_v55 = vld [vmem:[%s12236_s26 + $0x62] sm:$0xff] }
  0x2a   : > { %10493 = vmatpush3.bf16.msra.mxu0 %v11558_v31  ;;  %1017 = vst [vmem:[#allocation3 + $0xc] sm:$0xf] %v9998_v49  ;;  %442 = vst [vmem:[#allocation3 + $0x48] sm:$0xf] %v9998_v49  ;;  %v478_v30 = vld [vmem:[%s12236_s26 + $0x49] sm:$0xff]  ;;  %v479_v31 = vld [vmem:[%s12236_s26 + $0x51] sm:$0xff] }
  0x2b   : > { %10605 = vmatpush3.bf16.msra.mxu1 %v11559_v32  ;;  %1018 = vst [vmem:[#allocation3 + $0x30] sm:$0xf] %v9999_v50  ;;  %10702 = vmatprep.subr.bf16.mxu0 %v11564_v52  ;;  %443 = vst [vmem:[#allocation3 + $0x6c] sm:$0xf] %v9999_v50  ;;  %v670_v32 = vld [vmem:[%s12236_s26 + $0x4a] sm:$0xff]  ;;  %v9940_v33 = vpack.c.bf16 %v478_v30, %v478_v30  ;;  %v9941_v34 = vpack.c.bf16 %v479_v31, %v479_v31  ;;  %v671_v35 = vld [vmem:[%s12236_s26 + $0x52] sm:$0xff] }
  0x2c   : > { %634 = vst [vmem:[#allocation3 + $0x4c] sm:$0xf] %v9936_v58  ;;  %635 = vst [vmem:[#allocation3 + $0x70] sm:$0xf] %v9937_v59  ;;  %v9972_v36 = vpack.c.bf16 %v670_v32, %v670_v32  ;;  %v9973_v42 = vpack.c.bf16 %v671_v35, %v671_v35  ;;  %v480_v50 = vld [vmem:[%s12236_s26 + $0x61] sm:$0xff]  ;;  %v481_v53 = vld [vmem:[%s12236_s26 + $0x69] sm:$0xff]  ;;  %v9974_v58 = vpack.c.bf16 %v672_v55, %v672_v55 }
  0x2d   : > { %826 = vst [vmem:[#allocation3 + $0x50] sm:$0xf] %v9968_v61  ;;  %827 = vst [vmem:[#allocation3 + $0x74] sm:$0xf] %v9969_v1  ;;  %v9942_v54 = vpack.c.bf16 %v480_v50, %v480_v50  ;;  %v673_v56 = vld [vmem:[%s12236_s26 + $0x6a] sm:$0xff]  ;;  %v8799_v60 = vld [vmem:[%s12236_s26 + $0x78] sm:$0xff] }
  0x2e   : > { %1019 = vst [vmem:[#allocation3 + $0x54] sm:$0xf] %v10000_v2  ;;  %1020 = vst [vmem:[#allocation3 + $0x78] sm:$0xf] %v10001_v3  ;;  %v9975_v59 = vpack.c.bf16 %v673_v56, %v673_v56  ;;  %v8800_v61 = vld [vmem:[%s12236_s26 + $0x80] sm:$0xff]  ;;  %v10006_v62 = vpack.c.bf16 %v8799_v60, %v8799_v60  ;;  %v11589_v4 = vld [vmem:[%s14109_s1 + $0x128] sm:$0xff]  }
  0x2f   : > { %v2010_v15 = vld [vmem:[#allocation3] sm:$0xff]  ;;  %444 = vst [vmem:[#allocation3 + $0x90] sm:$0xf] %v10000_v2  ;;  %445 = vst [vmem:[#allocation3 + $0xb4] sm:$0xf] %v10001_v3  ;;  %v10007_v63 = vpack.c.bf16 %v8800_v61, %v8800_v61  ;;  %v482_v6 = vld [vmem:[%s12236_s26 + $0x79] sm:$0xff] }
  0x30   : > { %v2015_v20 = vld [vmem:[#allocation3 + $0x24] sm:$0xff]  ;;  %636 = vst [vmem:[#allocation3 + $0x94] sm:$0xf] %v9938_v9  ;;  %637 = vst [vmem:[#allocation3 + $0xb8] sm:$0xf] %v9939_v10  ;;  %v9944_v9 = vpack.c.bf16 %v482_v6, %v482_v6  ;;  %v675_v11 = vld [vmem:[%s12236_s26 + $0x82] sm:$0xff] }
  0x31   : > { %v11560_v21 = vld [vmem:[#allocation3 + $0x4] ss:$36 sps:$4 sm:$0xff]   ;;  %828 = vst [vmem:[#allocation3 + $0x98] sm:$0xf] %v9970_v12  ;;  %4644 = vst [vmem:[#allocation3] sm:$0xf] %v12087_v23  ;;  %v9175_v25 = vcombine.low %v2010_v15, %v2015_v20  ;;  %v9977_v15 = vpack.c.bf16 %v675_v11, %v675_v11 }
  0x32   : > { %4645 = vst [vmem:[#allocation3 + $0x24] sm:$0xf] %v12087_v23  ;;  %4836 = vst [vmem:[#allocation3 + $0x4] sm:$0xf] %v10222_v57  ;;  %v2011_v24 = vld [vmem:[#allocation3 + $0x8] sm:$0xff]  ;;  %3514 = vmatprep.mubr.bf16.mxu0 %v11560_v21  ;;  %v9943_v57 = vpack.c.bf16 %v481_v53, %v481_v53  ;;  %v8801_v13 = vld [vmem:[%s12236_s26 + $0x90] sm:$0xff] }
  0x33   : > { %4837 = vst [vmem:[#allocation3 + $0x28] sm:$0xf] %v10223_v0  ;;  %829 = vst [vmem:[#allocation3 + $0xbc] sm:$0xf] %v9971_v17  ;;  %v2016_v26 = vld [vmem:[#allocation3 + $0x2c] sm:$0xff]  ;;  %3515 = vmatmul.mubr.bf16.vlgmr.msra.gmra.mxu0 %v9175_v25  ;;  %v11588_v0 = vld [vmem:[%s14109_s1 + $0x168] sm:$0xff]  }
  0x34   : > { %1021 = vst [vmem:[#allocation3 + $0x9c] sm:$0xf] %v10002_v18  ;;  %1022 = vst [vmem:[#allocation3 + $0xc0] sm:$0xf] %v10003_v19  ;;  %v11562_v27 = vld [vmem:[#allocation3 + $0xc] ss:$36 sps:$4 sm:$0xff]   ;;  %v9177_v29 = vcombine.low %v2011_v24, %v2016_v26  ;;  %10703 = vmatpush3.bf16.msra.mxu0 %v11565_v8 }
  0x35   : > { %446 = vst [vmem:[#allocation3 + $0xd8] sm:$0xf] %v10002_v18  ;;  %447 = vst [vmem:[#allocation3 + $0xfc] sm:$0xf] %v10003_v19  ;;  %3675 = vmatprep.mubr.bf16.mxu1 %v11562_v27  ;;  %v2020_v39 = vld [vmem:[#allocation3 + $0x48] sm:$0xff]  ;;  %10704 = vmatprep.subr.bf16.mxu0 %v11576_v22  ;;  %v8803_v25 = vld [vmem:[%s12236_s26 + $0xa8] sm:$0xff] }
  0x36   : > { %5028 = vst [vmem:[#allocation3 + $0x8] sm:$0xf] %v10254_v7  ;;  %5029 = vst [vmem:[#allocation3 + $0x2c] sm:$0xf] %v10255_v16  ;;  %3676 = vmatmul.mubr.bf16.vlgmr.msra.gmra.mxu1 %v9177_v29  ;;  %v2025_v40 = vld [vmem:[#allocation3 + $0x6c] sm:$0xff]  ;;  %v10008_v16 = vpack.c.bf16 %v8801_v13, %v8801_v13  ;;  %v484_v18 = vld [vmem:[%s12236_s26 + $0x91] sm:$0xff]  ;;  %v10010_v30 = vpack.c.bf16 %v8803_v25, %v8803_v25 }
  0x37   : > { %v11566_v41 = vld [vmem:[#allocation3 + $0x4c] ss:$36 sps:$4 sm:$0xff]   ;;  %v11568_v45 = vld [vmem:[#allocation3 + $0x54] ss:$36 sps:$4 sm:$0xff]   ;;  %638 = vst [vmem:[#allocation3 + $0xdc] sm:$0xf] %v9940_v33  ;;  %v9184_v46 = vcombine.low %v2020_v39, %v2025_v40  ;;  %v9946_v21 = vpack.c.bf16 %v484_v18, %v484_v18 }
  0x38   : > { %639 = vst [vmem:[#allocation3 + $0x100] sm:$0xf] %v9941_v34  ;;  %830 = vst [vmem:[#allocation3 + $0xe0] sm:$0xf] %v9972_v36  ;;  %3522 = vmatprep.mubr.bf16.mxu0 %v11566_v41  ;;  %3683 = vmatprep.mubr.bf16.mxu1 %v11568_v45  ;;  %v11571_v47 = vld [vmem:[#allocation3 + $0x94] ss:$36 sps:$4 sm:$0xff]  }
  0x39   : > { %831 = vst [vmem:[#allocation3 + $0x104] sm:$0xf] %v9973_v42  ;;  %1023 = vst [vmem:[#allocation3 + $0xe4] sm:$0xf] %v10004_v43  ;;  %10705 = vmatpush3.bf16.msra.mxu0 %v11577_v28  ;;  %v11570_v48 = vld [vmem:[#allocation3 + $0x50] ss:$36 sps:$4 sm:$0xff]  }
  0x3a   : > { %1024 = vst [vmem:[#allocation3 + $0x108] sm:$0xf] %v10005_v44  ;;  %448 = vst [vmem:[#allocation3 + $0x120] sm:$0xf] %v10004_v43  ;;  %v2030_v51 = vld [vmem:[#allocation3 + $0x90] sm:$0xff]  ;;  %10706 = vmatprep.subr.bf16.mxu0 %v11588_v0  ;;  %v8802_v14 = vld [vmem:[%s12236_s26 + $0x98] sm:$0xff] }
  0x3b   : > { %449 = vst [vmem:[#allocation3 + $0x144] sm:$0xf] %v10005_v44  ;;  %v11573_v49 = vld [vmem:[#allocation3 + $0x9c] ss:$36 sps:$4 sm:$0xff]   ;;  %v2035_v52 = vld [vmem:[#allocation3 + $0xb4] sm:$0xff]  ;;  %3523 = vmatmul.mubr.bf16.gmra.mxu0 %v9184_v46  ;;  %v674_v8 = vld [vmem:[%s12236_s26 + $0x7a] sm:$0xff]  ;;  %v10009_v17 = vpack.c.bf16 %v8802_v14, %v8802_v14 }
  0x3c   : > { %3530 = vmatprep.mubr.bf16.mxu0 %v11571_v47  ;;  %640 = vst [vmem:[#allocation3 + $0x124] sm:$0xf] %v9942_v54  ;;  %641 = vst [vmem:[#allocation3 + $0x148] sm:$0xf] %v9943_v57  ;;  %v9193_v1 = vcombine.low %v2030_v51, %v2035_v52  ;;  %v11575_v2 = vld [vmem:[#allocation3 + $0x98] ss:$36 sps:$4 sm:$0xff]   ;;  %v9976_v12 = vpack.c.bf16 %v674_v8, %v674_v8 }
  0x3d   : > { %832 = vst [vmem:[#allocation3 + $0x128] sm:$0xf] %v9974_v58  ;;  %833 = vst [vmem:[#allocation3 + $0x14c] sm:$0xf] %v9975_v59  ;;  %v483_v7 = vld [vmem:[%s12236_s26 + $0x81] sm:$0xff]  ;;  %10707 = vmatpush3.bf16.msra.mxu0 %v11589_v4  ;;  %v485_v19 = vld [vmem:[%s12236_s26 + $0x99] sm:$0xff] }
  0x3e   : > { %3684 = vmatmul.mubr.bf16.gmra.mxu1 %v11570_v48  ;;  %1025 = vst [vmem:[#allocation3 + $0x12c] sm:$0xf] %v10006_v62  ;;  %1026 = vst [vmem:[#allocation3 + $0x150] sm:$0xf] %v10007_v63  ;;  %v9945_v10 = vpack.c.bf16 %v483_v7, %v483_v7  ;;  %v676_v20 = vld [vmem:[%s12236_s26 + $0x92] sm:$0xff]  ;;  %v9947_v22 = vpack.c.bf16 %v485_v19, %v485_v19  ;;  %v677_v23 = vld [vmem:[%s12236_s26 + $0x9a] sm:$0xff] }
  0x3f   : > { %3691 = vmatprep.mubr.bf16.mxu1 %v11573_v49  ;;  %450 = vst [vmem:[#allocation3 + $0x168] sm:$0xf] %v10006_v62  ;;  %451 = vst [vmem:[#allocation3 + $0x18c] sm:$0xf] %v10007_v63  ;;  %v11578_v3 = vld [vmem:[#allocation3 + $0xdc] ss:$36 sps:$4 sm:$0xff]   ;;  %v9978_v24 = vpack.c.bf16 %v676_v20, %v676_v20  ;;  %v9979_v28 = vpack.c.bf16 %v677_v23, %v677_v23 }
  0x40   : > { %642 = vst [vmem:[#allocation3 + $0x16c] sm:$0xf] %v9944_v9  ;;  %643 = vst [vmem:[#allocation3 + $0x190] sm:$0xf] %v9945_v10  ;;  %v2040_v26 = vld [vmem:[#allocation3 + $0xd8] sm:$0xff]  ;;  %v8804_v29 = vld [vmem:[%s12236_s26 + $0xb0] sm:$0xff] }
  0x41   : > { %v11580_v5 = vld [vmem:[#allocation3 + $0xe4] ss:$36 sps:$4 sm:$0xff]   ;;  %834 = vst [vmem:[#allocation3 + $0x170] sm:$0xf] %v9976_v12  ;;  %v2045_v27 = vld [vmem:[#allocation3 + $0xfc] sm:$0xff]  ;;  %v10011_v31 = vpack.c.bf16 %v8804_v29, %v8804_v29  ;;  %v11600_v35 = vld [vmem:[%s14109_s1 + $0x160] sm:$0xff]  }
  0x42   : > { %835 = vst [vmem:[#allocation3 + $0x194] sm:$0xf] %v9977_v15  ;;  %1027 = vst [vmem:[#allocation3 + $0x174] sm:$0xf] %v10008_v16  ;;  %v9202_v33 = vcombine.low %v2040_v26, %v2045_v27  ;;  %v11582_v34 = vld [vmem:[#allocation3 + $0xe0] ss:$36 sps:$4 sm:$0xff]   ;;  %10708 = vmatprep.subr.bf16.mxu0 %v11600_v35 }
  0x43   : > { %3531 = vmatmul.mubr.bf16.gmra.mxu0 %v9193_v1  ;;  %1028 = vst [vmem:[#allocation3 + $0x198] sm:$0xf] %v10009_v17  ;;  %452 = vst [vmem:[#allocation3 + $0x1b0] sm:$0xf] %v10008_v16  ;;  %v11583_v32 = vld [vmem:[#allocation3 + $0x124] ss:$36 sps:$4 sm:$0xff]  }
  0x44   : > { %3538 = vmatprep.mubr.bf16.mxu0 %v11578_v3  ;;  %453 = vst [vmem:[#allocation3 + $0x1d4] sm:$0xf] %v10009_v17  ;;  %644 = vst [vmem:[#allocation3 + $0x1b4] sm:$0xf] %v9946_v21  ;;  %v11601_v36 = vld [vmem:[%s14109_s1 + $0x120] sm:$0xff]   ;;  %v486_v37 = vld [vmem:[%s12236_s26 + $0xa9] sm:$0xff] }
  0x45   : > { %645 = vst [vmem:[#allocation3 + $0x1d8] sm:$0xf] %v9947_v22  ;;  %836 = vst [vmem:[#allocation3 + $0x1b8] sm:$0xf] %v9978_v24  ;;  %v487_v38 = vld [vmem:[%s12236_s26 + $0xb1] sm:$0xff]  ;;  %v9948_v39 = vpack.c.bf16 %v486_v37, %v486_v37  ;;  %v8805_v43 = vld [vmem:[%s12236_s26 + $0xc0] sm:$0xff]  ;;  %10709 = vmatpush3.bf16.msra.mxu0 %v11601_v36 }
  0x46   : > { %3692 = vmatmul.mubr.bf16.gmra.mxu1 %v11575_v2  ;;  %837 = vst [vmem:[#allocation3 + $0x1dc] sm:$0xf] %v9979_v28  ;;  %1029 = vst [vmem:[#allocation3 + $0x1bc] sm:$0xf] %v10010_v30  ;;  %v9949_v40 = vpack.c.bf16 %v487_v38, %v487_v38  ;;  %v678_v41 = vld [vmem:[%s12236_s26 + $0xaa] sm:$0xff]  ;;  %v679_v42 = vld [vmem:[%s12236_s26 + $0xb2] sm:$0xff]  ;;  %v10012_v47 = vpack.c.bf16 %v8805_v43, %v8805_v43 }
  0x47   : > { %3699 = vmatprep.mubr.bf16.mxu1 %v11580_v5  ;;  %454 = vst [vmem:[#allocation3 + $0x1f8] sm:$0xf] %v10010_v30  ;;  %1030 = vst [vmem:[#allocation3 + $0x1e0] sm:$0xf] %v10011_v31  ;;  %v11585_v44 = vld [vmem:[#allocation3 + $0x12c] ss:$36 sps:$4 sm:$0xff]   ;;  %v9980_v45 = vpack.c.bf16 %v678_v41, %v678_v41  ;;  %v9981_v46 = vpack.c.bf16 %v679_v42, %v679_v42 }
  0x48   : > { %455 = vst [vmem:[#allocation3 + $0x21c] sm:$0xf] %v10011_v31  ;;  %646 = vst [vmem:[#allocation3 + $0x1fc] sm:$0xf] %v9948_v39  ;;  %v2050_v48 = vld [vmem:[#allocation3 + $0x120] sm:$0xff]  ;;  %v8806_v50 = vld [vmem:[%s12236_s26 + $0xc8] sm:$0xff] }
  0x49   : > { %647 = vst [vmem:[#allocation3 + $0x220] sm:$0xf] %v9949_v40  ;;  %v2055_v49 = vld [vmem:[#allocation3 + $0x144] sm:$0xff]  ;;  %838 = vst [vmem:[#allocation3 + $0x200] sm:$0xf] %v9980_v45  ;;  %v10013_v52 = vpack.c.bf16 %v8806_v50, %v8806_v50  ;;  %v488_v55 = vld [vmem:[%s12236_s26 + $0xc1] sm:$0xff] }
  0x4a   : > { %839 = vst [vmem:[#allocation3 + $0x224] sm:$0xf] %v9981_v46  ;;  %1031 = vst [vmem:[#allocation3 + $0x204] sm:$0xf] %v10012_v47  ;;  %v11590_v51 = vld [vmem:[#allocation3 + $0x16c] ss:$36 sps:$4 sm:$0xff]   ;;  %v9211_v53 = vcombine.low %v2050_v48, %v2055_v49  ;;  %v9950_v58 = vpack.c.bf16 %v488_v55, %v488_v55 }
  0x4b   : > { %3539 = vmatmul.mubr.bf16.gmra.mxu0 %v9202_v33  ;;  %456 = vst [vmem:[#allocation3 + $0x240] sm:$0xf] %v10012_v47  ;;  %v11587_v54 = vld [vmem:[#allocation3 + $0x128] ss:$36 sps:$4 sm:$0xff]   ;;  %v489_v56 = vld [vmem:[%s12236_s26 + $0xc9] sm:$0xff]  ;;  %v8808_v63 = vld [vmem:[%s12236_s26 + $0xe0] sm:$0xff] }
  0x4c   : > { %3546 = vmatprep.mubr.bf16.mxu0 %v11583_v32  ;;  %v680_v57 = vld [vmem:[%s12236_s26 + $0xc2] sm:$0xff]  ;;  %1032 = vst [vmem:[#allocation3 + $0x228] sm:$0xf] %v10013_v52  ;;  %457 = vst [vmem:[#allocation3 + $0x264] sm:$0xf] %v10013_v52  ;;  %v9951_v59 = vpack.c.bf16 %v489_v56, %v489_v56  ;;  %v681_v60 = vld [vmem:[%s12236_s26 + $0xca] sm:$0xff]  ;;  %v10015_v2 = vpack.c.bf16 %v8808_v63, %v8808_v63 }
  0x4d   : > { %v9982_v61 = vpack.c.bf16 %v680_v57, %v680_v57  ;;  %v8807_v62 = vld [vmem:[%s12236_s26 + $0xd8] sm:$0xff]  ;;  %v9983_v0 = vpack.c.bf16 %v681_v60, %v681_v60  ;;  %v11592_v6 = vld [vmem:[#allocation3 + $0x174] ss:$36 sps:$4 sm:$0xff]   ;;  %648 = vst [vmem:[#allocation3 + $0x244] sm:$0xf] %v9950_v58  ;;  %v8809_v14 = vld [vmem:[%s12236_s26 + $0xf0] sm:$0xff] }
  0x4e   : > { %3700 = vmatmul.mubr.bf16.gmra.mxu1 %v11582_v34  ;;  %v10014_v1 = vpack.c.bf16 %v8807_v62, %v8807_v62  ;;  %v11612_v3 = vld [vmem:[%s14109_s1 + $0x158] sm:$0xff]   ;;  %649 = vst [vmem:[#allocation3 + $0x268] sm:$0xf] %v9951_v59  ;;  %1034 = vst [vmem:[#allocation3 + $0x270] sm:$0xf] %v10015_v2  ;;  %v491_v9 = vld [vmem:[%s12236_s26 + $0xe1] sm:$0xff]  ;;  %v10016_v18 = vpack.c.bf16 %v8809_v14, %v8809_v14 }
  0x4f   : > { %3707 = vmatprep.mubr.bf16.mxu1 %v11585_v44  ;;  %v2060_v4 = vld [vmem:[#allocation3 + $0x168] sm:$0xff]  ;;  %840 = vst [vmem:[#allocation3 + $0x248] sm:$0xf] %v9982_v61  ;;  %841 = vst [vmem:[#allocation3 + $0x26c] sm:$0xf] %v9983_v0  ;;  %10710 = vmatprep.subr.bf16.mxu0 %v11612_v3  ;;  %v9953_v11 = vpack.c.bf16 %v491_v9, %v491_v9  ;;  %v683_v13 = vld [vmem:[%s12236_s26 + $0xe2] sm:$0xff] }
  0x50   : > { %v2065_v5 = vld [vmem:[#allocation3 + $0x18c] sm:$0xff]  ;;  %1033 = vst [vmem:[#allocation3 + $0x24c] sm:$0xf] %v10014_v1  ;;  %458 = vst [vmem:[#allocation3 + $0x288] sm:$0xf] %v10014_v1  ;;  %v9985_v16 = vpack.c.bf16 %v683_v13, %v683_v13  ;;  %v492_v19 = vld [vmem:[%s12236_s26 + $0xf1] sm:$0xff] }
  0x51   : > { %459 = vst [vmem:[#allocation3 + $0x2ac] sm:$0xf] %v10015_v2  ;;  %v11613_v7 = vld [vmem:[%s14109_s1 + $0x118] sm:$0xff]   ;;  %v9220_v21 = vcombine.low %v2060_v4, %v2065_v5  ;;  %v11595_v22 = vld [vmem:[#allocation3 + $0x1b4] ss:$36 sps:$4 sm:$0xff]   ;;  %v9954_v24 = vpack.c.bf16 %v492_v19, %v492_v19  ;;  %v8812_v36 = vld [vmem:[%s12236_s26 + $0x110] sm:$0xff] }
  0x52   : > { %v490_v8 = vld [vmem:[%s12236_s26 + $0xd9] sm:$0xff]  ;;  %10711 = vmatpush3.bf16.msra.mxu0 %v11613_v7  ;;  %651 = vst [vmem:[#allocation3 + $0x2b0] sm:$0xf] %v9953_v11  ;;  %843 = vst [vmem:[#allocation3 + $0x2b4] sm:$0xf] %v9985_v16  ;;  %v8811_v28 = vld [vmem:[%s12236_s26 + $0x108] sm:$0xff]  ;;  %v10019_v37 = vpack.c.bf16 %v8812_v36, %v8812_v36 }
  0x53   : > { %3547 = vmatmul.mubr.bf16.gmra.mxu0 %v9211_v53  ;;  %v9952_v10 = vpack.c.bf16 %v490_v8, %v490_v8  ;;  %v682_v12 = vld [vmem:[%s12236_s26 + $0xda] sm:$0xff]  ;;  %1035 = vst [vmem:[#allocation3 + $0x294] sm:$0xf] %v10016_v18  ;;  %460 = vst [vmem:[#allocation3 + $0x2d0] sm:$0xf] %v10016_v18  ;;  %v684_v26 = vld [vmem:[%s12236_s26 + $0xf2] sm:$0xff]  ;;  %v10018_v32 = vpack.c.bf16 %v8811_v28, %v8811_v28 }
  0x54   : > { %3554 = vmatprep.mubr.bf16.mxu0 %v11590_v51  ;;  %v9984_v15 = vpack.c.bf16 %v682_v12, %v682_v12  ;;  %v8810_v17 = vld [vmem:[%s12236_s26 + $0xf8] sm:$0xff]  ;;  %v11594_v29 = vld [vmem:[#allocation3 + $0x170] ss:$36 sps:$4 sm:$0xff]   ;;  %652 = vst [vmem:[#allocation3 + $0x2d4] sm:$0xf] %v9954_v24  ;;  %v9986_v30 = vpack.c.bf16 %v684_v26, %v684_v26  ;;  %v11624_v38 = vld [vmem:[%s14109_s1 + $0x150] sm:$0xff]  }
  0x55   : > { %v493_v20 = vld [vmem:[%s12236_s26 + $0xf9] sm:$0xff]  ;;  %650 = vst [vmem:[#allocation3 + $0x28c] sm:$0xf] %v9952_v10  ;;  %v10017_v23 = vpack.c.bf16 %v8810_v17, %v8810_v17  ;;  %v11597_v34 = vld [vmem:[#allocation3 + $0x1bc] ss:$36 sps:$4 sm:$0xff]   ;;  %v2075_v35 = vld [vmem:[#allocation3 + $0x1d4] sm:$0xff]  ;;  %10712 = vmatprep.subr.bf16.mxu0 %v11624_v38 }
  0x56   : > { %3708 = vmatmul.mubr.bf16.gmra.mxu1 %v11587_v54  ;;  %v9955_v25 = vpack.c.bf16 %v493_v20, %v493_v20  ;;  %842 = vst [vmem:[#allocation3 + $0x290] sm:$0xf] %v9984_v15  ;;  %v685_v27 = vld [vmem:[%s12236_s26 + $0xfa] sm:$0xff]  ;;  %844 = vst [vmem:[#allocation3 + $0x2d8] sm:$0xf] %v9986_v30  ;;  %v11625_v39 = vld [vmem:[%s14109_s1 + $0x110] sm:$0xff]  }
  0x57   : > { %3715 = vmatprep.mubr.bf16.mxu1 %v11592_v6  ;;  %1036 = vst [vmem:[#allocation3 + $0x2b8] sm:$0xf] %v10017_v23  ;;  %461 = vst [vmem:[#allocation3 + $0x2f4] sm:$0xf] %v10017_v23  ;;  %v9987_v31 = vpack.c.bf16 %v685_v27, %v685_v27  ;;  %v2070_v33 = vld [vmem:[#allocation3 + $0x1b0] sm:$0xff]  ;;  %v494_v40 = vld [vmem:[%s12236_s26 + $0x109] sm:$0xff]  ;;  %10713 = vmatpush3.bf16.msra.mxu0 %v11625_v39 }
  0x58   : > { %653 = vst [vmem:[#allocation3 + $0x2f8] sm:$0xf] %v9955_v25  ;;  %1037 = vst [vmem:[#allocation3 + $0x2dc] sm:$0xf] %v10018_v32  ;;  %v9956_v41 = vpack.c.bf16 %v494_v40, %v494_v40  ;;  %v9229_v42 = vcombine.low %v2070_v33, %v2075_v35  ;;  %v495_v43 = vld [vmem:[%s12236_s26 + $0x111] sm:$0xff]  ;;  %v2080_v50 = vld [vmem:[#allocation3 + $0x1f8] sm:$0xff] }
  0x59   : > { %845 = vst [vmem:[#allocation3 + $0x2fc] sm:$0xf] %v9987_v31  ;;  %462 = vst [vmem:[#allocation3 + $0x318] sm:$0xf] %v10018_v32  ;;  %v686_v44 = vld [vmem:[%s12236_s26 + $0x10a] sm:$0xff]  ;;  %v9957_v46 = vpack.c.bf16 %v495_v43, %v495_v43  ;;  %v687_v52 = vld [vmem:[%s12236_s26 + $0x112] sm:$0xff] }
  0x5a   : > { %1038 = vst [vmem:[#allocation3 + $0x300] sm:$0xf] %v10019_v37  ;;  %463 = vst [vmem:[#allocation3 + $0x33c] sm:$0xf] %v10019_v37  ;;  %v11602_v45 = vld [vmem:[#allocation3 + $0x1fc] ss:$36 sps:$4 sm:$0xff]   ;;  %v9988_v47 = vpack.c.bf16 %v686_v44, %v686_v44  ;;  %v9989_v54 = vpack.c.bf16 %v687_v52, %v687_v52 }
  0x5b   : > { %3555 = vmatmul.mubr.bf16.gmra.mxu0 %v9220_v21  ;;  %654 = vst [vmem:[#allocation3 + $0x31c] sm:$0xf] %v9956_v41  ;;  %v11599_v48 = vld [vmem:[#allocation3 + $0x1b8] ss:$36 sps:$4 sm:$0xff]   ;;  %v11604_v49 = vld [vmem:[#allocation3 + $0x204] ss:$36 sps:$4 sm:$0xff]  }
  0x5c   : > { %3562 = vmatprep.mubr.bf16.mxu0 %v11595_v22  ;;  %v2085_v51 = vld [vmem:[#allocation3 + $0x21c] sm:$0xff]  ;;  %655 = vst [vmem:[#allocation3 + $0x340] sm:$0xf] %v9957_v46  ;;  %846 = vst [vmem:[#allocation3 + $0x320] sm:$0xf] %v9988_v47  ;;  %v8813_v53 = vld [vmem:[%s12236_s26 + $0x120] sm:$0xff] }
  0x5d   : > { %v8814_v55 = vld [vmem:[%s12236_s26 + $0x128] sm:$0xff]  ;;  %v10020_v56 = vpack.c.bf16 %v8813_v53, %v8813_v53  ;;  %v8815_v0 = vld [vmem:[%s12236_s26 + $0x138] sm:$0xff]  ;;  %847 = vst [vmem:[#allocation3 + $0x344] sm:$0xf] %v9989_v54  ;;  %v8816_v4 = vld [vmem:[%s12236_s26 + $0x140] sm:$0xff]  ;;  %v9238_v5 = vcombine.low %v2080_v50, %v2085_v51 }
  0x5e   : > { %3716 = vmatmul.mubr.bf16.gmra.mxu1 %v11594_v29  ;;  %v496_v57 = vld [vmem:[%s12236_s26 + $0x121] sm:$0xff]  ;;  %v497_v58 = vld [vmem:[%s12236_s26 + $0x129] sm:$0xff]  ;;  %v10021_v59 = vpack.c.bf16 %v8814_v55, %v8814_v55  ;;  %v10022_v3 = vpack.c.bf16 %v8815_v0, %v8815_v0  ;;  %v11607_v6 = vld [vmem:[#allocation3 + $0x244] ss:$36 sps:$4 sm:$0xff]   ;;  %v10023_v7 = vpack.c.bf16 %v8816_v4, %v8816_v4 }
  0x5f   : > { %3723 = vmatprep.mubr.bf16.mxu1 %v11597_v34  ;;  %v9958_v60 = vpack.c.bf16 %v496_v57, %v496_v57  ;;  %v9959_v61 = vpack.c.bf16 %v497_v58, %v497_v58  ;;  %v688_v62 = vld [vmem:[%s12236_s26 + $0x122] sm:$0xff]  ;;  %v689_v63 = vld [vmem:[%s12236_s26 + $0x12a] sm:$0xff]  ;;  %1039 = vst [vmem:[#allocation3 + $0x324] sm:$0xf] %v10020_v56  ;;  %464 = vst [vmem:[#allocation3 + $0x360] sm:$0xf] %v10020_v56 }
  0x60   : > { %v9990_v1 = vpack.c.bf16 %v688_v62, %v688_v62  ;;  %v9991_v2 = vpack.c.bf16 %v689_v63, %v689_v63  ;;  %1040 = vst [vmem:[#allocation3 + $0x348] sm:$0xf] %v10021_v59  ;;  %465 = vst [vmem:[#allocation3 + $0x384] sm:$0xf] %v10021_v59  ;;  %v11636_v8 = vld [vmem:[%s14109_s1 + $0x148] sm:$0xff]   ;;  %v2090_v12 = vld [vmem:[#allocation3 + $0x240] sm:$0xff] }
  0x61   : > { %656 = vst [vmem:[#allocation3 + $0x364] sm:$0xf] %v9958_v60  ;;  %657 = vst [vmem:[#allocation3 + $0x388] sm:$0xf] %v9959_v61  ;;  %v11637_v9 = vld [vmem:[%s14109_s1 + $0x108] sm:$0xff]   ;;  %10714 = vmatprep.subr.bf16.mxu0 %v11636_v8  ;;  %v2095_v13 = vld [vmem:[#allocation3 + $0x264] sm:$0xff] }
  0x62   : > { %848 = vst [vmem:[#allocation3 + $0x368] sm:$0xf] %v9990_v1  ;;  %849 = vst [vmem:[#allocation3 + $0x38c] sm:$0xf] %v9991_v2  ;;  %v11606_v10 = vld [vmem:[#allocation3 + $0x200] ss:$36 sps:$4 sm:$0xff]   ;;  %10715 = vmatpush3.bf16.msra.mxu0 %v11637_v9  ;;  %v9247_v19 = vcombine.low %v2090_v12, %v2095_v13 }
  0x63   : > { %3563 = vmatmul.mubr.bf16.gmra.mxu0 %v9229_v42  ;;  %1041 = vst [vmem:[#allocation3 + $0x36c] sm:$0xf] %v10022_v3  ;;  %466 = vst [vmem:[#allocation3 + $0x3a8] sm:$0xf] %v10022_v3  ;;  %v11609_v11 = vld [vmem:[#allocation3 + $0x24c] ss:$36 sps:$4 sm:$0xff]  }
  0x64   : > { %3570 = vmatprep.mubr.bf16.mxu0 %v11602_v45  ;;  %1042 = vst [vmem:[#allocation3 + $0x390] sm:$0xf] %v10023_v7  ;;  %467 = vst [vmem:[#allocation3 + $0x3cc] sm:$0xf] %v10023_v7  ;;  %v11638_v14 = vld [vmem:[%s14109_s1 + $0x1f8] sm:$0xff]   ;;  %v11640_v16 = vld [vmem:[%s14109_s1 + $0x1f0] sm:$0xff]  }
  0x65   : > { %v11639_v15 = vld [vmem:[%s14109_s1 + $0x1b8] sm:$0xff]   ;;  %10814 = vmatprep.subr.bf16.mxu1 %v11638_v14  ;;  %v499_v21 = vld [vmem:[%s12236_s26 + $0x141] sm:$0xff]  ;;  %v8817_v28 = vld [vmem:[%s12236_s26 + $0x150] sm:$0xff] }
  0x66   : > { %3724 = vmatmul.mubr.bf16.gmra.mxu1 %v11599_v48  ;;  %v498_v17 = vld [vmem:[%s12236_s26 + $0x139] sm:$0xff]  ;;  %v11616_v24 = vld [vmem:[#allocation3 + $0x294] ss:$36 sps:$4 sm:$0xff]   ;;  %v9961_v25 = vpack.c.bf16 %v499_v21, %v499_v21  ;;  %v10024_v33 = vpack.c.bf16 %v8817_v28, %v8817_v28  ;;  %v11645_v35 = vld [vmem:[%s14109_s1 + $0x1b0] sm:$0xff]  }
  0x67   : > { %3731 = vmatprep.mubr.bf16.mxu1 %v11604_v49  ;;  %v9960_v18 = vpack.c.bf16 %v498_v17, %v498_v17  ;;  %10815 = vmatpush3.bf16.msra.mxu1 %v11639_v15  ;;  %v11611_v20 = vld [vmem:[#allocation3 + $0x248] ss:$36 sps:$4 sm:$0xff]   ;;  %v691_v27 = vld [vmem:[%s12236_s26 + $0x142] sm:$0xff]  ;;  %v8820_v50 = vld [vmem:[%s12236_s26 + $0x170] sm:$0xff] }
  0x68   : > { %10816 = vmatprep.subr.bf16.mxu1 %v11640_v16  ;;  %v690_v22 = vld [vmem:[%s12236_s26 + $0x13a] sm:$0xff]  ;;  %659 = vst [vmem:[#allocation3 + $0x3d0] sm:$0xf] %v9961_v25  ;;  %v9993_v32 = vpack.c.bf16 %v691_v27, %v691_v27  ;;  %v11647_v36 = vld [vmem:[%s14109_s1 + $0x1e8] sm:$0xff]   ;;  %1043 = vst [vmem:[#allocation3 + $0x3b4] sm:$0xf] %v10024_v33  ;;  %v10027_v54 = vpack.c.bf16 %v8820_v50, %v8820_v50 }
  0x69   : > { %658 = vst [vmem:[#allocation3 + $0x3ac] sm:$0xf] %v9960_v18  ;;  %v11614_v23 = vld [vmem:[#allocation3 + $0x28c] ss:$36 sps:$4 sm:$0xff]   ;;  %v9992_v26 = vpack.c.bf16 %v690_v22, %v690_v22  ;;  %v11648_v37 = vld [vmem:[%s14109_s1 + $0x1a8] sm:$0xff]   ;;  %v500_v40 = vld [vmem:[%s12236_s26 + $0x151] sm:$0xff] }
  0x6a   : > { %v8818_v29 = vld [vmem:[%s12236_s26 + $0x158] sm:$0xff]  ;;  %851 = vst [vmem:[#allocation3 + $0x3d4] sm:$0xf] %v9993_v32  ;;  %468 = vst [vmem:[#allocation3 + $0x3f0] sm:$0xf] %v10024_v33  ;;  %v11649_v38 = vld [vmem:[%s14109_s1 + $0x1e0] sm:$0xff]   ;;  %v9962_v43 = vpack.c.bf16 %v500_v40, %v500_v40 }
  0x6b   : > { %3571 = vmatmul.mubr.bf16.gmra.mxu0 %v9238_v5  ;;  %v2100_v30 = vld [vmem:[#allocation3 + $0x288] sm:$0xff]  ;;  %850 = vst [vmem:[#allocation3 + $0x3b0] sm:$0xf] %v9992_v26  ;;  %v10025_v34 = vpack.c.bf16 %v8818_v29, %v8818_v29  ;;  %10817 = vmatpush3.bf16.msra.mxu1 %v11645_v35  ;;  %v11619_v39 = vld [vmem:[#allocation3 + $0x2d4] ss:$36 sps:$4 sm:$0xff]   ;;  %v11660_v1 = vld [vmem:[%s14109_s1 + $0x1d0] sm:$0xff]  }
  0x6c   : > { %3578 = vmatprep.mubr.bf16.mxu0 %v11607_v6  ;;  %v2105_v31 = vld [vmem:[#allocation3 + $0x2ac] sm:$0xff]  ;;  %10818 = vmatprep.subr.bf16.mxu1 %v11647_v36  ;;  %v692_v45 = vld [vmem:[%s12236_s26 + $0x152] sm:$0xff]  ;;  %v8819_v47 = vld [vmem:[%s12236_s26 + $0x168] sm:$0xff]  ;;  %660 = vst [vmem:[#allocation3 + $0x3f4] sm:$0xf] %v9962_v43 }
  0x6d   : > { %1044 = vst [vmem:[#allocation3 + $0x3d8] sm:$0xf] %v10025_v34  ;;  %469 = vst [vmem:[#allocation3 + $0x414] sm:$0xf] %v10025_v34  ;;  %v501_v41 = vld [vmem:[%s12236_s26 + $0x159] sm:$0xff]  ;;  %v9256_v42 = vcombine.low %v2100_v30, %v2105_v31  ;;  %v9994_v48 = vpack.c.bf16 %v692_v45, %v692_v45  ;;  %v10026_v51 = vpack.c.bf16 %v8819_v47, %v8819_v47  ;;  %v2115_v58 = vld [vmem:[#allocation3 + $0x2f4] sm:$0xff] }
  0x6e   : > { %3732 = vmatmul.mubr.bf16.gmra.mxu1 %v11606_v10  ;;  %v9963_v44 = vpack.c.bf16 %v501_v41, %v501_v41  ;;  %v693_v46 = vld [vmem:[%s12236_s26 + $0x15a] sm:$0xff]  ;;  %v11621_v53 = vld [vmem:[#allocation3 + $0x2dc] ss:$36 sps:$4 sm:$0xff]   ;;  %1046 = vst [vmem:[#allocation3 + $0x420] sm:$0xf] %v10027_v54  ;;  %v8920_v28 = vld [vmem:[%s12236_s26 + $0x22] sm:$0xff] }
  0x6f   : > { %3739 = vmatprep.mubr.bf16.mxu1 %v11609_v11  ;;  %10819 = vmatpush3.bf16.msra.mxu1 %v11648_v37  ;;  %v9995_v49 = vpack.c.bf16 %v693_v46, %v693_v46  ;;  %v11618_v52 = vld [vmem:[#allocation3 + $0x290] ss:$36 sps:$4 sm:$0xff]   ;;  %852 = vst [vmem:[#allocation3 + $0x3f8] sm:$0xf] %v9994_v48  ;;  %1045 = vst [vmem:[#allocation3 + $0x3fc] sm:$0xf] %v10026_v51  ;;  %v10063_v34 = vpack.c.bf16 %v8920_v28, %v8920_v28 }
  0x70   : > { %10820 = vmatprep.subr.bf16.mxu1 %v11649_v38  ;;  %661 = vst [vmem:[#allocation3 + $0x418] sm:$0xf] %v9963_v44  ;;  %v11654_v55 = vld [vmem:[%s14109_s1 + $0x1a0] sm:$0xff]   ;;  %470 = vst [vmem:[#allocation3 + $0x438] sm:$0xf] %v10026_v51  ;;  %v11658_v60 = vld [vmem:[%s14109_s1 + $0x1d8] sm:$0xff]  }
  0x71   : > { %853 = vst [vmem:[#allocation3 + $0x41c] sm:$0xf] %v9995_v49  ;;  %v11656_v56 = vld [vmem:[%s14109_s1 + $0x140] sm:$0xff]   ;;  %471 = vst [vmem:[#allocation3 + $0x45c] sm:$0xf] %v10027_v54  ;;  %v11659_v62 = vld [vmem:[%s14109_s1 + $0x198] sm:$0xff]  }
  0x72   : > { %v2110_v57 = vld [vmem:[#allocation3 + $0x2d0] sm:$0xff]  ;;  %10716 = vmatprep.subr.bf16.mxu0 %v11656_v56  ;;  %v11623_v63 = vld [vmem:[#allocation3 + $0x2d8] ss:$36 sps:$4 sm:$0xff]   ;;  %v11628_v5 = vld [vmem:[#allocation3 + $0x324] ss:$36 sps:$4 sm:$0xff]  }
  0x73   : > { %3579 = vmatmul.mubr.bf16.gmra.mxu0 %v9247_v19  ;;  %10821 = vmatpush3.bf16.msra.mxu1 %v11654_v55  ;;  %v11657_v59 = vld [vmem:[%s14109_s1 + $0x100] sm:$0xff]   ;;  %v9265_v61 = vcombine.low %v2110_v57, %v2115_v58  ;;  %v11626_v0 = vld [vmem:[#allocation3 + $0x31c] ss:$36 sps:$4 sm:$0xff]   ;;  %v11631_v18 = vld [vmem:[#allocation3 + $0x364] ss:$36 sps:$4 sm:$0xff]  }
  0x74   : > { %3586 = vmatprep.mubr.bf16.mxu0 %v11614_v23  ;;  %10717 = vmatpush3.bf16.msra.mxu0 %v11657_v59  ;;  %v502_v2 = vld [vmem:[%s12236_s26 + $0x169] sm:$0xff]  ;;  %v503_v7 = vld [vmem:[%s12236_s26 + $0x171] sm:$0xff]  ;;  %v8821_v13 = vld [vmem:[%s12236_s26 + $0x180] sm:$0xff]  ;;  %1402 = vst [vmem:[#allocation3 + $0x38] sm:$0xf] %v10063_v34 }
  0x75   : > { %10822 = vmatprep.subr.bf16.mxu1 %v11658_v60  ;;  %v2120_v3 = vld [vmem:[#allocation3 + $0x318] sm:$0xff]  ;;  %v9964_v6 = vpack.c.bf16 %v502_v2, %v502_v2  ;;  %v695_v9 = vld [vmem:[%s12236_s26 + $0x172] sm:$0xff]  ;;  %v9965_v10 = vpack.c.bf16 %v503_v7, %v503_v7  ;;  %v10028_v15 = vpack.c.bf16 %v8821_v13, %v8821_v13  ;;  %v11669_v23 = vld [vmem:[%s14109_s1 + $0x1c0] sm:$0xff]  }
  0x76   : > { %3740 = vmatmul.mubr.bf16.gmra.mxu1 %v11611_v20  ;;  %v2125_v4 = vld [vmem:[#allocation3 + $0x33c] sm:$0xff]  ;;  %v9997_v12 = vpack.c.bf16 %v695_v9, %v695_v9  ;;  %v8856_v25 = vld [vmem:[%s12236_s26 + $0x21] sm:$0xff]  ;;  %v2135_v30 = vld [vmem:[#allocation3 + $0x384] sm:$0xff] }
  0x77   : > { %3747 = vmatprep.mubr.bf16.mxu1 %v11616_v24  ;;  %10823 = vmatpush3.bf16.msra.mxu1 %v11659_v62  ;;  %v694_v8 = vld [vmem:[%s12236_s26 + $0x16a] sm:$0xff]  ;;  %662 = vst [vmem:[#allocation3 + $0x43c] sm:$0xf] %v9964_v6  ;;  %663 = vst [vmem:[#allocation3 + $0x460] sm:$0xf] %v9965_v10  ;;  %v9274_v20 = vcombine.low %v2120_v3, %v2125_v4  ;;  %v8855_v24 = vld [vmem:[%s12236_s26 + $0x19] sm:$0xff]  ;;  %v10031_v32 = vpack.c.bf16 %v8856_v25, %v8856_v25 }
  0x78   : > { %10824 = vmatprep.subr.bf16.mxu1 %v11660_v1  ;;  %v9996_v11 = vpack.c.bf16 %v694_v8, %v694_v8  ;;  %v8822_v14 = vld [vmem:[%s12236_s26 + $0x188] sm:$0xff]  ;;  %v11665_v17 = vld [vmem:[%s14109_s1 + $0x190] sm:$0xff]   ;;  %855 = vst [vmem:[#allocation3 + $0x464] sm:$0xf] %v9997_v12  ;;  %1047 = vst [vmem:[#allocation3 + $0x444] sm:$0xf] %v10028_v15  ;;  %v10030_v26 = vpack.c.bf16 %v8855_v24, %v8855_v24 }
  0x79   : > { %v10029_v16 = vpack.c.bf16 %v8822_v14, %v8822_v14  ;;  %v11667_v19 = vld [vmem:[%s14109_s1 + $0x1c8] sm:$0xff]   ;;  %v11630_v21 = vld [vmem:[#allocation3 + $0x320] ss:$36 sps:$4 sm:$0xff]   ;;  %v8919_v27 = vld [vmem:[%s12236_s26 + $0x1a] sm:$0xff]  ;;  %1210 = vst [vmem:[#allocation3 + $0x34] sm:$0xf] %v10031_v32 }
  0x7a   : > { %854 = vst [vmem:[#allocation3 + $0x440] sm:$0xf] %v9996_v11  ;;  %v11668_v22 = vld [vmem:[%s14109_s1 + $0x188] sm:$0xff]   ;;  %v2130_v29 = vld [vmem:[#allocation3 + $0x360] sm:$0xff]  ;;  %v11633_v31 = vld [vmem:[#allocation3 + $0x36c] ss:$36 sps:$4 sm:$0xff]   ;;  %v10062_v33 = vpack.c.bf16 %v8919_v27, %v8919_v27 }
  0x7b   : > { %3587 = vmatmul.mubr.bf16.gmra.mxu0 %v9256_v42  ;;  %1048 = vst [vmem:[#allocation3 + $0x468] sm:$0xf] %v10029_v16  ;;  %10825 = vmatpush3.bf16.msra.mxu1 %v11665_v17  ;;  %1209 = vst [vmem:[#allocation3 + $0x10] sm:$0xf] %v10030_v26  ;;  %v11672_v35 = vld [vmem:[%s14109_s1 + $0x180] sm:$0xff]   ;;  %v12461_v36 = vld [vmem:[%s14109_s1 + $0x238] sm:$0xff]   ;;  %v9283_v43 = vcombine.low %v2130_v29, %v2135_v30 }
  0x7c   : > { %3594 = vmatprep.mubr.bf16.mxu0 %v11619_v39  ;;  %10826 = vmatprep.subr.bf16.mxu1 %v11667_v19  ;;  %1401 = vst [vmem:[#allocation3 + $0x14] sm:$0xf] %v10062_v33  ;;  %v8983_v37 = vld [vmem:[%s12236_s26 + $0x30] sm:$0xff]  ;;  %v8984_v38 = vld [vmem:[%s12236_s26 + $0x38] sm:$0xff]  ;;  %v11643_v48 = vld [vmem:[#allocation3 + $0x3b4] ss:$36 sps:$4 sm:$0xff]  }
  0x7d   : > { %v10094_v39 = vpack.c.bf16 %v8983_v37, %v8983_v37  ;;  %v10095_v40 = vpack.c.bf16 %v8984_v38, %v8984_v38  ;;  %v9047_v41 = vld [vmem:[%s12236_s26 + $0x31] sm:$0xff]  ;;  %11422 = vmatprep.subr.bf16.mxu0 %v12461_v36  ;;  %v11641_v45 = vld [vmem:[#allocation3 + $0x3ac] ss:$36 sps:$4 sm:$0xff]   ;;  %v9049_v57 = vld [vmem:[%s12236_s26 + $0x49] sm:$0xff] }
  0x7e   : > { %3748 = vmatmul.mubr.bf16.gmra.mxu1 %v11618_v52  ;;  %v10126_v42 = vpack.c.bf16 %v9047_v41, %v9047_v41  ;;  %v11635_v44 = vld [vmem:[#allocation3 + $0x368] ss:$36 sps:$4 sm:$0xff]   ;;  %v8985_v52 = vld [vmem:[%s12236_s26 + $0x48] sm:$0xff]  ;;  %v10128_v60 = vpack.c.bf16 %v9049_v57, %v9049_v57  ;;  %v8987_v3 = vld [vmem:[%s12236_s26 + $0x60] sm:$0xff] }
  0x7f   : > { %3755 = vmatprep.mubr.bf16.mxu1 %v11621_v53  ;;  %10827 = vmatpush3.bf16.msra.mxu1 %v11668_v22  ;;  %1594 = vst [vmem:[#allocation3 + $0x18] sm:$0xf] %v10094_v39  ;;  %1595 = vst [vmem:[#allocation3 + $0x3c] sm:$0xf] %v10095_v40  ;;  %v9048_v46 = vld [vmem:[%s12236_s26 + $0x39] sm:$0xff]  ;;  %v8986_v53 = vld [vmem:[%s12236_s26 + $0x50] sm:$0xff]  ;;  %v10096_v55 = vpack.c.bf16 %v8985_v52, %v8985_v52 }
  0x80   : > { %10828 = vmatprep.subr.bf16.mxu1 %v11669_v23  ;;  %v8921_v47 = vld [vmem:[%s12236_s26 + $0x32] sm:$0xff]  ;;  %v10127_v49 = vpack.c.bf16 %v9048_v46, %v9048_v46  ;;  %1786 = vst [vmem:[#allocation3 + $0x1c] sm:$0xf] %v10126_v42  ;;  %1211 = vst [vmem:[#allocation3 + $0x58] sm:$0xf] %v10126_v42  ;;  %v8922_v50 = vld [vmem:[%s12236_s26 + $0x3a] sm:$0xff]  ;;  %v10097_v56 = vpack.c.bf16 %v8986_v53, %v8986_v53 }
  0x81   : > { %v10064_v51 = vpack.c.bf16 %v8921_v47, %v8921_v47  ;;  %v10065_v54 = vpack.c.bf16 %v8922_v50, %v8922_v50  ;;  %v9050_v58 = vld [vmem:[%s12236_s26 + $0x51] sm:$0xff]  ;;  %1596 = vst [vmem:[#allocation3 + $0x60] sm:$0xf] %v10096_v55  ;;  %v2145_v2 = vld [vmem:[#allocation3 + $0x3cc] sm:$0xff]  ;;  %1788 = vst [vmem:[#allocation3 + $0x64] sm:$0xf] %v10128_v60 }
  0x82   : > { %v8923_v59 = vld [vmem:[%s12236_s26 + $0x4a] sm:$0xff]  ;;  %1787 = vst [vmem:[#allocation3 + $0x40] sm:$0xf] %v10127_v49  ;;  %1212 = vst [vmem:[#allocation3 + $0x7c] sm:$0xf] %v10127_v49  ;;  %v8924_v62 = vld [vmem:[%s12236_s26 + $0x52] sm:$0xff] }
  0x83   : > { %3595 = vmatmul.mubr.bf16.gmra.mxu0 %v9265_v61  ;;  %10829 = vmatpush3.bf16.msra.mxu1 %v11672_v35  ;;  %1403 = vst [vmem:[#allocation3 + $0x5c] sm:$0xf] %v10064_v51  ;;  %v10129_v61 = vpack.c.bf16 %v9050_v58, %v9050_v58  ;;  %1404 = vst [vmem:[#allocation3 + $0x80] sm:$0xf] %v10065_v54  ;;  %v2140_v1 = vld [vmem:[#allocation3 + $0x3a8] sm:$0xff]  ;;  %v8988_v4 = vld [vmem:[%s12236_s26 + $0x68] sm:$0xff] }
  0x84   : > { %3602 = vmatprep.mubr.bf16.mxu0 %v11626_v0  ;;  %1597 = vst [vmem:[#allocation3 + $0x84] sm:$0xf] %v10097_v56  ;;  %v10067_v0 = vpack.c.bf16 %v8924_v62, %v8924_v62  ;;  %1213 = vst [vmem:[#allocation3 + $0xa0] sm:$0xf] %v10128_v60  ;;  %v9051_v6 = vld [vmem:[%s12236_s26 + $0x61] sm:$0xff]  ;;  %v9052_v7 = vld [vmem:[%s12236_s26 + $0x69] sm:$0xff]  ;;  %v10099_v9 = vpack.c.bf16 %v8988_v4, %v8988_v4  ;;  %v9292_v15 = vcombine.low %v2140_v1, %v2145_v2 }
  0x85   : > { %1789 = vst [vmem:[#allocation3 + $0x88] sm:$0xf] %v10129_v61  ;;  %1214 = vst [vmem:[#allocation3 + $0xc4] sm:$0xf] %v10129_v61  ;;  %v11650_v8 = vld [vmem:[#allocation3 + $0x3f4] ss:$36 sps:$4 sm:$0xff]   ;;  %v10130_v10 = vpack.c.bf16 %v9051_v6, %v9051_v6  ;;  %v10131_v11 = vpack.c.bf16 %v9052_v7, %v9052_v7 }
  0x86   : > { %3756 = vmatmul.mubr.bf16.gmra.mxu1 %v11623_v63  ;;  %v10066_v63 = vpack.c.bf16 %v8923_v59, %v8923_v59  ;;  %1406 = vst [vmem:[#allocation3 + $0xc8] sm:$0xf] %v10067_v0  ;;  %v8925_v12 = vld [vmem:[%s12236_s26 + $0x62] sm:$0xff]  ;;  %v8926_v13 = vld [vmem:[%s12236_s26 + $0x6a] sm:$0xff]  ;;  %v8989_v14 = vld [vmem:[%s12236_s26 + $0x78] sm:$0xff] }
  0x87   : > { %3763 = vmatprep.mubr.bf16.mxu1 %v11628_v5  ;;  %v10098_v5 = vpack.c.bf16 %v8987_v3, %v8987_v3  ;;  %v10068_v16 = vpack.c.bf16 %v8925_v12, %v8925_v12  ;;  %v10069_v17 = vpack.c.bf16 %v8926_v13, %v8926_v13  ;;  %v10100_v19 = vpack.c.bf16 %v8989_v14, %v8989_v14  ;;  %v9054_v22 = vld [vmem:[%s12236_s26 + $0x81] sm:$0xff]  ;;  %v11652_v30 = vld [vmem:[#allocation3 + $0x3fc] ss:$36 sps:$4 sm:$0xff]   ;;  %v11663_v37 = vld [vmem:[#allocation3 + $0x444] ss:$36 sps:$4 sm:$0xff]  }
  0x88   : > { %1405 = vst [vmem:[#allocation3 + $0xa4] sm:$0xf] %v10066_v63  ;;  %1599 = vst [vmem:[#allocation3 + $0xcc] sm:$0xf] %v10099_v9  ;;  %v8927_v24 = vld [vmem:[%s12236_s26 + $0x7a] sm:$0xff]  ;;  %v8928_v25 = vld [vmem:[%s12236_s26 + $0x82] sm:$0xff]  ;;  %v10133_v27 = vpack.c.bf16 %v9054_v22, %v9054_v22 }
  0x89   : > { %1598 = vst [vmem:[#allocation3 + $0xa8] sm:$0xf] %v10098_v5  ;;  %1790 = vst [vmem:[#allocation3 + $0xac] sm:$0xf] %v10130_v10  ;;  %v11646_v26 = vld [vmem:[#allocation3 + $0x3b0] ss:$36 sps:$4 sm:$0xff]   ;;  %v10070_v28 = vpack.c.bf16 %v8927_v24, %v8927_v24  ;;  %v10071_v29 = vpack.c.bf16 %v8928_v25, %v8928_v25 }
  0x8a   : > { %1791 = vst [vmem:[#allocation3 + $0xd0] sm:$0xf] %v10131_v11  ;;  %1215 = vst [vmem:[#allocation3 + $0xe8] sm:$0xf] %v10130_v10  ;;  %v2155_v32 = vld [vmem:[#allocation3 + $0x414] sm:$0xff]  ;;  %v2165_v39 = vld [vmem:[#allocation3 + $0x45c] sm:$0xff] }
  0x8b   : > { %3603 = vmatmul.mubr.bf16.gmra.mxu0 %v9274_v20  ;;  %v9053_v20 = vld [vmem:[%s12236_s26 + $0x79] sm:$0xff]  ;;  %1216 = vst [vmem:[#allocation3 + $0x10c] sm:$0xf] %v10131_v11  ;;  %1407 = vst [vmem:[#allocation3 + $0xec] sm:$0xf] %v10068_v16  ;;  %v2160_v38 = vld [vmem:[#allocation3 + $0x438] sm:$0xff] }
  0x8c   : > { %3610 = vmatprep.mubr.bf16.mxu0 %v11631_v18  ;;  %v8990_v18 = vld [vmem:[%s12236_s26 + $0x80] sm:$0xff]  ;;  %v10132_v23 = vpack.c.bf16 %v9053_v20, %v9053_v20  ;;  %1408 = vst [vmem:[#allocation3 + $0x110] sm:$0xf] %v10069_v17  ;;  %1600 = vst [vmem:[#allocation3 + $0xf0] sm:$0xf] %v10100_v19  ;;  %v8991_v40 = vld [vmem:[%s12236_s26 + $0x90] sm:$0xff]  ;;  %v9310_v54 = vcombine.low %v2160_v38, %v2165_v39 }
  0x8d   : > { %1793 = vst [vmem:[#allocation3 + $0x118] sm:$0xf] %v10133_v27  ;;  %1218 = vst [vmem:[#allocation3 + $0x154] sm:$0xf] %v10133_v27  ;;  %v11661_v34 = vld [vmem:[#allocation3 + $0x43c] ss:$36 sps:$4 sm:$0xff]   ;;  %v10102_v42 = vpack.c.bf16 %v8991_v40, %v8991_v40 }
  0x8e   : > { %3764 = vmatmul.mubr.bf16.gmra.mxu1 %v11630_v21  ;;  %v10101_v21 = vpack.c.bf16 %v8990_v18, %v8990_v18  ;;  %1792 = vst [vmem:[#allocation3 + $0xf4] sm:$0xf] %v10132_v23  ;;  %1217 = vst [vmem:[#allocation3 + $0x130] sm:$0xf] %v10132_v23  ;;  %v11655_v35 = vld [vmem:[#allocation3 + $0x3f8] ss:$36 sps:$4 sm:$0xff]  }
  0x8f   : > { %3771 = vmatprep.mubr.bf16.mxu1 %v11633_v31  ;;  %1409 = vst [vmem:[#allocation3 + $0x134] sm:$0xf] %v10070_v28  ;;  %1410 = vst [vmem:[#allocation3 + $0x158] sm:$0xf] %v10071_v29  ;;  %v2150_v31 = vld [vmem:[#allocation3 + $0x3f0] sm:$0xff]  ;;  %v8992_v41 = vld [vmem:[%s12236_s26 + $0x98] sm:$0xff] }
  0x90   : > { %1601 = vst [vmem:[#allocation3 + $0x114] sm:$0xf] %v10101_v21  ;;  %v9301_v33 = vcombine.low %v2150_v31, %v2155_v32  ;;  %v8929_v46 = vld [vmem:[%s12236_s26 + $0x92] sm:$0xff]  ;;  %v11670_v47 = vld [vmem:[#allocation3 + $0x14] ss:$36 sps:$4 sm:$0xff]   ;;  %v8930_v50 = vld [vmem:[%s12236_s26 + $0x9a] sm:$0xff] }
  0x91   : > { %v10072_v51 = vpack.c.bf16 %v8929_v46, %v8929_v46  ;;  %v8993_v52 = vld [vmem:[%s12236_s26 + $0xa8] sm:$0xff]  ;;  %v8994_v53 = vld [vmem:[%s12236_s26 + $0xb0] sm:$0xff]  ;;  %1602 = vst [vmem:[#allocation3 + $0x138] sm:$0xf] %v10102_v42  ;;  %v10073_v56 = vpack.c.bf16 %v8930_v50, %v8930_v50  ;;  %v8995_v4 = vld [vmem:[%s12236_s26 + $0xc0] sm:$0xff] }
  0x92   : > { %v11666_v55 = vld [vmem:[#allocation3 + $0x440] ss:$36 sps:$4 sm:$0xff]   ;;  %v10104_v57 = vpack.c.bf16 %v8993_v52, %v8993_v52  ;;  %v10105_v58 = vpack.c.bf16 %v8994_v53, %v8994_v53  ;;  %v8996_v5 = vld [vmem:[%s12236_s26 + $0xc8] sm:$0xff]  ;;  %v10106_v6 = vpack.c.bf16 %v8995_v4, %v8995_v4  ;;  %v8998_v16 = vld [vmem:[%s12236_s26 + $0xe0] sm:$0xff] }
  0x93   : > { %3611 = vmatmul.mubr.bf16.gmra.mxu0 %v9283_v43  ;;  %v10103_v43 = vpack.c.bf16 %v8992_v41, %v8992_v41  ;;  %v9057_v59 = vld [vmem:[%s12236_s26 + $0xa9] sm:$0xff]  ;;  %v9058_v60 = vld [vmem:[%s12236_s26 + $0xb1] sm:$0xff]  ;;  %1411 = vst [vmem:[#allocation3 + $0x17c] sm:$0xf] %v10072_v51  ;;  %1412 = vst [vmem:[#allocation3 + $0x1a0] sm:$0xf] %v10073_v56  ;;  %v10107_v7 = vpack.c.bf16 %v8996_v5, %v8996_v5  ;;  %v10109_v19 = vpack.c.bf16 %v8998_v16, %v8998_v16 }
  0x94   : > { %3618 = vmatprep.mubr.bf16.mxu0 %v11641_v45  ;;  %v9056_v45 = vld [vmem:[%s12236_s26 + $0x99] sm:$0xff]  ;;  %v8931_v61 = vld [vmem:[%s12236_s26 + $0xaa] sm:$0xff]  ;;  %v10136_v62 = vpack.c.bf16 %v9057_v59, %v9057_v59  ;;  %v10137_v63 = vpack.c.bf16 %v9058_v60, %v9058_v60  ;;  %1604 = vst [vmem:[#allocation3 + $0x180] sm:$0xf] %v10104_v57  ;;  %1605 = vst [vmem:[#allocation3 + $0x1a4] sm:$0xf] %v10105_v58 }
  0x95   : > { %v10135_v49 = vpack.c.bf16 %v9056_v45, %v9056_v45  ;;  %1603 = vst [vmem:[#allocation3 + $0x15c] sm:$0xf] %v10103_v43  ;;  %v8932_v0 = vld [vmem:[%s12236_s26 + $0xb2] sm:$0xff]  ;;  %v10074_v1 = vpack.c.bf16 %v8931_v61, %v8931_v61  ;;  %v9060_v9 = vld [vmem:[%s12236_s26 + $0xc9] sm:$0xff]  ;;  %1606 = vst [vmem:[#allocation3 + $0x1c8] sm:$0xf] %v10106_v6 }
  0x96   : > { %3772 = vmatmul.mubr.bf16.gmra.mxu1 %v11635_v44  ;;  %v9055_v44 = vld [vmem:[%s12236_s26 + $0x91] sm:$0xff]  ;;  %v10075_v3 = vpack.c.bf16 %v8932_v0, %v8932_v0  ;;  %1796 = vst [vmem:[#allocation3 + $0x184] sm:$0xf] %v10136_v62  ;;  %1797 = vst [vmem:[#allocation3 + $0x1a8] sm:$0xf] %v10137_v63  ;;  %v8933_v10 = vld [vmem:[%s12236_s26 + $0xc2] sm:$0xff]  ;;  %v10139_v12 = vpack.c.bf16 %v9060_v9, %v9060_v9 }
  0x97   : > { %3779 = vmatprep.mubr.bf16.mxu1 %v11643_v48  ;;  %v10134_v48 = vpack.c.bf16 %v9055_v44, %v9055_v44  ;;  %1795 = vst [vmem:[#allocation3 + $0x160] sm:$0xf] %v10135_v49  ;;  %1220 = vst [vmem:[#allocation3 + $0x19c] sm:$0xf] %v10135_v49  ;;  %v11675_v2 = vld [vmem:[#allocation3 + $0x1c] ss:$36 sps:$4 sm:$0xff]   ;;  %v10076_v14 = vpack.c.bf16 %v8933_v10, %v8933_v10 }
  0x98   : > { %1221 = vst [vmem:[#allocation3 + $0x1c0] sm:$0xf] %v10136_v62  ;;  %1222 = vst [vmem:[#allocation3 + $0x1e4] sm:$0xf] %v10137_v63  ;;  %v8934_v13 = vld [vmem:[%s12236_s26 + $0xca] sm:$0xff]  ;;  %v9061_v20 = vld [vmem:[%s12236_s26 + $0xd9] sm:$0xff] }
  0x99   : > { %1794 = vst [vmem:[#allocation3 + $0x13c] sm:$0xf] %v10134_v48  ;;  %1219 = vst [vmem:[#allocation3 + $0x178] sm:$0xf] %v10134_v48  ;;  %v10077_v17 = vpack.c.bf16 %v8934_v13, %v8934_v13  ;;  %v9062_v21 = vld [vmem:[%s12236_s26 + $0xe1] sm:$0xff]  ;;  %v10140_v23 = vpack.c.bf16 %v9061_v20, %v9061_v20  ;;  %v8999_v28 = vld [vmem:[%s12236_s26 + $0xf0] sm:$0xff] }
  0x9a   : > { %1413 = vst [vmem:[#allocation3 + $0x1c4] sm:$0xf] %v10074_v1  ;;  %1414 = vst [vmem:[#allocation3 + $0x1e8] sm:$0xf] %v10075_v3  ;;  %v8935_v22 = vld [vmem:[%s12236_s26 + $0xda] sm:$0xff]  ;;  %v10141_v24 = vpack.c.bf16 %v9062_v21, %v9062_v21  ;;  %v8936_v25 = vld [vmem:[%s12236_s26 + $0xe2] sm:$0xff]  ;;  %v10110_v31 = vpack.c.bf16 %v8999_v28, %v8999_v28 }
  0x9b   : > { %3619 = vmatmul.mubr.bf16.gmra.mxu0 %v9292_v15  ;;  %v8997_v15 = vld [vmem:[%s12236_s26 + $0xd8] sm:$0xff]  ;;  %1607 = vst [vmem:[#allocation3 + $0x1ec] sm:$0xf] %v10107_v7  ;;  %1799 = vst [vmem:[#allocation3 + $0x1f0] sm:$0xf] %v10139_v12  ;;  %v10079_v27 = vpack.c.bf16 %v8936_v25, %v8936_v25  ;;  %v11700_v38 = vld [vmem:[%s14109_s1 + $0x228] sm:$0xff]  }
  0x9c   : > { %3626 = vmatprep.mubr.bf16.mxu0 %v11650_v8  ;;  %v9059_v8 = vld [vmem:[%s12236_s26 + $0xc1] sm:$0xff]  ;;  %v10108_v18 = vpack.c.bf16 %v8997_v15, %v8997_v15  ;;  %1224 = vst [vmem:[#allocation3 + $0x22c] sm:$0xf] %v10139_v12  ;;  %1415 = vst [vmem:[#allocation3 + $0x20c] sm:$0xf] %v10076_v14  ;;  %v9000_v29 = vld [vmem:[%s12236_s26 + $0xf8] sm:$0xff] }
  0x9d   : > { %v10138_v11 = vpack.c.bf16 %v9059_v8, %v9059_v8  ;;  %1416 = vst [vmem:[#allocation3 + $0x230] sm:$0xf] %v10077_v17  ;;  %1609 = vst [vmem:[#allocation3 + $0x234] sm:$0xf] %v10109_v19  ;;  %v10111_v32 = vpack.c.bf16 %v9000_v29, %v9000_v29  ;;  %v11680_v39 = vld [vmem:[#allocation3 + $0x58] ss:$36 sps:$4 sm:$0xff]  }
  0x9e   : > { %3780 = vmatmul.mubr.bf16.gmra.mxu1 %v11646_v26  ;;  %v10078_v26 = vpack.c.bf16 %v8935_v22, %v8935_v22  ;;  %1608 = vst [vmem:[#allocation3 + $0x210] sm:$0xf] %v10108_v18  ;;  %1800 = vst [vmem:[#allocation3 + $0x214] sm:$0xf] %v10140_v23  ;;  %v11683_v40 = vld [vmem:[#allocation3 + $0x60] ss:$36 sps:$4 sm:$0xff]  }
  0x9f   : > { %3787 = vmatprep.mubr.bf16.mxu1 %v11652_v30  ;;  %1798 = vst [vmem:[#allocation3 + $0x1cc] sm:$0xf] %v10138_v11  ;;  %1223 = vst [vmem:[#allocation3 + $0x208] sm:$0xf] %v10138_v11  ;;  %v11673_v30 = vld [vmem:[#allocation3 + $0x10] ss:$36 sps:$4 sm:$0xff]  }
  0xa0   : > { %1801 = vst [vmem:[#allocation3 + $0x238] sm:$0xf] %v10141_v24  ;;  %1225 = vst [vmem:[#allocation3 + $0x250] sm:$0xf] %v10140_v23  ;;  %v11684_v41 = vld [vmem:[#allocation3 + $0xa4] ss:$36 sps:$4 sm:$0xff]  }
  0xa1   : > { %1226 = vst [vmem:[#allocation3 + $0x274] sm:$0xf] %v10141_v24  ;;  %1417 = vst [vmem:[#allocation3 + $0x254] sm:$0xf] %v10078_v26  ;;  %v11688_v42 = vld [vmem:[#allocation3 + $0xac] ss:$36 sps:$4 sm:$0xff]  }
  0xa2   : > { %1418 = vst [vmem:[#allocation3 + $0x278] sm:$0xf] %v10079_v27  ;;  %1610 = vst [vmem:[#allocation3 + $0x258] sm:$0xf] %v10110_v31  ;;  %v9063_v43 = vld [vmem:[%s12236_s26 + $0xf1] sm:$0xff]  ;;  %v9064_v44 = vld [vmem:[%s12236_s26 + $0xf9] sm:$0xff] }
  0xa3   : > { %3627 = vmatmul.mubr.bf16.gmra.mxu0 %v9301_v33  ;;  %v11678_v33 = vld [vmem:[#allocation3 + $0x5c] ss:$36 sps:$4 sm:$0xff]   ;;  %1611 = vst [vmem:[#allocation3 + $0x27c] sm:$0xf] %v10111_v32  ;;  %v10142_v45 = vpack.c.bf16 %v9063_v43, %v9063_v43  ;;  %v10143_v48 = vpack.c.bf16 %v9064_v44, %v9064_v44  ;;  %v12537_v61 = vld [vmem:[%s14109_s1 + $0x218] sm:$0xff]   ;;  %v9067_v4 = vld [vmem:[%s12236_s26 + $0x121] sm:$0xff] }
  0xa4   : > { %3634 = vmatprep.mubr.bf16.mxu0 %v11661_v34  ;;  %v11677_v34 = vld [vmem:[#allocation3 + $0x18] ss:$36 sps:$4 sm:$0xff]   ;;  %v8937_v46 = vld [vmem:[%s12236_s26 + $0xf2] sm:$0xff]  ;;  %v11691_v1 = vld [vmem:[#allocation3 + $0xec] ss:$36 sps:$4 sm:$0xff]   ;;  %v10146_v10 = vpack.c.bf16 %v9067_v4, %v9067_v4 }
  0xa5   : > { %v10080_v49 = vpack.c.bf16 %v8937_v46, %v8937_v46  ;;  %v9001_v51 = vld [vmem:[%s12236_s26 + $0x108] sm:$0xff]  ;;  %v9002_v52 = vld [vmem:[%s12236_s26 + $0x110] sm:$0xff]  ;;  %1802 = vst [vmem:[#allocation3 + $0x25c] sm:$0xf] %v10142_v45  ;;  %1227 = vst [vmem:[#allocation3 + $0x298] sm:$0xf] %v10142_v45 }
  0xa6   : > { %3788 = vmatmul.mubr.bf16.gmra.mxu1 %v11655_v35  ;;  %v11687_v35 = vld [vmem:[%s14109_s1 + $0x230] sm:$0xff]   ;;  %1803 = vst [vmem:[#allocation3 + $0x280] sm:$0xf] %v10143_v48  ;;  %1228 = vst [vmem:[#allocation3 + $0x2bc] sm:$0xf] %v10143_v48  ;;  %v9004_v3 = vld [vmem:[%s12236_s26 + $0x128] sm:$0xff] }
  0xa7   : > { %3795 = vmatprep.mubr.bf16.mxu1 %v11663_v37  ;;  %v11681_v37 = vld [vmem:[#allocation3 + $0x64] ss:$36 sps:$4 sm:$0xff]   ;;  %v9065_v53 = vld [vmem:[%s12236_s26 + $0x109] sm:$0xff]  ;;  %1419 = vst [vmem:[#allocation3 + $0x29c] sm:$0xf] %v10080_v49  ;;  %v10115_v8 = vpack.c.bf16 %v9004_v3, %v9004_v3  ;;  %v9006_v17 = vld [vmem:[%s12236_s26 + $0x140] sm:$0xff] }
  0xa8   : > { %v9066_v56 = vld [vmem:[%s12236_s26 + $0x111] sm:$0xff]  ;;  %v10144_v57 = vpack.c.bf16 %v9065_v53, %v9065_v53  ;;  %1994 = vst [vmem:[#allocation3 + $0x260] sm:$0xf] %v10080_v49  ;;  %v9068_v9 = vld [vmem:[%s12236_s26 + $0x129] sm:$0xff]  ;;  %v9069_v18 = vld [vmem:[%s12236_s26 + $0x139] sm:$0xff]  ;;  %v10117_v20 = vpack.c.bf16 %v9006_v17, %v9006_v17 }
  0xa9   : > { %v8939_v58 = vld [vmem:[%s12236_s26 + $0x10a] sm:$0xff]  ;;  %v8940_v59 = vld [vmem:[%s12236_s26 + $0x112] sm:$0xff]  ;;  %v10145_v62 = vpack.c.bf16 %v9066_v56, %v9066_v56  ;;  %v8941_v11 = vld [vmem:[%s12236_s26 + $0x122] sm:$0xff]  ;;  %v10147_v13 = vpack.c.bf16 %v9068_v9, %v9068_v9  ;;  %1615 = vst [vmem:[#allocation3 + $0x30c] sm:$0xf] %v10115_v8  ;;  %v10148_v22 = vpack.c.bf16 %v9069_v18, %v9069_v18 }
  0xaa   : > { %v11686_v60 = vld [vmem:[#allocation3 + $0xa0] ss:$36 sps:$4 sm:$0xff]   ;;  %v10082_v63 = vpack.c.bf16 %v8939_v58, %v8939_v58  ;;  %v10083_v0 = vpack.c.bf16 %v8940_v59, %v8940_v59  ;;  %1804 = vst [vmem:[#allocation3 + $0x2a4] sm:$0xf] %v10144_v57  ;;  %1229 = vst [vmem:[#allocation3 + $0x2e0] sm:$0xf] %v10144_v57  ;;  %v10084_v14 = vpack.c.bf16 %v8941_v11, %v8941_v11 }
  0xab   : > { %3635 = vmatmul.mubr.bf16.gmra.mxu0 %v9310_v54  ;;  %v10112_v54 = vpack.c.bf16 %v9001_v51, %v9001_v51  ;;  %v11690_v5 = vld [vmem:[#allocation3 + $0xa8] ss:$36 sps:$4 sm:$0xff]   ;;  %1805 = vst [vmem:[#allocation3 + $0x2c8] sm:$0xf] %v10145_v62  ;;  %1230 = vst [vmem:[#allocation3 + $0x304] sm:$0xf] %v10145_v62 }
  0xac   : > { %3836 = vmatprep.mubr.bf16.mxu0 %v11670_v47  ;;  %v8938_v47 = vld [vmem:[%s12236_s26 + $0xfa] sm:$0xff]  ;;  %1421 = vst [vmem:[#allocation3 + $0x2e4] sm:$0xf] %v10082_v63  ;;  %1422 = vst [vmem:[#allocation3 + $0x308] sm:$0xf] %v10083_v0  ;;  %v11739_v6 = vld [vmem:[%s14109_s1 + $0x210] sm:$0xff]  }
  0xad   : > { %v10081_v50 = vpack.c.bf16 %v8938_v47, %v8938_v47  ;;  %1612 = vst [vmem:[#allocation3 + $0x2a0] sm:$0xf] %v10112_v54  ;;  %v8942_v12 = vld [vmem:[%s12236_s26 + $0x12a] sm:$0xff]  ;;  %1996 = vst [vmem:[#allocation3 + $0x2a8] sm:$0xf] %v10082_v63  ;;  %v9005_v16 = vld [vmem:[%s12236_s26 + $0x138] sm:$0xff] }
  0xae   : > { %3796 = vmatmul.mubr.bf16.gmra.mxu1 %v11666_v55  ;;  %v10113_v55 = vpack.c.bf16 %v9002_v52, %v9002_v52  ;;  %1997 = vst [vmem:[#allocation3 + $0x2cc] sm:$0xf] %v10083_v0  ;;  %v10085_v15 = vpack.c.bf16 %v8942_v12, %v8942_v12  ;;  %1806 = vst [vmem:[#allocation3 + $0x2ec] sm:$0xf] %v10146_v10  ;;  %v10116_v19 = vpack.c.bf16 %v9005_v16, %v9005_v16  ;;  %v9070_v21 = vld [vmem:[%s12236_s26 + $0x141] sm:$0xff]  ;;  %v9007_v29 = vld [vmem:[%s12236_s26 + $0x150] sm:$0xff] }
  0xaf   : > { %3997 = vmatprep.mubr.bf16.mxu1 %v11675_v2  ;;  %1420 = vst [vmem:[#allocation3 + $0x2c0] sm:$0xf] %v10081_v50  ;;  %1995 = vst [vmem:[#allocation3 + $0x284] sm:$0xf] %v10081_v50  ;;  %v9003_v2 = vld [vmem:[%s12236_s26 + $0x120] sm:$0xff]  ;;  %v10149_v26 = vpack.c.bf16 %v9070_v21, %v9070_v21  ;;  %v10118_v31 = vpack.c.bf16 %v9007_v29, %v9007_v29  ;;  %v8945_v45 = vld [vmem:[%s12236_s26 + $0x152] sm:$0xff] }
  0xb0   : > { %1613 = vst [vmem:[#allocation3 + $0x2c4] sm:$0xf] %v10113_v55  ;;  %v10114_v7 = vpack.c.bf16 %v9003_v2, %v9003_v2  ;;  %1231 = vst [vmem:[#allocation3 + $0x328] sm:$0xf] %v10146_v10  ;;  %v8943_v23 = vld [vmem:[%s12236_s26 + $0x13a] sm:$0xff]  ;;  %v8944_v24 = vld [vmem:[%s12236_s26 + $0x142] sm:$0xff]  ;;  %v10088_v49 = vpack.c.bf16 %v8945_v45, %v8945_v45 }
  0xb1   : > { %v11694_v25 = vld [vmem:[#allocation3 + $0xf4] ss:$36 sps:$4 sm:$0xff]   ;;  %1807 = vst [vmem:[#allocation3 + $0x310] sm:$0xf] %v10147_v13  ;;  %1232 = vst [vmem:[#allocation3 + $0x34c] sm:$0xf] %v10147_v13  ;;  %v10086_v27 = vpack.c.bf16 %v8943_v23, %v8943_v23  ;;  %v10087_v28 = vpack.c.bf16 %v8944_v24, %v8944_v24 }
  0xb2   : > { %1614 = vst [vmem:[#allocation3 + $0x2e8] sm:$0xf] %v10114_v7  ;;  %1423 = vst [vmem:[#allocation3 + $0x32c] sm:$0xf] %v10084_v14  ;;  %v8946_v46 = vld [vmem:[%s12236_s26 + $0x15a] sm:$0xff]  ;;  %v9009_v47 = vld [vmem:[%s12236_s26 + $0x168] sm:$0xff] }
  0xb3   : > { %3837 = vmatmul.mubr.bf16.vlgmr.msra.gmra.mxu0 %v11673_v30  ;;  %1424 = vst [vmem:[#allocation3 + $0x350] sm:$0xf] %v10085_v15  ;;  %1998 = vst [vmem:[#allocation3 + $0x2f0] sm:$0xf] %v10084_v14  ;;  %v9008_v30 = vld [vmem:[%s12236_s26 + $0x158] sm:$0xff]  ;;  %v10089_v50 = vpack.c.bf16 %v8946_v46, %v8946_v46  ;;  %v9010_v51 = vld [vmem:[%s12236_s26 + $0x170] sm:$0xff]  ;;  %v10120_v52 = vpack.c.bf16 %v9009_v47, %v9009_v47 }
  0xb4   : > { %11423 = vmatpush3.bf16.msra.mxu0 %v12461_v36  ;;  %3844 = vmatprep.mubr.bf16.mxu0 %v11678_v33  ;;  %v11713_v36 = vld [vmem:[%s14109_s1 + $0x220] sm:$0xff]   ;;  %1999 = vst [vmem:[#allocation3 + $0x314] sm:$0xf] %v10085_v15  ;;  %1616 = vst [vmem:[#allocation3 + $0x330] sm:$0xf] %v10116_v19  ;;  %v10119_v32 = vpack.c.bf16 %v9008_v30, %v9008_v30  ;;  %v11752_v33 = vld [vmem:[%s14109_s1 + $0x208] sm:$0xff]   ;;  %v10121_v55 = vpack.c.bf16 %v9010_v51, %v9010_v51 }
  0xb5   : > { %11424 = vmatprep.subr.bf16.mxu0 %v11687_v35  ;;  %1617 = vst [vmem:[#allocation3 + $0x354] sm:$0xf] %v10117_v20  ;;  %1808 = vst [vmem:[#allocation3 + $0x334] sm:$0xf] %v10148_v22  ;;  %v11707_v48 = vld [vmem:[#allocation3 + $0x184] ss:$36 sps:$4 sm:$0xff]  }
  0xb6   : > { %3998 = vmatmul.mubr.bf16.vlgmr.msra.gmra.mxu1 %v11677_v34  ;;  %1233 = vst [vmem:[#allocation3 + $0x370] sm:$0xf] %v10148_v22  ;;  %1809 = vst [vmem:[#allocation3 + $0x358] sm:$0xf] %v10149_v26  ;;  %v11693_v34 = vld [vmem:[#allocation3 + $0xe8] ss:$36 sps:$4 sm:$0xff]  }
  0xb7   : > { %4005 = vmatprep.mubr.bf16.mxu1 %v11681_v37  ;;  %1234 = vst [vmem:[#allocation3 + $0x394] sm:$0xf] %v10149_v26  ;;  %1425 = vst [vmem:[#allocation3 + $0x374] sm:$0xf] %v10086_v27  ;;  %v11696_v37 = vld [vmem:[#allocation3 + $0xf0] ss:$36 sps:$4 sm:$0xff]  }
  0xb8   : > { %11425 = vmatpush3.bf16.msra.mxu0 %v11687_v35  ;;  %1426 = vst [vmem:[#allocation3 + $0x398] sm:$0xf] %v10087_v28  ;;  %2000 = vst [vmem:[#allocation3 + $0x338] sm:$0xf] %v10086_v27  ;;  %v11697_v35 = vld [vmem:[#allocation3 + $0x134] ss:$36 sps:$4 sm:$0xff]  }
  0xb9   : > { %11426 = vmatprep.subr.bf16.mxu0 %v11700_v38  ;;  %2001 = vst [vmem:[#allocation3 + $0x35c] sm:$0xf] %v10087_v28  ;;  %1618 = vst [vmem:[#allocation3 + $0x378] sm:$0xf] %v10118_v31  ;;  %v9073_v53 = vld [vmem:[%s12236_s26 + $0x169] sm:$0xff]  ;;  %v9074_v54 = vld [vmem:[%s12236_s26 + $0x171] sm:$0xff] }
  0xba   : > { %1619 = vst [vmem:[#allocation3 + $0x39c] sm:$0xf] %v10119_v32  ;;  %v10152_v56 = vpack.c.bf16 %v9073_v53, %v9073_v53  ;;  %v10153_v57 = vpack.c.bf16 %v9074_v54, %v9074_v54  ;;  %v8947_v58 = vld [vmem:[%s12236_s26 + $0x16a] sm:$0xff]  ;;  %v8948_v59 = vld [vmem:[%s12236_s26 + $0x172] sm:$0xff]  ;;  %1427 = vst [vmem:[#allocation3 + $0x3bc] sm:$0xf] %v10088_v49 }
  0xbb   : > { %3845 = vmatmul.mubr.bf16.gmra.mxu0 %v11680_v39  ;;  %v11699_v39 = vld [vmem:[#allocation3 + $0x130] ss:$36 sps:$4 sm:$0xff]   ;;  %1428 = vst [vmem:[#allocation3 + $0x3e0] sm:$0xf] %v10089_v50  ;;  %1620 = vst [vmem:[#allocation3 + $0x3c0] sm:$0xf] %v10120_v52 }
  0xbc   : > { %3852 = vmatprep.mubr.bf16.mxu0 %v11684_v41  ;;  %11427 = vmatpush3.bf16.msra.mxu0 %v11700_v38  ;;  %v11701_v38 = vld [vmem:[#allocation3 + $0x13c] ss:$36 sps:$4 sm:$0xff]   ;;  %v11765_v62 = vld [vmem:[%s14109_s1 + $0x200] sm:$0xff]   ;;  %2002 = vst [vmem:[#allocation3 + $0x380] sm:$0xf] %v10088_v49  ;;  %v9013_v9 = vld [vmem:[%s12236_s26 + $0x198] sm:$0xff] }
  0xbd   : > { %11428 = vmatprep.subr.bf16.mxu0 %v11713_v36  ;;  %v9071_v41 = vld [vmem:[%s12236_s26 + $0x151] sm:$0xff]  ;;  %v9011_v63 = vld [vmem:[%s12236_s26 + $0x180] sm:$0xff]  ;;  %2003 = vst [vmem:[#allocation3 + $0x3a4] sm:$0xf] %v10089_v50  ;;  %1621 = vst [vmem:[#allocation3 + $0x3e4] sm:$0xf] %v10121_v55  ;;  %v10124_v13 = vpack.c.bf16 %v9013_v9, %v9013_v9 }
  0xbe   : > { %4006 = vmatmul.mubr.bf16.gmra.mxu1 %v11683_v40  ;;  %v11704_v40 = vld [vmem:[#allocation3 + $0x17c] ss:$36 sps:$4 sm:$0xff]   ;;  %v10150_v43 = vpack.c.bf16 %v9071_v41, %v9071_v41  ;;  %1812 = vst [vmem:[#allocation3 + $0x3c4] sm:$0xf] %v10152_v56  ;;  %1813 = vst [vmem:[#allocation3 + $0x3e8] sm:$0xf] %v10153_v57 }
  0xbf   : > { %4013 = vmatprep.mubr.bf16.mxu1 %v11688_v42  ;;  %v9072_v42 = vld [vmem:[%s12236_s26 + $0x159] sm:$0xff]  ;;  %1237 = vst [vmem:[#allocation3 + $0x400] sm:$0xf] %v10152_v56  ;;  %1238 = vst [vmem:[#allocation3 + $0x424] sm:$0xf] %v10153_v57  ;;  %v9012_v0 = vld [vmem:[%s12236_s26 + $0x188] sm:$0xff] }
  0xc0   : > { %11429 = vmatpush3.bf16.msra.mxu0 %v11713_v36  ;;  %v11703_v36 = vld [vmem:[#allocation3 + $0x138] ss:$36 sps:$4 sm:$0xff]   ;;  %v10151_v44 = vpack.c.bf16 %v9072_v42, %v9072_v42  ;;  %1810 = vst [vmem:[#allocation3 + $0x37c] sm:$0xf] %v10150_v43  ;;  %1235 = vst [vmem:[#allocation3 + $0x3b8] sm:$0xf] %v10150_v43  ;;  %v10123_v4 = vpack.c.bf16 %v9012_v0, %v9012_v0 }
  0xc1   : > { %11430 = vmatprep.subr.bf16.mxu0 %v12537_v61  ;;  %v9075_v2 = vld [vmem:[%s12236_s26 + $0x181] sm:$0xff]  ;;  %v9076_v3 = vld [vmem:[%s12236_s26 + $0x189] sm:$0xff]  ;;  %v9077_v14 = vld [vmem:[%s12236_s26 + $0x199] sm:$0xff]  ;;  %1624 = vst [vmem:[#allocation3 + $0x450] sm:$0xf] %v10124_v13 }
  0xc2   : > { %1811 = vst [vmem:[#allocation3 + $0x3a0] sm:$0xf] %v10151_v44  ;;  %1236 = vst [vmem:[#allocation3 + $0x3dc] sm:$0xf] %v10151_v44  ;;  %v8949_v7 = vld [vmem:[%s12236_s26 + $0x182] sm:$0xff]  ;;  %v8950_v8 = vld [vmem:[%s12236_s26 + $0x18a] sm:$0xff]  ;;  %v10156_v18 = vpack.c.bf16 %v9077_v14, %v9077_v14 }
  0xc3   : > { %3853 = vmatmul.mubr.bf16.gmra.mxu0 %v11686_v60  ;;  %v10090_v60 = vpack.c.bf16 %v8947_v58, %v8947_v58  ;;  %v10092_v10 = vpack.c.bf16 %v8949_v7, %v8949_v7  ;;  %v10093_v11 = vpack.c.bf16 %v8950_v8, %v8950_v8  ;;  %v9014_v12 = vld [vmem:[%s12236_s26 + $0x1a0] sm:$0xff]  ;;  %v11706_v16 = vld [vmem:[#allocation3 + $0x178] ss:$36 sps:$4 sm:$0xff]   ;;  %1623 = vst [vmem:[#allocation3 + $0x42c] sm:$0xf] %v10123_v4  ;;  %v9111_v20 = vld [vmem:[%s12236_s26 + $0x32] sm:$0xff] }
  0xc4   : > { %3860 = vmatprep.mubr.bf16.mxu0 %v11691_v1  ;;  %11431 = vmatpush3.bf16.msra.mxu0 %v12537_v61  ;;  %v10091_v61 = vpack.c.bf16 %v8948_v59, %v8948_v59  ;;  %v10122_v1 = vpack.c.bf16 %v9011_v63, %v9011_v63  ;;  %v9078_v15 = vld [vmem:[%s12236_s26 + $0x1a1] sm:$0xff]  ;;  %v10125_v17 = vpack.c.bf16 %v9014_v12, %v9014_v12  ;;  %v11709_v21 = vld [vmem:[#allocation3 + $0x180] ss:$36 sps:$4 sm:$0xff]   ;;  %v5859_v31 = vld [vmem:[#allocation2 + $0x199] sm:$0xff] }
  0xc5   : > { %11432 = vmatprep.subr.bf16.mxu0 %v11739_v6  ;;  %1429 = vst [vmem:[#allocation3 + $0x404] sm:$0xf] %v10090_v60  ;;  %2004 = vst [vmem:[#allocation3 + $0x3c8] sm:$0xf] %v10090_v60  ;;  %v10157_v19 = vpack.c.bf16 %v9078_v15, %v9078_v15  ;;  %v9112_v22 = vld [vmem:[%s12236_s26 + $0x3a] sm:$0xff]  ;;  %v10158_v23 = vpack.c.bf16 %v9111_v20, %v9111_v20  ;;  %v9113_v24 = vld [vmem:[%s12236_s26 + $0x4a] sm:$0xff] }
  0xc6   : > { %4014 = vmatmul.mubr.bf16.gmra.mxu1 %v11690_v5  ;;  %1430 = vst [vmem:[#allocation3 + $0x428] sm:$0xf] %v10091_v61  ;;  %v10154_v5 = vpack.c.bf16 %v9075_v2, %v9075_v2  ;;  %2005 = vst [vmem:[#allocation3 + $0x3ec] sm:$0xf] %v10091_v61  ;;  %v11710_v26 = vld [vmem:[#allocation3 + $0x1c4] ss:$36 sps:$4 sm:$0xff]   ;;  %v10159_v27 = vpack.c.bf16 %v9112_v22, %v9112_v22  ;;  %v10160_v28 = vpack.c.bf16 %v9113_v24, %v9113_v24 }
  0xc7   : > { %4021 = vmatprep.mubr.bf16.mxu1 %v11694_v25  ;;  %1622 = vst [vmem:[#allocation3 + $0x408] sm:$0xf] %v10122_v1  ;;  %1431 = vst [vmem:[#allocation3 + $0x44c] sm:$0xf] %v10092_v10  ;;  %v9114_v25 = vld [vmem:[%s12236_s26 + $0x52] sm:$0xff]  ;;  %v5860_v32 = vld [vmem:[#allocation2 + $0x1a1] sm:$0xff] }
  0xc8   : > { %11433 = vmatpush3.bf16.msra.mxu0 %v11739_v6  ;;  %v10155_v6 = vpack.c.bf16 %v9076_v3, %v9076_v3  ;;  %1814 = vst [vmem:[#allocation3 + $0x40c] sm:$0xf] %v10154_v5  ;;  %1239 = vst [vmem:[#allocation3 + $0x448] sm:$0xf] %v10154_v5  ;;  %v10161_v29 = vpack.c.bf16 %v9114_v25, %v9114_v25  ;;  %v11714_v30 = vld [vmem:[#allocation3 + $0x1cc] ss:$36 sps:$4 sm:$0xff]  }
  0xc9   : > { %11434 = vmatprep.subr.bf16.mxu0 %v11752_v33  ;;  %1432 = vst [vmem:[#allocation3 + $0x470] sm:$0xf] %v10093_v11  ;;  %2006 = vst [vmem:[#allocation3 + $0x410] sm:$0xf] %v10092_v10  ;;  %v11716_v41 = vld [vmem:[#allocation3 + $0x1c8] ss:$36 sps:$4 sm:$0xff]  }
  0xca   : > { %1815 = vst [vmem:[#allocation3 + $0x430] sm:$0xf] %v10155_v6  ;;  %1240 = vst [vmem:[#allocation3 + $0x46c] sm:$0xf] %v10155_v6  ;;  %v11720_v42 = vld [vmem:[#allocation3 + $0x214] ss:$36 sps:$4 sm:$0xff]  }
  0xcb   : > { %3861 = vmatmul.mubr.bf16.gmra.mxu0 %v11693_v34  ;;  %2007 = vst [vmem:[#allocation3 + $0x434] sm:$0xf] %v10093_v11  ;;  %1625 = vst [vmem:[#allocation3 + $0x474] sm:$0xf] %v10125_v17  ;;  %v9116_v43 = vld [vmem:[%s12236_s26 + $0x6a] sm:$0xff]  ;;  %v9117_v44 = vld [vmem:[%s12236_s26 + $0x7a] sm:$0xff] }
  0xcc   : > { %3868 = vmatprep.mubr.bf16.mxu0 %v11697_v35  ;;  %11435 = vmatpush3.bf16.msra.mxu0 %v11752_v33  ;;  %1816 = vst [vmem:[#allocation3 + $0x454] sm:$0xf] %v10156_v18  ;;  %1817 = vst [vmem:[#allocation3 + $0x478] sm:$0xf] %v10157_v19  ;;  %v12070_v33 = vld [vmem:[#allocation2] sm:$0xff]  ;;  %v10444_v35 = vpack.c.bf16 %v5859_v31, %v5859_v31  ;;  %v10163_v46 = vpack.c.bf16 %v9116_v43, %v9116_v43  ;;  %v9119_v49 = vld [vmem:[%s12236_s26 + $0x92] sm:$0xff] }
  0xcd   : > { %11436 = vmatprep.subr.bf16.mxu0 %v11765_v62  ;;  %1978 = vst [vmem:[#allocation3 + $0x20] sm:$0xf] %v10158_v23  ;;  %1979 = vst [vmem:[#allocation3 + $0x44] sm:$0xf] %v10159_v27  ;;  %v10412_v34 = vpack.c.bf16 %v12070_v33, %v12070_v33  ;;  %v9118_v47 = vld [vmem:[%s12236_s26 + $0x82] sm:$0xff]  ;;  %v9120_v50 = vld [vmem:[%s12236_s26 + $0x9a] sm:$0xff]  ;;  %v10166_v52 = vpack.c.bf16 %v9119_v49, %v9119_v49 }
  0xce   : > { %4022 = vmatmul.mubr.bf16.gmra.mxu1 %v11696_v37  ;;  %1980 = vst [vmem:[#allocation3 + $0x68] sm:$0xf] %v10160_v28  ;;  %1981 = vst [vmem:[#allocation3 + $0x8c] sm:$0xf] %v10161_v29  ;;  %v10445_v37 = vpack.c.bf16 %v5860_v32, %v5860_v32  ;;  %v10165_v51 = vpack.c.bf16 %v9118_v47, %v9118_v47  ;;  %v10167_v53 = vpack.c.bf16 %v9120_v50, %v9120_v50  ;;  %v9121_v54 = vld [vmem:[%s12236_s26 + $0xaa] sm:$0xff]  ;;  %v9122_v55 = vld [vmem:[%s12236_s26 + $0xb2] sm:$0xff] }
  0xcf   : > { %4029 = vmatprep.mubr.bf16.mxu1 %v11701_v38  ;;  %v11712_v38 = vld [vmem:[#allocation3 + $0x1c0] ss:$36 sps:$4 sm:$0xff]   ;;  %5827 = vst [vmem:[#allocation3 + $0x450] sm:$0xf] %v10412_v34  ;;  %5828 = vst [vmem:[#allocation3 + $0x474] sm:$0xf] %v10412_v34  ;;  %v10168_v57 = vpack.c.bf16 %v9121_v54, %v9121_v54  ;;  %v10169_v58 = vpack.c.bf16 %v9122_v55, %v9122_v55 }
  0xd0   : > { %11437 = vmatpush3.bf16.msra.mxu0 %v11765_v62  ;;  %v9123_v56 = vld [vmem:[%s12236_s26 + $0xc2] sm:$0xff]  ;;  %1983 = vst [vmem:[#allocation3 + $0xd4] sm:$0xf] %v10163_v46  ;;  %v9124_v59 = vld [vmem:[%s12236_s26 + $0xca] sm:$0xff]  ;;  %v9125_v61 = vld [vmem:[%s12236_s26 + $0xda] sm:$0xff] }
  0xd1   : > { %v10170_v60 = vpack.c.bf16 %v9123_v56, %v9123_v56  ;;  %v9126_v62 = vld [vmem:[%s12236_s26 + $0xe2] sm:$0xff]  ;;  %v11719_v63 = vld [vmem:[#allocation3 + $0x208] ss:$36 sps:$4 sm:$0xff]   ;;  %1985 = vst [vmem:[#allocation3 + $0x11c] sm:$0xf] %v10165_v51  ;;  %v10171_v0 = vpack.c.bf16 %v9124_v59, %v9124_v59  ;;  %v10172_v1 = vpack.c.bf16 %v9125_v61, %v9125_v61 }
  0xd2   : > { %1986 = vst [vmem:[#allocation3 + $0x140] sm:$0xf] %v10166_v52  ;;  %1987 = vst [vmem:[#allocation3 + $0x164] sm:$0xf] %v10167_v53  ;;  %v10173_v2 = vpack.c.bf16 %v9126_v62, %v9126_v62  ;;  %v11723_v3 = vld [vmem:[#allocation3 + $0x254] ss:$36 sps:$4 sm:$0xff]  }
  0xd3   : > { %3869 = vmatmul.mubr.bf16.gmra.mxu0 %v11699_v39  ;;  %v11717_v39 = vld [vmem:[#allocation3 + $0x20c] ss:$36 sps:$4 sm:$0xff]   ;;  %1988 = vst [vmem:[#allocation3 + $0x188] sm:$0xf] %v10168_v57  ;;  %1989 = vst [vmem:[#allocation3 + $0x1ac] sm:$0xf] %v10169_v58 }
  0xd4   : > { %3876 = vmatprep.mubr.bf16.mxu0 %v11704_v40  ;;  %v12588_v40 = vld [vmem:[#allocation3 + $0x454] ss:$36 sps:$4 sm:$0xff]   ;;  %1990 = vst [vmem:[#allocation3 + $0x1d0] sm:$0xf] %v10170_v60  ;;  %1991 = vst [vmem:[#allocation3 + $0x1f4] sm:$0xf] %v10171_v0 }
  0xd5   : > { %6019 = vst [vmem:[#allocation3 + $0x454] sm:$0xf] %v10444_v35  ;;  %6020 = vst [vmem:[#allocation3 + $0x478] sm:$0xf] %v10445_v37  ;;  %v11722_v4 = vld [vmem:[#allocation3 + $0x210] ss:$36 sps:$4 sm:$0xff]  }
  0xd6   : > { %4030 = vmatmul.mubr.bf16.gmra.mxu1 %v11703_v36  ;;  %v9115_v36 = vld [vmem:[%s12236_s26 + $0x62] sm:$0xff]  ;;  %1992 = vst [vmem:[#allocation3 + $0x218] sm:$0xf] %v10172_v1  ;;  %1993 = vst [vmem:[#allocation3 + $0x23c] sm:$0xf] %v10173_v2  ;;  %v9141_v11 = vld [vmem:[%s12236_s26 + $0x19a] sm:$0xff] }
  0xd7   : > { %4037 = vmatprep.mubr.bf16.mxu1 %v11707_v48  ;;  %v10162_v45 = vpack.c.bf16 %v9115_v36, %v9115_v36  ;;  %v10164_v48 = vpack.c.bf16 %v9117_v44, %v9117_v44  ;;  %v11727_v5 = vld [vmem:[#allocation3 + $0x25c] ss:$36 sps:$4 sm:$0xff]   ;;  %v11725_v6 = vld [vmem:[#allocation3 + $0x250] ss:$36 sps:$4 sm:$0xff]   ;;  %v11733_v9 = vld [vmem:[#allocation3 + $0x2a4] ss:$36 sps:$4 sm:$0xff]  }
  0xd8   : > { %v11730_v7 = vld [vmem:[#allocation3 + $0x29c] ss:$36 sps:$4 sm:$0xff]   ;;  %v9142_v12 = vld [vmem:[%s12236_s26 + $0x1a2] sm:$0xff]  ;;  %v11736_v19 = vld [vmem:[#allocation3 + $0x2e4] ss:$36 sps:$4 sm:$0xff]  }
  0xd9   : > { %1982 = vst [vmem:[#allocation3 + $0xb0] sm:$0xf] %v10162_v45  ;;  %1984 = vst [vmem:[#allocation3 + $0xf8] sm:$0xf] %v10164_v48  ;;  %v11729_v8 = vld [vmem:[#allocation3 + $0x258] ss:$36 sps:$4 sm:$0xff]   ;;  %v10189_v17 = vpack.c.bf16 %v9142_v12, %v9142_v12 }
  0xda   : > { %v11732_v15 = vld [vmem:[#allocation3 + $0x298] ss:$36 sps:$4 sm:$0xff]   ;;  %v6051_v20 = vld [vmem:[#allocation2 + $0x19a] sm:$0xff]  ;;  %v11735_v24 = vld [vmem:[#allocation3 + $0x2a0] ss:$36 sps:$4 sm:$0xff]  }
  0xdb   : > { %3877 = vmatmul.mubr.bf16.gmra.mxu0 %v11706_v16  ;;  %v10188_v16 = vpack.c.bf16 %v9141_v11, %v9141_v11  ;;  %2009 = vst [vmem:[#allocation3 + $0x47c] sm:$0xf] %v10189_v17  ;;  %v10476_v33 = vpack.c.bf16 %v6051_v20, %v6051_v20  ;;  %v11743_v36 = vld [vmem:[#allocation3 + $0x32c] ss:$36 sps:$4 sm:$0xff]   ;;  %v11746_v48 = vld [vmem:[#allocation3 + $0x334] ss:$36 sps:$4 sm:$0xff]  }
  0xdc   : > { %3884 = vmatprep.mubr.bf16.mxu0 %v11710_v26  ;;  %v11740_v26 = vld [vmem:[#allocation3 + $0x2ec] ss:$36 sps:$4 sm:$0xff]   ;;  %v11749_v61 = vld [vmem:[#allocation3 + $0x374] ss:$36 sps:$4 sm:$0xff]   ;;  %v11753_v2 = vld [vmem:[#allocation3 + $0x37c] ss:$36 sps:$4 sm:$0xff]  }
  0xdd   : > { %2008 = vst [vmem:[#allocation3 + $0x458] sm:$0xf] %v10188_v16  ;;  %v11742_v46 = vld [vmem:[#allocation3 + $0x2e8] ss:$36 sps:$4 sm:$0xff]   ;;  %v11748_v0 = vld [vmem:[#allocation3 + $0x330] ss:$36 sps:$4 sm:$0xff]  }
  0xde   : > { %4038 = vmatmul.mubr.bf16.gmra.mxu1 %v11709_v21  ;;  %v6052_v21 = vld [vmem:[#allocation2 + $0x1a2] sm:$0xff]  ;;  %v11745_v58 = vld [vmem:[#allocation3 + $0x328] ss:$36 sps:$4 sm:$0xff]  }
  0xdf   : > { %4045 = vmatprep.mubr.bf16.mxu1 %v11714_v30  ;;  %v10477_v34 = vpack.c.bf16 %v6052_v21, %v6052_v21  ;;  %v11751_v12 = vld [vmem:[#allocation3 + $0x370] ss:$36 sps:$4 sm:$0xff]   ;;  %v11759_v20 = vld [vmem:[#allocation3 + $0x3c4] ss:$36 sps:$4 sm:$0xff]  }
  0xe0   : > { %v11790_v21 = vld [vmem:[%s14110_s2 + $0x78] sm:$0xff]  }
  0xe1   : > { %10950 = vmatprep.subr.bf16.mxu1 %v11790_v21 }
  0xe3   : > { %3885 = vmatmul.mubr.bf16.gmra.mxu0 %v11712_v38 }
  0xe4   : > { %3892 = vmatprep.mubr.bf16.mxu0 %v11717_v39  ;;  %v11738_v39 = vld [vmem:[#allocation3 + $0x2e0] ss:$36 sps:$4 sm:$0xff]   ;;  %v12608_v43 = vld [vmem:[#allocation3 + $0x458] ss:$36 sps:$4 sm:$0xff]  }
  0xe5   : > { %6211 = vst [vmem:[#allocation3 + $0x458] sm:$0xf] %v10476_v33  ;;  %6212 = vst [vmem:[#allocation3 + $0x47c] sm:$0xf] %v10477_v34  ;;  %v11758_v33 = vld [vmem:[#allocation3 + $0x3b8] ss:$36 sps:$4 sm:$0xff]  }
  0xe6   : > { %4046 = vmatmul.mubr.bf16.gmra.mxu1 %v11716_v41 }
  0xe7   : > { %4053 = vmatprep.mubr.bf16.mxu1 %v11720_v42 }
  0xeb   : > { %3893 = vmatmul.mubr.bf16.gmra.mxu0 %v11719_v63 }
  0xec   : > { %3900 = vmatprep.mubr.bf16.mxu0 %v11723_v3 }
  0xee   : > { %4054 = vmatmul.mubr.bf16.gmra.mxu1 %v11722_v4 }
  0xef   : > { %4061 = vmatprep.mubr.bf16.mxu1 %v11727_v5 }
  0xf3   : > { %v10494_v10 = vpop.f32.mrf.mxu0  ;;  %3901 = vmatmul.mubr.bf16.gmra.mxu0 %v11725_v6 }
  0xf4   : > { %3908 = vmatprep.mubr.bf16.mxu0 %v11730_v7 }
  0xf5   : > { %v10495_v14 = vpop.f32.mrf.mxu0 }
  0xf6   : > { %v10606_v13 = vpop.f32.mrf.mxu1  ;;  %4062 = vmatmul.mubr.bf16.gmra.mxu1 %v11729_v8  ;;  %v10496_v18 = vadd.f32 %v10495_v14, %v10494_v10 }
  0xf7   : > { %4069 = vmatprep.mubr.bf16.mxu1 %v11733_v9  ;;  %v10497_v23 = vpop.f32.mrf.mxu0 }
  0xf8   : > { %v10607_v22 = vpop.f32.mrf.mxu1 }
  0xf9   : > { %v10608_v25 = vadd.f32 %v10607_v22, %v10606_v13  ;;  %v10498_v28 = vpop.f32.mrf.mxu0  ;;  %v11791_v22 = vld [vmem:[%s14110_s2 + $0x38] sm:$0xff]  }
  0xfa   : > { %v10609_v27 = vpop.f32.mrf.mxu1  ;;  %v10499_v30 = vadd.f32 %v10498_v28, %v10497_v23  ;;  %10951 = vmatpush3.bf16.msra.mxu1 %v11791_v22 }
  0xfb   : > { %v12604_v29 = vadd.f32 %v10608_v25, %v10496_v18  ;;  %v10500_v32 = vpop.f32.mrf.mxu0  ;;  %3909 = vmatmul.mubr.bf16.gmra.mxu0 %v11732_v15  ;;  %v11756_v15 = vld [vmem:[#allocation3 + $0x3bc] ss:$36 sps:$4 sm:$0xff]  }
  0xfc   : > { %v10610_v31 = vpop.f32.mrf.mxu1  ;;  %3916 = vmatprep.mubr.bf16.mxu0 %v11736_v19  ;;  %v11755_v18 = vld [vmem:[#allocation3 + $0x378] ss:$36 sps:$4 sm:$0xff]  }
  0xfd   : > { %v10611_v35 = vadd.f32 %v10610_v31, %v10609_v27  ;;  %v10501_v38 = vpop.f32.mrf.mxu0 }
  0xfe   : > { %v10612_v37 = vpop.f32.mrf.mxu1  ;;  %4070 = vmatmul.mubr.bf16.gmra.mxu1 %v11735_v24  ;;  %v10502_v42 = vadd.f32 %v10501_v38, %v10500_v32 }
  0xff   : > { %v12606_v41 = vadd.f32 %v10611_v35, %v10499_v30  ;;  %4077 = vmatprep.mubr.bf16.mxu1 %v11740_v26  ;;  %v10503_v45 = vpop.f32.mrf.mxu0 }
 0x100   : > { %v10613_v44 = vpop.f32.mrf.mxu1 }
 0x101   : > { %v10614_v47 = vadd.f32 %v10613_v44, %v10612_v37  ;;  %v10504_v50 = vpop.f32.mrf.mxu0  ;;  %v11762_v37 = vld [vmem:[#allocation3 + $0x404] ss:$36 sps:$4 sm:$0xff]   ;;  %v11766_v44 = vld [vmem:[#allocation3 + $0x40c] ss:$36 sps:$4 sm:$0xff]  }
 0x102   : > { %v10615_v49 = vpop.f32.mrf.mxu1  ;;  %v10505_v52 = vadd.f32 %v10504_v50, %v10503_v45 }
 0x103   : > { %v12610_v51 = vadd.f32 %v10614_v47, %v10502_v42  ;;  %v10506_v54 = vpop.f32.mrf.mxu0  ;;  %3917 = vmatmul.mubr.bf16.gmra.mxu0 %v11738_v39  ;;  %v11761_v42 = vld [vmem:[#allocation3 + $0x3c0] ss:$36 sps:$4 sm:$0xff]  }
 0x104   : > { %v10616_v53 = vpop.f32.mrf.mxu1  ;;  %3924 = vmatprep.mubr.bf16.mxu0 %v11743_v36 }
 0x105   : > { %v10617_v55 = vadd.f32 %v10616_v53, %v10615_v49  ;;  %v10507_v57 = vpop.f32.mrf.mxu0 }
 0x106   : > { %v10618_v56 = vpop.f32.mrf.mxu1  ;;  %4078 = vmatmul.mubr.bf16.gmra.mxu1 %v11742_v46  ;;  %v10508_v60 = vadd.f32 %v10507_v57, %v10506_v54 }
 0x107   : > { %v12612_v59 = vadd.f32 %v10617_v55, %v10505_v52  ;;  %4085 = vmatprep.mubr.bf16.mxu1 %v11746_v48  ;;  %v10509_v63 = vpop.f32.mrf.mxu0  ;;  %v11764_v55 = vld [vmem:[#allocation3 + $0x400] ss:$36 sps:$4 sm:$0xff]  }
 0x108   : > { %v10619_v62 = vpop.f32.mrf.mxu1 }
 0x109   : > { %v10620_v1 = vadd.f32 %v10619_v62, %v10618_v56  ;;  %v10510_v4 = vpop.f32.mrf.mxu0  ;;  %v11768_v62 = vld [vmem:[#allocation3 + $0x408] ss:$36 sps:$4 sm:$0xff]  }
 0x10a   : > { %v10621_v3 = vpop.f32.mrf.mxu1  ;;  %v10511_v6 = vadd.f32 %v10510_v4, %v10509_v63 }
 0x10b   : > { %v12614_v5 = vadd.f32 %v10620_v1, %v10508_v60  ;;  %v10512_v8 = vpop.f32.mrf.mxu0  ;;  %3925 = vmatmul.mubr.bf16.gmra.mxu0 %v11745_v58  ;;  %v11769_v58 = vld [vmem:[#allocation3 + $0x44c] ss:$36 sps:$4 sm:$0xff]   ;;  %v11793_v1 = vld [vmem:[%s14110_s2 + $0x30] sm:$0xff]  }
 0x10c   : > { %v10622_v7 = vpop.f32.mrf.mxu1  ;;  %3932 = vmatprep.mubr.bf16.mxu0 %v11749_v61 }
 0x10d   : > { %v10623_v9 = vadd.f32 %v10622_v7, %v10621_v3  ;;  %v10513_v11 = vpop.f32.mrf.mxu0 }
 0x10e   : > { %v10624_v10 = vpop.f32.mrf.mxu1  ;;  %4086 = vmatmul.mubr.bf16.gmra.mxu1 %v11748_v0  ;;  %v10514_v14 = vadd.f32 %v10513_v11, %v10512_v8  ;;  %v11792_v0 = vld [vmem:[%s14110_s2 + $0x70] sm:$0xff]   ;;  %v2168_v11 = vld [vmem:[#allocation3 + $0x474] sm:$0xff] }
 0x10f   : > { %v12616_v13 = vadd.f32 %v10623_v9, %v10511_v6  ;;  %4093 = vmatprep.mubr.bf16.mxu1 %v11753_v2  ;;  %v10515_v17 = vpop.f32.mrf.mxu0  ;;  %10952 = vmatprep.subr.bf16.mxu1 %v11792_v0 }
 0x110   : > { %v10625_v16 = vpop.f32.mrf.mxu1  ;;  %10953 = vmatpush3.bf16.msra.mxu1 %v11793_v1  ;;  %v11778_v1 = vld [vmem:[#allocation3 + $0x140] ss:$36 sps:$4 sm:$0xff]  }
 0x111   : > { %v10626_v19 = vadd.f32 %v10625_v16, %v10624_v10  ;;  %v10516_v24 = vpop.f32.mrf.mxu0  ;;  %v2163_v10 = vld [vmem:[#allocation3 + $0x450] sm:$0xff] }
 0x112   : > { %v10627_v23 = vpop.f32.mrf.mxu1  ;;  %v10517_v26 = vadd.f32 %v10516_v24, %v10515_v17  ;;  %v9316_v24 = vcombine.low %v2163_v10, %v2168_v11 }
 0x113   : > { %v12624_v25 = vadd.f32 %v10626_v19, %v10514_v14  ;;  %v10518_v28 = vpop.f32.mrf.mxu0  ;;  %3933 = vmatmul.mubr.bf16.gmra.mxu0 %v11751_v12 }
 0x114   : > { %v10628_v27 = vpop.f32.mrf.mxu1  ;;  %3940 = vmatprep.mubr.bf16.mxu0 %v11756_v15  ;;  %v11771_v15 = vld [vmem:[#allocation3 + $0x448] ss:$36 sps:$4 sm:$0xff]  }
 0x115   : > { %v10629_v30 = vadd.f32 %v10628_v27, %v10627_v23  ;;  %v10519_v32 = vpop.f32.mrf.mxu0 }
 0x116   : > { %v10630_v31 = vpop.f32.mrf.mxu1  ;;  %4094 = vmatmul.mubr.bf16.gmra.mxu1 %v11755_v18  ;;  %v10520_v35 = vadd.f32 %v10519_v32, %v10518_v28  ;;  %v11774_v18 = vld [vmem:[#allocation3 + $0x20] ss:$36 sps:$4 sm:$0xff]  }
 0x117   : > { %v12626_v34 = vadd.f32 %v10629_v30, %v10517_v26  ;;  %4101 = vmatprep.mubr.bf16.mxu1 %v11759_v20  ;;  %v10521_v39 = vpop.f32.mrf.mxu0 }
 0x118   : > { %v10631_v38 = vpop.f32.mrf.mxu1 }
 0x119   : > { %v10632_v36 = vadd.f32 %v10631_v38, %v10630_v31  ;;  %v10522_v46 = vpop.f32.mrf.mxu0 }
 0x11a   : > { %v10633_v45 = vpop.f32.mrf.mxu1  ;;  %v10523_v48 = vadd.f32 %v10522_v46, %v10521_v39  ;;  %v11775_v39 = vld [vmem:[#allocation3 + $0x68] ss:$36 sps:$4 sm:$0xff]  }
 0x11b   : > { %v12628_v47 = vadd.f32 %v10632_v36, %v10520_v35  ;;  %v10524_v50 = vpop.f32.mrf.mxu0  ;;  %3941 = vmatmul.mubr.bf16.gmra.mxu0 %v11758_v33  ;;  %v11776_v36 = vld [vmem:[#allocation3 + $0xb0] ss:$36 sps:$4 sm:$0xff]  }
 0x11c   : > { %v10634_v49 = vpop.f32.mrf.mxu1  ;;  %3948 = vmatprep.mubr.bf16.mxu0 %v11762_v37 }
 0x11d   : > { %v10635_v52 = vadd.f32 %v10634_v49, %v10633_v45  ;;  %v10525_v54 = vpop.f32.mrf.mxu0  ;;  %v11795_v45 = vld [vmem:[%s14110_s2 + $0x28] sm:$0xff]  }
 0x11e   : > { %v10636_v53 = vpop.f32.mrf.mxu1  ;;  %4102 = vmatmul.mubr.bf16.gmra.mxu1 %v11761_v42  ;;  %v10526_v57 = vadd.f32 %v10525_v54, %v10524_v50 }
 0x11f   : > { %v12630_v56 = vadd.f32 %v10635_v52, %v10523_v48  ;;  %4109 = vmatprep.mubr.bf16.mxu1 %v11766_v44  ;;  %v10527_v61 = vpop.f32.mrf.mxu0  ;;  %v11794_v44 = vld [vmem:[%s14110_s2 + $0x68] sm:$0xff]  }
 0x120   : > { %v10637_v60 = vpop.f32.mrf.mxu1  ;;  %10954 = vmatprep.subr.bf16.mxu1 %v11794_v44  ;;  %v11781_v44 = vld [vmem:[#allocation3 + $0x218] ss:$36 sps:$4 sm:$0xff]  }
 0x121   : > { %v10638_v63 = vadd.f32 %v10637_v60, %v10636_v53  ;;  %v10528_v3 = vpop.f32.mrf.mxu0  ;;  %10955 = vmatpush3.bf16.msra.mxu1 %v11795_v45 }
 0x122   : > { %v10639_v2 = vpop.f32.mrf.mxu1  ;;  %v10529_v6 = vadd.f32 %v10528_v3, %v10527_v61 }
 0x123   : > { %v12638_v4 = vadd.f32 %v10638_v63, %v10526_v57  ;;  %v10530_v8 = vpop.f32.mrf.mxu0  ;;  %3949 = vmatmul.mubr.bf16.gmra.mxu0 %v11764_v55  ;;  %v11777_v63 = vld [vmem:[#allocation3 + $0xf8] ss:$36 sps:$4 sm:$0xff]  }
 0x124   : > { %v10640_v7 = vpop.f32.mrf.mxu1  ;;  %3956 = vmatprep.mubr.bf16.mxu0 %v11769_v58 }
 0x125   : > { %v10641_v9 = vadd.f32 %v10640_v7, %v10639_v2  ;;  %v10531_v14 = vpop.f32.mrf.mxu0 }
 0x126   : > { %v10642_v12 = vpop.f32.mrf.mxu1  ;;  %4110 = vmatmul.mubr.bf16.gmra.mxu1 %v11768_v62  ;;  %v10532_v17 = vadd.f32 %v10531_v14, %v10530_v8 }
 0x127   : > { %v12640_v16 = vadd.f32 %v10641_v9, %v10529_v6  ;;  %4117 = vmatprep.mubr.bf16.mxu1 %v12588_v40  ;;  %v10533_v20 = vpop.f32.mrf.mxu0 }
 0x128   : > { %v10643_v19 = vpop.f32.mrf.mxu1 }
 0x129   : > { %v10644_v21 = vadd.f32 %v10643_v19, %v10642_v12  ;;  %v10534_v23 = vpop.f32.mrf.mxu0  ;;  %v11779_v19 = vld [vmem:[#allocation3 + $0x188] ss:$36 sps:$4 sm:$0xff]  }
 0x12a   : > { %v10645_v22 = vpop.f32.mrf.mxu1  ;;  %v10535_v27 = vadd.f32 %v10534_v23, %v10533_v20  ;;  %v11797_v23 = vld [vmem:[%s14110_s2 + $0x20] sm:$0xff]  }
 0x12b   : > { %v12643_v26 = vadd.f32 %v10644_v21, %v10532_v17  ;;  %v10536_v30 = vpop.f32.mrf.mxu0  ;;  %3957 = vmatmul.mubr.bf16.gmra.mxu0 %v11771_v15  ;;  %v11780_v21 = vld [vmem:[#allocation3 + $0x1d0] ss:$36 sps:$4 sm:$0xff]  }
 0x12c   : > { %v10646_v28 = vpop.f32.mrf.mxu1  ;;  %11438 = vmatprep.mubr.bf16.mxu0 %v11774_v18 }
 0x12d   : > { %v10647_v31 = vadd.f32 %v10646_v28, %v10645_v22  ;;  %v10537_v33 = vpop.f32.mrf.mxu0  ;;  %v11796_v22 = vld [vmem:[%s14110_s2 + $0x60] sm:$0xff]  }
 0x12e   : > { %v10648_v32 = vpop.f32.mrf.mxu1  ;;  %4118 = vmatmul.mubr.bf16.gmra.mxu1 %v9316_v24  ;;  %v10538_v40 = vadd.f32 %v10537_v33, %v10536_v30  ;;  %10956 = vmatprep.subr.bf16.mxu1 %v11796_v22 }
 0x12f   : > { %v12645_v35 = vadd.f32 %v10647_v31, %v10535_v27  ;;  %v10539_v38 = vpop.f32.mrf.mxu0  ;;  %10957 = vmatpush3.bf16.msra.mxu1 %v11797_v23 }
 0x130   : > { %v10649_v37 = vpop.f32.mrf.mxu1 }
 0x131   : > { %v10650_v42 = vadd.f32 %v10649_v37, %v10648_v32  ;;  %v10540_v48 = vpop.f32.mrf.mxu0 }
 0x132   : > { %v10651_v46 = vpop.f32.mrf.mxu1  ;;  %v10541_v50 = vadd.f32 %v10540_v48, %v10539_v38 }
 0x133   : > { %v12653_v49 = vadd.f32 %v10650_v42, %v10538_v40  ;;  %v10542_v53 = vpop.f32.mrf.mxu0  ;;  %11439 = vmatmul.mubr.bf16.vlgmr.msra.gmra.mxu0 %v11775_v39 }
 0x134   : > { %v10652_v52 = vpop.f32.mrf.mxu1  ;;  %11442 = vmatprep.mubr.bf16.mxu0 %v11776_v36 }
 0x135   : > { %v10653_v54 = vadd.f32 %v10652_v52, %v10651_v46  ;;  %v10543_v57 = vpop.f32.mrf.mxu0  ;;  %v11782_v46 = vld [vmem:[#allocation3 + $0x260] ss:$36 sps:$4 sm:$0xff]  }
 0x136   : > { %v10654_v55 = vpop.f32.mrf.mxu1  ;;  %v10544_v60 = vadd.f32 %v10543_v57, %v10542_v53 }
 0x137   : > { %v12655_v58 = vadd.f32 %v10653_v54, %v10541_v50  ;;  %v10545_v62 = vpop.f32.mrf.mxu0 }
 0x138   : > { %v10655_v61 = vpop.f32.mrf.mxu1 }
 0x139   : > { %v10656_v0 = vadd.f32 %v10655_v61, %v10654_v55  ;;  %v10546_v3 = vpop.f32.mrf.mxu0 }
 0x13a   : > { %v10657_v2 = vpop.f32.mrf.mxu1  ;;  %v10547_v7 = vadd.f32 %v10546_v3, %v10545_v62 }
 0x13b   : > { %v12657_v6 = vadd.f32 %v10656_v0, %v10544_v60  ;;  %v10548_v9 = vpop.f32.mrf.mxu0  ;;  %11443 = vmatmul.mubr.bf16.gmra.mxu0 %v11777_v63 }
 0x13c   : > { %v10658_v8 = vpop.f32.mrf.mxu1  ;;  %11446 = vmatprep.mubr.bf16.mxu0 %v11778_v1 }
 0x13d   : > { %v10659_v10 = vadd.f32 %v10658_v8, %v10657_v2  ;;  %v10549_v12 = vpop.f32.mrf.mxu0  ;;  %v11783_v2 = vld [vmem:[#allocation3 + $0x2a8] ss:$36 sps:$4 sm:$0xff]  }
 0x13e   : > { %v10660_v11 = vpop.f32.mrf.mxu1  ;;  %v10550_v15 = vadd.f32 %v10549_v12, %v10548_v9  ;;  %v11798_v8 = vld [vmem:[%s14110_s2 + $0x58] sm:$0xff]  }
 0x13f   : > { %v12659_v14 = vadd.f32 %v10659_v10, %v10547_v7  ;;  %v10551_v18 = vpop.f32.mrf.mxu0  ;;  %v11784_v7 = vld [vmem:[#allocation3 + $0x2f0] ss:$36 sps:$4 sm:$0xff]   ;;  %v11799_v9 = vld [vmem:[%s14110_s2 + $0x18] sm:$0xff]   ;;  %10958 = vmatprep.subr.bf16.mxu1 %v11798_v8 }
 0x140   : > { %v10661_v17 = vpop.f32.mrf.mxu1  ;;  %10959 = vmatpush3.bf16.msra.mxu1 %v11799_v9 }
 0x141   : > { %v10662_v20 = vadd.f32 %v10661_v17, %v10660_v11  ;;  %v10552_v27 = vpop.f32.mrf.mxu0 }
 0x142   : > { %v10663_v24 = vpop.f32.mrf.mxu1  ;;  %v10553_v30 = vadd.f32 %v10552_v27, %v10551_v18 }
 0x143   : > { %v12667_v28 = vadd.f32 %v10662_v20, %v10550_v15  ;;  %v10554_v32 = vpop.f32.mrf.mxu0  ;;  %11447 = vmatmul.mubr.bf16.gmra.mxu0 %v11779_v19 }
 0x144   : > { %v10664_v31 = vpop.f32.mrf.mxu1  ;;  %11450 = vmatprep.mubr.bf16.mxu0 %v11780_v21 }
 0x145   : > { %v10665_v33 = vadd.f32 %v10664_v31, %v10663_v24  ;;  %v10555_v37 = vpop.f32.mrf.mxu0 }
 0x146   : > { %v10666_v40 = vpop.f32.mrf.mxu1  ;;  %v10556_v39 = vadd.f32 %v10555_v37, %v10554_v32  ;;  %v11786_v32 = vld [vmem:[#allocation3 + $0x380] ss:$36 sps:$4 sm:$0xff]  }
 0x147   : > { %v12669_v38 = vadd.f32 %v10665_v33, %v10553_v30  ;;  %v10557_v36 = vpop.f32.mrf.mxu0  ;;  %v11785_v30 = vld [vmem:[#allocation3 + $0x338] ss:$36 sps:$4 sm:$0xff]  }
 0x148   : > { %v10667_v42 = vpop.f32.mrf.mxu1 }
 0x149   : > { %v10668_v45 = vadd.f32 %v10667_v42, %v10666_v40  ;;  %v10558_v50 = vpop.f32.mrf.mxu0 }
 0x14a   : > { %v10669_v48 = vpop.f32.mrf.mxu1  ;;  %v10559_v53 = vadd.f32 %v10558_v50, %v10557_v36 }
 0x14b   : > { %v12671_v52 = vadd.f32 %v10668_v45, %v10556_v39  ;;  %v10560_v55 = vpop.f32.mrf.mxu0  ;;  %11451 = vmatmul.mubr.bf16.gmra.mxu0 %v11781_v44 }
 0x14c   : > { %v10670_v54 = vpop.f32.mrf.mxu1  ;;  %11454 = vmatprep.mubr.bf16.mxu0 %v11782_v46 }
 0x14d   : > { %v10671_v57 = vadd.f32 %v10670_v54, %v10669_v48  ;;  %v10561_v61 = vpop.f32.mrf.mxu0 }
 0x14e   : > { %v10672_v60 = vpop.f32.mrf.mxu1  ;;  %v10562_v63 = vadd.f32 %v10561_v61, %v10560_v55  ;;  %v11787_v55 = vld [vmem:[#allocation3 + $0x3c8] ss:$36 sps:$4 sm:$0xff]   ;;  %v11800_v61 = vld [vmem:[%s14110_s2 + $0x50] sm:$0xff]  }
 0x14f   : > { %v12673_v62 = vadd.f32 %v10671_v57, %v10559_v53  ;;  %v10563_v1 = vpop.f32.mrf.mxu0  ;;  %10960 = vmatprep.subr.bf16.mxu1 %v11800_v61 }
 0x150   : > { %v10673_v0 = vpop.f32.mrf.mxu1 }
 0x151   : > { %v10674_v3 = vadd.f32 %v10673_v0, %v10672_v60  ;;  %v10564_v11 = vpop.f32.mrf.mxu0  ;;  %v11788_v60 = vld [vmem:[#allocation3 + $0x410] ss:$36 sps:$4 sm:$0xff]  }
 0x152   : > { %v10675_v10 = vpop.f32.mrf.mxu1  ;;  %v10565_v15 = vadd.f32 %v10564_v11, %v10563_v1 }
 0x153   : > { %v12681_v12 = vadd.f32 %v10674_v3, %v10562_v63  ;;  %v10566_v18 = vpop.f32.mrf.mxu0  ;;  %11455 = vmatmul.mubr.bf16.gmra.mxu0 %v11783_v2  ;;  %v11801_v63 = vld [vmem:[%s14110_s2 + $0x10] sm:$0xff]  }
 0x154   : > { %v10676_v17 = vpop.f32.mrf.mxu1  ;;  %11458 = vmatprep.mubr.bf16.mxu0 %v11784_v7  ;;  %10961 = vmatpush3.bf16.msra.mxu1 %v11801_v63 }
 0x155   : > { %v10677_v19 = vadd.f32 %v10676_v17, %v10675_v10  ;;  %v10567_v21 = vpop.f32.mrf.mxu0 }
 0x156   : > { %v10678_v20 = vpop.f32.mrf.mxu1  ;;  %v10568_v23 = vadd.f32 %v10567_v21, %v10566_v18 }
 0x157   : > { %v12683_v22 = vadd.f32 %v10677_v19, %v10565_v15  ;;  %v10569_v27 = vpop.f32.mrf.mxu0 }
 0x158   : > { %v10679_v24 = vpop.f32.mrf.mxu1 }
 0x159   : > { %v10680_v31 = vadd.f32 %v10679_v24, %v10678_v20  ;;  %v10570_v40 = vpop.f32.mrf.mxu0 }
 0x15a   : > { %v10681_v33 = vpop.f32.mrf.mxu1  ;;  %v10571_v39 = vadd.f32 %v10570_v40, %v10569_v27 }
 0x15b   : > { %v12685_v37 = vadd.f32 %v10680_v31, %v10568_v23  ;;  %v10572_v36 = vpop.f32.mrf.mxu0  ;;  %11459 = vmatmul.mubr.bf16.gmra.mxu0 %v11785_v30 }
 0x15c   : > { %v10682_v42 = vpop.f32.mrf.mxu1  ;;  %11462 = vmatprep.mubr.bf16.mxu0 %v11786_v32 }
 0x15d   : > { %v10683_v44 = vadd.f32 %v10682_v42, %v10681_v33  ;;  %v10573_v46 = vpop.f32.mrf.mxu0 }
 0x15e   : > { %v10684_v45 = vpop.f32.mrf.mxu1  ;;  %v10574_v50 = vadd.f32 %v10573_v46, %v10572_v36  ;;  %v11802_v46 = vld [vmem:[%s14110_s2 + $0x48] sm:$0xff]  }
 0x15f   : > { %v12687_v48 = vadd.f32 %v10683_v44, %v10571_v39  ;;  %v10575_v54 = vpop.f32.mrf.mxu0  ;;  %10962 = vmatprep.subr.bf16.mxu1 %v11802_v46 }
 0x160   : > { %v10685_v53 = vpop.f32.mrf.mxu1 }
 0x161   : > { %v10686_v57 = vadd.f32 %v10685_v53, %v10684_v45  ;;  %v10576_v1 = vpop.f32.mrf.mxu0 }
 0x162   : > { %v10687_v0 = vpop.f32.mrf.mxu1  ;;  %v10577_v3 = vadd.f32 %v10576_v1, %v10575_v54 }
 0x163   : > { %v12695_v2 = vadd.f32 %v10686_v57, %v10574_v50  ;;  %v10578_v8 = vpop.f32.mrf.mxu0  ;;  %11463 = vmatmul.mubr.bf16.gmra.mxu0 %v11787_v55  ;;  %v11803_v50 = vld [vmem:[%s14110_s2 + $0x8] sm:$0xff]  }
 0x164   : > { %v10688_v7 = vpop.f32.mrf.mxu1  ;;  %11466 = vmatprep.mubr.bf16.mxu0 %v11788_v60  ;;  %10963 = vmatpush3.bf16.msra.mxu1 %v11803_v50 }
 0x165   : > { %v10689_v9 = vadd.f32 %v10688_v7, %v10687_v0  ;;  %v10579_v11 = vpop.f32.mrf.mxu0  ;;  %v11804_v7 = vld [vmem:[%s14110_s2 + $0xf8] sm:$0xff]  }
 0x166   : > { %v10690_v10 = vpop.f32.mrf.mxu1  ;;  %v10580_v17 = vadd.f32 %v10579_v11, %v10578_v8  ;;  %11062 = vmatprep.subr.bf16.mxu0 %v11804_v7 }
 0x167   : > { %v12697_v15 = vadd.f32 %v10689_v9, %v10577_v3  ;;  %v10581_v19 = vpop.f32.mrf.mxu0 }
 0x168   : > { %v10691_v18 = vpop.f32.mrf.mxu1 }
 0x169   : > { %v10692_v20 = vadd.f32 %v10691_v18, %v10690_v10  ;;  %v10582_v23 = vpop.f32.mrf.mxu0  ;;  %v11805_v10 = vld [vmem:[%s14110_s2 + $0xb8] sm:$0xff]  }
 0x16a   : > { %v10693_v21 = vpop.f32.mrf.mxu1  ;;  %v10583_v27 = vadd.f32 %v10582_v23, %v10581_v19  ;;  %11063 = vmatpush3.bf16.msra.mxu0 %v11805_v10  ;;  %v11806_v23 = vld [vmem:[%s14110_s2 + $0xf0] sm:$0xff]  }
 0x16b   : > { %v12699_v24 = vadd.f32 %v10692_v20, %v10580_v17  ;;  %v10584_v31 = vpop.f32.mrf.mxu0  ;;  %11467 = vmatmul.mubr.bf16.gmra.mxu0 %v12608_v43  ;;  %11064 = vmatprep.subr.bf16.mxu0 %v11806_v23 }
 0x16c   : > { %v10694_v30 = vpop.f32.mrf.mxu1 }
 0x16d   : > { %v10695_v32 = vadd.f32 %v10694_v30, %v10693_v21  ;;  %v10585_v40 = vpop.f32.mrf.mxu0 }
 0x16e   : > { %v10696_v33 = vpop.f32.mrf.mxu1  ;;  %v10586_v42 = vadd.f32 %v10585_v40, %v10584_v31  ;;  %v11807_v31 = vld [vmem:[%s14110_s2 + $0xb0] sm:$0xff]  }
 0x16f   : > { %v12702_v39 = vadd.f32 %v10695_v32, %v10583_v27  ;;  %v10587_v44 = vpop.f32.mrf.mxu0  ;;  %11065 = vmatpush3.bf16.msra.mxu0 %v11807_v31  ;;  %v11819_v31 = vld [vmem:[%s14110_s2 + $0xd0] sm:$0xff]  }
 0x170   : > { %v10697_v36 = vpop.f32.mrf.mxu1 }
 0x171   : > { %v10698_v45 = vadd.f32 %v10697_v36, %v10696_v33  ;;  %v10588_v54 = vpop.f32.mrf.mxu0 }
 0x172   : > { %v10699_v53 = vpop.f32.mrf.mxu1  ;;  %v10589_v55 = vadd.f32 %v10588_v54, %v10587_v44  ;;  %v11809_v44 = vld [vmem:[%s14110_s2 + $0xe8] sm:$0xff]  }
 0x173   : > { %v12710_v43 = vadd.f32 %v10698_v45, %v10586_v42  ;;  %v10718_v60 = vpop.f32.mrf.mxu0  ;;  %11066 = vmatprep.subr.bf16.mxu0 %v11809_v44 }
 0x174   : > { %v10700_v57 = vpop.f32.mrf.mxu1 }
 0x175   : > { %14116 = vst [vmem:[#allocation4_spill] sm:$0xff] %v12710_v43  ;;  %v10701_v61 = vadd.f32 %v10700_v57, %v10699_v53  ;;  %v10719_v63 = vpop.f32.mrf.mxu0  ;;  %v11812_v57 = vld [vmem:[%s14110_s2 + $0xe0] sm:$0xff]  }
 0x176   : > { %v10830_v0 = vpop.f32.mrf.mxu1  ;;  %v10720_v3 = vadd.f32 %v10719_v63, %v10718_v60  ;;  %v11813_v63 = vld [vmem:[%s14110_s2 + $0xa0] sm:$0xff]  }
 0x177   : > { %v12712_v1 = vadd.f32 %v10701_v61, %v10589_v55  ;;  %v10721_v8 = vpop.f32.mrf.mxu0 }
 0x178   : > { %v10831_v9 = vpop.f32.mrf.mxu1  ;;  %v3839_v11 = vadd.f32 %v10720_v3, %v12604_v29 }
 0x179   : > { %14117 = vst [vmem:[#allocation5_spill] sm:$0xff] %v12712_v1  ;;  %v10832_v17 = vadd.f32 %v10831_v9, %v10830_v0  ;;  %v10722_v18 = vpop.f32.mrf.mxu0  ;;  %v11808_v0 = vld [vmem:[%s14110_s2 + $0x40] sm:$0xff]  }
 0x17a   : > { %v10833_v19 = vpop.f32.mrf.mxu1  ;;  %v10723_v20 = vadd.f32 %v10722_v18, %v10721_v8  ;;  %v11810_v8 = vld [vmem:[%s14110_s2] sm:$0xff]   ;;  %10964 = vmatprep.subr.bf16.mxu1 %v11808_v0  ;;  %v11818_v18 = vld [vmem:[#allocation3 + $0x4] ss:$36 sps:$4 sm:$0xff]  }
 0x17b   : > { %v12721_v21 = vadd.f32 %v10832_v17, %v3839_v11  ;;  %v10724_v27 = vpop.f32.mrf.mxu0  ;;  %10965 = vmatpush3.bf16.msra.mxu1 %v11810_v8  ;;  %v11815_v17 = vld [vmem:[%s14110_s2 + $0x98] sm:$0xff]   ;;  %7717 = vmatprep.mubr.bf16.mxu1 %v11818_v18 }
 0x17c   : > { %v10834_v30 = vpop.f32.mrf.mxu1  ;;  %v3842_v29 = vadd.f32 %v10723_v20, %v12606_v41  ;;  %v11811_v41 = vld [vmem:[%s14110_s2 + $0xa8] sm:$0xff]   ;;  %v11816_v20 = vld [vmem:[#allocation3] ss:$36 sps:$4 sm:$0xff]  }
 0x17d   : > { %14118 = vst [vmem:[#allocation6_spill] sm:$0xff] %v12721_v21  ;;  %v10835_v32 = vadd.f32 %v10834_v30, %v10833_v19  ;;  %v10725_v33 = vpop.f32.mrf.mxu0  ;;  %11067 = vmatpush3.bf16.msra.mxu0 %v11811_v41  ;;  %v11821_v41 = vld [vmem:[%s14110_s2 + $0xc8] sm:$0xff]  }
 0x17e   : > { %v12730_v40 = vpop.f32.mrf.mxu1  ;;  %v10726_v42 = vadd.f32 %v10725_v33, %v10724_v27  ;;  %11068 = vmatprep.subr.bf16.mxu0 %v11812_v57  ;;  %7718 = vmatmul.mubr.bf16.vlgmr.msra.gmra.mxu1 %v11816_v20  ;;  %v11823_v57 = vld [vmem:[%s14110_s2 + $0x88] sm:$0xff]  }
 0x17f   : > { %v12732_v36 = vadd.f32 %v10835_v32, %v3842_v29  ;;  %v10727_v45 = vpop.f32.mrf.mxu0 }
 0x180   : > { %v12737_v46 = vpop.f32.mrf.mxu1  ;;  %v12743_v50 = vadd.f32 %v10726_v42, %v12610_v51 }
 0x181   : > { %14119 = vst [vmem:[#allocation7_spill] sm:$0xff] %v12732_v36  ;;  %v10728_v53 = vpop.f32.mrf.mxu0  ;;  %11069 = vmatpush3.bf16.msra.mxu0 %v11813_v63 }
 0x182   : > { %v12745_v54 = vpop.f32.mrf.mxu1  ;;  %v10729_v55 = vadd.f32 %v10728_v53, %v10727_v45 }
 0x183   : > { %v10730_v60 = vpop.f32.mrf.mxu0 }
 0x184   : > { %v12750_v61 = vpop.f32.mrf.mxu1  ;;  %v12756_v51 = vadd.f32 %v10729_v55, %v12612_v59  ;;  %v11814_v59 = vld [vmem:[%s14110_s2 + $0xd8] sm:$0xff]  }
 0x185   : > { %v10731_v3 = vpop.f32.mrf.mxu0  ;;  %11070 = vmatprep.subr.bf16.mxu0 %v11814_v59  ;;  %v11826_v59 = vld [vmem:[%s14110_s2 + $0x80] sm:$0xff]  }
 0x186   : > { %v12761_v7 = vpop.f32.mrf.mxu1  ;;  %v10732_v9 = vadd.f32 %v10731_v3, %v10730_v60  ;;  %11071 = vmatpush3.bf16.msra.mxu0 %v11815_v17  ;;  %v11825_v3 = vld [vmem:[%s14110_s2 + $0xc0] sm:$0xff]  }
 0x187   : > { %v10733_v10 = vpop.f32.mrf.mxu0  ;;  %11072 = vmatprep.subr.bf16.mxu0 %v11819_v31 }
 0x188   : > { %v12769_v11 = vpop.f32.mrf.mxu1  ;;  %v12775_v19 = vadd.f32 %v10732_v9, %v12614_v5  ;;  %v11820_v5 = vld [vmem:[%s14110_s2 + $0x90] sm:$0xff]  }
 0x189   : > { %v10734_v23 = vpop.f32.mrf.mxu0 }
 0x18a   : > { %v12777_v27 = vpop.f32.mrf.mxu1  ;;  %v10735_v30 = vadd.f32 %v10734_v23, %v10733_v10  ;;  %11073 = vmatpush3.bf16.msra.mxu0 %v11820_v5 }
 0x18b   : > { %v10736_v29 = vpop.f32.mrf.mxu0  ;;  %11074 = vmatprep.subr.bf16.mxu0 %v11821_v41 }
 0x18c   : > { %v12782_v32 = vpop.f32.mrf.mxu1  ;;  %v12788_v33 = vadd.f32 %v10735_v30, %v12616_v13 }
 0x18d   : > { %v10737_v42 = vpop.f32.mrf.mxu0 }
 0x18e   : > { %v12790_v44 = vpop.f32.mrf.mxu1  ;;  %v10738_v45 = vadd.f32 %v10737_v42, %v10736_v29  ;;  %11075 = vmatpush3.bf16.msra.mxu0 %v11823_v57 }
 0x18f   : > { %v10739_v53 = vpop.f32.mrf.mxu0  ;;  %11076 = vmatprep.subr.bf16.mxu0 %v11825_v3  ;;  %v11822_v3 = vld [vmem:[%s14110_s2 + $0x178] sm:$0xff]  }
 0x190   : > { %v12795_v55 = vpop.f32.mrf.mxu1  ;;  %v12801_v13 = vadd.f32 %v10738_v45, %v12624_v25  ;;  %11174 = vmatprep.subr.bf16.mxu1 %v11822_v3 }
 0x191   : > { %v10740_v60 = vpop.f32.mrf.mxu0 }
 0x192   : > { %v12803_v63 = vpop.f32.mrf.mxu1  ;;  %v10741_v0 = vadd.f32 %v10740_v60, %v10739_v53  ;;  %11077 = vmatpush3.bf16.msra.mxu0 %v11826_v59 }
 0x193   : > { %v10742_v8 = vpop.f32.mrf.mxu0 }
 0x194   : > { %v12808_v9 = vpop.f32.mrf.mxu1  ;;  %v12814_v25 = vadd.f32 %v10741_v0, %v12626_v34 }
 0x195   : > { %v10743_v10 = vpop.f32.mrf.mxu0 }
 0x196   : > { %v12816_v17 = vpop.f32.mrf.mxu1  ;;  %v10744_v18 = vadd.f32 %v10743_v10, %v10742_v8  ;;  %v11824_v8 = vld [vmem:[%s14110_s2 + $0x138] sm:$0xff]  }
 0x197   : > { %v10745_v20 = vpop.f32.mrf.mxu0  ;;  %11175 = vmatpush3.bf16.msra.mxu1 %v11824_v8 }
 0x198   : > { %v12818_v23 = vpop.f32.mrf.mxu1  ;;  %v12821_v30 = vadd.f32 %v10744_v18, %v12628_v47 }
 0x199   : > { %v10746_v31 = vpop.f32.mrf.mxu0 }
 0x19a   : > { %14120 = vst [vmem:[#allocation8_spill] sm:$0xff] %v12821_v30  ;;  %v12823_v29 = vpop.f32.mrf.mxu1  ;;  %v10747_v5 = vadd.f32 %v10746_v31, %v10745_v20 }
 0x19b   : > { %v10748_v42 = vpop.f32.mrf.mxu0 }
 0x19c   : > { %v12825_v45 = vpop.f32.mrf.mxu1  ;;  %v12828_v34 = vadd.f32 %v10747_v5, %v12630_v56 }
 0x19d   : > { %v10749_v41 = vpop.f32.mrf.mxu0 }
 0x19e   : > { %14121 = vst [vmem:[#allocation9_spill] sm:$0xff] %v12828_v34  ;;  %v12830_v53 = vpop.f32.mrf.mxu1  ;;  %v10750_v57 = vadd.f32 %v10749_v41, %v10748_v42 }
 0x19f   : > { %v10751_v60 = vpop.f32.mrf.mxu0 }
 0x1a0   : > { %v12832_v0 = vpop.f32.mrf.mxu1  ;;  %v12835_v47 = vadd.f32 %v10750_v57, %v12638_v4 }
 0x1a1   : > { %v10752_v56 = vpop.f32.mrf.mxu0 }
 0x1a2   : > { %14122 = vst [vmem:[#allocation10_spill] sm:$0xff] %v12835_v47  ;;  %v12843_v59 = vpop.f32.mrf.mxu1  ;;  %v10753_v10 = vadd.f32 %v10752_v56, %v10751_v60 }
 0x1a3   : > { %v10754_v18 = vpop.f32.mrf.mxu0 }
 0x1a4   : > { %v12845_v20 = vpop.f32.mrf.mxu1  ;;  %v12848_v4 = vadd.f32 %v10753_v10, %v12640_v16 }
 0x1a5   : > { %v10755_v31 = vpop.f32.mrf.mxu0 }
 0x1a6   : > { %14123 = vst [vmem:[#allocation11_spill] sm:$0xff] %v12848_v4  ;;  %v12850_v5 = vpop.f32.mrf.mxu1  ;;  %v10756_v42 = vadd.f32 %v10755_v31, %v10754_v18 }
 0x1a7   : > { %v10757_v41 = vpop.f32.mrf.mxu0 }
 0x1a8   : > { %v12852_v57 = vpop.f32.mrf.mxu1  ;;  %v12855_v1 = vadd.f32 %v10756_v42, %v12643_v26  ;;  %v11839_v26 = vld [vmem:[%s14110_s2 + $0x170] sm:$0xff]  }
 0x1a9   : > { %v10758_v43 = vpop.f32.mrf.mxu0  ;;  %11176 = vmatprep.subr.bf16.mxu1 %v11839_v26 }
 0x1aa   : > { %14124 = vst [vmem:[#allocation12_spill] sm:$0xff] %v12855_v1  ;;  %v12857_v60 = vpop.f32.mrf.mxu1  ;;  %v10759_v3 = vadd.f32 %v10758_v43, %v10757_v41  ;;  %v11846_v43 = vld [vmem:[%s14110_s2 + $0x130] sm:$0xff]  }
 0x1ab   : > { %v10760_v56 = vpop.f32.mrf.mxu0  ;;  %11177 = vmatpush3.bf16.msra.mxu1 %v11846_v43 }
 0x1ac   : > { %v12859_v36 = vpop.f32.mrf.mxu1  ;;  %v12862_v16 = vadd.f32 %v10759_v3, %v12645_v35 }
 0x1ad   : > { %v10761_v8 = vpop.f32.mrf.mxu0 }
 0x1ae   : > { %14125 = vst [vmem:[#allocation13_spill] sm:$0xff] %v12862_v16  ;;  %v12864_v10 = vpop.f32.mrf.mxu1  ;;  %v10762_v18 = vadd.f32 %v10761_v8, %v10760_v56 }
 0x1af   : > { %v10763_v31 = vpop.f32.mrf.mxu0 }
 0x1b0   : > { %v12866_v21 = vpop.f32.mrf.mxu1  ;;  %v12875_v42 = vadd.f32 %v10762_v18, %v12653_v49 }
 0x1b1   : > { %v10764_v35 = vpop.f32.mrf.mxu0 }
 0x1b2   : > { %14126 = vst [vmem:[#allocation14_spill] sm:$0xff] %v12875_v42  ;;  %v12877_v41 = vpop.f32.mrf.mxu1  ;;  %v10765_v3 = vadd.f32 %v10764_v35, %v10763_v31 }
 0x1b3   : > { %v10766_v56 = vpop.f32.mrf.mxu0 }
 0x1b4   : > { %v12879_v8 = vpop.f32.mrf.mxu1  ;;  %v12882_v16 = vadd.f32 %v10765_v3, %v12655_v58 }
 0x1b5   : > { %v10767_v1 = vpop.f32.mrf.mxu0 }
 0x1b6   : > { %14127 = vst [vmem:[#allocation15_spill] sm:$0xff] %v12882_v16  ;;  %v12884_v4 = vpop.f32.mrf.mxu1  ;;  %v10768_v47 = vadd.f32 %v10767_v1, %v10766_v56 }
 0x1b7   : > { %v10769_v34 = vpop.f32.mrf.mxu0 }
 0x1b8   : > { %v12886_v30 = vpop.f32.mrf.mxu1  ;;  %v12889_v49 = vadd.f32 %v10768_v47, %v12657_v6  ;;  %v11860_v47 = vld [vmem:[%s14110_s2 + $0x128] sm:$0xff]  }
 0x1b9   : > { %v10770_v18 = vpop.f32.mrf.mxu0 }
 0x1ba   : > { %14128 = vst [vmem:[#allocation16_spill] sm:$0xff] %v12889_v49  ;;  %v12891_v26 = vpop.f32.mrf.mxu1  ;;  %v10771_v31 = vadd.f32 %v10770_v18, %v10769_v34  ;;  %v11853_v34 = vld [vmem:[%s14110_s2 + $0x168] sm:$0xff]   ;;  %v11874_v49 = vld [vmem:[%s14110_s2 + $0x120] sm:$0xff]  }
 0x1bb   : > { %v10772_v43 = vpop.f32.mrf.mxu0  ;;  %11178 = vmatprep.subr.bf16.mxu1 %v11853_v34 }
 0x1bc   : > { %v12893_v35 = vpop.f32.mrf.mxu1  ;;  %v12896_v58 = vadd.f32 %v10771_v31, %v12659_v14  ;;  %11179 = vmatpush3.bf16.msra.mxu1 %v11860_v47 }
 0x1bd   : > { %v10773_v3 = vpop.f32.mrf.mxu0 }
 0x1be   : > { %14129 = vst [vmem:[#allocation17_spill] sm:$0xff] %v12896_v58  ;;  %v12898_v16 = vpop.f32.mrf.mxu1  ;;  %v10774_v1 = vadd.f32 %v10773_v3, %v10772_v43  ;;  %v11867_v58 = vld [vmem:[%s14110_s2 + $0x160] sm:$0xff]  }
 0x1bf   : > { %v10775_v56 = vpop.f32.mrf.mxu0  ;;  %11180 = vmatprep.subr.bf16.mxu1 %v11867_v58 }
 0x1c0   : > { %v12900_v42 = vpop.f32.mrf.mxu1  ;;  %v12903_v6 = vadd.f32 %v10774_v1, %v12667_v28  ;;  %11181 = vmatpush3.bf16.msra.mxu1 %v11874_v49 }
 0x1c1   : > { %v10776_v14 = vpop.f32.mrf.mxu0 }
 0x1c2   : > { %14130 = vst [vmem:[#allocation18_spill] sm:$0xff] %v12903_v6  ;;  %v12911_v18 = vpop.f32.mrf.mxu1  ;;  %v10777_v31 = vadd.f32 %v10776_v14, %v10775_v56 }
 0x1c3   : > { %14131 = vst [vmem:[#allocation19_spill] sm:$0xff] %v12911_v18  ;;  %v10778_v43 = vpop.f32.mrf.mxu0 }
 0x1c4   : > { %v12913_v3 = vpop.f32.mrf.mxu1  ;;  %v12916_v28 = vadd.f32 %v10777_v31, %v12669_v38 }
 0x1c5   : > { %14132 = vst [vmem:[#allocation20_spill] sm:$0xff] %v12913_v3  ;;  %v10779_v1 = vpop.f32.mrf.mxu0 }
 0x1c6   : > { %14133 = vst [vmem:[#allocation21_spill] sm:$0xff] %v12916_v28  ;;  %v12918_v6 = vpop.f32.mrf.mxu1  ;;  %v10780_v56 = vadd.f32 %v10779_v1, %v10778_v43 }
 0x1c7   : > { %14134 = vst [vmem:[#allocation22_spill] sm:$0xff] %v12918_v6  ;;  %v10781_v34 = vpop.f32.mrf.mxu0  ;;  %v11881_v6 = vld [vmem:[%s14110_s2 + $0x1f8] sm:$0xff]  }
 0x1c8   : > { %v12926_v14 = vpop.f32.mrf.mxu1  ;;  %v12929_v47 = vadd.f32 %v10780_v56, %v12671_v52  ;;  %11286 = vmatprep.subr.bf16.mxu0 %v11881_v6  ;;  %v11890_v6 = vld [vmem:[%s14110_s2 + $0x118] sm:$0xff]  }
 0x1c9   : > { %v10782_v38 = vpop.f32.mrf.mxu0 }
 0x1ca   : > { %14135 = vst [vmem:[#allocation23_spill] sm:$0xff] %v12929_v47  ;;  %v12931_v31 = vpop.f32.mrf.mxu1  ;;  %v10783_v28 = vadd.f32 %v10782_v38, %v10781_v34 }
 0x1cb   : > { %v10784_v3 = vpop.f32.mrf.mxu0 }
 0x1cc   : > { %v12936_v18 = vpop.f32.mrf.mxu1  ;;  %v12939_v43 = vadd.f32 %v10783_v28, %v12673_v62 }
 0x1cd   : > { %14136 = vst [vmem:[#allocation24_spill] sm:$0xff] %v12936_v18  ;;  %v10785_v58 = vpop.f32.mrf.mxu0  ;;  %v11883_v18 = vld [vmem:[%s14110_s2 + $0x158] sm:$0xff]  }
 0x1ce   : > { %14137 = vst [vmem:[#allocation25_spill] sm:$0xff] %v12939_v43  ;;  %v12941_v1 = vpop.f32.mrf.mxu1  ;;  %v10786_v52 = vadd.f32 %v10785_v58, %v10784_v3  ;;  %11182 = vmatprep.subr.bf16.mxu1 %v11883_v18 }
 0x1cf   : > { %14138 = vst [vmem:[#allocation26_spill] sm:$0xff] %v12941_v1  ;;  %v10787_v49 = vpop.f32.mrf.mxu0  ;;  %11183 = vmatpush3.bf16.msra.mxu1 %v11890_v6 }
 0x1d0   : > { %v12943_v56 = vpop.f32.mrf.mxu1  ;;  %v12946_v34 = vadd.f32 %v10786_v52, %v12681_v12 }
 0x1d1   : > { %14139 = vst [vmem:[#allocation27_spill] sm:$0xff] %v12943_v56  ;;  %v10788_v38 = vpop.f32.mrf.mxu0 }
 0x1d2   : > { %14140 = vst [vmem:[#allocation28_spill] sm:$0xff] %v12946_v34  ;;  %v12948_v47 = vpop.f32.mrf.mxu1  ;;  %v10789_v62 = vadd.f32 %v10788_v38, %v10787_v49 }
 0x1d3   : > { %14141 = vst [vmem:[#allocation29_spill] sm:$0xff] %v12948_v47  ;;  %v10790_v28 = vpop.f32.mrf.mxu0 }
 0x1d4   : > { %v12956_v3 = vpop.f32.mrf.mxu1  ;;  %v12959_v58 = vadd.f32 %v10789_v62, %v12683_v22 }
 0x1d5   : > { %14142 = vst [vmem:[#allocation30_spill] sm:$0xff] %v12956_v3  ;;  %v10791_v12 = vpop.f32.mrf.mxu0 }
 0x1d6   : > { %14143 = vst [vmem:[#allocation31_spill] sm:$0xff] %v12959_v58  ;;  %v12961_v52 = vpop.f32.mrf.mxu1  ;;  %v10792_v34 = vadd.f32 %v10791_v12, %v10790_v28 }
 0x1d7   : > { %v10793_v43 = vpop.f32.mrf.mxu0 }
 0x1d8   : > { %v12963_v47 = vpop.f32.mrf.mxu1  ;;  %v12966_v49 = vadd.f32 %v10792_v34, %v12685_v37 }
 0x1d9   : > { %v10794_v38 = vpop.f32.mrf.mxu0 }
 0x1da   : > { %14144 = vst [vmem:[#allocation32_spill] sm:$0xff] %v12966_v49  ;;  %v12968_v56 = vpop.f32.mrf.mxu1  ;;  %v10795_v1 = vadd.f32 %v10794_v38, %v10793_v43  ;;  %v11899_v43 = vld [vmem:[%s14110_s2 + $0x150] sm:$0xff]  }
 0x1db   : > { %v10796_v3 = vpop.f32.mrf.mxu0  ;;  %11184 = vmatprep.subr.bf16.mxu1 %v11899_v43  ;;  %v10841_v43 = vadd.f32 %v12750_v61, %v12745_v54  ;;  %v10859_v54 = vadd.f32 %v12825_v45, %v12823_v29  ;;  %v14149_v45 = vld [vmem:[#allocation8_spill] sm:$0xff] }
 0x1dc   : > { %v12970_v18 = vpop.f32.mrf.mxu1  ;;  %v12973_v22 = vadd.f32 %v10795_v1, %v12687_v48  ;;  %v11906_v48 = vld [vmem:[%s14110_s2 + $0x110] sm:$0xff]  }
 0x1dd   : > { %v10797_v62 = vpop.f32.mrf.mxu0  ;;  %11185 = vmatpush3.bf16.msra.mxu1 %v11906_v48 }
 0x1de   : > { %14145 = vst [vmem:[#allocation33_spill] sm:$0xff] %v12973_v22  ;;  %v12975_v6 = vpop.f32.mrf.mxu1  ;;  %v10798_v28 = vadd.f32 %v10797_v62, %v10796_v3 }
 0x1df   : > { %v10799_v12 = vpop.f32.mrf.mxu0 }
 0x1e0   : > { %v12977_v58 = vpop.f32.mrf.mxu1  ;;  %v12980_v37 = vadd.f32 %v10798_v28, %v12695_v2 }
 0x1e1   : > { %14146 = vst [vmem:[#allocation34_spill] sm:$0xff] %v12977_v58  ;;  %v10800_v34 = vpop.f32.mrf.mxu0  ;;  %v10838_v58 = vadd.f32 %v12737_v46, %v12730_v40  ;;  %v10853_v40 = vadd.f32 %v12808_v9, %v12803_v63  ;;  %v10856_v46 = vadd.f32 %v12818_v23, %v12816_v17  ;;  %v10877_v17 = vadd.f32 %v12879_v8, %v12877_v41  ;;  %v14155_v41 = vld [vmem:[#allocation22_spill] sm:$0xff] }
 0x1e2   : > { %14147 = vst [vmem:[#allocation35_spill] sm:$0xff] %v12980_v37  ;;  %v12982_v49 = vpop.f32.mrf.mxu1  ;;  %v10801_v38 = vadd.f32 %v10800_v34, %v10799_v12  ;;  %v10892_v8 = vadd.f32 %v12926_v14, %v14155_v41 }
 0x1e3   : > { %14148 = vst [vmem:[#allocation36_spill] sm:$0xff] %v12982_v49  ;;  %v10802_v1 = vpop.f32.mrf.mxu0 }
 0x1e4   : > { %v12990_v3 = vpop.f32.mrf.mxu1  ;;  %v12993_v62 = vadd.f32 %v10801_v38, %v12697_v15  ;;  %v10844_v38 = vadd.f32 %v12769_v11, %v12761_v7  ;;  %v10862_v7 = vadd.f32 %v12832_v0, %v12830_v53  ;;  %v10865_v11 = vadd.f32 %v12845_v20, %v12843_v59  ;;  %v14151_v59 = vld [vmem:[#allocation19_spill] sm:$0xff]  ;;  %v14152_v20 = vld [vmem:[#allocation20_spill] sm:$0xff] }
 0x1e5   : > { %v10803_v2 = vpop.f32.mrf.mxu0  ;;  %v13062_v53 = vadd.f32 %v10856_v46, %v14149_v45  ;;  %v14161_v46 = vld [vmem:[#allocation16_spill] sm:$0xff]  ;;  %v14165_v45 = vld [vmem:[#allocation30_spill] sm:$0xff] }
 0x1e6   : > { %v12995_v28 = vpop.f32.mrf.mxu1  ;;  %v10804_v22 = vadd.f32 %v10803_v2, %v10802_v1  ;;  %v10847_v1 = vadd.f32 %v12782_v32, %v12777_v27  ;;  %v4011_v27 = vadd.f32 %v10841_v43, %v12756_v51  ;;  %v10868_v32 = vadd.f32 %v12852_v57, %v12850_v5  ;;  %v14153_v5 = vld [vmem:[#allocation10_spill] sm:$0xff] }
 0x1e7   : > { %v10805_v37 = vpop.f32.mrf.mxu0  ;;  %v13040_v9 = vadd.f32 %v10844_v38, %v12775_v19  ;;  %v13059_v19 = vadd.f32 %v10853_v40, %v12814_v25  ;;  %v13075_v57 = vadd.f32 %v10862_v7, %v14153_v5  ;;  %v14154_v25 = vld [vmem:[#allocation11_spill] sm:$0xff]  ;;  %v14162_v7 = vld [vmem:[#allocation26_spill] sm:$0xff] }
 0x1e8   : > { %v12998_v49 = vadd.f32 %v10804_v22, %v12699_v24  ;;  %v13000_v12 = vpop.f32.mrf.mxu1  ;;  %v10850_v24 = vadd.f32 %v12795_v55, %v12790_v44  ;;  %v10871_v44 = vadd.f32 %v12859_v36, %v12857_v60  ;;  %v10874_v55 = vadd.f32 %v12866_v21, %v12864_v10  ;;  %v11922_v10 = vld [vmem:[%s14110_s2 + $0x108] sm:$0xff]   ;;  %v14168_v5 = vld [vmem:[#allocation18_spill] sm:$0xff] }
 0x1e9   : > { %v10806_v34 = vpop.f32.mrf.mxu0  ;;  %v13052_v36 = vadd.f32 %v10847_v1, %v12788_v33  ;;  %v10883_v21 = vadd.f32 %v12893_v35, %v12891_v26  ;;  %v10886_v33 = vadd.f32 %v12900_v42, %v12898_v16  ;;  %v13078_v60 = vadd.f32 %v10865_v11, %v14154_v25  ;;  %v13088_v16 = vld [vmem:[%s14111_s3] ss:$0 sm:$0xff]  ;;  %v14163_v11 = vld [vmem:[#allocation27_spill] sm:$0xff] }
 0x1ea   : > { %v10807_v15 = vadd.f32 %v10806_v34, %v10805_v37  ;;  %v13017_v2 = vpop.f32.mrf.mxu1  ;;  %v13049_v23 = vadd.f32 %v10850_v24, %v12801_v13  ;;  %v11915_v13 = vld [vmem:[%s14110_s2 + $0x148] sm:$0xff]   ;;  %v14156_v42 = vld [vmem:[#allocation14_spill] sm:$0xff]  ;;  %v14158_v34 = vld [vmem:[#allocation13_spill] sm:$0xff] }
 0x1eb   : > { %v13008_v48 = vpop.f32.mrf.mxu0  ;;  %v13091_v35 = vadd.f32 %v10874_v55, %v14156_v42  ;;  %v13097_v43 = vadd.f32 %v10871_v44, %v14158_v34  ;;  %11186 = vmatprep.subr.bf16.mxu1 %v11915_v13  ;;  %v14160_v24 = vld [vmem:[#allocation15_spill] sm:$0xff]  ;;  %v14164_v55 = vld [vmem:[#allocation29_spill] sm:$0xff]  ;;  %v13124_v25 = vadd.f32 %v10886_v33, %v14168_v5  ;;  %v14171_v42 = vld [vmem:[#allocation36_spill] sm:$0xff] }
 0x1ec   : > { %v13015_v22 = vadd.f32 %v10807_v15, %v12702_v39  ;;  %v4008_v39 = vadd.f32 %v10838_v58, %v12743_v50  ;;  %v10880_v50 = vadd.f32 %v12886_v30, %v12884_v4  ;;  %v13046_v51 = vpop.f32.mrf.mxu1  ;;  %v14150_v30 = vld [vmem:[#allocation9_spill] sm:$0xff]  ;;  %v10889_v4 = vadd.f32 %v14152_v20, %v14151_v59  ;;  %v14157_v58 = vld [vmem:[#allocation12_spill] sm:$0xff]  ;;  %11187 = vmatpush3.bf16.msra.mxu1 %v11922_v10  ;;  %v14167_v59 = vld [vmem:[#allocation6_spill] sm:$0xff] }
 0x1ed   : > { %v10809_v61 = vpop.f32.mrf.mxu0  ;;  %v13065_v0 = vadd.f32 %v10859_v54, %v14150_v30  ;;  %v13094_v37 = vadd.f32 %v10868_v32, %v14157_v58  ;;  %v14159_v15 = vld [vmem:[#allocation24_spill] sm:$0xff]  ;;  %v13102_v40 = vadd.f32 %v10877_v17, %v14160_v24  ;;  %v10898_v32 = vadd.f32 %v14163_v11, %v14162_v7  ;;  %v14166_v17 = vld [vmem:[#allocation17_spill] sm:$0xff]  ;;  %v14172_v34 = vld [vmem:[#allocation23_spill] sm:$0xff] }
 0x1ee   : > { %v10895_v38 = vadd.f32 %v14159_v15, %v12931_v31  ;;  %v10920_v14 = vpop.f32.mrf.mxu1  ;;  %v13105_v54 = vadd.f32 %v10880_v50, %v14161_v46  ;;  %v10901_v44 = vadd.f32 %v14165_v45, %v14164_v55  ;;  %v10904_v30 = vadd.f32 %v12963_v47, %v12961_v52  ;;  %v13116_v31 = vld [vmem:[%s14113_s5] ss:$0 sm:$0xff]  ;;  %v14169_v10 = vld [vmem:[#allocation21_spill] sm:$0xff] }
 0x1ef   : > { %v13037_v63 = vpop.f32.mrf.mxu0  ;;  %v13119_v13 = vadd.f32 %v10883_v21, %v14166_v17  ;;  %v13127_v41 = vadd.f32 %v10889_v4, %v14169_v10  ;;  %v10907_v47 = vadd.f32 %v12970_v18, %v12968_v56  ;;  %v14170_v52 = vld [vmem:[#allocation34_spill] sm:$0xff]  ;;  %v10913_v21 = vadd.f32 %v12990_v3, %v14171_v42  ;;  %v14173_v46 = vld [vmem:[#allocation25_spill] sm:$0xff]  ;;  %v14175_v3 = vld [vmem:[#allocation31_spill] sm:$0xff] }
 0x1f0   : > { %v13136_v15 = vadd.f32 %v10892_v8, %v14172_v34  ;;  %v13141_v7 = vadd.f32 %v10895_v38, %v14173_v46  ;;  %v10810_v56 = vadd.f32 %v10809_v61, %v13008_v48  ;;  %v13148_v55 = vadd.f32 %v10901_v44, %v14175_v3  ;;  %v14176_v8 = vld [vmem:[#allocation32_spill] sm:$0xff] }
 0x1f1   : > { %v13056_v29 = vpop.f32.mrf.mxu0  ;;  %v13151_v45 = vadd.f32 %v10904_v30, %v14176_v8  ;;  %v10916_v48 = vadd.f32 %v13000_v12, %v12995_v28  ;;  %v13162_v44 = vadd.f32 %v10913_v21, %v12993_v62  ;;  %v10919_v28 = vadd.f32 %v13046_v51, %v13017_v2  ;;  %v14180_v12 = vld [vmem:[#allocation4_spill] sm:$0xff] }
 0x1f2   : > { %v10813_v46 = vadd.f32 %v13056_v29, %v13037_v63  ;;  %v11931_v29 = vld [vmem:[%s14110_s2 + $0x140] sm:$0xff]  }
 0x1f3   : > { %v11440_v26 = vpop.f32.mrf.mxu0  ;;  %v13185_v63 = vadd.f32 %v10919_v28, %v13015_v22  ;;  %11188 = vmatprep.subr.bf16.mxu1 %v11931_v29 }
 0x1f4   : > { %v4169_v1 = vadd.f32 %v11440_v26, %v4008_v39  ;;  %v10910_v26 = vadd.f32 %v14170_v52, %v12975_v6  ;;  %v14174_v6 = vld [vmem:[#allocation28_spill] sm:$0xff] }
 0x1f5   : > { %v4160_v39 = vpop.f32.mrf.mxu0  ;;  %v13145_v11 = vadd.f32 %v10898_v32, %v14174_v6 }
 0x1f6   : > { %v4296_v50 = vmul.f32 %v13088_v16, %v4169_v1  ;;  %v4161_v20 = vadd.f32 %v4160_v39, %v14167_v59  ;;  %v10921_v1 = vpop.f32.mrf.mxu1  ;;  %v14178_v59 = vld [vmem:[#allocation35_spill] sm:$0xff] }
 0x1f7   : > { %v11441_v58 = vpop.f32.mrf.mxu0  ;;  %v13159_v32 = vadd.f32 %v10910_v26, %v14178_v59  ;;  %v3959_v26 = vadd.f32 %v10810_v56, %v14180_v12 }
 0x1f8   : > { %v4335_v33 = vadd.f32 %v13116_v31, %v4296_v50  ;;  %v4294_v24 = vmul.f32 %v13088_v16, %v4161_v20  ;;  %v4172_v4 = vadd.f32 %v11441_v58, %v4011_v27  ;;  %v14177_v50 = vld [vmem:[#allocation7_spill] sm:$0xff]  ;;  %v14179_v20 = vld [vmem:[#allocation33_spill] sm:$0xff]  ;;  %v10923_v5 = vpop.f32.mrf.mxu1 }
 0x1f9   : > { %v4163_v18 = vpop.f32.mrf.mxu0  ;;  %v13165_v30 = vadd.f32 %v10907_v47, %v14179_v20 }
 0x1fa   : > { %v4367_v39 = vmax.f32 %v4335_v33, 0.0  ;;  %v4333_v17 = vadd.f32 %v13116_v31, %v4294_v24  ;;  %v4297_v27 = vmul.f32 %v13088_v16, %v4172_v4  ;;  %v4164_v38 = vadd.f32 %v4163_v18, %v14177_v50  ;;  %v10924_v2 = vpop.f32.mrf.mxu1 }
 0x1fb   : > { %v11444_v61 = vpop.f32.mrf.mxu0  ;;  %v10922_v4 = vadd.f32 %v10921_v1, %v10920_v14  ;;  %v13182_v14 = vadd.f32 %v10916_v48, %v12998_v49  ;;  %v11938_v49 = vld [vmem:[%s14110_s2 + $0x100] sm:$0xff]   ;;  %v10925_v50 = vadd.f32 %v10924_v2, %v10923_v5 }
 0x1fc   : > { %4454 = vst [vmem:[#allocation2 + $0x31] sm:$0xff] %v4367_v39  ;;  %v4365_v10 = vmax.f32 %v4333_v17, 0.0  ;;  %v4336_v52 = vadd.f32 %v13116_v31, %v4297_v27  ;;  %v4295_v42 = vmul.f32 %v13088_v16, %v4164_v38  ;;  %v4185_v58 = vadd.f32 %v11444_v61, %v13049_v23  ;;  %v14181_v27 = vld [vmem:[#allocation5_spill] sm:$0xff]  ;;  %11189 = vmatpush3.bf16.msra.mxu1 %v11938_v49 }
 0x1fd   : > { %v4176_v34 = vpop.f32.mrf.mxu0  ;;  %v10226_v62 = vpack.c.bf16 %v4367_v39, %v4367_v39  ;;  %v3962_v22 = vadd.f32 %v10813_v46, %v14181_v27  ;;  %v13197_v59 = vadd.f32 %v10922_v4, %v3959_v26 }
 0x1fe   : > { %4452 = vst [vmem:[#allocation2 + $0x19] sm:$0xff] %v4365_v10  ;;  %v4368_v21 = vmax.f32 %v4336_v52, 0.0  ;;  %v4334_v47 = vadd.f32 %v13116_v31, %v4295_v42  ;;  %v4300_v33 = vmul.f32 %v13088_v16, %v4185_v58  ;;  %v4177_v24 = vadd.f32 %v4176_v34, %v13040_v9 }
 0x1ff   : > { %v11445_v23 = vpop.f32.mrf.mxu0  ;;  %v10224_v18 = vpack.c.bf16 %v4365_v10, %v4365_v10  ;;  %4840 = vst [vmem:[#allocation3 + $0x94] sm:$0xf] %v10226_v62  ;;  %5414 = vst [vmem:[#allocation3 + $0x58] sm:$0xf] %v10226_v62  ;;  %v13205_v46 = vadd.f32 %v10925_v50, %v3962_v22 }
 0x200   : > { %5989 = vst [vmem:[#allocation3 + $0x1c] sm:$0xf] %v10226_v62  ;;  %4455 = vst [vmem:[#allocation2 + $0x39] sm:$0xff] %v4368_v21  ;;  %v4366_v51 = vmax.f32 %v4334_v47, 0.0  ;;  %v4339_v56 = vadd.f32 %v13116_v31, %v4300_v33  ;;  %v4298_v6 = vmul.f32 %v13088_v16, %v4177_v24  ;;  %v4188_v3 = vadd.f32 %v11445_v23, %v13059_v19 }
 0x201   : > { %v4179_v8 = vpop.f32.mrf.mxu0  ;;  %4838 = vst [vmem:[#allocation3 + $0x4c] sm:$0xf] %v10224_v18  ;;  %v10227_v9 = vpack.c.bf16 %v4368_v21, %v4368_v21  ;;  %5412 = vst [vmem:[#allocation3 + $0x10] sm:$0xf] %v10224_v18 }
 0x202   : > { %4453 = vst [vmem:[#allocation2 + $0x21] sm:$0xff] %v4366_v51  ;;  %v4371_v1 = vmax.f32 %v4339_v56, 0.0  ;;  %v4337_v39 = vadd.f32 %v13116_v31, %v4298_v6  ;;  %v4301_v19 = vmul.f32 %v13088_v16, %v4188_v3  ;;  %v4180_v17 = vadd.f32 %v4179_v8, %v13052_v36 }
 0x203   : > { %v4488_v38 = vld [vmem:[#allocation2 + $0x30] sm:$0xff]  ;;  %v11448_v48 = vpop.f32.mrf.mxu0  ;;  %v10225_v61 = vpack.c.bf16 %v4366_v51, %v4366_v51  ;;  %4841 = vst [vmem:[#allocation3 + $0xb8] sm:$0xf] %v10227_v9  ;;  %5415 = vst [vmem:[#allocation3 + $0x7c] sm:$0xf] %v10227_v9 }
 0x204   : > { %5990 = vst [vmem:[#allocation3 + $0x40] sm:$0xf] %v10227_v9  ;;  %4458 = vst [vmem:[#allocation2 + $0x61] sm:$0xff] %v4371_v1  ;;  %v4369_v20 = vmax.f32 %v4337_v39, 0.0  ;;  %v4340_v36 = vadd.f32 %v13116_v31, %v4301_v19  ;;  %v4299_v10 = vmul.f32 %v13088_v16, %v4180_v17  ;;  %v4201_v52 = vadd.f32 %v11448_v48, %v13075_v57 }
 0x205   : > { %v4486_v42 = vld [vmem:[#allocation2 + $0x18] sm:$0xff]  ;;  %v4192_v5 = vpop.f32.mrf.mxu0  ;;  %4839 = vst [vmem:[#allocation3 + $0x70] sm:$0xf] %v10225_v61  ;;  %v10194_v58 = vpack.c.bf16 %v4488_v38, %v4488_v38  ;;  %v10230_v28 = vpack.c.bf16 %v4371_v1, %v4371_v1 }
 0x206   : > { %4456 = vst [vmem:[#allocation2 + $0x49] sm:$0xff] %v4369_v20  ;;  %v4372_v12 = vmax.f32 %v4340_v36, 0.0  ;;  %v4338_v26 = vadd.f32 %v13116_v31, %v4299_v10  ;;  %v4304_v34 = vmul.f32 %v13088_v16, %v4201_v52  ;;  %v4193_v62 = vadd.f32 %v4192_v5, %v13062_v53 }
 0x207   : > { %v4489_v21 = vld [vmem:[#allocation2 + $0x38] sm:$0xff]  ;;  %v11449_v24 = vpop.f32.mrf.mxu0  ;;  %v10192_v4 = vpack.c.bf16 %v4486_v42, %v4486_v42  ;;  %4648 = vst [vmem:[#allocation3 + $0x90] sm:$0xf] %v10194_v58  ;;  %5222 = vst [vmem:[#allocation3 + $0x54] sm:$0xf] %v10194_v58  ;;  %v10228_v57 = vpack.c.bf16 %v4369_v20, %v4369_v20 }
 0x208   : > { %v4872_v47 = vld [vmem:[#allocation2 + $0x32] sm:$0xff]  ;;  %v4873_v33 = vld [vmem:[#allocation2 + $0x3a] sm:$0xff]  ;;  %4844 = vst [vmem:[#allocation3 + $0x124] sm:$0xf] %v10230_v28  ;;  %5797 = vst [vmem:[#allocation3 + $0x18] sm:$0xf] %v10194_v58  ;;  %v4343_v18 = vadd.f32 %v13116_v31, %v4304_v34  ;;  %v4302_v53 = vmul.f32 %v13088_v16, %v4193_v62  ;;  %v4204_v2 = vadd.f32 %v11449_v24, %v13078_v60 }
 0x209   : > { %5418 = vst [vmem:[#allocation3 + $0xe8] sm:$0xf] %v10230_v28  ;;  %5993 = vst [vmem:[#allocation3 + $0xac] sm:$0xf] %v10230_v28  ;;  %v4370_v23 = vmax.f32 %v4338_v26, 0.0  ;;  %v4195_v51 = vpop.f32.mrf.mxu0  ;;  %v4487_v56 = vld [vmem:[#allocation2 + $0x20] sm:$0xff]  ;;  %v13210_v6 = vpack.c.bf16 %v4489_v21, %v4489_v21  ;;  %v13212_v9 = vpack.c.bf16 %v4872_v47, %v4872_v47  ;;  %v13214_v29 = vpack.c.bf16 %v4873_v33, %v4873_v33 }
 0x20a   : > { %4459 = vst [vmem:[#allocation2 + $0x69] sm:$0xff] %v4372_v12  ;;  %4646 = vst [vmem:[#allocation3 + $0x48] sm:$0xf] %v10192_v4  ;;  %v4870_v3 = vld [vmem:[#allocation2 + $0x1a] sm:$0xff]  ;;  %v4871_v8 = vld [vmem:[#allocation2 + $0x22] sm:$0xff]  ;;  %v13216_v1 = vpack.c.bf16 %v4372_v12, %v4372_v12  ;;  %v4375_v39 = vmax.f32 %v4343_v18, 0.0  ;;  %v4341_v60 = vadd.f32 %v13116_v31, %v4302_v53  ;;  %v4305_v19 = vmul.f32 %v13088_v16, %v4204_v2 }
 0x20b   : > { %5220 = vst [vmem:[#allocation3 + $0xc] sm:$0xf] %v10192_v4  ;;  %4842 = vst [vmem:[#allocation3 + $0xdc] sm:$0xf] %v10228_v57  ;;  %v4196_v17 = vadd.f32 %v4195_v51, %v13065_v0  ;;  %v5253_v49 = vld [vmem:[#allocation2 + $0x21] sm:$0xff]  ;;  %v11452_v50 = vpop.f32.mrf.mxu0  ;;  %v10193_v38 = vpack.c.bf16 %v4487_v56, %v4487_v56  ;;  %v10256_v48 = vpack.c.bf16 %v4870_v3, %v4870_v3 }
 0x20c   : > { %5416 = vst [vmem:[#allocation3 + $0xa0] sm:$0xf] %v10228_v57  ;;  %5991 = vst [vmem:[#allocation3 + $0x64] sm:$0xf] %v10228_v57  ;;  %v5444_v27 = vld [vmem:[#allocation2 + $0x1a] sm:$0xff]  ;;  %v10257_v61 = vpack.c.bf16 %v4871_v8, %v4871_v8  ;;  %v10229_v20 = vpack.c.bf16 %v4370_v23, %v4370_v23  ;;  %v4373_v0 = vmax.f32 %v4341_v60, 0.0  ;;  %v4344_v36 = vadd.f32 %v13116_v31, %v4305_v19 }
 0x20d   : > { %4457 = vst [vmem:[#allocation2 + $0x51] sm:$0xff] %v4370_v23  ;;  %v4492_v22 = vld [vmem:[#allocation2 + $0x60] sm:$0xff]  ;;  %4649 = vst [vmem:[#allocation3 + $0xb4] sm:$0xf] %v13210_v6  ;;  %v4303_v10 = vmul.f32 %v13088_v16, %v4196_v17  ;;  %v4217_v52 = vadd.f32 %v11452_v50, %v13091_v35  ;;  %v4490_v5 = vld [vmem:[#allocation2 + $0x48] sm:$0xff]  ;;  %v4208_v58 = vpop.f32.mrf.mxu0  ;;  %v13231_v12 = vpack.c.bf16 %v4375_v39, %v4375_v39 }
 0x20e   : > { %5223 = vst [vmem:[#allocation3 + $0x78] sm:$0xf] %v13210_v6  ;;  %5032 = vst [vmem:[#allocation3 + $0x98] sm:$0xf] %v13212_v9  ;;  %v5445_v42 = vld [vmem:[#allocation2 + $0x22] sm:$0xff]  ;;  %v13229_v28 = vpack.c.bf16 %v4492_v22, %v4492_v22  ;;  %v10319_v26 = vpack.c.bf16 %v5253_v49, %v5253_v49  ;;  %v10350_v34 = vpack.c.bf16 %v5444_v27, %v5444_v27  ;;  %v4376_v62 = vmax.f32 %v4344_v36, 0.0 }
 0x20f   : > { %5033 = vst [vmem:[#allocation3 + $0xbc] sm:$0xf] %v13214_v29  ;;  %4845 = vst [vmem:[#allocation3 + $0x148] sm:$0xf] %v13216_v1  ;;  %v4342_v21 = vadd.f32 %v13116_v31, %v4303_v10  ;;  %v4308_v35 = vmul.f32 %v13088_v16, %v4217_v52  ;;  %v4209_v47 = vadd.f32 %v4208_v58, %v13094_v37  ;;  %v11453_v57 = vpop.f32.mrf.mxu0  ;;  %v11835_v58 = vld [vmem:[#allocation3 + $0x94] ss:$36 sps:$4 sm:$0xff]  }
 0x210   : > { %4462 = vst [vmem:[#allocation2 + $0x91] sm:$0xff] %v4375_v39  ;;  %4647 = vst [vmem:[#allocation3 + $0x6c] sm:$0xf] %v10193_v38  ;;  %v13236_v23 = vpack.c.bf16 %v4490_v5, %v4490_v5  ;;  %v13240_v18 = vpack.c.bf16 %v4373_v0, %v4373_v0  ;;  %v10351_v53 = vpack.c.bf16 %v5445_v42, %v5445_v42  ;;  %v11829_v5 = vld [vmem:[#allocation3 + $0x4c] ss:$36 sps:$4 sm:$0xff]  }
 0x211   : > { %5221 = vst [vmem:[#allocation3 + $0x30] sm:$0xf] %v10193_v38  ;;  %5030 = vst [vmem:[#allocation3 + $0x50] sm:$0xf] %v10256_v48  ;;  %v4493_v33 = vld [vmem:[#allocation2 + $0x68] sm:$0xff]  ;;  %v4374_v2 = vmax.f32 %v4342_v21, 0.0  ;;  %v4347_v37 = vadd.f32 %v13116_v31, %v4308_v35  ;;  %v4306_v51 = vmul.f32 %v13088_v16, %v4209_v47  ;;  %v4220_v56 = vadd.f32 %v11453_v57, %v13102_v40  ;;  %v4211_v39 = vpop.f32.mrf.mxu0 }
 0x212   : > { %5031 = vst [vmem:[#allocation3 + $0x74] sm:$0xf] %v10257_v61  ;;  %4843 = vst [vmem:[#allocation3 + $0x100] sm:$0xf] %v10229_v20  ;;  %v4876_v24 = vld [vmem:[#allocation2 + $0x62] sm:$0xff]  ;;  %v4877_v4 = vld [vmem:[#allocation2 + $0x6a] sm:$0xff]  ;;  %v13248_v19 = vpack.c.bf16 %v4493_v33, %v4493_v33  ;;  %v13255_v27 = vpack.c.bf16 %v4376_v62, %v4376_v62  ;;  %v4212_v20 = vadd.f32 %v4211_v39, %v13097_v43  ;;  %7725 = vmatprep.mubr.bf16.mxu1 %v11829_v5 }
 0x213   : > { %4460 = vst [vmem:[#allocation2 + $0x79] sm:$0xff] %v4373_v0  ;;  %4652 = vst [vmem:[#allocation3 + $0x120] sm:$0xf] %v13229_v28  ;;  %v13251_v17 = vpack.c.bf16 %v4876_v24, %v4876_v24  ;;  %v13253_v49 = vpack.c.bf16 %v4877_v4, %v4877_v4  ;;  %v4379_v50 = vmax.f32 %v4347_v37, 0.0  ;;  %v4345_v38 = vadd.f32 %v13116_v31, %v4306_v51  ;;  %v11456_v0 = vpop.f32.mrf.mxu0  ;;  %v11897_v24 = vld [vmem:[%s14110_s2 + $0x1f0] sm:$0xff]  }
 0x214   : > { %5226 = vst [vmem:[#allocation3 + $0xe4] sm:$0xf] %v13229_v28  ;;  %4848 = vst [vmem:[#allocation3 + $0x1b4] sm:$0xf] %v13231_v12  ;;  %v6023_v3 = vld [vmem:[#allocation2 + $0x4a] sm:$0xff]  ;;  %v6024_v8 = vld [vmem:[#allocation2 + $0x52] sm:$0xff]  ;;  %v4309_v61 = vmul.f32 %v13088_v16, %v4220_v56  ;;  %v10233_v10 = vpack.c.bf16 %v4374_v2, %v4374_v2  ;;  %v4233_v52 = vadd.f32 %v11456_v0, %v13124_v25 }
 0x215   : > { %5413 = vst [vmem:[#allocation3 + $0x34] sm:$0xf] %v10319_v26  ;;  %5604 = vst [vmem:[#allocation3 + $0x14] sm:$0xf] %v10350_v34  ;;  %v4491_v60 = vld [vmem:[#allocation2 + $0x50] sm:$0xff]  ;;  %v10448_v40 = vpack.c.bf16 %v6023_v3, %v6023_v3  ;;  %v10449_v22 = vpack.c.bf16 %v6024_v8, %v6024_v8  ;;  %v4377_v43 = vmax.f32 %v4345_v38, 0.0  ;;  %v13272_v34 = vpack.c.bf16 %v4379_v50, %v4379_v50  ;;  %v4224_v33 = vpop.f32.mrf.mxu0 }
 0x216   : > { %4463 = vst [vmem:[#allocation2 + $0x99] sm:$0xff] %v4376_v62  ;;  %4650 = vst [vmem:[#allocation3 + $0xd8] sm:$0xf] %v13236_v23  ;;  %v10197_v36 = vpack.c.bf16 %v4491_v60, %v4491_v60  ;;  %v11882_v62 = vld [vmem:[%s14110_s2 + $0x1b8] sm:$0xff]   ;;  %v4348_v35 = vadd.f32 %v13116_v31, %v4309_v61  ;;  %v4307_v47 = vmul.f32 %v13088_v16, %v4212_v20 }
 0x217   : > { %5224 = vst [vmem:[#allocation3 + $0x9c] sm:$0xf] %v13236_v23  ;;  %4846 = vst [vmem:[#allocation3 + $0x16c] sm:$0xf] %v13240_v18  ;;  %v4496_v48 = vld [vmem:[#allocation2 + $0x90] sm:$0xff]  ;;  %v4312_v4 = vmul.f32 %v13088_v16, %v4233_v52  ;;  %v4225_v57 = vadd.f32 %v4224_v33, %v13105_v54  ;;  %v13288_v37 = vpack.c.bf16 %v4377_v43, %v4377_v43  ;;  %v11457_v60 = vpop.f32.mrf.mxu0  ;;  %v11914_v33 = vld [vmem:[%s14110_s2 + $0x1a8] sm:$0xff]  }
 0x218   : > { %5605 = vst [vmem:[#allocation3 + $0x38] sm:$0xf] %v10351_v53  ;;  %5606 = vst [vmem:[#allocation3 + $0x5c] sm:$0xf] %v13212_v9  ;;  %v11950_v9 = vld [vmem:[%s14110_s2 + $0x238] sm:$0xff]   ;;  %v13270_v26 = vpack.c.bf16 %v4496_v48, %v4496_v48  ;;  %v4380_v8 = vmax.f32 %v4348_v35, 0.0  ;;  %v4346_v39 = vadd.f32 %v13116_v31, %v4307_v47 }
 0x219   : > { %4461 = vst [vmem:[#allocation2 + $0x81] sm:$0xff] %v4374_v2  ;;  %4653 = vst [vmem:[#allocation3 + $0x144] sm:$0xf] %v13248_v19  ;;  %v11827_v42 = vld [vmem:[#allocation3 + $0x48] ss:$36 sps:$4 sm:$0xff]   ;;  %11470 = vmatprep.subr.bf16.mxu1 %v11950_v9  ;;  %v4351_v54 = vadd.f32 %v13116_v31, %v4312_v4 }
 0x21a   : > { %5227 = vst [vmem:[#allocation3 + $0x108] sm:$0xf] %v13248_v19  ;;  %5036 = vst [vmem:[#allocation3 + $0x128] sm:$0xf] %v13251_v17  ;;  %v4494_v21 = vld [vmem:[#allocation2 + $0x78] sm:$0xff]  ;;  %7726 = vmatmul.mubr.bf16.gmra.mxu1 %v11827_v42 }
 0x21b   : > { %5037 = vst [vmem:[#allocation3 + $0x14c] sm:$0xf] %v13253_v49  ;;  %4849 = vst [vmem:[#allocation3 + $0x1d8] sm:$0xf] %v13255_v27  ;;  %v11830_v25 = vld [vmem:[#allocation3 + $0x8] ss:$36 sps:$4 sm:$0xff]   ;;  %v13284_v2 = vpack.c.bf16 %v4494_v21, %v4494_v21  ;;  %7733 = vmatprep.mubr.bf16.mxu1 %v11835_v58  ;;  %v13319_v58 = vpack.c.bf16 %v4380_v8, %v4380_v8 }
 0x21c   : > { %6183 = vst [vmem:[#allocation3 + $0x68] sm:$0xf] %v10448_v40  ;;  %6184 = vst [vmem:[#allocation3 + $0x8c] sm:$0xf] %v10449_v22  ;;  %v11832_v53 = vld [vmem:[#allocation3 + $0xc] ss:$36 sps:$4 sm:$0xff]  }
 0x21d   : > { %4466 = vst [vmem:[#allocation2 + $0xc1] sm:$0xff] %v4379_v50  ;;  %5034 = vst [vmem:[#allocation3 + $0xe0] sm:$0xf] %v10448_v40  ;;  %v4497_v51 = vld [vmem:[#allocation2 + $0x98] sm:$0xff]  ;;  %v4310_v40 = vmul.f32 %v13088_v16, %v4225_v57  ;;  %7878 = vmatprep.mubr.bf16.mxu0 %v11832_v53  ;;  %v11838_v50 = vld [vmem:[#allocation3 + $0x54] ss:$36 sps:$4 sm:$0xff]  }
 0x21e   : > { %5035 = vst [vmem:[#allocation3 + $0x104] sm:$0xf] %v10449_v22  ;;  %4651 = vst [vmem:[#allocation3 + $0xfc] sm:$0xf] %v10197_v36  ;;  %v4880_v56 = vld [vmem:[#allocation2 + $0x92] sm:$0xff]  ;;  %v4881_v3 = vld [vmem:[#allocation2 + $0x9a] sm:$0xff]  ;;  %v4236_v22 = vadd.f32 %v11457_v60, %v13127_v41  ;;  %7879 = vmatmul.mubr.bf16.vlgmr.msra.gmra.mxu0 %v11830_v25  ;;  %v13300_v61 = vpack.c.bf16 %v4497_v51, %v4497_v51 }
 0x21f   : > { %5225 = vst [vmem:[#allocation3 + $0xc0] sm:$0xf] %v10197_v36  ;;  %4847 = vst [vmem:[#allocation3 + $0x190] sm:$0xf] %v10233_v10  ;;  %v13302_v20 = vpack.c.bf16 %v4880_v56, %v4880_v56  ;;  %v13304_v0 = vpack.c.bf16 %v4881_v3, %v4881_v3  ;;  %v4383_v10 = vmax.f32 %v4351_v54, 0.0  ;;  %v4349_v9 = vadd.f32 %v13116_v31, %v4310_v40 }
 0x220   : > { %4464 = vst [vmem:[#allocation2 + $0xa9] sm:$0xff] %v4377_v43  ;;  %4656 = vst [vmem:[#allocation3 + $0x1b0] sm:$0xf] %v13270_v26  ;;  %v6027_v38 = vld [vmem:[#allocation2 + $0x7a] sm:$0xff]  ;;  %v6028_v48 = vld [vmem:[#allocation2 + $0x82] sm:$0xff]  ;;  %7886 = vmatprep.mubr.bf16.mxu0 %v11838_v50  ;;  %11287 = vmatpush3.bf16.msra.mxu0 %v11882_v62  ;;  %v4313_v42 = vmul.f32 %v13088_v16, %v4236_v22 }
 0x221   : > { %5230 = vst [vmem:[#allocation3 + $0x174] sm:$0xf] %v13270_v26  ;;  %4852 = vst [vmem:[#allocation3 + $0x244] sm:$0xf] %v13272_v34  ;;  %v10452_v41 = vpack.c.bf16 %v6027_v38, %v6027_v38  ;;  %v10453_v36 = vpack.c.bf16 %v6028_v48, %v6028_v48  ;;  %v11898_v43 = vld [vmem:[%s14110_s2 + $0x1b0] sm:$0xff]   ;;  %11288 = vmatprep.subr.bf16.mxu0 %v11897_v24  ;;  %v11913_v62 = vld [vmem:[%s14110_s2 + $0x1e8] sm:$0xff]   ;;  %v13327_v47 = vpack.c.bf16 %v4383_v10, %v4383_v10 }
 0x222   : > { %5607 = vst [vmem:[#allocation3 + $0x80] sm:$0xf] %v13214_v29  ;;  %5798 = vst [vmem:[#allocation3 + $0x3c] sm:$0xf] %v13210_v6  ;;  %v4378_v29 = vmax.f32 %v4346_v39, 0.0  ;;  %v4227_v6 = vpop.f32.mrf.mxu0  ;;  %v4352_v24 = vadd.f32 %v13116_v31, %v4313_v42  ;;  %v4495_v38 = vld [vmem:[#allocation2 + $0x80] sm:$0xff] }
 0x223   : > { %4654 = vst [vmem:[#allocation3 + $0x168] sm:$0xf] %v13284_v2  ;;  %5228 = vst [vmem:[#allocation3 + $0x12c] sm:$0xf] %v13284_v2  ;;  %v11833_v4 = vld [vmem:[#allocation3 + $0x90] ss:$36 sps:$4 sm:$0xff]  }
 0x224   : > { %4850 = vst [vmem:[#allocation3 + $0x1fc] sm:$0xf] %v13288_v37  ;;  %4467 = vst [vmem:[#allocation2 + $0xc9] sm:$0xff] %v4380_v8  ;;  %v4500_v52 = vld [vmem:[#allocation2 + $0xc0] sm:$0xff]  ;;  %v11460_v5 = vpop.f32.mrf.mxu0  ;;  %v11842_v8 = vld [vmem:[#allocation3 + $0xdc] ss:$36 sps:$4 sm:$0xff]   ;;  %11289 = vmatpush3.bf16.msra.mxu0 %v11898_v43  ;;  %7734 = vmatmul.mubr.bf16.gmra.mxu1 %v11833_v4 }
 0x225   : > { %5799 = vst [vmem:[#allocation3 + $0x60] sm:$0xf] %v13236_v23  ;;  %5419 = vst [vmem:[#allocation3 + $0x10c] sm:$0xf] %v13216_v1  ;;  %v4228_v23 = vadd.f32 %v4227_v6, %v13119_v13  ;;  %v4381_v13 = vmax.f32 %v4349_v9, 0.0  ;;  %v4249_v21 = vadd.f32 %v11460_v5, %v13145_v11  ;;  %v13325_v35 = vpack.c.bf16 %v4500_v52, %v4500_v52  ;;  %v13338_v11 = vld [vmem:[%s14110_s2 + $0x1e0] sm:$0xff]  }
 0x226   : > { %5994 = vst [vmem:[#allocation3 + $0xd0] sm:$0xf] %v13216_v1  ;;  %4465 = vst [vmem:[#allocation2 + $0xb1] sm:$0xff] %v4378_v29  ;;  %v10237_v1 = vpack.c.bf16 %v4378_v29, %v4378_v29  ;;  %v4240_v53 = vpop.f32.mrf.mxu0  ;;  %v11836_v51 = vld [vmem:[#allocation3 + $0x50] ss:$36 sps:$4 sm:$0xff]   ;;  %v4384_v54 = vmax.f32 %v4352_v24, 0.0  ;;  %11290 = vmatprep.subr.bf16.mxu0 %v11913_v62  ;;  %7741 = vmatprep.mubr.bf16.mxu1 %v11842_v8 }
 0x227   : > { %4657 = vst [vmem:[#allocation3 + $0x1d4] sm:$0xf] %v13300_v61  ;;  %5231 = vst [vmem:[#allocation3 + $0x198] sm:$0xf] %v13300_v61  ;;  %v4498_v25 = vld [vmem:[#allocation2 + $0xa8] sm:$0xff]  ;;  %v4311_v57 = vmul.f32 %v13088_v16, %v4228_v23  ;;  %v4316_v56 = vmul.f32 %v13088_v16, %v4249_v21  ;;  %v4241_v3 = vadd.f32 %v4240_v53, %v13136_v15  ;;  %7887 = vmatmul.mubr.bf16.gmra.mxu0 %v11836_v51 }
 0x228   : > { %5040 = vst [vmem:[#allocation3 + $0x1b8] sm:$0xf] %v13302_v20  ;;  %5041 = vst [vmem:[#allocation3 + $0x1dc] sm:$0xf] %v13304_v0  ;;  %v13342_v39 = vpack.c.bf16 %v4498_v25, %v4498_v25  ;;  %v13346_v60 = vpack.c.bf16 %v4381_v13, %v4381_v13  ;;  %v11461_v22 = vpop.f32.mrf.mxu0  ;;  %v11845_v50 = vld [vmem:[#allocation3 + $0x9c] ss:$36 sps:$4 sm:$0xff]   ;;  %11291 = vmatpush3.bf16.msra.mxu0 %v11914_v33  ;;  %v13376_v4 = vpack.c.bf16 %v4384_v54, %v4384_v54 }
 0x229   : > { %6187 = vst [vmem:[#allocation3 + $0xf8] sm:$0xf] %v10452_v41  ;;  %6188 = vst [vmem:[#allocation3 + $0x11c] sm:$0xf] %v10453_v36  ;;  %v4350_v40 = vadd.f32 %v13116_v31, %v4311_v57  ;;  %v4355_v6 = vadd.f32 %v13116_v31, %v4316_v56  ;;  %7894 = vmatprep.mubr.bf16.mxu0 %v11845_v50  ;;  %11292 = vmatprep.subr.bf16.mxu0 %v13338_v11  ;;  %v11849_v56 = vld [vmem:[#allocation3 + $0x124] ss:$36 sps:$4 sm:$0xff]  }
 0x22a   : > { %4470 = vst [vmem:[#allocation2 + $0xf1] sm:$0xff] %v4383_v10  ;;  %5038 = vst [vmem:[#allocation3 + $0x170] sm:$0xf] %v10452_v41  ;;  %v4314_v41 = vmul.f32 %v13088_v16, %v4241_v3  ;;  %v10201_v10 = vpack.c.bf16 %v4495_v38, %v4495_v38  ;;  %v4243_v9 = vpop.f32.mrf.mxu0  ;;  %v13388_v3 = vld [vmem:[%s14110_s2 + $0x198] sm:$0xff]   ;;  %v11840_v8 = vld [vmem:[#allocation3 + $0xd8] ss:$36 sps:$4 sm:$0xff]  }
 0x22b   : > { %5039 = vst [vmem:[#allocation3 + $0x194] sm:$0xf] %v10453_v36  ;;  %4851 = vst [vmem:[#allocation3 + $0x220] sm:$0xf] %v10237_v1  ;;  %v4501_v15 = vld [vmem:[#allocation2 + $0xc8] sm:$0xff]  ;;  %v4252_v36 = vadd.f32 %v11461_v22, %v13148_v55  ;;  %v4387_v5 = vmax.f32 %v4355_v6, 0.0 }
 0x22c   : > { %4853 = vst [vmem:[#allocation3 + $0x268] sm:$0xf] %v13319_v58  ;;  %4468 = vst [vmem:[#allocation2 + $0xd9] sm:$0xff] %v4381_v13  ;;  %v4884_v48 = vld [vmem:[#allocation2 + $0xc2] sm:$0xff]  ;;  %v4885_v29 = vld [vmem:[#allocation2 + $0xca] sm:$0xff]  ;;  %v13361_v43 = vpack.c.bf16 %v4501_v15, %v4501_v15  ;;  %v4353_v1 = vadd.f32 %v13116_v31, %v4314_v41  ;;  %v4244_v13 = vadd.f32 %v4243_v9, %v13141_v7  ;;  %7742 = vmatmul.mubr.bf16.gmra.mxu1 %v11840_v8 }
 0x22d   : > { %4660 = vst [vmem:[#allocation3 + $0x240] sm:$0xf] %v13325_v35  ;;  %5234 = vst [vmem:[#allocation3 + $0x204] sm:$0xf] %v13325_v35  ;;  %v13363_v52 = vpack.c.bf16 %v4884_v48, %v4884_v48  ;;  %v13365_v55 = vpack.c.bf16 %v4885_v29, %v4885_v29  ;;  %v6031_v42 = vld [vmem:[#allocation2 + $0xaa] sm:$0xff]  ;;  %v6032_v23 = vld [vmem:[#allocation2 + $0xb2] sm:$0xff]  ;;  %v4317_v62 = vmul.f32 %v13088_v16, %v4252_v36  ;;  %7749 = vmatprep.mubr.bf16.mxu1 %v11849_v56 }
 0x22e   : > { %4856 = vst [vmem:[#allocation3 + $0x2d4] sm:$0xf] %v13327_v47  ;;  %5610 = vst [vmem:[#allocation3 + $0xec] sm:$0xf] %v13251_v17  ;;  %v11930_v17 = vld [vmem:[%s14110_s2 + $0x1a0] sm:$0xff]   ;;  %v10456_v21 = vpack.c.bf16 %v6031_v42, %v6031_v42  ;;  %v10457_v25 = vpack.c.bf16 %v6032_v23, %v6032_v23  ;;  %v11939_v7 = vld [vmem:[%s14110_s2 + $0x1d8] sm:$0xff]   ;;  %v4315_v53 = vmul.f32 %v13088_v16, %v4244_v13 }
 0x22f   : > { %5611 = vst [vmem:[#allocation3 + $0x110] sm:$0xf] %v13253_v49  ;;  %4658 = vst [vmem:[#allocation3 + $0x1f8] sm:$0xf] %v13342_v39  ;;  %v4382_v49 = vmax.f32 %v4350_v40, 0.0  ;;  %v4385_v33 = vmax.f32 %v4353_v1, 0.0  ;;  %v4356_v57 = vadd.f32 %v13116_v31, %v4317_v62  ;;  %11293 = vmatpush3.bf16.msra.mxu0 %v11930_v17 }
 0x230   : > { %5232 = vst [vmem:[#allocation3 + $0x1bc] sm:$0xf] %v13342_v39  ;;  %4854 = vst [vmem:[#allocation3 + $0x28c] sm:$0xf] %v13346_v60  ;;  %v4499_v40 = vld [vmem:[#allocation2 + $0xb0] sm:$0xff]  ;;  %v4354_v48 = vadd.f32 %v13116_v31, %v4315_v53  ;;  %11294 = vmatprep.subr.bf16.mxu0 %v11939_v7 }
 0x231   : > { %4471 = vst [vmem:[#allocation2 + $0xf9] sm:$0xff] %v4384_v54  ;;  %5801 = vst [vmem:[#allocation3 + $0xa8] sm:$0xf] %v13229_v28  ;;  %v4504_v24 = vld [vmem:[#allocation2 + $0xf0] sm:$0xff]  ;;  %v11464_v28 = vpop.f32.mrf.mxu0  ;;  %v4388_v38 = vmax.f32 %v4356_v57, 0.0  ;;  %v13405_v9 = vpack.c.bf16 %v4385_v33, %v4385_v33 }
 0x232   : > { %5802 = vst [vmem:[#allocation3 + $0xcc] sm:$0xf] %v13248_v19  ;;  %4655 = vst [vmem:[#allocation3 + $0x18c] sm:$0xf] %v10201_v10  ;;  %v10241_v19 = vpack.c.bf16 %v4382_v49, %v4382_v49  ;;  %v4265_v51 = vadd.f32 %v11464_v28, %v13159_v32  ;;  %v13390_v22 = vpack.c.bf16 %v4504_v24, %v4504_v24  ;;  %v11947_v50 = vld [vmem:[%s14110_s2 + $0x1d0] sm:$0xff]   ;;  %v4386_v23 = vmax.f32 %v4354_v48, 0.0 }
 0x233   : > { %5229 = vst [vmem:[#allocation3 + $0x150] sm:$0xf] %v10201_v10  ;;  %4469 = vst [vmem:[#allocation2 + $0xe1] sm:$0xff] %v4382_v49  ;;  %v4502_v11 = vld [vmem:[#allocation2 + $0xd8] sm:$0xff]  ;;  %v4256_v54 = vpop.f32.mrf.mxu0  ;;  %v13393_v32 = vpack.c.bf16 %v4387_v5, %v4387_v5  ;;  %v11843_v15 = vld [vmem:[#allocation3 + $0x98] ss:$36 sps:$4 sm:$0xff]   ;;  %v10205_v10 = vpack.c.bf16 %v4499_v40, %v4499_v40  ;;  %11295 = vmatpush3.bf16.msra.mxu0 %v13388_v3 }
 0x234   : > { %4661 = vst [vmem:[#allocation3 + $0x264] sm:$0xf] %v13361_v43  ;;  %5235 = vst [vmem:[#allocation3 + $0x228] sm:$0xf] %v13361_v43  ;;  %v4320_v29 = vmul.f32 %v13088_v16, %v4265_v51  ;;  %v4257_v6 = vadd.f32 %v4256_v54, %v13151_v45  ;;  %v11852_v36 = vld [vmem:[#allocation3 + $0xe4] ss:$36 sps:$4 sm:$0xff]   ;;  %v13401_v49 = vpack.c.bf16 %v4502_v11, %v4502_v11  ;;  %7895 = vmatmul.mubr.bf16.gmra.mxu0 %v11843_v15 }
 0x235   : > { %5044 = vst [vmem:[#allocation3 + $0x248] sm:$0xf] %v13363_v52  ;;  %5045 = vst [vmem:[#allocation3 + $0x26c] sm:$0xf] %v13365_v55  ;;  %v11465_v41 = vpop.f32.mrf.mxu0  ;;  %7902 = vmatprep.mubr.bf16.mxu0 %v11852_v36  ;;  %v10245_v8 = vpack.c.bf16 %v4386_v23, %v4386_v23  ;;  %11296 = vmatprep.subr.bf16.mxu0 %v11947_v50  ;;  %v11847_v54 = vld [vmem:[#allocation3 + $0x120] ss:$36 sps:$4 sm:$0xff]  }
 0x236   : > { %4474 = vst [vmem:[#allocation2 + $0x121] sm:$0xff] %v4387_v5  ;;  %6191 = vst [vmem:[#allocation3 + $0x188] sm:$0xf] %v10456_v21  ;;  %v4359_v5 = vadd.f32 %v13116_v31, %v4320_v29  ;;  %v4318_v1 = vmul.f32 %v13088_v16, %v4257_v6  ;;  %v4268_v62 = vadd.f32 %v11465_v41, %v13162_v44  ;;  %v11948_v44 = vld [vmem:[%s14110_s2 + $0x190] sm:$0xff]   ;;  %v13449_v40 = vld [vmem:[%s14111_s3] ss:$0 sm:$0xff]  ;;  %7750 = vmatmul.mubr.bf16.gmra.mxu1 %v11847_v54 }
 0x237   : > { %6192 = vst [vmem:[#allocation3 + $0x1ac] sm:$0xf] %v10457_v25  ;;  %5042 = vst [vmem:[#allocation3 + $0x200] sm:$0xf] %v10456_v21  ;;  %v4259_v13 = vpop.f32.mrf.mxu0  ;;  %v11850_v36 = vld [vmem:[#allocation3 + $0xe0] ss:$36 sps:$4 sm:$0xff]   ;;  %11297 = vmatpush3.bf16.msra.mxu0 %v11948_v44 }
 0x238   : > { %5043 = vst [vmem:[#allocation3 + $0x224] sm:$0xf] %v10457_v25  ;;  %4855 = vst [vmem:[#allocation3 + $0x2b0] sm:$0xf] %v10241_v19  ;;  %v4505_v45 = vld [vmem:[#allocation2 + $0xf8] sm:$0xff]  ;;  %v13423_v25 = vpack.c.bf16 %v4388_v38, %v4388_v38  ;;  %v4391_v19 = vmax.f32 %v4359_v5, 0.0  ;;  %v4357_v7 = vadd.f32 %v13116_v31, %v4318_v1  ;;  %v4260_v57 = vadd.f32 %v4259_v13, %v13165_v30 }
 0x239   : > { %4857 = vst [vmem:[#allocation3 + $0x2f8] sm:$0xf] %v13376_v4  ;;  %4472 = vst [vmem:[#allocation2 + $0x109] sm:$0xff] %v4385_v33  ;;  %v4888_v17 = vld [vmem:[#allocation2 + $0xf2] sm:$0xff]  ;;  %v4889_v42 = vld [vmem:[#allocation2 + $0xfa] sm:$0xff]  ;;  %v4321_v33 = vmul.f32 %v13088_v16, %v4268_v62  ;;  %v11468_v11 = vpop.f32.mrf.mxu0 }
 0x23a   : > { %4664 = vst [vmem:[#allocation3 + $0x2d0] sm:$0xf] %v13390_v22  ;;  %5238 = vst [vmem:[#allocation3 + $0x294] sm:$0xf] %v13390_v22  ;;  %v13421_v21 = vpack.c.bf16 %v4889_v42, %v4889_v42  ;;  %v6035_v24 = vld [vmem:[#allocation2 + $0xda] sm:$0xff]  ;;  %v6036_v28 = vld [vmem:[#allocation2 + $0xe2] sm:$0xff]  ;;  %v4319_v50 = vmul.f32 %v13449_v40, %v4260_v57  ;;  %v13455_v6 = vpack.c.bf16 %v4391_v19, %v4391_v19 }
 0x23b   : > { %4860 = vst [vmem:[#allocation3 + $0x364] sm:$0xf] %v13393_v32  ;;  %5420 = vst [vmem:[#allocation3 + $0x130] sm:$0xf] %v13240_v18  ;;  %v10460_v53 = vpack.c.bf16 %v6035_v24, %v6035_v24  ;;  %v10461_v51 = vpack.c.bf16 %v6036_v28, %v6036_v28  ;;  %v11949_v16 = vld [vmem:[%s14110_s2 + $0x1c8] sm:$0xff]   ;;  %v4389_v31 = vmax.f32 %v4357_v7, 0.0  ;;  %v4272_v48 = vpop.f32.mrf.mxu0 }
 0x23c   : > { %5803 = vst [vmem:[#allocation3 + $0xf0] sm:$0xf] %v13284_v2  ;;  %5995 = vst [vmem:[#allocation3 + $0xf4] sm:$0xf] %v13240_v18  ;;  %v13416_v18 = vpack.c.bf16 %v4505_v45, %v4505_v45  ;;  %v13419_v2 = vpack.c.bf16 %v4888_v17, %v4888_v17  ;;  %v13443_v30 = vld [vmem:[%s14113_s5] ss:$0 sm:$0xff]  ;;  %v4273_v45 = vadd.f32 %v4272_v48, %v13182_v14  ;;  %11298 = vmatprep.subr.bf16.mxu0 %v11949_v16 }
 0x23d   : > { %4475 = vst [vmem:[#allocation2 + $0x129] sm:$0xff] %v4388_v38  ;;  %4659 = vst [vmem:[#allocation3 + $0x21c] sm:$0xf] %v10205_v10  ;;  %v4508_v56 = vld [vmem:[#allocation2 + $0x120] sm:$0xff]  ;;  %v4360_v3 = vadd.f32 %v13443_v30, %v4321_v33  ;;  %v4281_v38 = vadd.f32 %v11468_v11, %v13197_v59  ;;  %v4358_v59 = vadd.f32 %v13443_v30, %v4319_v50  ;;  %v11469_v62 = vpop.f32.mrf.mxu0  ;;  %7903 = vmatmul.mubr.bf16.gmra.mxu0 %v11850_v36 }
 0x23e   : > { %5233 = vst [vmem:[#allocation3 + $0x1e0] sm:$0xf] %v10205_v10  ;;  %4662 = vst [vmem:[#allocation3 + $0x288] sm:$0xf] %v13401_v49  ;;  %v13453_v29 = vpack.c.bf16 %v4508_v56, %v4508_v56  ;;  %v11856_v17 = vld [vmem:[#allocation3 + $0x16c] ss:$36 sps:$4 sm:$0xff]   ;;  %v4322_v28 = vmul.f32 %v13449_v40, %v4273_v45 }
 0x23f   : > { %5236 = vst [vmem:[#allocation3 + $0x24c] sm:$0xf] %v13401_v49  ;;  %4858 = vst [vmem:[#allocation3 + $0x31c] sm:$0xf] %v13405_v9  ;;  %v4392_v41 = vmax.f32 %v4360_v3, 0.0  ;;  %v4324_v10 = vmul.f32 %v13449_v40, %v4281_v38  ;;  %v4503_v42 = vld [vmem:[#allocation2 + $0xe0] sm:$0xff]  ;;  %7757 = vmatprep.mubr.bf16.mxu1 %v11856_v17 }
 0x240   : > { %4473 = vst [vmem:[#allocation2 + $0x111] sm:$0xff] %v4386_v23  ;;  %4665 = vst [vmem:[#allocation3 + $0x2f4] sm:$0xf] %v13416_v18  ;;  %v4506_v15 = vld [vmem:[#allocation2 + $0x108] sm:$0xff]  ;;  %v10209_v13 = vpack.c.bf16 %v4503_v42, %v4503_v42  ;;  %v4390_v14 = vmax.f32 %v4358_v59, 0.0  ;;  %v4361_v16 = vadd.f32 %v13443_v30, %v4322_v28 }
 0x241   : > { %5239 = vst [vmem:[#allocation3 + $0x2b8] sm:$0xf] %v13416_v18  ;;  %5048 = vst [vmem:[#allocation3 + $0x2d8] sm:$0xf] %v13419_v2  ;;  %v13462_v24 = vpack.c.bf16 %v4506_v15, %v4506_v15  ;;  %v4363_v44 = vadd.f32 %v13443_v30, %v4324_v10  ;;  %v11859_v7 = vld [vmem:[#allocation3 + $0x12c] ss:$36 sps:$4 sm:$0xff]  }
 0x242   : > { %5049 = vst [vmem:[#allocation3 + $0x2fc] sm:$0xf] %v13421_v21  ;;  %4861 = vst [vmem:[#allocation3 + $0x388] sm:$0xf] %v13423_v25  ;;  %7910 = vmatprep.mubr.bf16.mxu0 %v11859_v7  ;;  %v10249_v50 = vpack.c.bf16 %v4390_v14, %v4390_v14  ;;  %v4393_v38 = vmax.f32 %v4361_v16, 0.0 }
 0x243   : > { %4478 = vst [vmem:[#allocation2 + $0x151] sm:$0xff] %v4391_v19  ;;  %6195 = vst [vmem:[#allocation3 + $0x218] sm:$0xf] %v10460_v53  ;;  %v4284_v19 = vadd.f32 %v11469_v62, %v13205_v46  ;;  %v13485_v46 = vpack.c.bf16 %v4392_v41, %v4392_v41  ;;  %v11854_v15 = vld [vmem:[#allocation3 + $0x168] ss:$36 sps:$4 sm:$0xff]  }
 0x244   : > { %6196 = vst [vmem:[#allocation3 + $0x23c] sm:$0xf] %v10461_v51  ;;  %5046 = vst [vmem:[#allocation3 + $0x290] sm:$0xf] %v10460_v53  ;;  %v4509_v23 = vld [vmem:[#allocation2 + $0x128] sm:$0xff]  ;;  %v4275_v53 = vpop.f32.mrf.mxu0  ;;  %v13508_v42 = vpack.c.bf16 %v4393_v38, %v4393_v38  ;;  %7758 = vmatmul.mubr.bf16.gmra.mxu1 %v11854_v15  ;;  %v11958_v15 = vld [vmem:[%s14110_s2 + $0x1c0] sm:$0xff]  }
 0x245   : > { %5047 = vst [vmem:[#allocation3 + $0x2b4] sm:$0xf] %v10461_v51  ;;  %4859 = vst [vmem:[#allocation3 + $0x340] sm:$0xf] %v10245_v8  ;;  %v4892_v5 = vld [vmem:[#allocation2 + $0x122] sm:$0xff]  ;;  %v4893_v1 = vld [vmem:[#allocation2 + $0x12a] sm:$0xff]  ;;  %v4325_v3 = vmul.f32 %v13449_v40, %v4284_v19  ;;  %v4276_v54 = vadd.f32 %v4275_v53, %v13185_v63 }
 0x246   : > { %5422 = vst [vmem:[#allocation3 + $0x178] sm:$0xf] %v13231_v12  ;;  %5997 = vst [vmem:[#allocation3 + $0x13c] sm:$0xf] %v13231_v12  ;;  %v13466_v12 = vpack.c.bf16 %v4389_v31, %v4389_v31  ;;  %v13483_v51 = vpack.c.bf16 %v4893_v1, %v4893_v1  ;;  %v13487_v8 = vmax.f32 %v4363_v44, 0.0  ;;  %v12074_v53 = vld [vmem:[#allocation2 + $0x3a] sm:$0xff] }
 0x247   : > { %4476 = vst [vmem:[#allocation2 + $0x139] sm:$0xff] %v4389_v31  ;;  %4668 = vst [vmem:[#allocation3 + $0x360] sm:$0xf] %v13453_v29  ;;  %v6039_v33 = vld [vmem:[#allocation2 + $0x10a] sm:$0xff]  ;;  %v6040_v57 = vld [vmem:[#allocation2 + $0x112] sm:$0xff]  ;;  %v4323_v36 = vmul.f32 %v13449_v40, %v4276_v54 }
 0x248   : > { %5242 = vst [vmem:[#allocation3 + $0x324] sm:$0xf] %v13453_v29  ;;  %4864 = vst [vmem:[#allocation3 + $0x3f4] sm:$0xf] %v13455_v6  ;;  %v10464_v56 = vpack.c.bf16 %v6039_v33, %v6039_v33  ;;  %v10465_v11 = vpack.c.bf16 %v6040_v57, %v6040_v57  ;;  %v11857_v59 = vld [vmem:[#allocation3 + $0x128] ss:$36 sps:$4 sm:$0xff]  }
 0x249   : > { %5423 = vst [vmem:[#allocation3 + $0x19c] sm:$0xf] %v13255_v27  ;;  %5614 = vst [vmem:[#allocation3 + $0x17c] sm:$0xf] %v13302_v20  ;;  %v11863_v10 = vld [vmem:[#allocation3 + $0x1b4] ss:$36 sps:$4 sm:$0xff]   ;;  %v4362_v1 = vadd.f32 %v13443_v30, %v4323_v36  ;;  %7911 = vmatmul.mubr.bf16.gmra.mxu0 %v11857_v59 }
 0x24a   : > { %5998 = vst [vmem:[#allocation3 + $0x160] sm:$0xf] %v13255_v27  ;;  %6189 = vst [vmem:[#allocation3 + $0x140] sm:$0xf] %v13302_v20  ;;  %v13478_v27 = vpack.c.bf16 %v4509_v23, %v4509_v23  ;;  %v13481_v20 = vpack.c.bf16 %v4892_v5, %v4892_v5  ;;  %v4512_v31 = vld [vmem:[#allocation2 + $0x150] sm:$0xff]  ;;  %7765 = vmatprep.mubr.bf16.mxu1 %v11863_v10  ;;  %v11959_v36 = vld [vmem:[%s14110_s2 + $0x180] sm:$0xff]  }
 0x24b   : > { %4479 = vst [vmem:[#allocation2 + $0x159] sm:$0xff] %v4392_v41  ;;  %4663 = vst [vmem:[#allocation3 + $0x2ac] sm:$0xf] %v10209_v13  ;;  %v13498_v63 = vpack.c.bf16 %v4512_v31, %v4512_v31  ;;  %v4364_v41 = vadd.f32 %v13443_v30, %v4325_v3  ;;  %v4507_v45 = vld [vmem:[#allocation2 + $0x110] sm:$0xff]  ;;  %v11871_v31 = vld [vmem:[#allocation3 + $0x1b8] ss:$36 sps:$4 sm:$0xff]  }
 0x24c   : > { %5237 = vst [vmem:[#allocation3 + $0x270] sm:$0xf] %v10209_v13  ;;  %4666 = vst [vmem:[#allocation3 + $0x318] sm:$0xf] %v13462_v24  ;;  %v10213_v62 = vpack.c.bf16 %v4507_v45, %v4507_v45  ;;  %v11866_v13 = vld [vmem:[#allocation3 + $0x174] ss:$36 sps:$4 sm:$0xff]  }
 0x24d   : > { %5240 = vst [vmem:[#allocation3 + $0x2dc] sm:$0xf] %v13462_v24  ;;  %4862 = vst [vmem:[#allocation3 + $0x3ac] sm:$0xf] %v13466_v12  ;;  %7918 = vmatprep.mubr.bf16.mxu0 %v11866_v13  ;;  %v12073_v33 = vld [vmem:[#allocation2 + $0x32] sm:$0xff] }
 0x24e   : > { %4477 = vst [vmem:[#allocation2 + $0x141] sm:$0xff] %v4390_v14  ;;  %4669 = vst [vmem:[#allocation3 + $0x384] sm:$0xf] %v13478_v27  ;;  %v4510_v48 = vld [vmem:[#allocation2 + $0x138] sm:$0xff]  ;;  %v4394_v14 = vmax.f32 %v4362_v1, 0.0  ;;  %v10446_v57 = vpack.c.bf16 %v12073_v33, %v12073_v33 }
 0x24f   : > { %5243 = vst [vmem:[#allocation3 + $0x348] sm:$0xf] %v13478_v27  ;;  %5052 = vst [vmem:[#allocation3 + $0x368] sm:$0xf] %v13481_v20  ;;  %v13504_v17 = vpack.c.bf16 %v4510_v48, %v4510_v48  ;;  %v11880_v54 = vld [vmem:[#allocation3 + $0x204] ss:$36 sps:$4 sm:$0xff]  }
 0x250   : > { %5053 = vst [vmem:[#allocation3 + $0x38c] sm:$0xf] %v13483_v51  ;;  %4865 = vst [vmem:[#allocation3 + $0x418] sm:$0xf] %v13485_v46  ;;  %v5257_v59 = vld [vmem:[#allocation2 + $0x51] sm:$0xff] }
 0x251   : > { %6199 = vst [vmem:[#allocation3 + $0x2a8] sm:$0xf] %v10464_v56  ;;  %6200 = vst [vmem:[#allocation3 + $0x2cc] sm:$0xf] %v10465_v11  ;;  %v10323_v45 = vpack.c.bf16 %v5257_v59, %v5257_v59 }
 0x252   : > { %4482 = vst [vmem:[#allocation2 + $0x181] sm:$0xff] %v13487_v8  ;;  %5050 = vst [vmem:[#allocation3 + $0x320] sm:$0xf] %v10464_v56  ;;  %v4513_v40 = vld [vmem:[#allocation2 + $0x158] sm:$0xff] }
 0x253   : > { %5051 = vst [vmem:[#allocation3 + $0x344] sm:$0xf] %v10465_v11  ;;  %4863 = vst [vmem:[#allocation3 + $0x3d0] sm:$0xf] %v10249_v50  ;;  %v4896_v23 = vld [vmem:[#allocation2 + $0x152] sm:$0xff]  ;;  %v4897_v5 = vld [vmem:[#allocation2 + $0x15a] sm:$0xff] }
 0x254   : > { %5615 = vst [vmem:[#allocation3 + $0x1a0] sm:$0xf] %v13304_v0  ;;  %6190 = vst [vmem:[#allocation3 + $0x164] sm:$0xf] %v13304_v0  ;;  %v13512_v0 = vmax.f32 %v4364_v41, 0.0  ;;  %v13525_v30 = vpack.c.bf16 %v4897_v5, %v4897_v5  ;;  %v11954_v50 = vld [vmem:[%s14110_s2 + $0x188] sm:$0xff]  }
 0x255   : > { %4480 = vst [vmem:[#allocation2 + $0x169] sm:$0xff] %v4393_v38  ;;  %4672 = vst [vmem:[#allocation3 + $0x3f0] sm:$0xf] %v13498_v63  ;;  %v11868_v11 = vld [vmem:[#allocation3 + $0x1f8] ss:$36 sps:$4 sm:$0xff]   ;;  %v10966_v38 = vpop.f32.mrf.mxu1  ;;  %11299 = vmatpush3.bf16.msra.mxu0 %v11954_v50  ;;  %v5660_v59 = vld [vmem:[#allocation2 + $0x140] sm:$0xff] }
 0x256   : > { %5246 = vst [vmem:[#allocation3 + $0x3b4] sm:$0xf] %v13498_v63  ;;  %5805 = vst [vmem:[#allocation3 + $0x138] sm:$0xf] %v13270_v26  ;;  %v13520_v26 = vpack.c.bf16 %v4513_v40, %v4513_v40  ;;  %v11886_v41 = vld [vmem:[#allocation3 + $0x28c] ss:$36 sps:$4 sm:$0xff]   ;;  %11300 = vmatprep.subr.bf16.mxu0 %v11958_v15 }
 0x257   : > { %5806 = vst [vmem:[#allocation3 + $0x15c] sm:$0xf] %v13300_v61  ;;  %5424 = vst [vmem:[#allocation3 + $0x1c0] sm:$0xf] %v13288_v37  ;;  %v13523_v61 = vpack.c.bf16 %v4896_v23, %v4896_v23  ;;  %v10967_v48 = vpop.f32.mrf.mxu1  ;;  %v5640_v40 = vld [vmem:[#allocation2 + $0x50] sm:$0xff]  ;;  %v5277_v15 = vld [vmem:[#allocation2 + $0x141] sm:$0xff] }
 0x258   : > { %5807 = vst [vmem:[#allocation3 + $0x180] sm:$0xf] %v13342_v39  ;;  %5999 = vst [vmem:[#allocation3 + $0x184] sm:$0xf] %v13288_v37  ;;  %v6043_v37 = vld [vmem:[#allocation2 + $0x13a] sm:$0xff]  ;;  %v6044_v39 = vld [vmem:[#allocation2 + $0x142] sm:$0xff]  ;;  %v13600_v10 = vadd.f32 %v10967_v48, %v10966_v38  ;;  %v10385_v1 = vpack.c.bf16 %v5640_v40, %v5640_v40  ;;  %v10343_v48 = vpack.c.bf16 %v5277_v15, %v5277_v15 }
 0x259   : > { %4670 = vst [vmem:[#allocation3 + $0x3a8] sm:$0xf] %v13504_v17  ;;  %5244 = vst [vmem:[#allocation3 + $0x36c] sm:$0xf] %v13504_v17  ;;  %v10468_v44 = vpack.c.bf16 %v6043_v37, %v6043_v37  ;;  %v10469_v28 = vpack.c.bf16 %v6044_v39, %v6044_v39  ;;  %v11878_v23 = vld [vmem:[#allocation3 + $0x200] ss:$36 sps:$4 sm:$0xff]   ;;  %11301 = vmatpush3.bf16.msra.mxu0 %v11959_v36 }
 0x25a   : > { %4866 = vst [vmem:[#allocation3 + $0x43c] sm:$0xf] %v13508_v42  ;;  %5426 = vst [vmem:[#allocation3 + $0x208] sm:$0xf] %v13272_v34  ;;  %v11884_v13 = vld [vmem:[#allocation3 + $0x288] ss:$36 sps:$4 sm:$0xff]  }
 0x25b   : > { %5427 = vst [vmem:[#allocation3 + $0x22c] sm:$0xf] %v13319_v58  ;;  %6001 = vst [vmem:[#allocation3 + $0x1cc] sm:$0xf] %v13272_v34  ;;  %v5090_v34 = vld [vmem:[#allocation2 + $0x180] sm:$0xff] }
 0x25c   : > { %6002 = vst [vmem:[#allocation3 + $0x1f0] sm:$0xf] %v13319_v58  ;;  %4483 = vst [vmem:[#allocation2 + $0x189] sm:$0xff] %v13512_v0  ;;  %v10253_v58 = vpack.c.bf16 %v4394_v14, %v4394_v14  ;;  %v13544_v19 = vpack.c.bf16 %v5090_v34, %v5090_v34  ;;  %v5453_v37 = vld [vmem:[#allocation2 + $0x82] sm:$0xff]  ;;  %v11910_v50 = vld [vmem:[#allocation3 + $0x320] ss:$36 sps:$4 sm:$0xff]  }
 0x25d   : > { %4667 = vst [vmem:[#allocation3 + $0x33c] sm:$0xf] %v10213_v62  ;;  %5241 = vst [vmem:[#allocation3 + $0x300] sm:$0xf] %v10213_v62  ;;  %v11889_v62 = vld [vmem:[#allocation3 + $0x24c] ss:$36 sps:$4 sm:$0xff]  }
 0x25e   : > { %5618 = vst [vmem:[#allocation3 + $0x20c] sm:$0xf] %v13363_v52  ;;  %6193 = vst [vmem:[#allocation3 + $0x1d0] sm:$0xf] %v13363_v52  ;;  %v11861_v52 = vld [vmem:[#allocation3 + $0x1b0] ss:$36 sps:$4 sm:$0xff]  }
 0x25f   : > { %4673 = vst [vmem:[#allocation3 + $0x414] sm:$0xf] %v13520_v26  ;;  %5247 = vst [vmem:[#allocation3 + $0x3d8] sm:$0xf] %v13520_v26  ;;  %7766 = vmatmul.mubr.bf16.gmra.mxu1 %v11861_v52  ;;  %v11896_v52 = vld [vmem:[#allocation3 + $0x294] ss:$36 sps:$4 sm:$0xff]  }
 0x260   : > { %5056 = vst [vmem:[#allocation3 + $0x3f8] sm:$0xf] %v13523_v61  ;;  %5057 = vst [vmem:[#allocation3 + $0x41c] sm:$0xf] %v13525_v30  ;;  %v11925_v40 = vld [vmem:[#allocation3 + $0x3f4] ss:$36 sps:$4 sm:$0xff]  }
 0x261   : > { %5619 = vst [vmem:[#allocation3 + $0x230] sm:$0xf] %v13365_v55  ;;  %6194 = vst [vmem:[#allocation3 + $0x1f4] sm:$0xf] %v13365_v55  ;;  %v11864_v55 = vld [vmem:[#allocation3 + $0x170] ss:$36 sps:$4 sm:$0xff]  }
 0x262   : > { %4481 = vst [vmem:[#allocation2 + $0x171] sm:$0xff] %v4394_v14  ;;  %5809 = vst [vmem:[#allocation3 + $0x1c8] sm:$0xf] %v13325_v35  ;;  %v4514_v35 = vld [vmem:[#allocation2 + $0x168] sm:$0xff]  ;;  %7919 = vmatmul.mubr.bf16.gmra.mxu0 %v11864_v55  ;;  %v5644_v14 = vld [vmem:[#allocation2 + $0x80] sm:$0xff] }
 0x263   : > { %5810 = vst [vmem:[#allocation3 + $0x1ec] sm:$0xf] %v13361_v43  ;;  %5428 = vst [vmem:[#allocation3 + $0x250] sm:$0xf] %v13346_v60  ;;  %v11873_v43 = vld [vmem:[#allocation3 + $0x1bc] ss:$36 sps:$4 sm:$0xff]   ;;  %v10220_v7 = vpack.c.bf16 %v4514_v35, %v4514_v35  ;;  %v10389_v34 = vpack.c.bf16 %v5644_v14, %v5644_v14 }
 0x264   : > { %6003 = vst [vmem:[#allocation3 + $0x214] sm:$0xf] %v13346_v60  ;;  %6203 = vst [vmem:[#allocation3 + $0x338] sm:$0xf] %v10468_v44  ;;  %v11870_v60 = vld [vmem:[#allocation3 + $0x1fc] ss:$36 sps:$4 sm:$0xff]   ;;  %7926 = vmatprep.mubr.bf16.mxu0 %v11873_v43 }
 0x265   : > { %6204 = vst [vmem:[#allocation3 + $0x35c] sm:$0xf] %v10469_v28  ;;  %5054 = vst [vmem:[#allocation3 + $0x3b0] sm:$0xf] %v10468_v44  ;;  %7773 = vmatprep.mubr.bf16.mxu1 %v11870_v60  ;;  %v11893_v44 = vld [vmem:[#allocation3 + $0x2d4] ss:$36 sps:$4 sm:$0xff]  }
 0x266   : > { %5055 = vst [vmem:[#allocation3 + $0x3d4] sm:$0xf] %v10469_v28  ;;  %5811 = vst [vmem:[#allocation3 + $0x210] sm:$0xf] %v13401_v49  ;;  %v4511_v49 = vld [vmem:[#allocation2 + $0x140] sm:$0xff]  ;;  %v10359_v28 = vpack.c.bf16 %v5453_v37, %v5453_v37  ;;  %v5456_v35 = vld [vmem:[#allocation2 + $0xaa] sm:$0xff] }
 0x267   : > { %5430 = vst [vmem:[#allocation3 + $0x298] sm:$0xf] %v13327_v47  ;;  %6005 = vst [vmem:[#allocation3 + $0x25c] sm:$0xf] %v13327_v47  ;;  %v10217_v47 = vpack.c.bf16 %v4511_v49, %v4511_v49  ;;  %7774 = vmatmul.mubr.bf16.gmra.mxu1 %v11868_v11  ;;  %v5457_v60 = vld [vmem:[#allocation2 + $0xb2] sm:$0xff]  ;;  %v10362_v43 = vpack.c.bf16 %v5456_v35, %v5456_v35 }
 0x268   : > { %4867 = vst [vmem:[#allocation3 + $0x460] sm:$0xf] %v10253_v58  ;;  %5431 = vst [vmem:[#allocation3 + $0x2bc] sm:$0xf] %v13376_v4  ;;  %v11887_v58 = vld [vmem:[#allocation3 + $0x248] ss:$36 sps:$4 sm:$0xff]  }
 0x269   : > { %5622 = vst [vmem:[#allocation3 + $0x29c] sm:$0xf] %v13419_v2  ;;  %5623 = vst [vmem:[#allocation3 + $0x2c0] sm:$0xf] %v13421_v21  ;;  %v4515_v16 = vld [vmem:[#allocation2 + $0x170] sm:$0xff] }
 0x26a   : > { %6006 = vst [vmem:[#allocation3 + $0x280] sm:$0xf] %v13376_v4  ;;  %6197 = vst [vmem:[#allocation3 + $0x260] sm:$0xf] %v13419_v2  ;;  %v5091_v4 = vld [vmem:[#allocation2 + $0x188] sm:$0xff]  ;;  %v6048_v2 = vld [vmem:[#allocation2 + $0x172] sm:$0xff]  ;;  %v10221_v3 = vpack.c.bf16 %v4515_v16, %v4515_v16  ;;  %7927 = vmatmul.mubr.bf16.gmra.mxu0 %v11871_v31 }
 0x26b   : > { %6198 = vst [vmem:[#allocation3 + $0x284] sm:$0xf] %v13421_v21  ;;  %5250 = vst [vmem:[#allocation3 + $0x444] sm:$0xf] %v13544_v19  ;;  %v10348_v21 = vpack.c.bf16 %v13487_v8, %v13487_v8  ;;  %v11877_v8 = vld [vmem:[#allocation3 + $0x244] ss:$36 sps:$4 sm:$0xff]   ;;  %7934 = vmatprep.mubr.bf16.mxu0 %v11880_v54 }
 0x26c   : > { %5813 = vst [vmem:[#allocation3 + $0x258] sm:$0xf] %v13390_v22  ;;  %5814 = vst [vmem:[#allocation3 + $0x27c] sm:$0xf] %v13416_v18  ;;  %v5474_v22 = vld [vmem:[#allocation2 + $0x182] sm:$0xff]  ;;  %v5475_v18 = vld [vmem:[#allocation2 + $0x18a] sm:$0xff]  ;;  %7781 = vmatprep.mubr.bf16.mxu1 %v11877_v8 }
 0x26d   : > { %5432 = vst [vmem:[#allocation3 + $0x2e0] sm:$0xf] %v13405_v9  ;;  %6007 = vst [vmem:[#allocation3 + $0x2a4] sm:$0xf] %v13405_v9  ;;  %v6047_v9 = vld [vmem:[#allocation2 + $0x16a] sm:$0xff] }
 0x26e   : > { %5815 = vst [vmem:[#allocation3 + $0x2a0] sm:$0xf] %v13462_v24  ;;  %5434 = vst [vmem:[#allocation3 + $0x328] sm:$0xf] %v13393_v32  ;;  %v10472_v24 = vpack.c.bf16 %v6047_v9, %v6047_v9  ;;  %v5648_v49 = vld [vmem:[#allocation2 + $0xb0] sm:$0xff]  ;;  %v5269_v9 = vld [vmem:[#allocation2 + $0xe1] sm:$0xff] }
 0x26f   : > { %5435 = vst [vmem:[#allocation3 + $0x34c] sm:$0xf] %v13423_v25  ;;  %5626 = vst [vmem:[#allocation3 + $0x32c] sm:$0xf] %v13481_v20  ;;  %v11900_v33 = vld [vmem:[#allocation3 + $0x318] ss:$36 sps:$4 sm:$0xff]  }
 0x270   : > { %6009 = vst [vmem:[#allocation3 + $0x2ec] sm:$0xf] %v13393_v32  ;;  %6010 = vst [vmem:[#allocation3 + $0x310] sm:$0xf] %v13423_v25  ;;  %v10317_v32 = vpack.c.bf16 %v5091_v4, %v5091_v4  ;;  %v10349_v25 = vpack.c.bf16 %v13512_v0, %v13512_v0  ;;  %v10393_v4 = vpack.c.bf16 %v5648_v49, %v5648_v49  ;;  %v5656_v8 = vld [vmem:[#allocation2 + $0x110] sm:$0xff] }
 0x271   : > { %6201 = vst [vmem:[#allocation3 + $0x2f0] sm:$0xf] %v13481_v20  ;;  %4674 = vst [vmem:[#allocation3 + $0x438] sm:$0xf] %v10220_v7  ;;  %v12075_v20 = vld [vmem:[#allocation2 + $0x62] sm:$0xff]  ;;  %v10401_v31 = vpack.c.bf16 %v5656_v8, %v5656_v8 }
 0x272   : > { %5248 = vst [vmem:[#allocation3 + $0x3fc] sm:$0xf] %v10220_v7  ;;  %5627 = vst [vmem:[#allocation3 + $0x350] sm:$0xf] %v13483_v51  ;;  %7935 = vmatmul.mubr.bf16.gmra.mxu0 %v11878_v23  ;;  %v11918_v54 = vld [vmem:[#allocation3 + $0x3ac] ss:$36 sps:$4 sm:$0xff]  }
 0x273   : > { %5817 = vst [vmem:[#allocation3 + $0x2e8] sm:$0xf] %v13453_v29  ;;  %5818 = vst [vmem:[#allocation3 + $0x30c] sm:$0xf] %v13478_v27  ;;  %v10380_v29 = vpack.c.bf16 %v5474_v22, %v5474_v22  ;;  %v10447_v27 = vpack.c.bf16 %v12074_v53, %v12074_v53  ;;  %7942 = vmatprep.mubr.bf16.mxu0 %v11889_v62  ;;  %v11902_v22 = vld [vmem:[#allocation3 + $0x31c] ss:$36 sps:$4 sm:$0xff]  }
 0x274   : > { %6202 = vst [vmem:[#allocation3 + $0x314] sm:$0xf] %v13483_v51  ;;  %4671 = vst [vmem:[#allocation3 + $0x3cc] sm:$0xf] %v10217_v47  ;;  %v10450_v51 = vpack.c.bf16 %v12075_v20, %v12075_v20  ;;  %v11903_v53 = vld [vmem:[#allocation3 + $0x2d8] ss:$36 sps:$4 sm:$0xff]  }
 0x275   : > { %5245 = vst [vmem:[#allocation3 + $0x390] sm:$0xf] %v10217_v47  ;;  %5436 = vst [vmem:[#allocation3 + $0x370] sm:$0xf] %v13466_v12  ;;  %v10363_v47 = vpack.c.bf16 %v5457_v60, %v5457_v60  ;;  %v5273_v20 = vld [vmem:[#allocation2 + $0x111] sm:$0xff] }
 0x276   : > { %5819 = vst [vmem:[#allocation3 + $0x330] sm:$0xf] %v13504_v17  ;;  %6011 = vst [vmem:[#allocation3 + $0x334] sm:$0xf] %v13466_v12  ;;  %v10473_v12 = vpack.c.bf16 %v6048_v2, %v6048_v2  ;;  %v5448_v17 = vld [vmem:[#allocation2 + $0x4a] sm:$0xff]  ;;  %v5460_v2 = vld [vmem:[#allocation2 + $0xda] sm:$0xff] }
 0x277   : > { %5438 = vst [vmem:[#allocation3 + $0x3b8] sm:$0xf] %v13455_v6  ;;  %6013 = vst [vmem:[#allocation3 + $0x37c] sm:$0xf] %v13455_v6  ;;  %v10381_v6 = vpack.c.bf16 %v5475_v18, %v5475_v18  ;;  %v10354_v5 = vpack.c.bf16 %v5448_v17, %v5448_v17  ;;  %v11894_v18 = vld [vmem:[#allocation3 + $0x290] ss:$36 sps:$4 sm:$0xff]   ;;  %v10405_v17 = vpack.c.bf16 %v5660_v59, %v5660_v59 }
 0x278   : > { %5439 = vst [vmem:[#allocation3 + $0x3dc] sm:$0xf] %v13485_v46  ;;  %5630 = vst [vmem:[#allocation3 + $0x3bc] sm:$0xf] %v13523_v61  ;;  %v11928_v23 = vld [vmem:[#allocation3 + $0x3b4] ss:$36 sps:$4 sm:$0xff]  }
 0x279   : > { %5631 = vst [vmem:[#allocation3 + $0x3e0] sm:$0xf] %v13525_v30  ;;  %5821 = vst [vmem:[#allocation3 + $0x378] sm:$0xf] %v13498_v63  ;;  %v11875_v63 = vld [vmem:[#allocation3 + $0x240] ss:$36 sps:$4 sm:$0xff]  }
 0x27a   : > { %6014 = vst [vmem:[#allocation3 + $0x3a0] sm:$0xf] %v13485_v46  ;;  %6205 = vst [vmem:[#allocation3 + $0x380] sm:$0xf] %v13523_v61  ;;  %v12076_v46 = vld [vmem:[#allocation2 + $0x6a] sm:$0xff]  ;;  %7782 = vmatmul.mubr.bf16.gmra.mxu1 %v11875_v63  ;;  %v5452_v61 = vld [vmem:[#allocation2 + $0x7a] sm:$0xff]  ;;  %7943 = vmatmul.mubr.bf16.gmra.mxu0 %v11887_v58 }
 0x27b   : > { %6206 = vst [vmem:[#allocation3 + $0x3a4] sm:$0xf] %v13525_v30  ;;  %5251 = vst [vmem:[#allocation3 + $0x468] sm:$0xf] %v10317_v32  ;;  %v10451_v56 = vpack.c.bf16 %v12076_v46, %v12076_v46  ;;  %7789 = vmatprep.mubr.bf16.mxu1 %v11886_v41  ;;  %v10358_v39 = vpack.c.bf16 %v5452_v61, %v5452_v61  ;;  %7950 = vmatprep.mubr.bf16.mxu0 %v11896_v52  ;;  %v5468_v63 = vld [vmem:[#allocation2 + $0x13a] sm:$0xff]  ;;  %v5469_v41 = vld [vmem:[#allocation2 + $0x142] sm:$0xff] }
 0x27c   : > { %5822 = vst [vmem:[#allocation3 + $0x39c] sm:$0xf] %v13520_v26  ;;  %5440 = vst [vmem:[#allocation3 + $0x400] sm:$0xf] %v13508_v42  ;;  %v5261_v26 = vld [vmem:[#allocation2 + $0x81] sm:$0xff]  ;;  %v10339_v46 = vpack.c.bf16 %v5273_v20, %v5273_v20  ;;  %v10374_v36 = vpack.c.bf16 %v5468_v63, %v5468_v63  ;;  %v5664_v61 = vld [vmem:[#allocation2 + $0x170] sm:$0xff] }
 0x27d   : > { %5823 = vst [vmem:[#allocation3 + $0x3c0] sm:$0xf] %v10220_v7  ;;  %6015 = vst [vmem:[#allocation3 + $0x3c4] sm:$0xf] %v13508_v42  ;;  %v5449_v42 = vld [vmem:[#allocation2 + $0x52] sm:$0xff]  ;;  %v10327_v30 = vpack.c.bf16 %v5261_v26, %v5261_v26  ;;  %v10409_v37 = vpack.c.bf16 %v5664_v61, %v5664_v61 }
 0x27e   : > { %5442 = vst [vmem:[#allocation3 + $0x448] sm:$0xf] %v10348_v21  ;;  %5443 = vst [vmem:[#allocation3 + $0x46c] sm:$0xf] %v10349_v25  ;;  %v10355_v0 = vpack.c.bf16 %v5449_v42, %v5449_v42  ;;  %v11891_v7 = vld [vmem:[#allocation3 + $0x2d0] ss:$36 sps:$4 sm:$0xff]  }
 0x27f   : > { %5634 = vst [vmem:[#allocation3 + $0x44c] sm:$0xf] %v10380_v29  ;;  %5635 = vst [vmem:[#allocation3 + $0x470] sm:$0xf] %v10381_v6  ;;  %v11921_v38 = vld [vmem:[#allocation3 + $0x36c] ss:$36 sps:$4 sm:$0xff]  }
 0x280   : > { %6017 = vst [vmem:[#allocation3 + $0x40c] sm:$0xf] %v10348_v21  ;;  %6018 = vst [vmem:[#allocation3 + $0x430] sm:$0xf] %v10349_v25  ;;  %v10335_v21 = vpack.c.bf16 %v5269_v9, %v5269_v9  ;;  %v5461_v25 = vld [vmem:[#allocation2 + $0xe2] sm:$0xff] }
 0x281   : > { %6209 = vst [vmem:[#allocation3 + $0x410] sm:$0xf] %v10380_v29  ;;  %6210 = vst [vmem:[#allocation3 + $0x434] sm:$0xf] %v10381_v6  ;;  %v10366_v29 = vpack.c.bf16 %v5460_v2, %v5460_v2  ;;  %v5652_v6 = vld [vmem:[#allocation2 + $0xe0] sm:$0xff]  ;;  %v12005_v2 = vld [vmem:[%s14110_s2 + $0x218] sm:$0xff]  }
 0x282   : > { %6207 = vst [vmem:[#allocation3 + $0x3c8] sm:$0xf] %v10472_v24  ;;  %6208 = vst [vmem:[#allocation3 + $0x3ec] sm:$0xf] %v10473_v12  ;;  %7790 = vmatmul.mubr.bf16.gmra.mxu1 %v11884_v13  ;;  %7951 = vmatmul.mubr.bf16.gmra.mxu0 %v11894_v18  ;;  %v11916_v42 = vld [vmem:[#allocation3 + $0x3a8] ss:$36 sps:$4 sm:$0xff]  }
 0x283   : > { %5058 = vst [vmem:[#allocation3 + $0x440] sm:$0xf] %v10472_v24  ;;  %5059 = vst [vmem:[#allocation3 + $0x464] sm:$0xf] %v10473_v12  ;;  %7797 = vmatprep.mubr.bf16.mxu1 %v11893_v44  ;;  %v10367_v24 = vpack.c.bf16 %v5461_v25, %v5461_v25  ;;  %v10397_v12 = vpack.c.bf16 %v5652_v6, %v5652_v6  ;;  %v5473_v13 = vld [vmem:[#allocation2 + $0x172] sm:$0xff] }
 0x284   : > { %5825 = vst [vmem:[#allocation3 + $0x408] sm:$0xf] %v13544_v19  ;;  %5826 = vst [vmem:[#allocation3 + $0x42c] sm:$0xf] %v10317_v32  ;;  %v5265_v19 = vld [vmem:[#allocation2 + $0xb1] sm:$0xff] }
 0x285   : > { %6181 = vst [vmem:[#allocation3 + $0x20] sm:$0xf] %v10446_v57  ;;  %6182 = vst [vmem:[#allocation3 + $0x44] sm:$0xf] %v10447_v27  ;;  %v10331_v55 = vpack.c.bf16 %v5265_v19, %v5265_v19  ;;  %v11905_v32 = vld [vmem:[#allocation3 + $0x2dc] ss:$36 sps:$4 sm:$0xff]  }
 0x286   : > { %6185 = vst [vmem:[#allocation3 + $0xb0] sm:$0xf] %v10450_v51  ;;  %6186 = vst [vmem:[#allocation3 + $0xd4] sm:$0xf] %v10451_v56  ;;  %7958 = vmatprep.mubr.bf16.mxu0 %v11905_v32  ;;  %v11909_v57 = vld [vmem:[#allocation3 + $0x364] ss:$36 sps:$4 sm:$0xff]  }
 0x287   : > { %4675 = vst [vmem:[#allocation3 + $0x45c] sm:$0xf] %v10221_v3  ;;  %5249 = vst [vmem:[#allocation3 + $0x420] sm:$0xf] %v10221_v3  ;;  %v11912_v27 = vld [vmem:[#allocation3 + $0x324] ss:$36 sps:$4 sm:$0xff]  }
 0x288   : > { %5417 = vst [vmem:[#allocation3 + $0xc4] sm:$0xf] %v10323_v45  ;;  %5992 = vst [vmem:[#allocation3 + $0x88] sm:$0xf] %v10323_v45  ;;  %v5464_v51 = vld [vmem:[#allocation2 + $0x10a] sm:$0xff]  ;;  %v5465_v56 = vld [vmem:[#allocation2 + $0x112] sm:$0xff]  ;;  %v10375_v45 = vpack.c.bf16 %v5469_v41, %v5469_v41 }
 0x289   : > { %5608 = vst [vmem:[#allocation3 + $0xa4] sm:$0xf] %v10354_v5  ;;  %5609 = vst [vmem:[#allocation3 + $0xc8] sm:$0xf] %v10355_v0  ;;  %v10370_v11 = vpack.c.bf16 %v5464_v51, %v5464_v51  ;;  %v10371_v16 = vpack.c.bf16 %v5465_v56, %v5465_v56  ;;  %v11907_v3 = vld [vmem:[#allocation3 + $0x360] ss:$36 sps:$4 sm:$0xff]  }
 0x28a   : > { %5800 = vst [vmem:[#allocation3 + $0x84] sm:$0xf] %v10385_v1  ;;  %5421 = vst [vmem:[#allocation3 + $0x154] sm:$0xf] %v10327_v30  ;;  %7798 = vmatmul.mubr.bf16.gmra.mxu1 %v11891_v7  ;;  %7959 = vmatmul.mubr.bf16.gmra.mxu0 %v11903_v53  ;;  %v11919_v5 = vld [vmem:[#allocation3 + $0x368] ss:$36 sps:$4 sm:$0xff]  }
 0x28b   : > { %5612 = vst [vmem:[#allocation3 + $0x134] sm:$0xf] %v10358_v39  ;;  %5996 = vst [vmem:[#allocation3 + $0x118] sm:$0xf] %v10327_v30  ;;  %7805 = vmatprep.mubr.bf16.mxu1 %v11902_v22  ;;  %7966 = vmatprep.mubr.bf16.mxu0 %v11912_v27  ;;  %v5281_v0 = vld [vmem:[#allocation2 + $0x171] sm:$0xff]  ;;  %v10379_v30 = vpack.c.bf16 %v5473_v13, %v5473_v13  ;;  %v11992_v22 = vld [vmem:[%s14110_s2 + $0x220] sm:$0xff]  }
 0x28c   : > { %5613 = vst [vmem:[#allocation3 + $0x158] sm:$0xf] %v10359_v28  ;;  %5804 = vst [vmem:[#allocation3 + $0x114] sm:$0xf] %v10389_v34  ;;  %v5472_v1 = vld [vmem:[#allocation2 + $0x16a] sm:$0xff]  ;;  %v10347_v62 = vpack.c.bf16 %v5281_v0, %v5281_v0  ;;  %v12077_v7 = vld [vmem:[%s14110_s2 + $0x238] sm:$0xff]  }
 0x28d   : > { %5425 = vst [vmem:[#allocation3 + $0x1e4] sm:$0xf] %v10331_v55  ;;  %5616 = vst [vmem:[#allocation3 + $0x1c4] sm:$0xf] %v10362_v43  ;;  %v10378_v26 = vpack.c.bf16 %v5472_v1, %v5472_v1  ;;  %v11923_v39 = vld [vmem:[#allocation3 + $0x3f0] ss:$36 sps:$4 sm:$0xff]  }
 0x28e   : > { %6000 = vst [vmem:[#allocation3 + $0x1a8] sm:$0xf] %v10331_v55  ;;  %5617 = vst [vmem:[#allocation3 + $0x1e8] sm:$0xf] %v10363_v47  ;;  %v11934_v14 = vld [vmem:[#allocation3 + $0x43c] ss:$36 sps:$4 sm:$0xff]  }
 0x28f   : > { %5808 = vst [vmem:[#allocation3 + $0x1a4] sm:$0xf] %v10393_v4  ;;  %5429 = vst [vmem:[#allocation3 + $0x274] sm:$0xf] %v10335_v21  ;;  %v11926_v44 = vld [vmem:[#allocation3 + $0x3b0] ss:$36 sps:$4 sm:$0xff]  }
 0x290   : > { %5620 = vst [vmem:[#allocation3 + $0x254] sm:$0xf] %v10366_v29  ;;  %6004 = vst [vmem:[#allocation3 + $0x238] sm:$0xf] %v10335_v21  ;;  %v11937_v28 = vld [vmem:[#allocation3 + $0x3fc] ss:$36 sps:$4 sm:$0xff]  }
 0x291   : > { %5621 = vst [vmem:[#allocation3 + $0x278] sm:$0xf] %v10367_v24  ;;  %5812 = vst [vmem:[#allocation3 + $0x234] sm:$0xf] %v10397_v12  ;;  %v11932_v34 = vld [vmem:[#allocation3 + $0x438] ss:$36 sps:$4 sm:$0xff]  }
 0x292   : > { %7806 = vmatmul.mubr.bf16.gmra.mxu1 %v11900_v33  ;;  %5433 = vst [vmem:[#allocation3 + $0x304] sm:$0xf] %v10339_v46  ;;  %5624 = vst [vmem:[#allocation3 + $0x2e4] sm:$0xf] %v10370_v11  ;;  %7967 = vmatmul.mubr.bf16.gmra.mxu0 %v11910_v50  ;;  %v11945_v58 = vld [vmem:[#allocation3 + $0x14] ss:$36 sps:$4 sm:$0xff]  }
 0x293   : > { %7813 = vmatprep.mubr.bf16.mxu1 %v11909_v57  ;;  %6008 = vst [vmem:[#allocation3 + $0x2c8] sm:$0xf] %v10339_v46  ;;  %5625 = vst [vmem:[#allocation3 + $0x308] sm:$0xf] %v10371_v16  ;;  %7974 = vmatprep.mubr.bf16.mxu0 %v11921_v38  ;;  %v11935_v52 = vld [vmem:[#allocation3 + $0x3f8] ss:$36 sps:$4 sm:$0xff]  }
 0x294   : > { %5816 = vst [vmem:[#allocation3 + $0x2c4] sm:$0xf] %v10401_v31  ;;  %5437 = vst [vmem:[#allocation3 + $0x394] sm:$0xf] %v10343_v48  ;;  %v11942_v19 = vld [vmem:[#allocation3 + $0x444] ss:$36 sps:$4 sm:$0xff]  }
 0x295   : > { %5628 = vst [vmem:[#allocation3 + $0x374] sm:$0xf] %v10374_v36  ;;  %6012 = vst [vmem:[#allocation3 + $0x358] sm:$0xf] %v10343_v48  ;;  %v11943_v35 = vld [vmem:[#allocation3 + $0x10] ss:$36 sps:$4 sm:$0xff]  }
 0x296   : > { %5629 = vst [vmem:[#allocation3 + $0x398] sm:$0xf] %v10375_v45  ;;  %5820 = vst [vmem:[#allocation3 + $0x354] sm:$0xf] %v10405_v17  ;;  %v11966_v55 = vld [vmem:[%s14110_s2 + $0x230] sm:$0xff]   ;;  %v11979_v47 = vld [vmem:[%s14110_s2 + $0x228] sm:$0xff]  }
 0x297   : > { %5441 = vst [vmem:[#allocation3 + $0x424] sm:$0xf] %v10347_v62  ;;  %5632 = vst [vmem:[#allocation3 + $0x404] sm:$0xf] %v10378_v26  ;;  %v11953_v60 = vld [vmem:[#allocation3 + $0x5c] ss:$36 sps:$4 sm:$0xff]  }
 0x298   : > { %6016 = vst [vmem:[#allocation3 + $0x3e8] sm:$0xf] %v10347_v62  ;;  %5633 = vst [vmem:[#allocation3 + $0x428] sm:$0xf] %v10379_v30  ;;  %v11940_v43 = vld [vmem:[#allocation3 + $0x440] ss:$36 sps:$4 sm:$0xff]  }
 0x299   : > { %5824 = vst [vmem:[#allocation3 + $0x3e4] sm:$0xf] %v10409_v37  ;;  %v11957_v49 = vld [vmem:[#allocation3 + $0x1c] ss:$36 sps:$4 sm:$0xff]   ;;  %v11962_v18 = vld [vmem:[#allocation3 + $0xa4] ss:$36 sps:$4 sm:$0xff]  }
 0x29a   : > { %7814 = vmatmul.mubr.bf16.gmra.mxu1 %v11907_v3  ;;  %7975 = vmatmul.mubr.bf16.gmra.mxu0 %v11919_v5  ;;  %v11951_v4 = vld [vmem:[#allocation3 + $0x58] ss:$36 sps:$4 sm:$0xff]   ;;  %v11965_v9 = vld [vmem:[#allocation3 + $0x64] ss:$36 sps:$4 sm:$0xff]   ;;  %v11969_v29 = vld [vmem:[#allocation3 + $0xec] ss:$36 sps:$4 sm:$0xff]  }
 0x29b   : > { %7821 = vmatprep.mubr.bf16.mxu1 %v11918_v54  ;;  %7982 = vmatprep.mubr.bf16.mxu0 %v11928_v23  ;;  %v11955_v32 = vld [vmem:[#allocation3 + $0x18] ss:$36 sps:$4 sm:$0xff]   ;;  %v11960_v21 = vld [vmem:[#allocation3 + $0xa0] ss:$36 sps:$4 sm:$0xff]   ;;  %v11972_v24 = vld [vmem:[#allocation3 + $0xac] ss:$36 sps:$4 sm:$0xff]  }
 0x29c   : > { %v12018_v25 = vld [vmem:[%s14110_s2 + $0x210] sm:$0xff]   ;;  %v12031_v12 = vld [vmem:[%s14110_s2 + $0x208] sm:$0xff]   ;;  %v11967_v33 = vld [vmem:[#allocation3 + $0xe8] ss:$36 sps:$4 sm:$0xff]  }
 0x29d   : > { %v11963_v6 = vld [vmem:[#allocation3 + $0x60] ss:$36 sps:$4 sm:$0xff]   ;;  %v12044_v57 = vld [vmem:[%s14110_s2 + $0x200] sm:$0xff]   ;;  %v11970_v27 = vld [vmem:[#allocation3 + $0xa8] ss:$36 sps:$4 sm:$0xff]  }
 0x29e   : > { %v11975_v53 = vld [vmem:[#allocation3 + $0x134] ss:$36 sps:$4 sm:$0xff]   ;;  %v11982_v46 = vld [vmem:[#allocation3 + $0x17c] ss:$36 sps:$4 sm:$0xff]   ;;  %v11988_v16 = vld [vmem:[#allocation3 + $0x1c4] ss:$36 sps:$4 sm:$0xff]  }
 0x29f   : > { %v11978_v20 = vld [vmem:[#allocation3 + $0xf4] ss:$36 sps:$4 sm:$0xff]   ;;  %v11985_v11 = vld [vmem:[#allocation3 + $0x13c] ss:$36 sps:$4 sm:$0xff]   ;;  %v11991_v3 = vld [vmem:[#allocation3 + $0x184] ss:$36 sps:$4 sm:$0xff]  }
 0x2a0   : > { %v11973_v51 = vld [vmem:[#allocation3 + $0x130] ss:$36 sps:$4 sm:$0xff]   ;;  %v11980_v8 = vld [vmem:[#allocation3 + $0x178] ss:$36 sps:$4 sm:$0xff]   ;;  %v11986_v54 = vld [vmem:[#allocation3 + $0x1c0] ss:$36 sps:$4 sm:$0xff]  }
 0x2a1   : > { %v11976_v56 = vld [vmem:[#allocation3 + $0xf0] ss:$36 sps:$4 sm:$0xff]   ;;  %v11983_v31 = vld [vmem:[#allocation3 + $0x138] ss:$36 sps:$4 sm:$0xff]   ;;  %v11989_v38 = vld [vmem:[#allocation3 + $0x180] ss:$36 sps:$4 sm:$0xff]  }
 0x2a2   : > { %7822 = vmatmul.mubr.bf16.gmra.mxu1 %v11916_v42  ;;  %7983 = vmatmul.mubr.bf16.gmra.mxu0 %v11926_v44  ;;  %v11995_v50 = vld [vmem:[#allocation3 + $0x20c] ss:$36 sps:$4 sm:$0xff]   ;;  %v12001_v48 = vld [vmem:[#allocation3 + $0x254] ss:$36 sps:$4 sm:$0xff]   ;;  %v12008_v45 = vld [vmem:[#allocation3 + $0x29c] ss:$36 sps:$4 sm:$0xff]  }
 0x2a3   : > { %7829 = vmatprep.mubr.bf16.mxu1 %v11925_v40  ;;  %7990 = vmatprep.mubr.bf16.mxu0 %v11937_v28  ;;  %v11998_v15 = vld [vmem:[#allocation3 + $0x1cc] ss:$36 sps:$4 sm:$0xff]   ;;  %v12004_v36 = vld [vmem:[#allocation3 + $0x214] ss:$36 sps:$4 sm:$0xff]   ;;  %v12011_v42 = vld [vmem:[#allocation3 + $0x25c] ss:$36 sps:$4 sm:$0xff]   ;;  %v10969_v40 = vpop.f32.mrf.mxu1 }
 0x2a4   : > { %v11993_v63 = vld [vmem:[#allocation3 + $0x208] ss:$36 sps:$4 sm:$0xff]   ;;  %v11999_v59 = vld [vmem:[#allocation3 + $0x250] ss:$36 sps:$4 sm:$0xff]   ;;  %v12006_v5 = vld [vmem:[#allocation3 + $0x298] ss:$36 sps:$4 sm:$0xff]  }
 0x2a5   : > { %v11996_v41 = vld [vmem:[#allocation3 + $0x1c8] ss:$36 sps:$4 sm:$0xff]   ;;  %v12002_v17 = vld [vmem:[#allocation3 + $0x210] ss:$36 sps:$4 sm:$0xff]   ;;  %v10970_v23 = vpop.f32.mrf.mxu1  ;;  %v12009_v1 = vld [vmem:[#allocation3 + $0x258] ss:$36 sps:$4 sm:$0xff]  }
 0x2a6   : > { %v12014_v0 = vld [vmem:[#allocation3 + $0x2e4] ss:$36 sps:$4 sm:$0xff]  }
 0x2a7   : > { %v12017_v13 = vld [vmem:[#allocation3 + $0x2a4] ss:$36 sps:$4 sm:$0xff]  }
 0x2a8   : > { %v12012_v44 = vld [vmem:[#allocation3 + $0x2e0] ss:$36 sps:$4 sm:$0xff]  }
 0x2aa   : > { %7830 = vmatmul.mubr.bf16.gmra.mxu1 %v11923_v39  ;;  %7991 = vmatmul.mubr.bf16.gmra.mxu0 %v11935_v52 }
 0x2ab   : > { %7837 = vmatprep.mubr.bf16.mxu1 %v11934_v14  ;;  %7998 = vmatprep.mubr.bf16.mxu0 %v11942_v19  ;;  %v12021_v19 = vld [vmem:[#allocation3 + $0x32c] ss:$36 sps:$4 sm:$0xff]  }
 0x2b2   : > { %7838 = vmatmul.mubr.bf16.gmra.mxu1 %v11932_v34  ;;  %7999 = vmatmul.mubr.bf16.gmra.mxu0 %v11940_v43  ;;  %v10971_v43 = vadd.f32 %v10970_v23, %v10969_v40 }
 0x2b3   : > { %8039 = vmatprep.mubr.bf16.mxu1 %v11945_v58  ;;  %8200 = vmatprep.mubr.bf16.mxu0 %v11957_v49 }
 0x2ba   : > { %8040 = vmatmul.mubr.bf16.vlgmr.msra.gmra.mxu1 %v11943_v35  ;;  %8201 = vmatmul.mubr.bf16.vlgmr.msra.gmra.mxu0 %v11955_v32  ;;  %v12015_v35 = vld [vmem:[#allocation3 + $0x2a0] ss:$36 sps:$4 sm:$0xff]  }
 0x2bb   : > { %8047 = vmatprep.mubr.bf16.mxu1 %v11953_v60  ;;  %11471 = vmatpush3.bf16.msra.mxu1 %v12077_v7  ;;  %v12024_v7 = vld [vmem:[#allocation3 + $0x2ec] ss:$36 sps:$4 sm:$0xff]  }
 0x2bc   : > { %11472 = vmatprep.subr.bf16.mxu1 %v11966_v55  ;;  %8208 = vmatprep.mubr.bf16.mxu0 %v11965_v9 }
 0x2bf   : > { %11473 = vmatpush3.bf16.msra.mxu1 %v11966_v55 }
 0x2c0   : > { %11474 = vmatprep.subr.bf16.mxu1 %v11979_v47 }
 0x2c2   : > { %8048 = vmatmul.mubr.bf16.gmra.mxu1 %v11951_v4  ;;  %8209 = vmatmul.mubr.bf16.gmra.mxu0 %v11963_v6 }
 0x2c3   : > { %8055 = vmatprep.mubr.bf16.mxu1 %v11962_v18  ;;  %11475 = vmatpush3.bf16.msra.mxu1 %v11979_v47 }
 0x2c4   : > { %11476 = vmatprep.subr.bf16.mxu1 %v11992_v22  ;;  %8216 = vmatprep.mubr.bf16.mxu0 %v11972_v24  ;;  %v12027_v24 = vld [vmem:[#allocation3 + $0x374] ss:$36 sps:$4 sm:$0xff]  }
 0x2c7   : > { %11477 = vmatpush3.bf16.msra.mxu1 %v11992_v22 }
 0x2c8   : > { %11478 = vmatprep.subr.bf16.mxu1 %v12005_v2 }
 0x2ca   : > { %8056 = vmatmul.mubr.bf16.gmra.mxu1 %v11960_v21  ;;  %8217 = vmatmul.mubr.bf16.gmra.mxu0 %v11970_v27  ;;  %v12030_v27 = vld [vmem:[#allocation3 + $0x334] ss:$36 sps:$4 sm:$0xff]  }
 0x2cb   : > { %8063 = vmatprep.mubr.bf16.mxu1 %v11969_v29  ;;  %11479 = vmatpush3.bf16.msra.mxu1 %v12005_v2  ;;  %v12019_v2 = vld [vmem:[#allocation3 + $0x328] ss:$36 sps:$4 sm:$0xff]  }
 0x2cc   : > { %11480 = vmatprep.subr.bf16.mxu1 %v12018_v25  ;;  %8224 = vmatprep.mubr.bf16.mxu0 %v11978_v20 }
 0x2cf   : > { %11481 = vmatpush3.bf16.msra.mxu1 %v12018_v25 }
 0x2d0   : > { %11482 = vmatprep.subr.bf16.mxu1 %v12031_v12 }
 0x2d2   : > { %8064 = vmatmul.mubr.bf16.gmra.mxu1 %v11967_v33  ;;  %8225 = vmatmul.mubr.bf16.gmra.mxu0 %v11976_v56 }
 0x2d3   : > { %8071 = vmatprep.mubr.bf16.mxu1 %v11975_v53  ;;  %11483 = vmatpush3.bf16.msra.mxu1 %v12031_v12  ;;  %v12022_v12 = vld [vmem:[#allocation3 + $0x2e8] ss:$36 sps:$4 sm:$0xff]  }
 0x2d4   : > { %11484 = vmatprep.subr.bf16.mxu1 %v12044_v57  ;;  %8232 = vmatprep.mubr.bf16.mxu0 %v11985_v11 }
 0x2d7   : > { %11485 = vmatpush3.bf16.msra.mxu1 %v12044_v57 }
 0x2da   : > { %8072 = vmatmul.mubr.bf16.gmra.mxu1 %v11973_v51  ;;  %8233 = vmatmul.mubr.bf16.gmra.mxu0 %v11983_v31  ;;  %v10972_v62 = vpop.f32.mrf.mxu1  ;;  %v12025_v31 = vld [vmem:[#allocation3 + $0x370] ss:$36 sps:$4 sm:$0xff]  }
 0x2db   : > { %8079 = vmatprep.mubr.bf16.mxu1 %v11982_v46  ;;  %8240 = vmatprep.mubr.bf16.mxu0 %v11991_v3 }
 0x2dc   : > { %v10973_v61 = vpop.f32.mrf.mxu1 }
 0x2dd   : > { %v10974_v30 = vadd.f32 %v10973_v61, %v10972_v62 }
 0x2de   : > { %v11078_v26 = vpop.f32.mrf.mxu0  ;;  %v10975_v39 = vpop.f32.mrf.mxu1 }
 0x2e0   : > { %v11079_v37 = vpop.f32.mrf.mxu0  ;;  %v10976_v34 = vpop.f32.mrf.mxu1 }
 0x2e1   : > { %v11080_v14 = vadd.f32 %v11079_v37, %v11078_v26  ;;  %v10977_v52 = vadd.f32 %v10976_v34, %v10975_v39  ;;  %v12035_v37 = vld [vmem:[#allocation3 + $0x378] ss:$36 sps:$4 sm:$0xff]  }
 0x2e2   : > { %8080 = vmatmul.mubr.bf16.gmra.mxu1 %v11980_v8  ;;  %8241 = vmatmul.mubr.bf16.gmra.mxu0 %v11989_v38  ;;  %v11081_v28 = vpop.f32.mrf.mxu0 }
 0x2e3   : > { %8087 = vmatprep.mubr.bf16.mxu1 %v11988_v16  ;;  %8248 = vmatprep.mubr.bf16.mxu0 %v11998_v15  ;;  %v13627_v58 = vadd.f32 %v11080_v14, %v13600_v10  ;;  %v12034_v15 = vld [vmem:[#allocation3 + $0x3bc] ss:$36 sps:$4 sm:$0xff]  }
 0x2e4   : > { %v11082_v55 = vpop.f32.mrf.mxu0  ;;  %v10978_v60 = vpop.f32.mrf.mxu1 }
 0x2e5   : > { %v11083_v49 = vadd.f32 %v11082_v55, %v11081_v28  ;;  %v12043_v28 = vld [vmem:[#allocation3 + $0x3c4] ss:$36 sps:$4 sm:$0xff]  }
 0x2e6   : > { %v10979_v4 = vpop.f32.mrf.mxu1 }
 0x2e7   : > { %v11084_v47 = vpop.f32.mrf.mxu0  ;;  %v13629_v22 = vadd.f32 %v11083_v49, %v10971_v43  ;;  %v10980_v18 = vadd.f32 %v10979_v4, %v10978_v60  ;;  %v12038_v49 = vld [vmem:[#allocation3 + $0x400] ss:$36 sps:$4 sm:$0xff]  }
 0x2e8   : > { %v10981_v10 = vpop.f32.mrf.mxu1 }
 0x2e9   : > { %v11085_v32 = vpop.f32.mrf.mxu0 }
 0x2ea   : > { %8088 = vmatmul.mubr.bf16.gmra.mxu1 %v11986_v54  ;;  %8249 = vmatmul.mubr.bf16.gmra.mxu0 %v11996_v41  ;;  %v11086_v9 = vadd.f32 %v11085_v32, %v11084_v47  ;;  %v10982_v25 = vpop.f32.mrf.mxu1  ;;  %v12047_v32 = vld [vmem:[#allocation3 + $0x44c] ss:$36 sps:$4 sm:$0xff]  }
 0x2eb   : > { %8095 = vmatprep.mubr.bf16.mxu1 %v11995_v50  ;;  %8256 = vmatprep.mubr.bf16.mxu0 %v12004_v36  ;;  %v11087_v21 = vpop.f32.mrf.mxu0  ;;  %v10983_v6 = vadd.f32 %v10982_v25, %v10981_v10  ;;  %v12041_v10 = vld [vmem:[#allocation3 + $0x3c0] ss:$36 sps:$4 sm:$0xff]   ;;  %v12050_v25 = vld [vmem:[#allocation3 + $0x40c] ss:$36 sps:$4 sm:$0xff]  }
 0x2ec   : > { %v13631_v29 = vadd.f32 %v11086_v9, %v10974_v30  ;;  %v10984_v57 = vpop.f32.mrf.mxu1  ;;  %v12040_v30 = vld [vmem:[#allocation3 + $0x404] ss:$36 sps:$4 sm:$0xff]  }
 0x2ed   : > { %v11088_v33 = vpop.f32.mrf.mxu0 }
 0x2ee   : > { %v11089_v53 = vadd.f32 %v11088_v33, %v11087_v21  ;;  %v10985_v51 = vpop.f32.mrf.mxu1 }
 0x2ef   : > { %v10986_v56 = vadd.f32 %v10985_v51, %v10984_v57 }
 0x2f0   : > { %v13633_v46 = vadd.f32 %v11089_v53, %v10977_v52  ;;  %v10987_v8 = vpop.f32.mrf.mxu1 }
 0x2f2   : > { %8096 = vmatmul.mubr.bf16.gmra.mxu1 %v11993_v63  ;;  %8257 = vmatmul.mubr.bf16.gmra.mxu0 %v12002_v17  ;;  %v10988_v54 = vpop.f32.mrf.mxu1  ;;  %v12028_v63 = vld [vmem:[#allocation3 + $0x330] ss:$36 sps:$4 sm:$0xff]  }
 0x2f3   : > { %8103 = vmatprep.mubr.bf16.mxu1 %v12001_v48  ;;  %8264 = vmatprep.mubr.bf16.mxu0 %v12011_v42  ;;  %v10989_v38 = vadd.f32 %v10988_v54, %v10987_v8 }
 0x2f4   : > { %v11090_v20 = vpop.f32.mrf.mxu0 }
 0x2f6   : > { %v11091_v11 = vpop.f32.mrf.mxu0  ;;  %v10990_v41 = vpop.f32.mrf.mxu1 }
 0x2f7   : > { %v11092_v16 = vadd.f32 %v11091_v11, %v11090_v20  ;;  %v12045_v20 = vld [vmem:[#allocation3 + $0x448] ss:$36 sps:$4 sm:$0xff]  }
 0x2f8   : > { %v11093_v3 = vpop.f32.mrf.mxu0  ;;  %v10991_v17 = vpop.f32.mrf.mxu1 }
 0x2f9   : > { %v13635_v50 = vadd.f32 %v11092_v16, %v10980_v18  ;;  %v10992_v40 = vadd.f32 %v10991_v17, %v10990_v41  ;;  %v12051_v16 = vld [vmem:[#allocation3 + $0x20] ss:$36 sps:$4 sm:$0xff]  }
 0x2fa   : > { %8104 = vmatmul.mubr.bf16.gmra.mxu1 %v11999_v59  ;;  %8265 = vmatmul.mubr.bf16.gmra.mxu0 %v12009_v1  ;;  %v11094_v48 = vpop.f32.mrf.mxu0  ;;  %v12037_v59 = vld [vmem:[#allocation3 + $0x37c] ss:$36 sps:$4 sm:$0xff]  }
 0x2fb   : > { %8111 = vmatprep.mubr.bf16.mxu1 %v12008_v45  ;;  %8272 = vmatprep.mubr.bf16.mxu0 %v12017_v13  ;;  %v11095_v36 = vadd.f32 %v11094_v48, %v11093_v3  ;;  %v12032_v1 = vld [vmem:[#allocation3 + $0x3b8] ss:$36 sps:$4 sm:$0xff]   ;;  %v12048_v3 = vld [vmem:[#allocation3 + $0x408] ss:$36 sps:$4 sm:$0xff]  }
 0x2fd   : > { %v11096_v45 = vpop.f32.mrf.mxu0  ;;  %v13637_v42 = vadd.f32 %v11095_v36, %v10983_v6 }
 0x2ff   : > { %v11097_v23 = vpop.f32.mrf.mxu0 }
 0x301   : > { %v11099_v62 = vpop.f32.mrf.mxu0 }
 0x302   : > { %8112 = vmatmul.mubr.bf16.gmra.mxu1 %v12006_v5  ;;  %8273 = vmatmul.mubr.bf16.gmra.mxu0 %v12015_v35  ;;  %v10993_v5 = vpop.f32.mrf.mxu1 }
 0x303   : > { %8119 = vmatprep.mubr.bf16.mxu1 %v12014_v0  ;;  %8280 = vmatprep.mubr.bf16.mxu0 %v12024_v7  ;;  %v11098_v0 = vadd.f32 %v11097_v23, %v11096_v45  ;;  %v11100_v39 = vpop.f32.mrf.mxu0 }
 0x304   : > { %v10994_v13 = vpop.f32.mrf.mxu1 }
 0x305   : > { %v13639_v26 = vadd.f32 %v11098_v0, %v10986_v56  ;;  %v10995_v61 = vadd.f32 %v10994_v13, %v10993_v5  ;;  %v12052_v5 = vld [vmem:[#allocation3 + $0x450] ss:$36 sps:$4 sm:$0xff]   ;;  %v12055_v0 = vld [vmem:[#allocation3 + $0x68] ss:$36 sps:$4 sm:$0xff]  }
 0x306   : > { %v10996_v14 = vpop.f32.mrf.mxu1  ;;  %v12056_v13 = vld [vmem:[#allocation3 + $0xb0] ss:$36 sps:$4 sm:$0xff]  }
 0x308   : > { %v10997_v52 = vpop.f32.mrf.mxu1 }
 0x309   : > { %v11102_v34 = vpop.f32.mrf.mxu0  ;;  %v10998_v35 = vadd.f32 %v10997_v52, %v10996_v14 }
 0x30a   : > { %8120 = vmatmul.mubr.bf16.gmra.mxu1 %v12012_v44  ;;  %8281 = vmatmul.mubr.bf16.gmra.mxu0 %v12022_v12  ;;  %v11101_v44 = vadd.f32 %v11100_v39, %v11099_v62  ;;  %v10999_v60 = vpop.f32.mrf.mxu1 }
 0x30b   : > { %8127 = vmatprep.mubr.bf16.mxu1 %v12021_v19  ;;  %8288 = vmatprep.mubr.bf16.mxu0 %v12030_v27  ;;  %v11103_v55 = vpop.f32.mrf.mxu0 }
 0x30c   : > { %v13641_v19 = vadd.f32 %v11101_v44, %v10989_v38  ;;  %v11104_v43 = vadd.f32 %v11103_v55, %v11102_v34  ;;  %v11000_v47 = vpop.f32.mrf.mxu1 }
 0x30d   : > { %v11105_v7 = vpop.f32.mrf.mxu0  ;;  %v11001_v18 = vadd.f32 %v11000_v47, %v10999_v60  ;;  %v12058_v47 = vld [vmem:[#allocation3 + $0x140] ss:$36 sps:$4 sm:$0xff]  }
 0x30e   : > { %v13643_v4 = vadd.f32 %v11104_v43, %v10992_v40  ;;  %v12057_v43 = vld [vmem:[#allocation3 + $0xf8] ss:$36 sps:$4 sm:$0xff]  }
 0x30f   : > { %v11106_v9 = vpop.f32.mrf.mxu0 }
 0x310   : > { %v11107_v21 = vadd.f32 %v11106_v9, %v11105_v7 }
 0x312   : > { %8128 = vmatmul.mubr.bf16.gmra.mxu1 %v12019_v2  ;;  %8289 = vmatmul.mubr.bf16.gmra.mxu0 %v12028_v63  ;;  %v13645_v12 = vadd.f32 %v11107_v21, %v10995_v61 }
 0x313   : > { %8135 = vmatprep.mubr.bf16.mxu1 %v12027_v24  ;;  %8296 = vmatprep.mubr.bf16.mxu0 %v12037_v59 }
 0x31a   : > { %8136 = vmatmul.mubr.bf16.gmra.mxu1 %v12025_v31  ;;  %8297 = vmatmul.mubr.bf16.gmra.mxu0 %v12035_v37  ;;  %v12054_v31 = vld [vmem:[#allocation3 + $0x454] ss:$36 sps:$4 sm:$0xff]  }
 0x31b   : > { %8143 = vmatprep.mubr.bf16.mxu1 %v12034_v15  ;;  %8304 = vmatprep.mubr.bf16.mxu0 %v12043_v28 }
 0x31f   : > { %v11002_v2 = vpop.f32.mrf.mxu1 }
 0x321   : > { %v11003_v24 = vpop.f32.mrf.mxu1 }
 0x322   : > { %8144 = vmatmul.mubr.bf16.gmra.mxu1 %v12032_v1  ;;  %v11108_v6 = vpop.f32.mrf.mxu0  ;;  %8305 = vmatmul.mubr.bf16.gmra.mxu0 %v12041_v10  ;;  %v11004_v33 = vadd.f32 %v11003_v24, %v11002_v2 }
 0x323   : > { %8151 = vmatprep.mubr.bf16.mxu1 %v12040_v30  ;;  %8312 = vmatprep.mubr.bf16.mxu0 %v12050_v25  ;;  %v11005_v53 = vpop.f32.mrf.mxu1 }
 0x324   : > { %v11109_v57 = vpop.f32.mrf.mxu0 }
 0x325   : > { %v11110_v27 = vadd.f32 %v11109_v57, %v11108_v6  ;;  %v11006_v56 = vpop.f32.mrf.mxu1 }
 0x326   : > { %v11111_v51 = vpop.f32.mrf.mxu0  ;;  %v11007_v8 = vadd.f32 %v11006_v56, %v11005_v53  ;;  %v12060_v56 = vld [vmem:[#allocation3 + $0x1d0] ss:$36 sps:$4 sm:$0xff]  }
 0x327   : > { %v13647_v11 = vadd.f32 %v11110_v27, %v10998_v35  ;;  %v11008_v38 = vpop.f32.mrf.mxu1  ;;  %v12059_v27 = vld [vmem:[#allocation3 + $0x188] ss:$36 sps:$4 sm:$0xff]  }
 0x328   : > { %v11112_v54 = vpop.f32.mrf.mxu0 }
 0x329   : > { %v11113_v15 = vadd.f32 %v11112_v54, %v11111_v51  ;;  %v11009_v48 = vpop.f32.mrf.mxu1 }
 0x32a   : > { %8152 = vmatmul.mubr.bf16.gmra.mxu1 %v12038_v49  ;;  %v11114_v63 = vpop.f32.mrf.mxu0  ;;  %8313 = vmatmul.mubr.bf16.gmra.mxu0 %v12048_v3  ;;  %v11010_v36 = vadd.f32 %v11009_v48, %v11008_v38 }
 0x32b   : > { %8159 = vmatprep.mubr.bf16.mxu1 %v12047_v32  ;;  %v13649_v41 = vadd.f32 %v11113_v15, %v11001_v18  ;;  %8320 = vmatprep.mubr.bf16.mxu0 %v12054_v31  ;;  %v11011_v45 = vpop.f32.mrf.mxu1 }
 0x32c   : > { %v11115_v59 = vpop.f32.mrf.mxu0 }
 0x32d   : > { %v11116_v17 = vadd.f32 %v11115_v59, %v11114_v63  ;;  %v11012_v23 = vpop.f32.mrf.mxu1 }
 0x32e   : > { %v11117_v40 = vpop.f32.mrf.mxu0  ;;  %v11013_v62 = vadd.f32 %v11012_v23, %v11011_v45 }
 0x32f   : > { %v13651_v1 = vadd.f32 %v11116_v17, %v11004_v33  ;;  %v12061_v17 = vld [vmem:[#allocation3 + $0x218] ss:$36 sps:$4 sm:$0xff]  }
 0x330   : > { %v11118_v61 = vpop.f32.mrf.mxu0 }
 0x331   : > { %v11119_v37 = vadd.f32 %v11118_v61, %v11117_v40 }
 0x332   : > { %8160 = vmatmul.mubr.bf16.gmra.mxu1 %v12045_v20  ;;  %v11120_v39 = vpop.f32.mrf.mxu0  ;;  %8321 = vmatmul.mubr.bf16.gmra.mxu0 %v12052_v5  ;;  %v12062_v5 = vld [vmem:[#allocation3 + $0x260] ss:$36 sps:$4 sm:$0xff]  }
 0x333   : > { %11486 = vmatprep.mubr.bf16.mxu1 %v12051_v16  ;;  %v13653_v44 = vadd.f32 %v11119_v37, %v11007_v8 }
 0x334   : > { %v11121_v34 = vpop.f32.mrf.mxu0 }
 0x335   : > { %v11122_v35 = vadd.f32 %v11121_v34, %v11120_v39 }
 0x336   : > { %v11123_v55 = vpop.f32.mrf.mxu0 }
 0x337   : > { %v13655_v49 = vadd.f32 %v11122_v35, %v11010_v36 }
 0x338   : > { %v11124_v18 = vpop.f32.mrf.mxu0 }
 0x339   : > { %v11125_v10 = vadd.f32 %v11124_v18, %v11123_v55  ;;  %v12063_v55 = vld [vmem:[#allocation3 + $0x2a8] ss:$36 sps:$4 sm:$0xff]  }
 0x33a   : > { %v11014_v30 = vpop.f32.mrf.mxu1  ;;  %11487 = vmatmul.mubr.bf16.vlgmr.msra.gmra.mxu1 %v12055_v0  ;;  %v11126_v9 = vpop.f32.mrf.mxu0 }
 0x33b   : > { %11490 = vmatprep.mubr.bf16.mxu1 %v12056_v13  ;;  %v13657_v21 = vadd.f32 %v11125_v10, %v11013_v62 }
 0x33c   : > { %v11015_v14 = vpop.f32.mrf.mxu1  ;;  %v11127_v6 = vpop.f32.mrf.mxu0 }
 0x33d   : > { %v11016_v28 = vadd.f32 %v11015_v14, %v11014_v30  ;;  %v11128_v33 = vadd.f32 %v11127_v6, %v11126_v9 }
 0x33e   : > { %v11017_v52 = vpop.f32.mrf.mxu1  ;;  %v11129_v57 = vpop.f32.mrf.mxu0 }
 0x33f   : > { %v13659_v20 = vadd.f32 %v11128_v33, %v11016_v28 }
 0x340   : > { %v11018_v60 = vpop.f32.mrf.mxu1  ;;  %v11130_v8 = vpop.f32.mrf.mxu0 }
 0x341   : > { %v11019_v7 = vadd.f32 %v11018_v60, %v11017_v52  ;;  %v11131_v31 = vadd.f32 %v11130_v8, %v11129_v57  ;;  %v12066_v8 = vld [vmem:[#allocation3 + $0x380] ss:$36 sps:$4 sm:$0xff]  }
 0x342   : > { %v11020_v32 = vpop.f32.mrf.mxu1  ;;  %11491 = vmatmul.mubr.bf16.gmra.mxu1 %v12057_v43  ;;  %v11132_v3 = vpop.f32.mrf.mxu0 }
 0x343   : > { %11494 = vmatprep.mubr.bf16.mxu1 %v12058_v47  ;;  %v13661_v38 = vadd.f32 %v11131_v31, %v11019_v7  ;;  %v12064_v7 = vld [vmem:[#allocation3 + $0x2f0] ss:$36 sps:$4 sm:$0xff]  }
 0x344   : > { %v11021_v2 = vpop.f32.mrf.mxu1  ;;  %v11133_v63 = vpop.f32.mrf.mxu0 }
 0x345   : > { %v11022_v25 = vadd.f32 %v11021_v2, %v11020_v32  ;;  %v11134_v36 = vadd.f32 %v11133_v63, %v11132_v3 }
 0x346   : > { %v11023_v24 = vpop.f32.mrf.mxu1  ;;  %v11135_v59 = vpop.f32.mrf.mxu0 }
 0x347   : > { %v13663_v40 = vadd.f32 %v11134_v36, %v11022_v25 }
 0x348   : > { %v11024_v53 = vpop.f32.mrf.mxu1  ;;  %v11136_v0 = vpop.f32.mrf.mxu0 }
 0x349   : > { %v11025_v51 = vadd.f32 %v11024_v53, %v11023_v24  ;;  %v11137_v13 = vadd.f32 %v11136_v0, %v11135_v59 }
 0x34a   : > { %v11026_v16 = vpop.f32.mrf.mxu1  ;;  %11495 = vmatmul.mubr.bf16.gmra.mxu1 %v12059_v27  ;;  %v11138_v61 = vpop.f32.mrf.mxu0  ;;  %v12065_v27 = vld [vmem:[#allocation3 + $0x338] ss:$36 sps:$4 sm:$0xff]  }
 0x34b   : > { %11498 = vmatprep.mubr.bf16.mxu1 %v12060_v56  ;;  %v13665_v37 = vadd.f32 %v11137_v13, %v11025_v51  ;;  %v12068_v13 = vld [vmem:[#allocation3 + $0x410] ss:$36 sps:$4 sm:$0xff]  }
 0x34c   : > { %v11027_v54 = vpop.f32.mrf.mxu1  ;;  %v11139_v14 = vpop.f32.mrf.mxu0 }
 0x34d   : > { %v11028_v15 = vadd.f32 %v11027_v54, %v11026_v16  ;;  %v11140_v34 = vadd.f32 %v11139_v14, %v11138_v61 }
 0x34e   : > { %v11029_v48 = vpop.f32.mrf.mxu1  ;;  %v11141_v52 = vpop.f32.mrf.mxu0 }
 0x34f   : > { %v13667_v60 = vadd.f32 %v11140_v34, %v11028_v15 }
 0x350   : > { %v11030_v45 = vpop.f32.mrf.mxu1  ;;  %v11142_v47 = vpop.f32.mrf.mxu0 }
 0x351   : > { %v11031_v23 = vadd.f32 %v11030_v45, %v11029_v48  ;;  %v11143_v32 = vadd.f32 %v11142_v47, %v11141_v52 }
 0x352   : > { %v11032_v62 = vpop.f32.mrf.mxu1  ;;  %11499 = vmatmul.mubr.bf16.gmra.mxu1 %v12061_v17  ;;  %v11144_v10 = vpop.f32.mrf.mxu0 }
 0x353   : > { %11502 = vmatprep.mubr.bf16.mxu1 %v12062_v5  ;;  %v13669_v2 = vadd.f32 %v11143_v32, %v11031_v23  ;;  %v12067_v5 = vld [vmem:[#allocation3 + $0x3c8] ss:$36 sps:$4 sm:$0xff]  }
 0x354   : > { %v11033_v30 = vpop.f32.mrf.mxu1  ;;  %v11145_v6 = vpop.f32.mrf.mxu0 }
 0x355   : > { %v11034_v39 = vadd.f32 %v11033_v30, %v11032_v62  ;;  %v11146_v33 = vadd.f32 %v11145_v6, %v11144_v10 }
 0x356   : > { %v11035_v28 = vpop.f32.mrf.mxu1  ;;  %v11147_v57 = vpop.f32.mrf.mxu0 }
 0x357   : > { %v13671_v51 = vadd.f32 %v11146_v33, %v11034_v39 }
 0x358   : > { %v11036_v35 = vpop.f32.mrf.mxu1  ;;  %v11148_v16 = vpop.f32.mrf.mxu0 }
 0x359   : > { %v11037_v43 = vadd.f32 %v11036_v35, %v11035_v28  ;;  %v11149_v3 = vadd.f32 %v11148_v16, %v11147_v57 }
 0x35a   : > { %v11038_v18 = vpop.f32.mrf.mxu1  ;;  %11503 = vmatmul.mubr.bf16.gmra.mxu1 %v12063_v55  ;;  %v11150_v54 = vpop.f32.mrf.mxu0 }
 0x35b   : > { %11506 = vmatprep.mubr.bf16.mxu1 %v12064_v7  ;;  %v13673_v63 = vadd.f32 %v11149_v3, %v11037_v43  ;;  %v12069_v43 = vld [vmem:[#allocation3 + $0x458] ss:$36 sps:$4 sm:$0xff]  }
 0x35c   : > { %v11039_v9 = vpop.f32.mrf.mxu1  ;;  %v11151_v36 = vpop.f32.mrf.mxu0 }
 0x35d   : > { %v11040_v25 = vadd.f32 %v11039_v9, %v11038_v18  ;;  %v11152_v45 = vadd.f32 %v11151_v36, %v11150_v54 }
 0x35e   : > { %v11041_v24 = vpop.f32.mrf.mxu1  ;;  %v11153_v17 = vpop.f32.mrf.mxu0 }
 0x35f   : > { %v13675_v0 = vadd.f32 %v11152_v45, %v11040_v25 }
 0x360   : > { %v11042_v53 = vpop.f32.mrf.mxu1  ;;  %v11154_v61 = vpop.f32.mrf.mxu0 }
 0x361   : > { %v11043_v56 = vadd.f32 %v11042_v53, %v11041_v24  ;;  %v11155_v39 = vadd.f32 %v11154_v61, %v11153_v17 }
 0x362   : > { %v11044_v31 = vpop.f32.mrf.mxu1  ;;  %11507 = vmatmul.mubr.bf16.gmra.mxu1 %v12065_v27  ;;  %v11156_v14 = vpop.f32.mrf.mxu0 }
 0x363   : > { %11510 = vmatprep.mubr.bf16.mxu1 %v12066_v8  ;;  %v13677_v34 = vadd.f32 %v11155_v39, %v11043_v56 }
 0x364   : > { %v11045_v15 = vpop.f32.mrf.mxu1  ;;  %v11157_v35 = vpop.f32.mrf.mxu0 }
 0x365   : > { %v11046_v48 = vadd.f32 %v11045_v15, %v11044_v31  ;;  %v11158_v7 = vadd.f32 %v11157_v35, %v11156_v14 }
 0x366   : > { %v11047_v59 = vpop.f32.mrf.mxu1  ;;  %v11159_v47 = vpop.f32.mrf.mxu0 }
 0x367   : > { %v13679_v32 = vadd.f32 %v11158_v7, %v11046_v48 }
 0x368   : > { %v11048_v23 = vpop.f32.mrf.mxu1  ;;  %v11160_v9 = vpop.f32.mrf.mxu0 }
 0x369   : > { %v11049_v62 = vadd.f32 %v11048_v23, %v11047_v59  ;;  %v11161_v6 = vadd.f32 %v11160_v9, %v11159_v47 }
 0x36a   : > { %v11050_v30 = vpop.f32.mrf.mxu1  ;;  %11511 = vmatmul.mubr.bf16.gmra.mxu1 %v12067_v5  ;;  %v11162_v24 = vpop.f32.mrf.mxu0 }
 0x36b   : > { %11514 = vmatprep.mubr.bf16.mxu1 %v12068_v13  ;;  %v13681_v57 = vadd.f32 %v11161_v6, %v11049_v62 }
 0x36c   : > { %v11051_v28 = vpop.f32.mrf.mxu1  ;;  %v11163_v27 = vpop.f32.mrf.mxu0 }
 0x36d   : > { %v11052_v52 = vadd.f32 %v11051_v28, %v11050_v30  ;;  %v11164_v8 = vadd.f32 %v11163_v27, %v11162_v24 }
 0x36e   : > { %v11053_v55 = vpop.f32.mrf.mxu1  ;;  %v11165_v16 = vpop.f32.mrf.mxu0 }
 0x36f   : > { %v13683_v3 = vadd.f32 %v11164_v8, %v11052_v52 }
 0x370   : > { %v11054_v18 = vpop.f32.mrf.mxu1  ;;  %v11166_v15 = vpop.f32.mrf.mxu0 }
 0x371   : > { %v11055_v10 = vadd.f32 %v11054_v18, %v11053_v55  ;;  %v11167_v36 = vadd.f32 %v11166_v15, %v11165_v16 }
 0x372   : > { %v11056_v25 = vpop.f32.mrf.mxu1  ;;  %11515 = vmatmul.mubr.bf16.gmra.mxu1 %v12069_v43  ;;  %v11168_v59 = vpop.f32.mrf.mxu0 }
 0x373   : > { %v13685_v17 = vadd.f32 %v11167_v36, %v11055_v10 }
 0x374   : > { %v11057_v33 = vpop.f32.mrf.mxu1  ;;  %v11169_v5 = vpop.f32.mrf.mxu0 }
 0x375   : > { %v11058_v53 = vadd.f32 %v11057_v33, %v11056_v25  ;;  %v11170_v13 = vadd.f32 %v11169_v5, %v11168_v59 }
 0x376   : > { %v11059_v56 = vpop.f32.mrf.mxu1  ;;  %v11171_v30 = vpop.f32.mrf.mxu0 }
 0x377   : > { %v13688_v14 = vadd.f32 %v11170_v13, %v11058_v53 }
 0x378   : > { %v11060_v31 = vpop.f32.mrf.mxu1  ;;  %v11172_v52 = vpop.f32.mrf.mxu0 }
 0x379   : > { %v11061_v54 = vadd.f32 %v11060_v31, %v11059_v56  ;;  %14182 = vst [vmem:[#allocation8_spill] sm:$0xff] %v13688_v14  ;;  %v11173_v55 = vadd.f32 %v11172_v52, %v11171_v30 }
 0x37a   : > { %v11190_v48 = vpop.f32.mrf.mxu1  ;;  %v11302_v7 = vpop.f32.mrf.mxu0 }
 0x37b   : > { %v13691_v18 = vadd.f32 %v11173_v55, %v11061_v54 }
 0x37c   : > { %v11191_v45 = vpop.f32.mrf.mxu1  ;;  %v11303_v9 = vpop.f32.mrf.mxu0 }
 0x37d   : > { %v11192_v23 = vadd.f32 %v11191_v45, %v11190_v48  ;;  %14183 = vst [vmem:[#allocation9_spill] sm:$0xff] %v13691_v18 }
 0x37e   : > { %v11193_v62 = vpop.f32.mrf.mxu1  ;;  %v11305_v24 = vpop.f32.mrf.mxu0 }
 0x37f   : > { %v8042_v61 = vadd.f32 %v11192_v23, %v13627_v58  ;;  %v11304_v58 = vadd.f32 %v11303_v9, %v11302_v7 }
 0x380   : > { %v11194_v39 = vpop.f32.mrf.mxu1  ;;  %v11306_v56 = vpop.f32.mrf.mxu0 }
 0x381   : > { %v11195_v28 = vadd.f32 %v11194_v39, %v11193_v62  ;;  %v13696_v27 = vadd.f32 %v11304_v58, %v8042_v61  ;;  %v11307_v16 = vadd.f32 %v11306_v56, %v11305_v24 }
 0x382   : > { %v11196_v35 = vpop.f32.mrf.mxu1  ;;  %v13701_v31 = vpop.f32.mrf.mxu0 }
 0x383   : > { %v8045_v43 = vadd.f32 %v11195_v28, %v13629_v22 }
 0x384   : > { %v11197_v47 = vpop.f32.mrf.mxu1 }
 0x385   : > { %v11198_v10 = vadd.f32 %v11197_v47, %v11196_v35  ;;  %v13703_v48 = vadd.f32 %v11307_v16, %v8045_v43 }
 0x386   : > { %v11199_v25 = vpop.f32.mrf.mxu1 }
 0x387   : > { %v13694_v6 = vadd.f32 %v11198_v10, %v13631_v29  ;;  %v13705_v29 = vpop.f32.mrf.mxu0 }
 0x388   : > { %v11200_v33 = vpop.f32.mrf.mxu1 }
 0x389   : > { %v11201_v53 = vadd.f32 %v11200_v33, %v11199_v25  ;;  %v13710_v45 = vpop.f32.mrf.mxu0 }
 0x38a   : > { %v11202_v8 = vpop.f32.mrf.mxu1 }
 0x38b   : > { %v13699_v22 = vadd.f32 %v11201_v53, %v13633_v46  ;;  %v13712_v62 = vpop.f32.mrf.mxu0 }
 0x38c   : > { %v11203_v54 = vpop.f32.mrf.mxu1 }
 0x38d   : > { %v11204_v15 = vadd.f32 %v11203_v54, %v11202_v8  ;;  %v13717_v61 = vpop.f32.mrf.mxu0 }
 0x38e   : > { %v11205_v36 = vpop.f32.mrf.mxu1 }
 0x38f   : > { %v13708_v59 = vadd.f32 %v11204_v15, %v13635_v50  ;;  %v13719_v28 = vpop.f32.mrf.mxu0 }
 0x390   : > { %v11206_v23 = vpop.f32.mrf.mxu1 }
 0x391   : > { %v11207_v5 = vadd.f32 %v11206_v23, %v11205_v36  ;;  %v13724_v35 = vpop.f32.mrf.mxu0 }
 0x392   : > { %v11208_v46 = vpop.f32.mrf.mxu1 }
 0x393   : > { %v13715_v13 = vadd.f32 %v11207_v5, %v13637_v42  ;;  %v13726_v7 = vpop.f32.mrf.mxu0 }
 0x394   : > { %v11209_v30 = vpop.f32.mrf.mxu1 }
 0x395   : > { %v11210_v39 = vadd.f32 %v11209_v30, %v11208_v46  ;;  %v13731_v10 = vpop.f32.mrf.mxu0 }
 0x396   : > { %v11211_v52 = vpop.f32.mrf.mxu1 }
 0x397   : > { %v13722_v50 = vadd.f32 %v11210_v39, %v13639_v26  ;;  %v13733_v58 = vpop.f32.mrf.mxu0 }
 0x398   : > { %v11212_v55 = vpop.f32.mrf.mxu1 }
 0x399   : > { %v11213_v43 = vadd.f32 %v11212_v55, %v11211_v52  ;;  %v13738_v33 = vpop.f32.mrf.mxu0 }
 0x39a   : > { %v11214_v47 = vpop.f32.mrf.mxu1 }
 0x39b   : > { %v13729_v42 = vadd.f32 %v11213_v43, %v13641_v19  ;;  %v13740_v8 = vpop.f32.mrf.mxu0 }
 0x39c   : > { %v11215_v9 = vpop.f32.mrf.mxu1 }
 0x39d   : > { %v11216_v25 = vadd.f32 %v11215_v9, %v11214_v47  ;;  %v13745_v54 = vpop.f32.mrf.mxu0 }
 0x39e   : > { %v11217_v24 = vpop.f32.mrf.mxu1 }
 0x39f   : > { %v13736_v26 = vadd.f32 %v11216_v25, %v13643_v4  ;;  %v13747_v23 = vpop.f32.mrf.mxu0 }
 0x3a0   : > { %v11218_v53 = vpop.f32.mrf.mxu1 }
 0x3a1   : > { %v11219_v56 = vadd.f32 %v11218_v53, %v11217_v24  ;;  %v13752_v46 = vpop.f32.mrf.mxu0 }
 0x3a2   : > { %v11220_v16 = vpop.f32.mrf.mxu1 }
 0x3a3   : > { %v13743_v19 = vadd.f32 %v11219_v56, %v13645_v12  ;;  %v13754_v52 = vpop.f32.mrf.mxu0 }
 0x3a4   : > { %v11221_v15 = vpop.f32.mrf.mxu1 }
 0x3a5   : > { %v11222_v36 = vadd.f32 %v11221_v15, %v11220_v16  ;;  %v13759_v43 = vpop.f32.mrf.mxu0 }
 0x3a6   : > { %v11223_v5 = vpop.f32.mrf.mxu1 }
 0x3a7   : > { %v13750_v4 = vadd.f32 %v11222_v36, %v13647_v11  ;;  %v13761_v25 = vpop.f32.mrf.mxu0 }
 0x3a8   : > { %v11224_v30 = vpop.f32.mrf.mxu1 }
 0x3a9   : > { %v11225_v39 = vadd.f32 %v11224_v30, %v11223_v5  ;;  %v13766_v53 = vpop.f32.mrf.mxu0 }
 0x3aa   : > { %v11226_v55 = vpop.f32.mrf.mxu1 }
 0x3ab   : > { %v13757_v12 = vadd.f32 %v11225_v39, %v13649_v41  ;;  %v13768_v15 = vpop.f32.mrf.mxu0 }
 0x3ac   : > { %v11227_v47 = vpop.f32.mrf.mxu1 }
 0x3ad   : > { %v11228_v9 = vadd.f32 %v11227_v47, %v11226_v55  ;;  %v13773_v5 = vpop.f32.mrf.mxu0 }
 0x3ae   : > { %v11229_v24 = vpop.f32.mrf.mxu1 }
 0x3af   : > { %v13764_v11 = vadd.f32 %v11228_v9, %v13651_v1  ;;  %v13775_v55 = vpop.f32.mrf.mxu0 }
 0x3b0   : > { %v11230_v56 = vpop.f32.mrf.mxu1 }
 0x3b1   : > { %14184 = vst [vmem:[#allocation19_spill] sm:$0xff] %v13764_v11  ;;  %v11231_v16 = vadd.f32 %v11230_v56, %v11229_v24  ;;  %v13780_v9 = vpop.f32.mrf.mxu0 }
 0x3b2   : > { %v11232_v36 = vpop.f32.mrf.mxu1  ;;  %14187 = vst [vmem:[#allocation11_spill] sm:$0xff] %v13780_v9 }
 0x3b3   : > { %v13771_v41 = vadd.f32 %v11231_v16, %v13653_v44  ;;  %v13782_v56 = vpop.f32.mrf.mxu0 }
 0x3b4   : > { %v11233_v30 = vpop.f32.mrf.mxu1  ;;  %14188 = vst [vmem:[#allocation22_spill] sm:$0xff] %v13782_v56 }
 0x3b5   : > { %14185 = vst [vmem:[#allocation20_spill] sm:$0xff] %v13771_v41  ;;  %v11234_v39 = vadd.f32 %v11233_v30, %v11232_v36  ;;  %v13787_v16 = vpop.f32.mrf.mxu0 }
 0x3b6   : > { %v11235_v47 = vpop.f32.mrf.mxu1 }
 0x3b7   : > { %v13778_v1 = vadd.f32 %v11234_v39, %v13655_v49  ;;  %v13789_v30 = vpop.f32.mrf.mxu0 }
 0x3b8   : > { %v11236_v18 = vpop.f32.mrf.mxu1 }
 0x3b9   : > { %14186 = vst [vmem:[#allocation10_spill] sm:$0xff] %v13778_v1  ;;  %v11237_v24 = vadd.f32 %v11236_v18, %v11235_v47  ;;  %v13794_v39 = vpop.f32.mrf.mxu0 }
 0x3ba   : > { %v11238_v14 = vpop.f32.mrf.mxu1 }
 0x3bb   : > { %v13785_v44 = vadd.f32 %v11237_v24, %v13657_v21  ;;  %v13796_v47 = vpop.f32.mrf.mxu0 }
 0x3bc   : > { %v11239_v41 = vpop.f32.mrf.mxu1  ;;  %14191 = vst [vmem:[#allocation13_spill] sm:$0xff] %v13796_v47 }
 0x3bd   : > { %14189 = vst [vmem:[#allocation14_spill] sm:$0xff] %v13785_v44  ;;  %v11240_v36 = vadd.f32 %v11239_v41, %v11238_v14  ;;  %v13801_v24 = vpop.f32.mrf.mxu0 }
 0x3be   : > { %v11241_v11 = vpop.f32.mrf.mxu1 }
 0x3bf   : > { %v13792_v49 = vadd.f32 %v11240_v36, %v13659_v20  ;;  %v13803_v41 = vpop.f32.mrf.mxu0 }
 0x3c0   : > { %v11242_v9 = vpop.f32.mrf.mxu1  ;;  %14193 = vst [vmem:[#allocation15_spill] sm:$0xff] %v13803_v41 }
 0x3c1   : > { %14190 = vst [vmem:[#allocation12_spill] sm:$0xff] %v13792_v49  ;;  %v11243_v18 = vadd.f32 %v11242_v9, %v11241_v11  ;;  %v13808_v36 = vpop.f32.mrf.mxu0 }
 0x3c2   : > { %v11244_v56 = vpop.f32.mrf.mxu1  ;;  %14195 = vst [vmem:[#allocation26_spill] sm:$0xff] %v13808_v36 }
 0x3c3   : > { %v13799_v21 = vadd.f32 %v11243_v18, %v13661_v38  ;;  %v13810_v9 = vpop.f32.mrf.mxu0 }
 0x3c4   : > { %v11245_v44 = vpop.f32.mrf.mxu1  ;;  %14196 = vst [vmem:[#allocation27_spill] sm:$0xff] %v13810_v9 }
 0x3c5   : > { %14192 = vst [vmem:[#allocation24_spill] sm:$0xff] %v13799_v21  ;;  %v11246_v14 = vadd.f32 %v11245_v44, %v11244_v56  ;;  %v13815_v18 = vpop.f32.mrf.mxu0 }
 0x3c6   : > { %v11247_v1 = vpop.f32.mrf.mxu1 }
 0x3c7   : > { %v13806_v20 = vadd.f32 %v11246_v14, %v13663_v40  ;;  %v13817_v44 = vpop.f32.mrf.mxu0 }
 0x3c8   : > { %v11248_v49 = vpop.f32.mrf.mxu1 }
 0x3c9   : > { %14194 = vst [vmem:[#allocation16_spill] sm:$0xff] %v13806_v20  ;;  %v11249_v11 = vadd.f32 %v11248_v49, %v11247_v1  ;;  %v13822_v14 = vpop.f32.mrf.mxu0 }
 0x3ca   : > { %v11250_v47 = vpop.f32.mrf.mxu1 }
 0x3cb   : > { %v13813_v38 = vadd.f32 %v11249_v11, %v13665_v37  ;;  %v13824_v49 = vpop.f32.mrf.mxu0 }
 0x3cc   : > { %v11251_v21 = vpop.f32.mrf.mxu1  ;;  %14199 = vst [vmem:[#allocation17_spill] sm:$0xff] %v13824_v49 }
 0x3cd   : > { %14197 = vst [vmem:[#allocation29_spill] sm:$0xff] %v13813_v38  ;;  %v11252_v56 = vadd.f32 %v11251_v21, %v11250_v47  ;;  %v13829_v11 = vpop.f32.mrf.mxu0 }
 0x3ce   : > { %v11253_v41 = vpop.f32.mrf.mxu1  ;;  %14201 = vst [vmem:[#allocation18_spill] sm:$0xff] %v13829_v11 }
 0x3cf   : > { %v13820_v40 = vadd.f32 %v11252_v56, %v13667_v60  ;;  %v13831_v21 = vpop.f32.mrf.mxu0 }
 0x3d0   : > { %v11254_v36 = vpop.f32.mrf.mxu1  ;;  %14202 = vst [vmem:[#allocation21_spill] sm:$0xff] %v13831_v21 }
 0x3d1   : > { %14198 = vst [vmem:[#allocation30_spill] sm:$0xff] %v13820_v40  ;;  %v11255_v1 = vadd.f32 %v11254_v36, %v11253_v41  ;;  %v13836_v40 = vpop.f32.mrf.mxu0 }
 0x3d2   : > { %v11256_v9 = vpop.f32.mrf.mxu1  ;;  %14203 = vst [vmem:[#allocation34_spill] sm:$0xff] %v13836_v40 }
 0x3d3   : > { %v13827_v37 = vadd.f32 %v11255_v1, %v13669_v2  ;;  %v13841_v1 = vpop.f32.mrf.mxu0 }
 0x3d4   : > { %v11257_v38 = vpop.f32.mrf.mxu1 }
 0x3d5   : > { %14200 = vst [vmem:[#allocation6_spill] sm:$0xff] %v13827_v37  ;;  %v11258_v47 = vadd.f32 %v11257_v38, %v11256_v9  ;;  %v13846_v21 = vpop.f32.mrf.mxu0 }
 0x3d6   : > { %v11259_v20 = vpop.f32.mrf.mxu1 }
 0x3d7   : > { %v13834_v60 = vadd.f32 %v11258_v47, %v13671_v51 }
 0x3d8   : > { %v11260_v56 = vpop.f32.mrf.mxu1 }
 0x3d9   : > { %v11261_v41 = vadd.f32 %v11260_v56, %v11259_v20  ;;  %v13851_v56 = vpop.f32.mrf.mxu0 }
 0x3da   : > { %v11262_v36 = vpop.f32.mrf.mxu1 }
 0x3db   : > { %v13839_v49 = vadd.f32 %v11261_v41, %v13673_v63 }
 0x3dc   : > { %v11263_v2 = vpop.f32.mrf.mxu1 }
 0x3dd   : > { %14204 = vst [vmem:[#allocation36_spill] sm:$0xff] %v13839_v49  ;;  %v11264_v37 = vadd.f32 %v11263_v2, %v11262_v36  ;;  %v13856_v2 = vpop.f32.mrf.mxu0 }
 0x3de   : > { %v11265_v11 = vpop.f32.mrf.mxu1 }
 0x3df   : > { %v13844_v9 = vadd.f32 %v11264_v37, %v13675_v0 }
 0x3e0   : > { %v11266_v38 = vpop.f32.mrf.mxu1 }
 0x3e1   : > { %14205 = vst [vmem:[#allocation23_spill] sm:$0xff] %v13844_v9  ;;  %v11267_v51 = vadd.f32 %v11266_v38, %v11265_v11  ;;  %v13861_v38 = vpop.f32.mrf.mxu0 }
 0x3e2   : > { %v11268_v47 = vpop.f32.mrf.mxu1 }
 0x3e3   : > { %v13849_v40 = vadd.f32 %v11267_v51, %v13677_v34 }
 0x3e4   : > { %v11269_v20 = vpop.f32.mrf.mxu1 }
 0x3e5   : > { %14206 = vst [vmem:[#allocation25_spill] sm:$0xff] %v13849_v40  ;;  %v11270_v63 = vadd.f32 %v11269_v20, %v11268_v47  ;;  %v13866_v20 = vpop.f32.mrf.mxu0 }
 0x3e6   : > { %v11271_v41 = vpop.f32.mrf.mxu1 }
 0x3e7   : > { %v13854_v49 = vadd.f32 %v11270_v63, %v13679_v32 }
 0x3e8   : > { %v11272_v36 = vpop.f32.mrf.mxu1 }
 0x3e9   : > { %v11273_v0 = vadd.f32 %v11272_v36, %v11271_v41  ;;  %v11310_v36 = vadd.f32 %v13705_v29, %v13701_v31  ;;  %v13896_v29 = vld [vmem:[%s14114_s6] ss:$0 sm:$0xff] }
 0x3ea   : > { %v11274_v37 = vpop.f32.mrf.mxu1 }
 0x3eb   : > { %v13859_v9 = vadd.f32 %v11273_v0, %v13681_v57  ;;  %v13877_v0 = vpop.f32.mrf.mxu0 }
 0x3ec   : > { %v11275_v11 = vpop.f32.mrf.mxu1 }
 0x3ed   : > { %14207 = vst [vmem:[#allocation28_spill] sm:$0xff] %v13859_v9  ;;  %v11276_v34 = vadd.f32 %v11275_v11, %v11274_v37  ;;  %v11313_v11 = vadd.f32 %v13712_v62, %v13710_v45  ;;  %v11325_v9 = vadd.f32 %v13740_v8, %v13738_v33 }
 0x3ee   : > { %v11277_v51 = vpop.f32.mrf.mxu1 }
 0x3ef   : > { %v13864_v40 = vadd.f32 %v11276_v34, %v13683_v3  ;;  %v13885_v34 = vpop.f32.mrf.mxu0  ;;  %v8214_v62 = vadd.f32 %v11313_v11, %v13699_v22 }
 0x3f0   : > { %v11278_v47 = vpop.f32.mrf.mxu1 }
 0x3f1   : > { %14208 = vst [vmem:[#allocation31_spill] sm:$0xff] %v13864_v40  ;;  %v11279_v32 = vadd.f32 %v11278_v47, %v11277_v51  ;;  %v8211_v51 = vadd.f32 %v11310_v36, %v13694_v6  ;;  %v13891_v47 = vld [vmem:[%s14112_s4] ss:$0 sm:$0xff]  ;;  %v11316_v36 = vadd.f32 %v13719_v28, %v13717_v61 }
 0x3f2   : > { %v13868_v63 = vpop.f32.mrf.mxu1 }
 0x3f3   : > { %v13871_v41 = vadd.f32 %v11279_v32, %v13685_v17  ;;  %v8219_v8 = vadd.f32 %v11316_v36, %v13708_v59 }
 0x3f4   : > { %v13873_v57 = vpop.f32.mrf.mxu1 }
 0x3f5   : > { %14209 = vst [vmem:[#allocation32_spill] sm:$0xff] %v13871_v41  ;;  %v13898_v41 = vpop.f32.mrf.mxu0 }
 0x3f6   : > { %v13879_v37 = vpop.f32.mrf.mxu1 }
 0x3f7   : > { %14210 = vst [vmem:[#allocation7_spill] sm:$0xff] %v13879_v37  ;;  %v13917_v22 = vpop.f32.mrf.mxu0 }
 0x3f8   : > { %v13881_v3 = vpop.f32.mrf.mxu1 }
 0x3f9   : > { %14211 = vst [vmem:[#allocation35_spill] sm:$0xff] %v13881_v3 }
 0x3fa   : > { %v11488_v17 = vpop.f32.mrf.mxu1 }
 0x3fb   : > { %v8372_v31 = vadd.f32 %v11488_v17, %v8211_v51  ;;  %v11322_v51 = vadd.f32 %v13733_v58, %v13731_v10 }
 0x3fc   : > { %v8363_v32 = vpop.f32.mrf.mxu1 }
 0x3fd   : > { %v8499_v45 = vmul.f32 %v13891_v47, %v8372_v31  ;;  %v8364_v6 = vadd.f32 %v8363_v32, %v13696_v27  ;;  %v8227_v11 = vadd.f32 %v11322_v51, %v13722_v50  ;;  %v11319_v31 = vadd.f32 %v13726_v7, %v13724_v35  ;;  %v13932_v50 = vpop.f32.mrf.mxu0 }
 0x3fe   : > { %v11489_v17 = vpop.f32.mrf.mxu1 }
 0x3ff   : > { %v8538_v40 = vadd.f32 %v13896_v29, %v8499_v45  ;;  %v8497_v3 = vmul.f32 %v13891_v47, %v8364_v6  ;;  %v8375_v37 = vadd.f32 %v11489_v17, %v8214_v62  ;;  %v11328_v62 = vadd.f32 %v13747_v23, %v13745_v54 }
 0x400   : > { %v8366_v27 = vpop.f32.mrf.mxu1 }
 0x401   : > { %v8570_v61 = vmax.f32 %v8538_v40, 0.0  ;;  %v8536_v28 = vadd.f32 %v13896_v29, %v8497_v3  ;;  %v8500_v10 = vmul.f32 %v13891_v47, %v8375_v37  ;;  %v8367_v58 = vadd.f32 %v8366_v27, %v13703_v48 }
 0x402   : > { %v11492_v33 = vpop.f32.mrf.mxu1  ;;  %v8230_v37 = vadd.f32 %v11325_v9, %v13729_v42  ;;  %v11334_v48 = vadd.f32 %v13761_v25, %v13759_v43  ;;  %v8222_v43 = vadd.f32 %v11319_v31, %v13715_v13  ;;  %v11337_v25 = vadd.f32 %v13768_v15, %v13766_v53 }
 0x403   : > { %8602 = vst [vmem:[%s13915_s20 + $0x10] sm:$0xff] %v8570_v61  ;;  %v8568_v32 = vmax.f32 %v8536_v28, 0.0  ;;  %v8539_v40 = vadd.f32 %v13896_v29, %v8500_v10  ;;  %v8498_v3 = vmul.f32 %v13891_v47, %v8367_v58  ;;  %v8388_v45 = vadd.f32 %v11492_v33, %v8227_v11  ;;  %v13945_v28 = vpop.f32.mrf.mxu0 }
 0x404   : > { %v8379_v6 = vpop.f32.mrf.mxu1  ;;  %v8243_v58 = vadd.f32 %v11334_v48, %v13750_v4  ;;  %v11331_v13 = vadd.f32 %v13754_v52, %v13752_v46  ;;  %v8235_v15 = vadd.f32 %v11328_v62, %v13736_v26  ;;  %v8246_v4 = vadd.f32 %v11337_v25, %v13757_v12  ;;  %v14215_v25 = vld [vmem:[#allocation22_spill] sm:$0xff] }
 0x405   : > { %8600 = vst [vmem:[%s13915_s20] sm:$0xff] %v8568_v32  ;;  %v8571_v59 = vmax.f32 %v8539_v40, 0.0  ;;  %v8537_v35 = vadd.f32 %v13896_v29, %v8498_v3  ;;  %v8380_v7 = vadd.f32 %v8379_v6, %v8219_v8  ;;  %v8503_v36 = vmul.f32 %v13891_v47, %v8388_v45  ;;  %v13960_v45 = vpop.f32.mrf.mxu0 }
 0x406   : > { %v11493_v51 = vpop.f32.mrf.mxu1  ;;  %v11346_v40 = vadd.f32 %v13789_v30, %v13787_v16  ;;  %v8238_v16 = vadd.f32 %v11331_v13, %v13743_v19 }
 0x407   : > { %8603 = vst [vmem:[%s13915_s20 + $0x18] sm:$0xff] %v8571_v59  ;;  %v8569_v17 = vmax.f32 %v8537_v35, 0.0  ;;  %v8501_v42 = vmul.f32 %v13891_v47, %v8380_v7  ;;  %v8391_v9 = vadd.f32 %v11493_v51, %v8230_v37  ;;  %v8542_v27 = vadd.f32 %v13896_v29, %v8503_v36  ;;  %v14212_v7 = vld [vmem:[#allocation13_spill] sm:$0xff]  ;;  %v14213_v51 = vld [vmem:[#allocation10_spill] sm:$0xff] }
 0x408   : > { %v8382_v61 = vpop.f32.mrf.mxu1  ;;  %v11340_v37 = vadd.f32 %v13775_v55, %v13773_v5  ;;  %v11349_v62 = vadd.f32 %v14212_v7, %v13794_v39 }
 0x409   : > { %8601 = vst [vmem:[%s13915_s20 + $0x8] sm:$0xff] %v8569_v17  ;;  %v8540_v54 = vadd.f32 %v13896_v29, %v8501_v42  ;;  %v8504_v23 = vmul.f32 %v13891_v47, %v8391_v9  ;;  %v8383_v10 = vadd.f32 %v8382_v61, %v8222_v43  ;;  %v8574_v11 = vmax.f32 %v8542_v27, 0.0  ;;  %v13974_v42 = vpop.f32.mrf.mxu0  ;;  %v14214_v43 = vld [vmem:[#allocation11_spill] sm:$0xff] }
 0x40a   : > { %v11496_v53 = vpop.f32.mrf.mxu1  ;;  %v8259_v17 = vadd.f32 %v11346_v40, %v14213_v51  ;;  %v11343_v27 = vadd.f32 %v14215_v25, %v14214_v43 }
 0x40b   : > { %v8572_v33 = vmax.f32 %v8540_v54, 0.0  ;;  %v8543_v8 = vadd.f32 %v13896_v29, %v8504_v23  ;;  %v8502_v31 = vmul.f32 %v13891_v47, %v8383_v10  ;;  %v8404_v32 = vadd.f32 %v11496_v53, %v8243_v58  ;;  %8606 = vst [vmem:[%s13915_s20 + $0x30] sm:$0xff] %v8574_v11  ;;  %v14216_v54 = vld [vmem:[#allocation19_spill] sm:$0xff] }
 0x40c   : > { %v8395_v3 = vpop.f32.mrf.mxu1  ;;  %v8251_v23 = vadd.f32 %v11340_v37, %v14216_v54  ;;  %v11358_v11 = vadd.f32 %v13817_v44, %v13815_v18  ;;  %v11370_v54 = vadd.f32 %v13851_v56, %v13846_v21 }
 0x40d   : > { %8604 = vst [vmem:[%s13915_s20 + $0x20] sm:$0xff] %v8572_v33  ;;  %v8575_v46 = vmax.f32 %v8543_v8, 0.0  ;;  %v8541_v26 = vadd.f32 %v13896_v29, %v8502_v31  ;;  %v8507_v52 = vmul.f32 %v13891_v47, %v8404_v32  ;;  %v8396_v6 = vadd.f32 %v8395_v3, %v8235_v15  ;;  %v14217_v15 = vld [vmem:[#allocation14_spill] sm:$0xff]  ;;  %v13988_v8 = vpop.f32.mrf.mxu0 }
 0x40e   : > { %v11497_v48 = vpop.f32.mrf.mxu1  ;;  %v8262_v33 = vadd.f32 %v11349_v62, %v14217_v15 }
 0x40f   : > { %8607 = vst [vmem:[%s13915_s20 + $0x38] sm:$0xff] %v8575_v46  ;;  %v8573_v30 = vmax.f32 %v8541_v26, 0.0  ;;  %v8546_v12 = vadd.f32 %v13896_v29, %v8507_v52  ;;  %v8505_v59 = vmul.f32 %v13891_v47, %v8396_v6  ;;  %v8407_v35 = vadd.f32 %v11497_v48, %v8246_v4  ;;  %v14218_v4 = vld [vmem:[#allocation15_spill] sm:$0xff]  ;;  %v14219_v52 = vld [vmem:[#allocation20_spill] sm:$0xff]  ;;  %v14002_v7 = vpop.f32.mrf.mxu0 }
 0x410   : > { %v8398_v36 = vpop.f32.mrf.mxu1  ;;  %v11352_v46 = vadd.f32 %v14218_v4, %v13801_v24  ;;  %v8254_v6 = vadd.f32 %v11343_v27, %v14219_v52  ;;  %v11373_v52 = vadd.f32 %v13861_v38, %v13856_v2 }
 0x411   : > { %8605 = vst [vmem:[%s13915_s20 + $0x28] sm:$0xff] %v8573_v30  ;;  %v8578_v5 = vmax.f32 %v8546_v12, 0.0  ;;  %v8544_v19 = vadd.f32 %v13896_v29, %v8505_v59  ;;  %v8508_v55 = vmul.f32 %v13891_v47, %v8407_v35  ;;  %v8399_v9 = vadd.f32 %v8398_v36, %v8238_v16  ;;  %v14220_v16 = vld [vmem:[#allocation17_spill] sm:$0xff]  ;;  %v14221_v59 = vld [vmem:[#allocation16_spill] sm:$0xff] }
 0x412   : > { %v11500_v61 = vpop.f32.mrf.mxu1  ;;  %v11361_v30 = vadd.f32 %v14220_v16, %v13822_v14  ;;  %v8275_v35 = vadd.f32 %v11358_v11, %v14221_v59 }
 0x413   : > { %8610 = vst [vmem:[%s13915_s20 + $0x50] sm:$0xff] %v8578_v5  ;;  %v8576_v39 = vmax.f32 %v8544_v19, 0.0  ;;  %v8547_v10 = vadd.f32 %v13896_v29, %v8508_v55  ;;  %v8506_v58 = vmul.f32 %v13891_v47, %v8399_v9  ;;  %v8420_v13 = vadd.f32 %v11500_v61, %v8259_v17  ;;  %v14222_v17 = vld [vmem:[#allocation26_spill] sm:$0xff]  ;;  %v14223_v5 = vld [vmem:[#allocation27_spill] sm:$0xff]  ;;  %v14224_v9 = vld [vmem:[#allocation12_spill] sm:$0xff] }
 0x414   : > { %v8411_v53 = vpop.f32.mrf.mxu1  ;;  %v11355_v19 = vadd.f32 %v14223_v5, %v14222_v17  ;;  %v8267_v43 = vadd.f32 %v11352_v46, %v14224_v9  ;;  %v14231_v5 = vld [vmem:[#allocation36_spill] sm:$0xff] }
 0x415   : > { %8608 = vst [vmem:[%s13915_s20 + $0x40] sm:$0xff] %v8576_v39  ;;  %v8579_v31 = vmax.f32 %v8547_v10, 0.0  ;;  %v8545_v32 = vadd.f32 %v13896_v29, %v8506_v58  ;;  %v8511_v40 = vmul.f32 %v13891_v47, %v8420_v13  ;;  %v8412_v3 = vadd.f32 %v8411_v53, %v8251_v23  ;;  %v14225_v39 = vld [vmem:[#allocation29_spill] sm:$0xff]  ;;  %v14016_v58 = vpop.f32.mrf.mxu0 }
 0x416   : > { %v11501_v26 = vpop.f32.mrf.mxu1  ;;  %v8278_v10 = vadd.f32 %v11361_v30, %v14225_v39 }
 0x417   : > { %8611 = vst [vmem:[%s13915_s20 + $0x58] sm:$0xff] %v8579_v31  ;;  %v8577_v18 = vmax.f32 %v8545_v32, 0.0  ;;  %v8550_v44 = vadd.f32 %v13896_v29, %v8511_v40  ;;  %v8509_v37 = vmul.f32 %v13891_v47, %v8412_v3  ;;  %v8423_v48 = vadd.f32 %v11501_v26, %v8262_v33  ;;  %v14226_v33 = vld [vmem:[#allocation18_spill] sm:$0xff]  ;;  %v14227_v31 = vld [vmem:[#allocation21_spill] sm:$0xff]  ;;  %v14228_v3 = vld [vmem:[#allocation24_spill] sm:$0xff] }
 0x418   : > { %v8414_v12 = vpop.f32.mrf.mxu1  ;;  %v11364_v32 = vadd.f32 %v14227_v31, %v14226_v33  ;;  %v8270_v4 = vadd.f32 %v11355_v19, %v14228_v3  ;;  %v8294_v19 = vadd.f32 %v11373_v52, %v14231_v5  ;;  %v11379_v31 = vadd.f32 %v13898_v41, %v13885_v34 }
 0x419   : > { %8609 = vst [vmem:[%s13915_s20 + $0x48] sm:$0xff] %v8577_v18  ;;  %v8582_v24 = vmax.f32 %v8550_v44, 0.0  ;;  %v8548_v62 = vadd.f32 %v13896_v29, %v8509_v37  ;;  %v8512_v36 = vmul.f32 %v13891_v47, %v8423_v48  ;;  %v8415_v51 = vadd.f32 %v8414_v12, %v8254_v6  ;;  %v11392_v44 = vpop.f32.mrf.mxu0  ;;  %v14229_v12 = vld [vmem:[#allocation34_spill] sm:$0xff] }
 0x41a   : > { %v11504_v55 = vpop.f32.mrf.mxu1  ;;  %v8291_v18 = vadd.f32 %v11370_v54, %v13834_v60  ;;  %v11367_v59 = vadd.f32 %v13841_v1, %v14229_v12 }
 0x41b   : > { %8614 = vst [vmem:[%s13915_s20 + $0x70] sm:$0xff] %v8582_v24  ;;  %v8580_v14 = vmax.f32 %v8548_v62, 0.0  ;;  %v8551_v25 = vadd.f32 %v13896_v29, %v8512_v36  ;;  %v8510_v27 = vmul.f32 %v13891_v47, %v8415_v51  ;;  %v8436_v61 = vadd.f32 %v11504_v55, %v8275_v35  ;;  %v14230_v24 = vld [vmem:[#allocation30_spill] sm:$0xff]  ;;  %v11393_v55 = vpop.f32.mrf.mxu0 }
 0x41c   : > { %v8427_v23 = vpop.f32.mrf.mxu1  ;;  %v8283_v62 = vadd.f32 %v11364_v32, %v14230_v24  ;;  %v11382_v51 = vadd.f32 %v13932_v50, %v13917_v22  ;;  %v11282_v32 = vadd.f32 %v13873_v57, %v13868_v63 }
 0x41d   : > { %8612 = vst [vmem:[%s13915_s20 + $0x60] sm:$0xff] %v8580_v14  ;;  %v8583_v13 = vmax.f32 %v8551_v25, 0.0  ;;  %v8549_v11 = vadd.f32 %v13896_v29, %v8510_v27  ;;  %v8515_v53 = vmul.f32 %v13891_v47, %v8436_v61  ;;  %v8428_v15 = vadd.f32 %v8427_v23, %v8267_v43  ;;  %v14232_v61 = vld [vmem:[#allocation6_spill] sm:$0xff] }
 0x41e   : > { %v11505_v40 = vpop.f32.mrf.mxu1  ;;  %v11376_v25 = vadd.f32 %v13877_v0, %v13866_v20  ;;  %v8286_v54 = vadd.f32 %v11367_v59, %v14232_v61  ;;  %v14238_v59 = vld [vmem:[#allocation25_spill] sm:$0xff] }
 0x41f   : > { %8615 = vst [vmem:[%s13915_s20 + $0x78] sm:$0xff] %v8583_v13  ;;  %v8581_v21 = vmax.f32 %v8549_v11, 0.0  ;;  %v8554_v56 = vadd.f32 %v13896_v29, %v8515_v53  ;;  %v8513_v46 = vmul.f32 %v13891_v47, %v8428_v15  ;;  %v8439_v26 = vadd.f32 %v11505_v40, %v8278_v10  ;;  %v11395_v53 = vpop.f32.mrf.mxu0 }
 0x420   : > { %v8430_v6 = vpop.f32.mrf.mxu1  ;;  %v11385_v10 = vadd.f32 %v13960_v45, %v13945_v28  ;;  %v8307_v11 = vadd.f32 %v11382_v51, %v13854_v49  ;;  %v14233_v28 = vld [vmem:[#allocation23_spill] sm:$0xff] }
 0x421   : > { %8613 = vst [vmem:[%s13915_s20 + $0x68] sm:$0xff] %v8581_v21  ;;  %v8586_v37 = vmax.f32 %v8554_v56, 0.0  ;;  %v8552_v48 = vadd.f32 %v13896_v29, %v8513_v46  ;;  %v8516_v16 = vmul.f32 %v13891_v47, %v8439_v26  ;;  %v8431_v30 = vadd.f32 %v8430_v6, %v8270_v4  ;;  %v14234_v26 = vld [vmem:[#allocation28_spill] sm:$0xff]  ;;  %v11396_v6 = vpop.f32.mrf.mxu0 }
 0x422   : > { %v11508_v35 = vpop.f32.mrf.mxu1  ;;  %v8299_v45 = vadd.f32 %v11376_v25, %v14233_v28  ;;  %v11394_v56 = vadd.f32 %v11393_v55, %v11392_v44  ;;  %v8310_v52 = vadd.f32 %v11385_v10, %v14234_v26 }
 0x423   : > { %8618 = vst [vmem:[%s13915_s20 + $0x90] sm:$0xff] %v8586_v37  ;;  %v8584_v2 = vmax.f32 %v8552_v48, 0.0  ;;  %v8555_v60 = vadd.f32 %v13896_v29, %v8516_v16  ;;  %v8514_v38 = vmul.f32 %v13891_v47, %v8431_v30  ;;  %v8452_v36 = vadd.f32 %v11508_v35, %v8291_v18  ;;  %v14235_v18 = vld [vmem:[#allocation8_spill] sm:$0xff]  ;;  %v14236_v16 = vld [vmem:[#allocation7_spill] sm:$0xff] }
 0x424   : > { %v8443_v17 = vpop.f32.mrf.mxu1  ;;  %v8162_v37 = vadd.f32 %v11282_v32, %v14235_v18  ;;  %v11388_v48 = vadd.f32 %v13988_v8, %v13974_v42  ;;  %v14237_v30 = vld [vmem:[#allocation35_spill] sm:$0xff]  ;;  %v8302_v35 = vadd.f32 %v11379_v31, %v14238_v59 }
 0x425   : > { %8616 = vst [vmem:[%s13915_s20 + $0x80] sm:$0xff] %v8584_v2  ;;  %v8587_v1 = vmax.f32 %v8555_v60, 0.0  ;;  %v8553_v9 = vadd.f32 %v13896_v29, %v8514_v38  ;;  %v8519_v43 = vmul.f32 %v13891_v47, %v8452_v36  ;;  %v8444_v14 = vadd.f32 %v8443_v17, %v8283_v62 }
 0x426   : > { %v11509_v27 = vpop.f32.mrf.mxu1  ;;  %v11285_v44 = vadd.f32 %v14237_v30, %v14236_v16  ;;  %v11397_v38 = vadd.f32 %v11396_v6, %v11395_v53  ;;  %v8323_v51 = vadd.f32 %v11394_v56, %v8162_v37 }
 0x427   : > { %8619 = vst [vmem:[%s13915_s20 + $0x98] sm:$0xff] %v8587_v1  ;;  %v8585_v22 = vmax.f32 %v8553_v9, 0.0  ;;  %v8558_v50 = vadd.f32 %v13896_v29, %v8519_v43  ;;  %v8517_v23 = vmul.f32 %v13891_v47, %v8444_v14  ;;  %v8455_v39 = vadd.f32 %v11509_v27, %v8294_v19  ;;  %v14239_v19 = vld [vmem:[#allocation9_spill] sm:$0xff]  ;;  %v14240_v43 = vld [vmem:[#allocation31_spill] sm:$0xff] }
 0x428   : > { %v8446_v13 = vpop.f32.mrf.mxu1  ;;  %v8165_v55 = vadd.f32 %v11285_v44, %v14239_v19  ;;  %v11391_v1 = vadd.f32 %v14016_v58, %v14002_v7  ;;  %v8315_v14 = vadd.f32 %v11388_v48, %v14240_v43 }
 0x429   : > { %8617 = vst [vmem:[%s13915_s20 + $0x88] sm:$0xff] %v8585_v22  ;;  %v8590_v20 = vmax.f32 %v8558_v50, 0.0  ;;  %v8556_v0 = vadd.f32 %v13896_v29, %v8517_v23  ;;  %v8520_v15 = vmul.f32 %v13891_v47, %v8455_v39  ;;  %v8447_v33 = vadd.f32 %v8446_v13, %v8286_v54  ;;  %v14241_v13 = vld [vmem:[#allocation32_spill] sm:$0xff] }
 0x42a   : > { %v11512_v40 = vpop.f32.mrf.mxu1  ;;  %v8326_v50 = vadd.f32 %v11397_v38, %v8165_v55 }
 0x42b   : > { %8622 = vst [vmem:[%s13915_s20 + $0xb0] sm:$0xff] %v8590_v20  ;;  %v8588_v49 = vmax.f32 %v8556_v0, 0.0  ;;  %v8559_v3 = vadd.f32 %v13896_v29, %v8520_v15  ;;  %v8518_v4 = vmul.f32 %v13891_v47, %v8447_v33  ;;  %v8468_v21 = vadd.f32 %v11512_v40, %v8307_v11 }
 0x42c   : > { %v8459_v46 = vpop.f32.mrf.mxu1  ;;  %v8318_v11 = vadd.f32 %v11391_v1, %v14241_v13 }
 0x42d   : > { %8620 = vst [vmem:[%s13915_s20 + $0xa0] sm:$0xff] %v8588_v49  ;;  %v8591_v41 = vmax.f32 %v8559_v3, 0.0  ;;  %v8557_v63 = vadd.f32 %v13896_v29, %v8518_v4  ;;  %v8523_v57 = vmul.f32 %v13891_v47, %v8468_v21  ;;  %v8460_v34 = vadd.f32 %v8459_v46, %v8299_v45 }
 0x42e   : > { %v11513_v12 = vpop.f32.mrf.mxu1 }
 0x42f   : > { %8623 = vst [vmem:[%s13915_s20 + $0xb8] sm:$0xff] %v8591_v41  ;;  %v8589_v24 = vmax.f32 %v8557_v63, 0.0  ;;  %v8562_v62 = vadd.f32 %v13896_v29, %v8523_v57  ;;  %v8521_v2 = vmul.f32 %v13891_v47, %v8460_v34  ;;  %v8471_v60 = vadd.f32 %v11513_v12, %v8310_v52 }
 0x430   : > { %v8462_v36 = vpop.f32.mrf.mxu1 }
 0x431   : > { %8621 = vst [vmem:[%s13915_s20 + $0xa8] sm:$0xff] %v8589_v24  ;;  %v8594_v42 = vmax.f32 %v8562_v62, 0.0  ;;  %v8560_v8 = vadd.f32 %v13896_v29, %v8521_v2  ;;  %v8524_v17 = vmul.f32 %v13891_v47, %v8471_v60  ;;  %v8463_v5 = vadd.f32 %v8462_v36, %v8302_v35 }
 0x432   : > { %v11516_v9 = vpop.f32.mrf.mxu1 }
 0x433   : > { %8626 = vst [vmem:[%s13915_s20 + $0xd0] sm:$0xff] %v8594_v42  ;;  %v8592_v25 = vmax.f32 %v8560_v8, 0.0  ;;  %v8563_v27 = vadd.f32 %v13896_v29, %v8524_v17  ;;  %v8522_v61 = vmul.f32 %v13891_v47, %v8463_v5  ;;  %v8484_v54 = vadd.f32 %v11516_v9, %v8323_v51 }
 0x434   : > { %v8475_v22 = vpop.f32.mrf.mxu1 }
 0x435   : > { %8624 = vst [vmem:[%s13915_s20 + $0xc0] sm:$0xff] %v8592_v25  ;;  %v8595_v23 = vmax.f32 %v8563_v27, 0.0  ;;  %v8561_v39 = vadd.f32 %v13896_v29, %v8522_v61  ;;  %v8527_v7 = vmul.f32 %v13891_v47, %v8484_v54  ;;  %v8476_v58 = vadd.f32 %v8475_v22, %v8315_v14 }
 0x436   : > { %v11517_v10 = vpop.f32.mrf.mxu1 }
 0x437   : > { %8627 = vst [vmem:[%s13915_s20 + $0xd8] sm:$0xff] %v8595_v23  ;;  %v8593_v53 = vmax.f32 %v8561_v39, 0.0  ;;  %v8566_v20 = vadd.f32 %v13896_v29, %v8527_v7  ;;  %v8525_v0 = vmul.f32 %v13891_v47, %v8476_v58  ;;  %v8487_v15 = vadd.f32 %v11517_v10, %v8326_v50 }
 0x438   : > { %v8478_v33 = vpop.f32.mrf.mxu1 }
 0x439   : > { %8625 = vst [vmem:[%s13915_s20 + $0xc8] sm:$0xff] %v8593_v53  ;;  %v8598_v31 = vmax.f32 %v8566_v20, 0.0  ;;  %v8564_v32 = vadd.f32 %v13896_v29, %v8525_v0  ;;  %v8528_v40 = vmul.f32 %v13891_v47, %v8487_v15  ;;  %v8479_v28 = vadd.f32 %v8478_v33, %v8318_v11 }
 0x43b   : > { %8630 = vst [vmem:[%s13915_s20 + $0xf0] sm:$0xff] %v8598_v31  ;;  %v8596_v45 = vmax.f32 %v8564_v32, 0.0  ;;  %v8567_v49 = vadd.f32 %v13896_v29, %v8528_v40  ;;  %v8526_v3 = vmul.f32 %v13891_v47, %v8479_v28 }
 0x43d   : > { %8628 = vst [vmem:[%s13915_s20 + $0xe0] sm:$0xff] %v8596_v45  ;;  %v8599_v4 = vmax.f32 %v8567_v49, 0.0  ;;  %v8565_v21 = vadd.f32 %v13896_v29, %v8526_v3 }
 0x43f   : > { %8631 = vst [vmem:[%s13915_s20 + $0xf8] sm:$0xff] %v8599_v4  ;;  %v8597_v56 = vmax.f32 %v8565_v21, 0.0 }
 0x441   : > { %8629 = vst [vmem:[%s13915_s20 + $0xe8] sm:$0xff] %v8597_v56 }
 0x442 PF: > { %s17_s24 = sadd.s32 1, %s12084_s24  }
 0x443   : > { %p14_p4 = scmp.ge.s32.totalorder %s17_s24, 4  }
 0x445   :  { %16 = sbr.rel (!%p14_p4) target bundleno = 1 (0x1), region = 82 }

</bundles_post_ra>
